<compile_context>
chip_gen: v6e
topology: v6e:2x2x1
jax: 0.10.0
libtpu: 0.0.40
codegen_flags: <defaults>
</compile_context>

<pallas_src>
import math

import jax
import jax.numpy as jnp
from jax.experimental import pallas as pl
from jax.experimental.pallas import tpu as pltpu

LAYER_NUM = 2      # MPNN layers
NUM_HEADS = 8      # nn.MultiheadAttention(embd_dim, num_heads=8)
SLOT_ITERS = 3     # slot-attention iterations
NEG_SLOPE = 0.01   # LeakyReLU default
LN_EPS = 1e-5
SLOT_EPS = 1e-8
NEG_INF = -1e30    # additive block-mask value (exp underflows to exactly 0)
BF16 = jnp.bfloat16


def _leaky(x):
    return jnp.where(x > 0, x, NEG_SLOPE * x)


def _layernorm(x, g, b):
    mu = jnp.mean(x, axis=-1, keepdims=True)
    var = jnp.mean((x - mu) ** 2, axis=-1, keepdims=True)
    return (x - mu) * jax.lax.rsqrt(var + LN_EPS) * g + b


def _mm(a, b):
    # bf16 MXU matmul, f32 accumulation.
    return jnp.dot(a.astype(BF16), b.astype(BF16), preferred_element_type=jnp.float32)


def _mm_t(a, b):
    # a @ b.T (contract last dims of both), bf16 operands, f32 accumulation.
    return jax.lax.dot_general(a.astype(BF16), b.astype(BF16),
                               (((1,), (1,)), ((), ())),
                               preferred_element_type=jnp.float32)


def _recip(x):
    # TODO(synk): switch to approx=False if bit-level parity with PyTorch softmax is asserted.
    return pl.reciprocal(x, approx=True)


def gnn_par_attn_kernel(
    # folded per-group graph data (group dim squeezed by BlockSpec)
    node_ref, edge_ref, srcoh_ref, dstoht_ref, phr_ref, noise_ref,
    # per-graph block masks (constants, shared by every group)
    tgtneg_ref, slotwithin_ref, mhaneg_ref,
    # MPNN params (concat-free split weights)
    wmsgh_ref, wmsge_ref, bmsg_ref, wupdh_ref, wupda_ref, bupd_ref,
    # target_fn (Linear(D, 1) stored as a (1, D) row)
    wtg_ref, btg_ref,
    # SlotAttention params (GRU/MLP weights stacked on the leading axis)
    mu_ref, logsig_ref, lng_ref, lnb_ref,
    wq_ref, wk_ref, wv_ref,
    wgrui_ref, wgruh_ref, bgrui_ref, bgruh_ref,
    wmlp_ref, bmlp_ref,
    # MultiheadAttention in-projection (q/k only; v-proj unused by this forward)
    wmhaq_ref, wmhak_ref, bmhaq_ref, bmhak_ref, headmask_ref,
    # packed output: [context (Nk rows) | rel (Nk rows) | target (Bg rows)] x Ppad
    out_ref,
):
    h = node_ref[...]            # (Nn, D) f32 — folded batch of graphs
    e = edge_ref[...]            # (Ne, D) bf16
    src_oh = srcoh_ref[...]      # (Ne, Nn) bf16 block-diagonal one-hot(src)
    dst_oh_t = dstoht_ref[...]   # (Nn, Ne) bf16 block-diagonal one-hot(dst).T
    Nn, D = h.shape
    Nk = noise_ref.shape[0]

    # ---- MPNN: edge-conditioned message passing, sum aggregation ----
    # TODO(synk): MPNN class body is not in the reference source; a standard
    # message-passing block (msg = f(h_src, e), sum-aggregate, node update) is
    # synthesised with the declared in/out/edge feature dims.
    for l in range(LAYER_NUM):
        h_src = _mm(src_oh, h)                                              # (Ne, D)
        msg = _leaky(_mm(h_src, wmsgh_ref[l]) + _mm(e, wmsge_ref[l]) + bmsg_ref[l])
        agg = _mm(dst_oh_t, msg)                                            # (Nn, D)
        h = _mm(h, wupdh_ref[l]) + _mm(agg, wupda_ref[l]) + bupd_ref[l]

    hid = _leaky(h)                                                         # (Nn, D)

    # ---- target_prob: per-graph softmax over nodes ----
    score = _mm_t(wtg_ref[...], hid) + btg_ref[...]                         # (1, Nn)
    s = score + tgtneg_ref[...]                                             # (Bg, Nn), cross-graph = -inf
    s = s - jnp.max(s, axis=-1, keepdims=True)
    es = jnp.exp(s)
    target_prob = es * _recip(jnp.sum(es, axis=-1, keepdims=True))          # (Bg, Nn)

    # ---- SlotAttention (iterative attention + GRU + MLP residual) ----
    # TODO(synk): SlotAttention class body not provided; canonical implementation used.
    within = slotwithin_ref[...]                                            # (Nk, Nn) {0,1}
    slot_neg = jnp.where(within > 0.5, 0.0, NEG_INF)                        # block mask (hoisted)
    eps_add = within * SLOT_EPS                                             # eps only within own graph

    scale = D ** -0.5
    inp = _layernorm(hid, lng_ref[0], lnb_ref[0])                           # (Nn, D)
    k = _mm(inp, wk_ref[...])                                               # (Nn, D)
    v = _mm(inp, wv_ref[...])                                               # (Nn, D)
    slots = mu_ref[...] + jnp.exp(logsig_ref[...]) * noise_ref[...]         # (Nk, D)
    attn = None
    for _ in range(SLOT_ITERS):
        slots_prev = slots
        sn = _layernorm(slots, lng_ref[1], lnb_ref[1])
        q = _mm(sn, wq_ref[...])                                            # (Nk, D)
        dots = _mm_t(q, k) * scale + slot_neg                               # (Nk, Nn)
        dots = dots - jnp.max(dots, axis=0, keepdims=True)
        a = jnp.exp(dots)
        a = a * _recip(jnp.sum(a, axis=0, keepdims=True)) + eps_add         # softmax over slots (per graph)
        attn = a * _recip(jnp.sum(a, axis=-1, keepdims=True))               # renorm over that graph's tokens
        updates = _mm(attn, v)                                              # (Nk, D)
        # GRUCell gates as separate (D, D) matmuls (leading-axis weight slices, no lane offsets)
        r = jax.nn.sigmoid(_mm(updates, wgrui_ref[0]) + bgrui_ref[0]
                           + _mm(slots_prev, wgruh_ref[0]) + bgruh_ref[0])
        z = jax.nn.sigmoid(_mm(updates, wgrui_ref[1]) + bgrui_ref[1]
                           + _mm(slots_prev, wgruh_ref[1]) + bgruh_ref[1])
        n = jnp.tanh(_mm(updates, wgrui_ref[2]) + bgrui_ref[2]
                     + r * (_mm(slots_prev, wgruh_ref[2]) + bgruh_ref[2]))
        slots = (1.0 - z) * n + z * slots_prev
        # MLP residual
        sf = _layernorm(slots, lng_ref[2], lnb_ref[2])
        hdn = jnp.maximum(_mm(sf, wmlp_ref[0]) + bmlp_ref[0], 0.0)
        slots = slots + _mm(hdn, wmlp_ref[1]) + bmlp_ref[1]

    context_prob = attn                                                     # (Nk, Nn)

    # ---- nn.MultiheadAttention attention weights, mean over heads ----
    q_all = _mm(slots, wmhaq_ref[...]) + bmhaq_ref[...]                     # (Nk, D)
    k_all = _mm(hid, wmhak_ref[...]) + bmhak_ref[...]                       # (Nn, D)
    # Head-masked q (mask has 1/sqrt(head_dim) pre-folded): (Nk, H, D) -> (Nk*H, D)
    qh = (q_all[:, None, :] * headmask_ref[...][None, :, :]).reshape(Nk * NUM_HEADS, D)
    sc = _mm_t(qh, k_all) + mhaneg_ref[...]                                 # (Nk*H, Nn)
    sc = sc - jnp.max(sc, axis=-1, keepdims=True)                           # softmax over keys (lane axis)
    ex = jnp.exp(sc)
    probs = ex * _recip(jnp.sum(ex, axis=-1, keepdims=True))                # (Nk*H, Nn)
    wr_prob = jnp.sum(probs.reshape(Nk, NUM_HEADS, Nn), axis=1) * (1.0 / NUM_HEADS)   # (Nk, Nn)

    # ---- fused phrase-weighted sums: one GEMM + one lane-dense store ----
    probs_all = jnp.concatenate([context_prob, wr_prob, target_prob], axis=0)  # (2Nk+Bg, Nn)
    out_ref[...] = jnp.dot(probs_all, phr_ref[...], preferred_element_type=jnp.float32)


def init_params(key, embd_dim, layer_num, pos_vocab, dep_vocab):
    """Deterministic synthetic parameters, laid out for the concat-free kernel."""
    D = embd_dim
    counter = [0]

    def nrm(shape, scale=0.1):
        counter[0] += 1
        k = jax.random.fold_in(key, counter[0])
        return (scale * jax.random.normal(k, shape)).astype(jnp.float32)

    return dict(
        pos_embd=nrm((pos_vocab, D), 1.0),
        dep_embd=nrm((dep_vocab, D), 1.0),
        # MPNN: separate weights for [h_src] / [e] and [h] / [agg] (no lane concat)
        w_msg_h=nrm((layer_num, D, D)),
        w_msg_e=nrm((layer_num, D, D)),
        b_msg=nrm((layer_num, 1, D)),
        w_upd_h=nrm((layer_num, D, D)),
        w_upd_a=nrm((layer_num, D, D)),
        b_upd=nrm((layer_num, 1, D)),
        # target_fn = Linear(D, 1), stored as its (1, D) weight row
        w_tg=nrm((1, D)),
        b_tg=nrm((1, 1)),
        # SlotAttention
        mu=nrm((1, D)),
        logsig=nrm((1, D)),
        ln_g=jnp.ones((3, 1, D), jnp.float32),
        ln_b=jnp.zeros((3, 1, D), jnp.float32),
        w_q=nrm((D, D)),
        w_k=nrm((D, D)),
        w_v=nrm((D, D)),
        w_gru_i=nrm((3, D, D)),     # [r, z, n] stacked on the LEADING axis
        w_gru_h=nrm((3, D, D)),
        b_gru_i=nrm((3, 1, D)),
        b_gru_h=nrm((3, 1, D)),
        w_mlp=nrm((2, D, D)),
        b_mlp=nrm((2, 1, D)),
        # MultiheadAttention in-projection: only q/k needed (the forward consumes
        # only the attention weights, never the attended values).
        w_mha_q=nrm((D, D)),
        w_mha_k=nrm((D, D)),
        b_mha_q=nrm((1, D)),
        b_mha_k=nrm((1, D)),
    )


def gnn_par_attn_forward(params, node_pos, edge_index, edge_tag, phrases, noise,
                         *, n_groups=1):
    """Batched forward over B independent graphs, batch folded into GEMM rows.

    node_pos: (B, N) int, edge_index: (B, 2, E) int, edge_tag: (B, E) int,
    phrases: (B, N, P) f32, noise: (B, K, D) f32 (stand-in for slot init noise).
    n_groups: grid width (1 for v5e/v6e single core; 2 on v7x to use both TCs).
    Returns (w_t (B, P), w_c (B, K, P), w_r (B, K, P)).
    """
    B, N = node_pos.shape
    E = edge_tag.shape[-1]
    P = phrases.shape[-1]
    K = noise.shape[1]
    D = params['pos_embd'].shape[-1]
    H = NUM_HEADS
    assert B % n_groups == 0
    G = n_groups
    Bg = B // G
    Nn, Ne, Nk = Bg * N, Bg * E, Bg * K

    # ---- glue: embedding gathers + block-diagonal incidence one-hots (plain JAX) ----
    node_feat = params['pos_embd'][node_pos].reshape(G, Nn, D).astype(jnp.float32)
    edge_feat = params['dep_embd'][edge_tag].reshape(G, Ne, D).astype(BF16)

    node_off = ((jnp.arange(B, dtype=jnp.int32) % Bg) * N)[:, None]         # (B, 1) in-group row offset
    src_g = (edge_index[:, 0, :] + node_off).reshape(G, Ne)
    dst_g = (edge_index[:, 1, :] + node_off).reshape(G, Ne)
    src_oh = jax.nn.one_hot(src_g, Nn, dtype=BF16)                          # (G, Ne, Nn)
    dst_oh_t = jnp.swapaxes(jax.nn.one_hot(dst_g, Nn, dtype=BF16), -1, -2)  # (G, Nn, Ne)

    # Pad phrase dim to a lane-dense multiple of 128; slice back after the kernel.
    P_pad = ((P + 127) // 128) * 128
    phrases_g = jnp.pad(phrases.astype(jnp.float32).reshape(G, Nn, P),
                        ((0, 0), (0, 0), (0, P_pad - P)))
    noise_g = noise.astype(jnp.float32).reshape(G, Nk, D)

    # ---- per-graph block masks (identical for every group → constant inputs) ----
    gid_n = jnp.arange(Nn, dtype=jnp.int32) // N      # graph-in-group of each node row
    gid_s = jnp.arange(Nk, dtype=jnp.int32) // K      # graph-in-group of each slot row
    tgt_neg = jnp.where(jnp.arange(Bg)[:, None] == gid_n[None, :],
                        0.0, NEG_INF).astype(jnp.float32)                   # (Bg, Nn)
    slot_within = (gid_s[:, None] == gid_n[None, :]).astype(jnp.float32)    # (Nk, Nn)
    mha_neg = jnp.where(jnp.repeat(gid_s, H)[:, None] == gid_n[None, :],
                        0.0, NEG_INF).astype(jnp.float32)                   # (Nk*H, Nn)

    hd = D // H
    head_mask_t = jnp.where(jnp.arange(D)[None, :] // hd == jnp.arange(H)[:, None],
                            1.0 / math.sqrt(hd), 0.0).astype(jnp.float32)   # (H, D), scale folded in

    data_inputs = (node_feat, edge_feat, src_oh, dst_oh_t, phrases_g, noise_g)
    const_inputs = (
        tgt_neg, slot_within, mha_neg,
        params['w_msg_h'].astype(BF16), params['w_msg_e'].astype(BF16), params['b_msg'],
        params['w_upd_h'].astype(BF16), params['w_upd_a'].astype(BF16), params['b_upd'],
        params['w_tg'].astype(BF16), params['b_tg'],
        params['mu'], params['logsig'], params['ln_g'], params['ln_b'],
        params['w_q'].astype(BF16), params['w_k'].astype(BF16), params['w_v'].astype(BF16),
        params['w_gru_i'].astype(BF16), params['w_gru_h'].astype(BF16),
        params['b_gru_i'], params['b_gru_h'],
        params['w_mlp'].astype(BF16), params['b_mlp'],
        params['w_mha_q'].astype(BF16), params['w_mha_k'].astype(BF16),
        params['b_mha_q'], params['b_mha_k'],
        head_mask_t,
    )

    def per_group(shape):
        nd = len(shape)
        return pl.BlockSpec((None,) + tuple(shape), lambda g, nd=nd: (g,) + (0,) * nd)

    def const(arr):
        nd = arr.ndim
        return pl.BlockSpec(arr.shape, lambda g, nd=nd: (0,) * nd)

    rows_out = 2 * Nk + Bg
    out = pl.pallas_call(
        gnn_par_attn_kernel,
        out_shape=jax.ShapeDtypeStruct((G, rows_out, P_pad), jnp.float32),
        grid=(G,),
        in_specs=([per_group(x.shape[1:]) for x in data_inputs]
                  + [const(x) for x in const_inputs]),
        out_specs=per_group((rows_out, P_pad)),
        compiler_params=pltpu.CompilerParams(
            dimension_semantics=("parallel",)),
    )(*data_inputs, *const_inputs)

    # Unpack [context | rel | target] rows and fold groups back to the batch.
    w_c = out[:, :Nk, :P].reshape(B, K, P)
    w_r = out[:, Nk:2 * Nk, :P].reshape(B, K, P)
    w_t = out[:, 2 * Nk:, :P].reshape(B, P)
    return w_t, w_c, w_r


if __name__ == "__main__":
    EMBD_DIM = 32      # must be divisible by NUM_HEADS
    SLOT_NUM = 4
    BATCH = 8          # graphs folded into the GEMM rows of one kernel invocation
    N_NODES = 9
    N_EDGES = 12
    PHR_DIM = 48
    POS_VOCAB = 18
    DEP_VOCAB = 40

    key = jax.random.PRNGKey(0)
    kp, kn, ke, kei, kph, kno = jax.random.split(key, 6)
    params = init_params(kp, EMBD_DIM, LAYER_NUM, POS_VOCAB, DEP_VOCAB)

    node_pos = jax.random.randint(kn, (BATCH, N_NODES), 0, POS_VOCAB)
    edge_tag = jax.random.randint(ke, (BATCH, N_EDGES), 0, DEP_VOCAB)
    edge_index = jax.random.randint(kei, (BATCH, 2, N_EDGES), 0, N_NODES)
    phrases = jax.random.normal(kph, (BATCH, N_NODES, PHR_DIM), jnp.float32)
    # deterministic stand-in for SlotAttention's random slot initialization noise
    noise = jax.random.normal(kno, (BATCH, SLOT_NUM, EMBD_DIM), jnp.float32)

    fwd = jax.jit(gnn_par_attn_forward)   # n_groups=1 (full fold); pass n_groups=2 on v7x
    w_t, w_c, w_r = fwd(params, node_pos, edge_index, edge_tag, phrases, noise)
    jax.block_until_ready((w_t, w_c, w_r))
    assert w_t.shape == (BATCH, PHR_DIM)
    assert w_c.shape == (BATCH, SLOT_NUM, PHR_DIM)
    assert w_r.shape == (BATCH, SLOT_NUM, PHR_DIM)
    assert all(bool(jnp.all(jnp.isfinite(x))) for x in (w_t, w_c, w_r))
    print("KERNEL_OK")
</pallas_src>

<mosaic_0001>
module attributes {stable_mosaic.version = 11 : i64} {
  func.func @gnn_par_attn_kernel(%arg0: i32, %arg1: memref<1x72x32xf32, #tpu.memory_space<vmem>>, %arg2: memref<1x96x32xbf16, #tpu.memory_space<vmem>>, %arg3: memref<1x96x72xbf16, #tpu.memory_space<vmem>>, %arg4: memref<1x72x96xbf16, #tpu.memory_space<vmem>>, %arg5: memref<1x72x128xf32, #tpu.memory_space<vmem>>, %arg6: memref<1x32x32xf32, #tpu.memory_space<vmem>>, %arg7: memref<8x72xf32, #tpu.memory_space<vmem>>, %arg8: memref<32x72xf32, #tpu.memory_space<vmem>>, %arg9: memref<256x72xf32, #tpu.memory_space<vmem>>, %arg10: memref<2x32x32xbf16, #tpu.memory_space<vmem>>, %arg11: memref<2x32x32xbf16, #tpu.memory_space<vmem>>, %arg12: memref<2x1x32xf32, #tpu.memory_space<vmem>>, %arg13: memref<2x32x32xbf16, #tpu.memory_space<vmem>>, %arg14: memref<2x32x32xbf16, #tpu.memory_space<vmem>>, %arg15: memref<2x1x32xf32, #tpu.memory_space<vmem>>, %arg16: memref<1x32xbf16, #tpu.memory_space<vmem>>, %arg17: memref<1x1xf32, #tpu.memory_space<vmem>>, %arg18: memref<1x32xf32, #tpu.memory_space<vmem>>, %arg19: memref<1x32xf32, #tpu.memory_space<vmem>>, %arg20: memref<3x1x32xf32, #tpu.memory_space<vmem>>, %arg21: memref<3x1x32xf32, #tpu.memory_space<vmem>>, %arg22: memref<32x32xbf16, #tpu.memory_space<vmem>>, %arg23: memref<32x32xbf16, #tpu.memory_space<vmem>>, %arg24: memref<32x32xbf16, #tpu.memory_space<vmem>>, %arg25: memref<3x32x32xbf16, #tpu.memory_space<vmem>>, %arg26: memref<3x32x32xbf16, #tpu.memory_space<vmem>>, %arg27: memref<3x1x32xf32, #tpu.memory_space<vmem>>, %arg28: memref<3x1x32xf32, #tpu.memory_space<vmem>>, %arg29: memref<2x32x32xbf16, #tpu.memory_space<vmem>>, %arg30: memref<2x1x32xf32, #tpu.memory_space<vmem>>, %arg31: memref<32x32xbf16, #tpu.memory_space<vmem>>, %arg32: memref<32x32xbf16, #tpu.memory_space<vmem>>, %arg33: memref<1x32xf32, #tpu.memory_space<vmem>>, %arg34: memref<1x32xf32, #tpu.memory_space<vmem>>, %arg35: memref<8x32xf32, #tpu.memory_space<vmem>>, %arg36: memref<1x72x128xf32, #tpu.memory_space<vmem>>) attributes {dimension_semantics = [#tpu.dimension_semantics<parallel>], iteration_bounds = array<i64: 1>, scalar_prefetch = 0 : i64, scratch_operands = 0 : i64, tpu.core_type = #tpu.core_type<tc>, window_params = [{transform_indices = @transform_0, window_bounds = array<i64: 1, 72, 32>}, {transform_indices = @transform_1, window_bounds = array<i64: 1, 96, 32>}, {transform_indices = @transform_2, window_bounds = array<i64: 1, 96, 72>}, {transform_indices = @transform_3, window_bounds = array<i64: 1, 72, 96>}, {transform_indices = @transform_4, window_bounds = array<i64: 1, 72, 128>}, {transform_indices = @transform_5, window_bounds = array<i64: 1, 32, 32>}, {pipeline_mode = #tpu.pipeline_mode<synchronous>, transform_indices = @transform_6, window_bounds = array<i64: 8, 72>}, {pipeline_mode = #tpu.pipeline_mode<synchronous>, transform_indices = @transform_7, window_bounds = array<i64: 32, 72>}, {pipeline_mode = #tpu.pipeline_mode<synchronous>, transform_indices = @transform_8, window_bounds = array<i64: 256, 72>}, {pipeline_mode = #tpu.pipeline_mode<synchronous>, transform_indices = @transform_9, window_bounds = array<i64: 2, 32, 32>}, {pipeline_mode = #tpu.pipeline_mode<synchronous>, transform_indices = @transform_10, window_bounds = array<i64: 2, 32, 32>}, {pipeline_mode = #tpu.pipeline_mode<synchronous>, transform_indices = @transform_11, window_bounds = array<i64: 2, 1, 32>}, {pipeline_mode = #tpu.pipeline_mode<synchronous>, transform_indices = @transform_12, window_bounds = array<i64: 2, 32, 32>}, {pipeline_mode = #tpu.pipeline_mode<synchronous>, transform_indices = @transform_13, window_bounds = array<i64: 2, 32, 32>}, {pipeline_mode = #tpu.pipeline_mode<synchronous>, transform_indices = @transform_14, window_bounds = array<i64: 2, 1, 32>}, {pipeline_mode = #tpu.pipeline_mode<synchronous>, transform_indices = @transform_15, window_bounds = array<i64: 1, 32>}, {pipeline_mode = #tpu.pipeline_mode<synchronous>, transform_indices = @transform_16, window_bounds = array<i64: 1, 1>}, {pipeline_mode = #tpu.pipeline_mode<synchronous>, transform_indices = @transform_17, window_bounds = array<i64: 1, 32>}, {pipeline_mode = #tpu.pipeline_mode<synchronous>, transform_indices = @transform_18, window_bounds = array<i64: 1, 32>}, {pipeline_mode = #tpu.pipeline_mode<synchronous>, transform_indices = @transform_19, window_bounds = array<i64: 3, 1, 32>}, {pipeline_mode = #tpu.pipeline_mode<synchronous>, transform_indices = @transform_20, window_bounds = array<i64: 3, 1, 32>}, {pipeline_mode = #tpu.pipeline_mode<synchronous>, transform_indices = @transform_21, window_bounds = array<i64: 32, 32>}, {pipeline_mode = #tpu.pipeline_mode<synchronous>, transform_indices = @transform_22, window_bounds = array<i64: 32, 32>}, {pipeline_mode = #tpu.pipeline_mode<synchronous>, transform_indices = @transform_23, window_bounds = array<i64: 32, 32>}, {pipeline_mode = #tpu.pipeline_mode<synchronous>, transform_indices = @transform_24, window_bounds = array<i64: 3, 32, 32>}, {pipeline_mode = #tpu.pipeline_mode<synchronous>, transform_indices = @transform_25, window_bounds = array<i64: 3, 32, 32>}, {pipeline_mode = #tpu.pipeline_mode<synchronous>, transform_indices = @transform_26, window_bounds = array<i64: 3, 1, 32>}, {pipeline_mode = #tpu.pipeline_mode<synchronous>, transform_indices = @transform_27, window_bounds = array<i64: 3, 1, 32>}, {pipeline_mode = #tpu.pipeline_mode<synchronous>, transform_indices = @transform_28, window_bounds = array<i64: 2, 32, 32>}, {pipeline_mode = #tpu.pipeline_mode<synchronous>, transform_indices = @transform_29, window_bounds = array<i64: 2, 1, 32>}, {pipeline_mode = #tpu.pipeline_mode<synchronous>, transform_indices = @transform_30, window_bounds = array<i64: 32, 32>}, {pipeline_mode = #tpu.pipeline_mode<synchronous>, transform_indices = @transform_31, window_bounds = array<i64: 32, 32>}, {pipeline_mode = #tpu.pipeline_mode<synchronous>, transform_indices = @transform_32, window_bounds = array<i64: 1, 32>}, {pipeline_mode = #tpu.pipeline_mode<synchronous>, transform_indices = @transform_33, window_bounds = array<i64: 1, 32>}, {pipeline_mode = #tpu.pipeline_mode<synchronous>, transform_indices = @transform_34, window_bounds = array<i64: 8, 32>}, {transform_indices = @transform_35, window_bounds = array<i64: 1, 72, 128>}]} {
    %c0 = arith.constant 0 : index
    %c0_0 = arith.constant 0 : index
    %c0_1 = arith.constant 0 : index
    %0 = vector.load %arg1[%c0, %c0_0, %c0_1] : memref<1x72x32xf32, #tpu.memory_space<vmem>>, vector<1x72x32xf32>
    %1 = vector.shape_cast %0 : vector<1x72x32xf32> to vector<72x32xf32>
    %c0_2 = arith.constant 0 : index
    %c0_3 = arith.constant 0 : index
    %c0_4 = arith.constant 0 : index
    %2 = vector.load %arg2[%c0_2, %c0_3, %c0_4] : memref<1x96x32xbf16, #tpu.memory_space<vmem>>, vector<1x96x32xbf16>
    %3 = vector.shape_cast %2 : vector<1x96x32xbf16> to vector<96x32xbf16>
    %c0_5 = arith.constant 0 : index
    %c0_6 = arith.constant 0 : index
    %c0_7 = arith.constant 0 : index
    %4 = vector.load %arg3[%c0_5, %c0_6, %c0_7] : memref<1x96x72xbf16, #tpu.memory_space<vmem>>, vector<1x96x72xbf16>
    %5 = vector.shape_cast %4 : vector<1x96x72xbf16> to vector<96x72xbf16>
    %c0_8 = arith.constant 0 : index
    %c0_9 = arith.constant 0 : index
    %c0_10 = arith.constant 0 : index
    %6 = vector.load %arg4[%c0_8, %c0_9, %c0_10] : memref<1x72x96xbf16, #tpu.memory_space<vmem>>, vector<1x72x96xbf16>
    %7 = vector.shape_cast %6 : vector<1x72x96xbf16> to vector<72x96xbf16>
    %8 = arith.truncf %1 : vector<72x32xf32> to vector<72x32xbf16>
    %cst = arith.constant dense<0.000000e+00> : vector<96x32xf32>
    %9 = tpu.matmul %5, %8, %cst {dimension_numbers = #tpu.dot_dimension_numbers<[1], [0], [0], [1], [0, 0, 1, 1], [], []>} : vector<96x72xbf16>, vector<72x32xbf16>, vector<96x32xf32> -> vector<96x32xf32>
    %c0_11 = arith.constant 0 : index
    %c0_12 = arith.constant 0 : index
    %c0_13 = arith.constant 0 : index
    %10 = vector.load %arg10[%c0_11, %c0_12, %c0_13] : memref<2x32x32xbf16, #tpu.memory_space<vmem>>, vector<1x32x32xbf16>
    %11 = vector.shape_cast %10 : vector<1x32x32xbf16> to vector<32x32xbf16>
    %12 = arith.truncf %9 : vector<96x32xf32> to vector<96x32xbf16>
    %cst_14 = arith.constant dense<0.000000e+00> : vector<96x32xf32>
    %13 = tpu.matmul %12, %11, %cst_14 {dimension_numbers = #tpu.dot_dimension_numbers<[1], [0], [0], [1], [0, 0, 1, 1], [], []>} : vector<96x32xbf16>, vector<32x32xbf16>, vector<96x32xf32> -> vector<96x32xf32>
    %c0_15 = arith.constant 0 : index
    %c0_16 = arith.constant 0 : index
    %c0_17 = arith.constant 0 : index
    %14 = vector.load %arg11[%c0_15, %c0_16, %c0_17] : memref<2x32x32xbf16, #tpu.memory_space<vmem>>, vector<1x32x32xbf16>
    %15 = vector.shape_cast %14 : vector<1x32x32xbf16> to vector<32x32xbf16>
    %cst_18 = arith.constant dense<0.000000e+00> : vector<96x32xf32>
    %16 = tpu.matmul %3, %15, %cst_18 {dimension_numbers = #tpu.dot_dimension_numbers<[1], [0], [0], [1], [0, 0, 1, 1], [], []>} : vector<96x32xbf16>, vector<32x32xbf16>, vector<96x32xf32> -> vector<96x32xf32>
    %17 = arith.addf %13, %16 : vector<96x32xf32>
    %c0_19 = arith.constant 0 : index
    %c0_20 = arith.constant 0 : index
    %c0_21 = arith.constant 0 : index
    %18 = vector.load %arg12[%c0_19, %c0_20, %c0_21] : memref<2x1x32xf32, #tpu.memory_space<vmem>>, vector<1x1x32xf32>
    %19 = vector.shape_cast %18 : vector<1x1x32xf32> to vector<1x32xf32>
    %20 = vector.broadcast %19 : vector<1x32xf32> to vector<96x32xf32>
    %21 = arith.addf %17, %20 : vector<96x32xf32>
    %cst_22 = arith.constant 0.000000e+00 : f32
    %22 = vector.broadcast %cst_22 : f32 to vector<96x32xf32>
    %23 = arith.cmpf ogt, %21, %22 : vector<96x32xf32>
    %cst_23 = arith.constant 0.00999999977 : f32
    %24 = vector.broadcast %cst_23 : f32 to vector<96x32xf32>
    %25 = arith.mulf %24, %21 : vector<96x32xf32>
    %26 = arith.select %23, %21, %25 : vector<96x32xi1>, vector<96x32xf32>
    %27 = arith.truncf %26 : vector<96x32xf32> to vector<96x32xbf16>
    %cst_24 = arith.constant dense<0.000000e+00> : vector<72x32xf32>
    %28 = tpu.matmul %7, %27, %cst_24 {dimension_numbers = #tpu.dot_dimension_numbers<[1], [0], [0], [1], [0, 0, 1, 1], [], []>} : vector<72x96xbf16>, vector<96x32xbf16>, vector<72x32xf32> -> vector<72x32xf32>
    %c0_25 = arith.constant 0 : index
    %c0_26 = arith.constant 0 : index
    %c0_27 = arith.constant 0 : index
    %29 = vector.load %arg13[%c0_25, %c0_26, %c0_27] : memref<2x32x32xbf16, #tpu.memory_space<vmem>>, vector<1x32x32xbf16>
    %30 = vector.shape_cast %29 : vector<1x32x32xbf16> to vector<32x32xbf16>
    %31 = arith.truncf %1 : vector<72x32xf32> to vector<72x32xbf16>
    %cst_28 = arith.constant dense<0.000000e+00> : vector<72x32xf32>
    %32 = tpu.matmul %31, %30, %cst_28 {dimension_numbers = #tpu.dot_dimension_numbers<[1], [0], [0], [1], [0, 0, 1, 1], [], []>} : vector<72x32xbf16>, vector<32x32xbf16>, vector<72x32xf32> -> vector<72x32xf32>
    %c0_29 = arith.constant 0 : index
    %c0_30 = arith.constant 0 : index
    %c0_31 = arith.constant 0 : index
    %33 = vector.load %arg14[%c0_29, %c0_30, %c0_31] : memref<2x32x32xbf16, #tpu.memory_space<vmem>>, vector<1x32x32xbf16>
    %34 = vector.shape_cast %33 : vector<1x32x32xbf16> to vector<32x32xbf16>
    %35 = arith.truncf %28 : vector<72x32xf32> to vector<72x32xbf16>
    %cst_32 = arith.constant dense<0.000000e+00> : vector<72x32xf32>
    %36 = tpu.matmul %35, %34, %cst_32 {dimension_numbers = #tpu.dot_dimension_numbers<[1], [0], [0], [1], [0, 0, 1, 1], [], []>} : vector<72x32xbf16>, vector<32x32xbf16>, vector<72x32xf32> -> vector<72x32xf32>
    %37 = arith.addf %32, %36 : vector<72x32xf32>
    %c0_33 = arith.constant 0 : index
    %c0_34 = arith.constant 0 : index
    %c0_35 = arith.constant 0 : index
    %38 = vector.load %arg15[%c0_33, %c0_34, %c0_35] : memref<2x1x32xf32, #tpu.memory_space<vmem>>, vector<1x1x32xf32>
    %39 = vector.shape_cast %38 : vector<1x1x32xf32> to vector<1x32xf32>
    %40 = vector.broadcast %39 : vector<1x32xf32> to vector<72x32xf32>
    %41 = arith.addf %37, %40 : vector<72x32xf32>
    %42 = arith.truncf %41 : vector<72x32xf32> to vector<72x32xbf16>
    %cst_36 = arith.constant dense<0.000000e+00> : vector<96x32xf32>
    %43 = tpu.matmul %5, %42, %cst_36 {dimension_numbers = #tpu.dot_dimension_numbers<[1], [0], [0], [1], [0, 0, 1, 1], [], []>} : vector<96x72xbf16>, vector<72x32xbf16>, vector<96x32xf32> -> vector<96x32xf32>
    %c1 = arith.constant 1 : index
    %c0_37 = arith.constant 0 : index
    %c0_38 = arith.constant 0 : index
    %44 = vector.load %arg10[%c1, %c0_37, %c0_38] : memref<2x32x32xbf16, #tpu.memory_space<vmem>>, vector<1x32x32xbf16>
    %45 = vector.shape_cast %44 : vector<1x32x32xbf16> to vector<32x32xbf16>
    %46 = arith.truncf %43 : vector<96x32xf32> to vector<96x32xbf16>
    %cst_39 = arith.constant dense<0.000000e+00> : vector<96x32xf32>
    %47 = tpu.matmul %46, %45, %cst_39 {dimension_numbers = #tpu.dot_dimension_numbers<[1], [0], [0], [1], [0, 0, 1, 1], [], []>} : vector<96x32xbf16>, vector<32x32xbf16>, vector<96x32xf32> -> vector<96x32xf32>
    %c1_40 = arith.constant 1 : index
    %c0_41 = arith.constant 0 : index
    %c0_42 = arith.constant 0 : index
    %48 = vector.load %arg11[%c1_40, %c0_41, %c0_42] : memref<2x32x32xbf16, #tpu.memory_space<vmem>>, vector<1x32x32xbf16>
    %49 = vector.shape_cast %48 : vector<1x32x32xbf16> to vector<32x32xbf16>
    %cst_43 = arith.constant dense<0.000000e+00> : vector<96x32xf32>
    %50 = tpu.matmul %3, %49, %cst_43 {dimension_numbers = #tpu.dot_dimension_numbers<[1], [0], [0], [1], [0, 0, 1, 1], [], []>} : vector<96x32xbf16>, vector<32x32xbf16>, vector<96x32xf32> -> vector<96x32xf32>
    %51 = arith.addf %47, %50 : vector<96x32xf32>
    %c1_44 = arith.constant 1 : index
    %c0_45 = arith.constant 0 : index
    %c0_46 = arith.constant 0 : index
    %52 = vector.load %arg12[%c1_44, %c0_45, %c0_46] : memref<2x1x32xf32, #tpu.memory_space<vmem>>, vector<1x1x32xf32>
    %53 = vector.shape_cast %52 : vector<1x1x32xf32> to vector<1x32xf32>
    %54 = vector.broadcast %53 : vector<1x32xf32> to vector<96x32xf32>
    %55 = arith.addf %51, %54 : vector<96x32xf32>
    %cst_47 = arith.constant 0.000000e+00 : f32
    %56 = vector.broadcast %cst_47 : f32 to vector<96x32xf32>
    %57 = arith.cmpf ogt, %55, %56 : vector<96x32xf32>
    %cst_48 = arith.constant 0.00999999977 : f32
    %58 = vector.broadcast %cst_48 : f32 to vector<96x32xf32>
    %59 = arith.mulf %58, %55 : vector<96x32xf32>
    %60 = arith.select %57, %55, %59 : vector<96x32xi1>, vector<96x32xf32>
    %61 = arith.truncf %60 : vector<96x32xf32> to vector<96x32xbf16>
    %cst_49 = arith.constant dense<0.000000e+00> : vector<72x32xf32>
    %62 = tpu.matmul %7, %61, %cst_49 {dimension_numbers = #tpu.dot_dimension_numbers<[1], [0], [0], [1], [0, 0, 1, 1], [], []>} : vector<72x96xbf16>, vector<96x32xbf16>, vector<72x32xf32> -> vector<72x32xf32>
    %c1_50 = arith.constant 1 : index
    %c0_51 = arith.constant 0 : index
    %c0_52 = arith.constant 0 : index
    %63 = vector.load %arg13[%c1_50, %c0_51, %c0_52] : memref<2x32x32xbf16, #tpu.memory_space<vmem>>, vector<1x32x32xbf16>
    %64 = vector.shape_cast %63 : vector<1x32x32xbf16> to vector<32x32xbf16>
    %65 = arith.truncf %41 : vector<72x32xf32> to vector<72x32xbf16>
    %cst_53 = arith.constant dense<0.000000e+00> : vector<72x32xf32>
    %66 = tpu.matmul %65, %64, %cst_53 {dimension_numbers = #tpu.dot_dimension_numbers<[1], [0], [0], [1], [0, 0, 1, 1], [], []>} : vector<72x32xbf16>, vector<32x32xbf16>, vector<72x32xf32> -> vector<72x32xf32>
    %c1_54 = arith.constant 1 : index
    %c0_55 = arith.constant 0 : index
    %c0_56 = arith.constant 0 : index
    %67 = vector.load %arg14[%c1_54, %c0_55, %c0_56] : memref<2x32x32xbf16, #tpu.memory_space<vmem>>, vector<1x32x32xbf16>
    %68 = vector.shape_cast %67 : vector<1x32x32xbf16> to vector<32x32xbf16>
    %69 = arith.truncf %62 : vector<72x32xf32> to vector<72x32xbf16>
    %cst_57 = arith.constant dense<0.000000e+00> : vector<72x32xf32>
    %70 = tpu.matmul %69, %68, %cst_57 {dimension_numbers = #tpu.dot_dimension_numbers<[1], [0], [0], [1], [0, 0, 1, 1], [], []>} : vector<72x32xbf16>, vector<32x32xbf16>, vector<72x32xf32> -> vector<72x32xf32>
    %71 = arith.addf %66, %70 : vector<72x32xf32>
    %c1_58 = arith.constant 1 : index
    %c0_59 = arith.constant 0 : index
    %c0_60 = arith.constant 0 : index
    %72 = vector.load %arg15[%c1_58, %c0_59, %c0_60] : memref<2x1x32xf32, #tpu.memory_space<vmem>>, vector<1x1x32xf32>
    %73 = vector.shape_cast %72 : vector<1x1x32xf32> to vector<1x32xf32>
    %74 = vector.broadcast %73 : vector<1x32xf32> to vector<72x32xf32>
    %75 = arith.addf %71, %74 : vector<72x32xf32>
    %cst_61 = arith.constant 0.000000e+00 : f32
    %76 = vector.broadcast %cst_61 : f32 to vector<72x32xf32>
    %77 = arith.cmpf ogt, %75, %76 : vector<72x32xf32>
    %cst_62 = arith.constant 0.00999999977 : f32
    %78 = vector.broadcast %cst_62 : f32 to vector<72x32xf32>
    %79 = arith.mulf %78, %75 : vector<72x32xf32>
    %80 = arith.select %77, %75, %79 : vector<72x32xi1>, vector<72x32xf32>
    %c0_63 = arith.constant 0 : index
    %c0_64 = arith.constant 0 : index
    %81 = vector.load %arg16[%c0_63, %c0_64] : memref<1x32xbf16, #tpu.memory_space<vmem>>, vector<1x32xbf16>
    %82 = arith.truncf %80 : vector<72x32xf32> to vector<72x32xbf16>
    %cst_65 = arith.constant dense<0.000000e+00> : vector<1x72xf32>
    %83 = tpu.matmul %81, %82, %cst_65 {dimension_numbers = #tpu.dot_dimension_numbers<[1], [1], [0], [0], [0, 0, 1, 0], [], []>} : vector<1x32xbf16>, vector<72x32xbf16>, vector<1x72xf32> -> vector<1x72xf32>
    %c0_66 = arith.constant 0 : index
    %c0_67 = arith.constant 0 : index
    %84 = vector.load %arg17[%c0_66, %c0_67] : memref<1x1xf32, #tpu.memory_space<vmem>>, vector<1x1xf32>
    %85 = vector.broadcast %84 : vector<1x1xf32> to vector<1x72xf32>
    %86 = arith.addf %83, %85 : vector<1x72xf32>
    %c0_68 = arith.constant 0 : index
    %c0_69 = arith.constant 0 : index
    %87 = vector.load %arg7[%c0_68, %c0_69] : memref<8x72xf32, #tpu.memory_space<vmem>>, vector<8x72xf32>
    %88 = vector.broadcast %86 : vector<1x72xf32> to vector<8x72xf32>
    %89 = arith.addf %88, %87 : vector<8x72xf32>
    %cst_70 = arith.constant dense<0xFF800000> : vector<8xf32>
    %90 = vector.multi_reduction <maximumf>, %89, %cst_70 [1] : vector<8x72xf32> to vector<8xf32>
    %91 = vector.shape_cast %90 : vector<8xf32> to vector<8x1xf32>
    %92 = vector.broadcast %91 : vector<8x1xf32> to vector<8x72xf32>
    %93 = arith.subf %89, %92 : vector<8x72xf32>
    %94 = math.exp %93 : vector<8x72xf32>
    %cst_71 = arith.constant dense<0.000000e+00> : vector<8xf32>
    %95 = vector.multi_reduction <add>, %94, %cst_71 [1] : vector<8x72xf32> to vector<8xf32>
    %96 = vector.shape_cast %95 : vector<8xf32> to vector<8x1xf32>
    %97 = tpu.reciprocal %96 {approx = true} : vector<8x1xf32> -> vector<8x1xf32>
    %98 = vector.broadcast %97 : vector<8x1xf32> to vector<8x72xf32>
    %99 = arith.mulf %94, %98 : vector<8x72xf32>
    %c0_72 = arith.constant 0 : index
    %c0_73 = arith.constant 0 : index
    %100 = vector.load %arg8[%c0_72, %c0_73] : memref<32x72xf32, #tpu.memory_space<vmem>>, vector<32x72xf32>
    %cst_74 = arith.constant 5.000000e-01 : f32
    %101 = vector.broadcast %cst_74 : f32 to vector<32x72xf32>
    %102 = arith.cmpf ogt, %100, %101 : vector<32x72xf32>
    %cst_75 = arith.constant 0.000000e+00 : f32
    %cst_76 = arith.constant -1.000000e+30 : f32
    %103 = vector.broadcast %cst_75 : f32 to vector<32x72xf32>
    %104 = vector.broadcast %cst_76 : f32 to vector<32x72xf32>
    %105 = arith.select %102, %103, %104 : vector<32x72xi1>, vector<32x72xf32>
    %cst_77 = arith.constant 9.99999993E-9 : f32
    %106 = vector.broadcast %cst_77 : f32 to vector<32x72xf32>
    %107 = arith.mulf %100, %106 : vector<32x72xf32>
    %c0_78 = arith.constant 0 : index
    %c0_79 = arith.constant 0 : index
    %c0_80 = arith.constant 0 : index
    %108 = vector.load %arg20[%c0_78, %c0_79, %c0_80] : memref<3x1x32xf32, #tpu.memory_space<vmem>>, vector<1x1x32xf32>
    %109 = vector.shape_cast %108 : vector<1x1x32xf32> to vector<1x32xf32>
    %c0_81 = arith.constant 0 : index
    %c0_82 = arith.constant 0 : index
    %c0_83 = arith.constant 0 : index
    %110 = vector.load %arg21[%c0_81, %c0_82, %c0_83] : memref<3x1x32xf32, #tpu.memory_space<vmem>>, vector<1x1x32xf32>
    %111 = vector.shape_cast %110 : vector<1x1x32xf32> to vector<1x32xf32>
    %cst_84 = arith.constant dense<0.000000e+00> : vector<72xf32>
    %112 = vector.multi_reduction <add>, %80, %cst_84 [1] : vector<72x32xf32> to vector<72xf32>
    %113 = vector.shape_cast %112 : vector<72xf32> to vector<72x1xf32>
    %cst_85 = arith.constant 3.200000e+01 : f32
    %114 = vector.broadcast %cst_85 : f32 to vector<72x1xf32>
    %115 = arith.divf %113, %114 : vector<72x1xf32>
    %116 = vector.broadcast %115 : vector<72x1xf32> to vector<72x32xf32>
    %117 = arith.subf %80, %116 : vector<72x32xf32>
    %118 = arith.mulf %117, %117 : vector<72x32xf32>
    %cst_86 = arith.constant dense<0.000000e+00> : vector<72xf32>
    %119 = vector.multi_reduction <add>, %118, %cst_86 [1] : vector<72x32xf32> to vector<72xf32>
    %120 = vector.shape_cast %119 : vector<72xf32> to vector<72x1xf32>
    %cst_87 = arith.constant 3.200000e+01 : f32
    %121 = vector.broadcast %cst_87 : f32 to vector<72x1xf32>
    %122 = arith.divf %120, %121 : vector<72x1xf32>
    %123 = vector.broadcast %115 : vector<72x1xf32> to vector<72x32xf32>
    %124 = arith.subf %80, %123 : vector<72x32xf32>
    %cst_88 = arith.constant 9.99999974E-6 : f32
    %125 = vector.broadcast %cst_88 : f32 to vector<72x1xf32>
    %126 = arith.addf %122, %125 : vector<72x1xf32>
    %127 = math.rsqrt %126 : vector<72x1xf32>
    %128 = vector.broadcast %127 : vector<72x1xf32> to vector<72x32xf32>
    %129 = arith.mulf %124, %128 : vector<72x32xf32>
    %130 = vector.broadcast %109 : vector<1x32xf32> to vector<72x32xf32>
    %131 = arith.mulf %129, %130 : vector<72x32xf32>
    %132 = vector.broadcast %111 : vector<1x32xf32> to vector<72x32xf32>
    %133 = arith.addf %131, %132 : vector<72x32xf32>
    %c0_89 = arith.constant 0 : index
    %c0_90 = arith.constant 0 : index
    %134 = vector.load %arg23[%c0_89, %c0_90] : memref<32x32xbf16, #tpu.memory_space<vmem>>, vector<32x32xbf16>
    %135 = arith.truncf %133 : vector<72x32xf32> to vector<72x32xbf16>
    %cst_91 = arith.constant dense<0.000000e+00> : vector<72x32xf32>
    %136 = tpu.matmul %135, %134, %cst_91 {dimension_numbers = #tpu.dot_dimension_numbers<[1], [0], [0], [1], [0, 0, 1, 1], [], []>} : vector<72x32xbf16>, vector<32x32xbf16>, vector<72x32xf32> -> vector<72x32xf32>
    %c0_92 = arith.constant 0 : index
    %c0_93 = arith.constant 0 : index
    %137 = vector.load %arg24[%c0_92, %c0_93] : memref<32x32xbf16, #tpu.memory_space<vmem>>, vector<32x32xbf16>
    %138 = arith.truncf %133 : vector<72x32xf32> to vector<72x32xbf16>
    %cst_94 = arith.constant dense<0.000000e+00> : vector<72x32xf32>
    %139 = tpu.matmul %138, %137, %cst_94 {dimension_numbers = #tpu.dot_dimension_numbers<[1], [0], [0], [1], [0, 0, 1, 1], [], []>} : vector<72x32xbf16>, vector<32x32xbf16>, vector<72x32xf32> -> vector<72x32xf32>
    %c0_95 = arith.constant 0 : index
    %c0_96 = arith.constant 0 : index
    %140 = vector.load %arg18[%c0_95, %c0_96] : memref<1x32xf32, #tpu.memory_space<vmem>>, vector<1x32xf32>
    %c0_97 = arith.constant 0 : index
    %c0_98 = arith.constant 0 : index
    %141 = vector.load %arg19[%c0_97, %c0_98] : memref<1x32xf32, #tpu.memory_space<vmem>>, vector<1x32xf32>
    %142 = math.exp %141 : vector<1x32xf32>
    %c0_99 = arith.constant 0 : index
    %c0_100 = arith.constant 0 : index
    %c0_101 = arith.constant 0 : index
    %143 = vector.load %arg6[%c0_99, %c0_100, %c0_101] : memref<1x32x32xf32, #tpu.memory_space<vmem>>, vector<1x32x32xf32>
    %144 = vector.shape_cast %143 : vector<1x32x32xf32> to vector<32x32xf32>
    %145 = vector.broadcast %142 : vector<1x32xf32> to vector<32x32xf32>
    %146 = arith.mulf %145, %144 : vector<32x32xf32>
    %147 = vector.broadcast %140 : vector<1x32xf32> to vector<32x32xf32>
    %148 = arith.addf %147, %146 : vector<32x32xf32>
    %c1_102 = arith.constant 1 : index
    %c0_103 = arith.constant 0 : index
    %c0_104 = arith.constant 0 : index
    %149 = vector.load %arg20[%c1_102, %c0_103, %c0_104] : memref<3x1x32xf32, #tpu.memory_space<vmem>>, vector<1x1x32xf32>
    %150 = vector.shape_cast %149 : vector<1x1x32xf32> to vector<1x32xf32>
    %c1_105 = arith.constant 1 : index
    %c0_106 = arith.constant 0 : index
    %c0_107 = arith.constant 0 : index
    %151 = vector.load %arg21[%c1_105, %c0_106, %c0_107] : memref<3x1x32xf32, #tpu.memory_space<vmem>>, vector<1x1x32xf32>
    %152 = vector.shape_cast %151 : vector<1x1x32xf32> to vector<1x32xf32>
    %cst_108 = arith.constant dense<0.000000e+00> : vector<32xf32>
    %153 = vector.multi_reduction <add>, %148, %cst_108 [1] : vector<32x32xf32> to vector<32xf32>
    %154 = vector.shape_cast %153 : vector<32xf32> to vector<32x1xf32>
    %cst_109 = arith.constant 3.200000e+01 : f32
    %155 = vector.broadcast %cst_109 : f32 to vector<32x1xf32>
    %156 = arith.divf %154, %155 : vector<32x1xf32>
    %157 = vector.broadcast %156 : vector<32x1xf32> to vector<32x32xf32>
    %158 = arith.subf %148, %157 : vector<32x32xf32>
    %159 = arith.mulf %158, %158 : vector<32x32xf32>
    %cst_110 = arith.constant dense<0.000000e+00> : vector<32xf32>
    %160 = vector.multi_reduction <add>, %159, %cst_110 [1] : vector<32x32xf32> to vector<32xf32>
    %161 = vector.shape_cast %160 : vector<32xf32> to vector<32x1xf32>
    %cst_111 = arith.constant 3.200000e+01 : f32
    %162 = vector.broadcast %cst_111 : f32 to vector<32x1xf32>
    %163 = arith.divf %161, %162 : vector<32x1xf32>
    %164 = vector.broadcast %156 : vector<32x1xf32> to vector<32x32xf32>
    %165 = arith.subf %148, %164 : vector<32x32xf32>
    %cst_112 = arith.constant 9.99999974E-6 : f32
    %166 = vector.broadcast %cst_112 : f32 to vector<32x1xf32>
    %167 = arith.addf %163, %166 : vector<32x1xf32>
    %168 = math.rsqrt %167 : vector<32x1xf32>
    %169 = vector.broadcast %168 : vector<32x1xf32> to vector<32x32xf32>
    %170 = arith.mulf %165, %169 : vector<32x32xf32>
    %171 = vector.broadcast %150 : vector<1x32xf32> to vector<32x32xf32>
    %172 = arith.mulf %170, %171 : vector<32x32xf32>
    %173 = vector.broadcast %152 : vector<1x32xf32> to vector<32x32xf32>
    %174 = arith.addf %172, %173 : vector<32x32xf32>
    %c0_113 = arith.constant 0 : index
    %c0_114 = arith.constant 0 : index
    %175 = vector.load %arg22[%c0_113, %c0_114] : memref<32x32xbf16, #tpu.memory_space<vmem>>, vector<32x32xbf16>
    %176 = arith.truncf %174 : vector<32x32xf32> to vector<32x32xbf16>
    %cst_115 = arith.constant dense<0.000000e+00> : vector<32x32xf32>
    %177 = tpu.matmul %176, %175, %cst_115 {dimension_numbers = #tpu.dot_dimension_numbers<[1], [0], [0], [1], [0, 0, 1, 1], [], []>} : vector<32x32xbf16>, vector<32x32xbf16>, vector<32x32xf32> -> vector<32x32xf32>
    %178 = arith.truncf %177 : vector<32x32xf32> to vector<32x32xbf16>
    %179 = arith.truncf %136 : vector<72x32xf32> to vector<72x32xbf16>
    %cst_116 = arith.constant dense<0.000000e+00> : vector<32x72xf32>
    %180 = tpu.matmul %178, %179, %cst_116 {dimension_numbers = #tpu.dot_dimension_numbers<[1], [1], [0], [0], [0, 0, 1, 0], [], []>} : vector<32x32xbf16>, vector<72x32xbf16>, vector<32x72xf32> -> vector<32x72xf32>
    %cst_117 = arith.constant 0.176776692 : f32
    %181 = vector.broadcast %cst_117 : f32 to vector<32x72xf32>
    %182 = arith.mulf %180, %181 : vector<32x72xf32>
    %183 = arith.addf %182, %105 : vector<32x72xf32>
    %cst_118 = arith.constant dense<0xFF800000> : vector<72xf32>
    %184 = vector.multi_reduction <maximumf>, %183, %cst_118 [0] : vector<32x72xf32> to vector<72xf32>
    %185 = vector.shape_cast %184 : vector<72xf32> to vector<1x72xf32>
    %186 = vector.broadcast %185 : vector<1x72xf32> to vector<32x72xf32>
    %187 = arith.subf %183, %186 : vector<32x72xf32>
    %188 = math.exp %187 : vector<32x72xf32>
    %cst_119 = arith.constant dense<0.000000e+00> : vector<72xf32>
    %189 = vector.multi_reduction <add>, %188, %cst_119 [0] : vector<32x72xf32> to vector<72xf32>
    %190 = vector.shape_cast %189 : vector<72xf32> to vector<1x72xf32>
    %191 = tpu.reciprocal %190 {approx = true} : vector<1x72xf32> -> vector<1x72xf32>
    %192 = vector.broadcast %191 : vector<1x72xf32> to vector<32x72xf32>
    %193 = arith.mulf %188, %192 : vector<32x72xf32>
    %194 = arith.addf %193, %107 : vector<32x72xf32>
    %cst_120 = arith.constant dense<0.000000e+00> : vector<32xf32>
    %195 = vector.multi_reduction <add>, %194, %cst_120 [1] : vector<32x72xf32> to vector<32xf32>
    %196 = vector.shape_cast %195 : vector<32xf32> to vector<32x1xf32>
    %197 = tpu.reciprocal %196 {approx = true} : vector<32x1xf32> -> vector<32x1xf32>
    %198 = vector.broadcast %197 : vector<32x1xf32> to vector<32x72xf32>
    %199 = arith.mulf %194, %198 : vector<32x72xf32>
    %200 = arith.truncf %199 : vector<32x72xf32> to vector<32x72xbf16>
    %201 = arith.truncf %139 : vector<72x32xf32> to vector<72x32xbf16>
    %cst_121 = arith.constant dense<0.000000e+00> : vector<32x32xf32>
    %202 = tpu.matmul %200, %201, %cst_121 {dimension_numbers = #tpu.dot_dimension_numbers<[1], [0], [0], [1], [0, 0, 1, 1], [], []>} : vector<32x72xbf16>, vector<72x32xbf16>, vector<32x32xf32> -> vector<32x32xf32>
    %c0_122 = arith.constant 0 : index
    %c0_123 = arith.constant 0 : index
    %c0_124 = arith.constant 0 : index
    %203 = vector.load %arg25[%c0_122, %c0_123, %c0_124] : memref<3x32x32xbf16, #tpu.memory_space<vmem>>, vector<1x32x32xbf16>
    %204 = vector.shape_cast %203 : vector<1x32x32xbf16> to vector<32x32xbf16>
    %205 = arith.truncf %202 : vector<32x32xf32> to vector<32x32xbf16>
    %cst_125 = arith.constant dense<0.000000e+00> : vector<32x32xf32>
    %206 = tpu.matmul %205, %204, %cst_125 {dimension_numbers = #tpu.dot_dimension_numbers<[1], [0], [0], [1], [0, 0, 1, 1], [], []>} : vector<32x32xbf16>, vector<32x32xbf16>, vector<32x32xf32> -> vector<32x32xf32>
    %c0_126 = arith.constant 0 : index
    %c0_127 = arith.constant 0 : index
    %c0_128 = arith.constant 0 : index
    %207 = vector.load %arg27[%c0_126, %c0_127, %c0_128] : memref<3x1x32xf32, #tpu.memory_space<vmem>>, vector<1x1x32xf32>
    %208 = vector.shape_cast %207 : vector<1x1x32xf32> to vector<1x32xf32>
    %209 = vector.broadcast %208 : vector<1x32xf32> to vector<32x32xf32>
    %210 = arith.addf %206, %209 : vector<32x32xf32>
    %c0_129 = arith.constant 0 : index
    %c0_130 = arith.constant 0 : index
    %c0_131 = arith.constant 0 : index
    %211 = vector.load %arg26[%c0_129, %c0_130, %c0_131] : memref<3x32x32xbf16, #tpu.memory_space<vmem>>, vector<1x32x32xbf16>
    %212 = vector.shape_cast %211 : vector<1x32x32xbf16> to vector<32x32xbf16>
    %213 = arith.truncf %148 : vector<32x32xf32> to vector<32x32xbf16>
    %cst_132 = arith.constant dense<0.000000e+00> : vector<32x32xf32>
    %214 = tpu.matmul %213, %212, %cst_132 {dimension_numbers = #tpu.dot_dimension_numbers<[1], [0], [0], [1], [0, 0, 1, 1], [], []>} : vector<32x32xbf16>, vector<32x32xbf16>, vector<32x32xf32> -> vector<32x32xf32>
    %215 = arith.addf %210, %214 : vector<32x32xf32>
    %c0_133 = arith.constant 0 : index
    %c0_134 = arith.constant 0 : index
    %c0_135 = arith.constant 0 : index
    %216 = vector.load %arg28[%c0_133, %c0_134, %c0_135] : memref<3x1x32xf32, #tpu.memory_space<vmem>>, vector<1x1x32xf32>
    %217 = vector.shape_cast %216 : vector<1x1x32xf32> to vector<1x32xf32>
    %218 = vector.broadcast %217 : vector<1x32xf32> to vector<32x32xf32>
    %219 = arith.addf %215, %218 : vector<32x32xf32>
    %220 = arith.negf %219 : vector<32x32xf32>
    %221 = math.exp %220 : vector<32x32xf32>
    %cst_136 = arith.constant 1.000000e+00 : f32
    %222 = vector.broadcast %cst_136 : f32 to vector<32x32xf32>
    %223 = arith.addf %222, %221 : vector<32x32xf32>
    %224 = arith.divf %222, %223 : vector<32x32xf32>
    %c1_137 = arith.constant 1 : index
    %c0_138 = arith.constant 0 : index
    %c0_139 = arith.constant 0 : index
    %225 = vector.load %arg25[%c1_137, %c0_138, %c0_139] : memref<3x32x32xbf16, #tpu.memory_space<vmem>>, vector<1x32x32xbf16>
    %226 = vector.shape_cast %225 : vector<1x32x32xbf16> to vector<32x32xbf16>
    %227 = arith.truncf %202 : vector<32x32xf32> to vector<32x32xbf16>
    %cst_140 = arith.constant dense<0.000000e+00> : vector<32x32xf32>
    %228 = tpu.matmul %227, %226, %cst_140 {dimension_numbers = #tpu.dot_dimension_numbers<[1], [0], [0], [1], [0, 0, 1, 1], [], []>} : vector<32x32xbf16>, vector<32x32xbf16>, vector<32x32xf32> -> vector<32x32xf32>
    %c1_141 = arith.constant 1 : index
    %c0_142 = arith.constant 0 : index
    %c0_143 = arith.constant 0 : index
    %229 = vector.load %arg27[%c1_141, %c0_142, %c0_143] : memref<3x1x32xf32, #tpu.memory_space<vmem>>, vector<1x1x32xf32>
    %230 = vector.shape_cast %229 : vector<1x1x32xf32> to vector<1x32xf32>
    %231 = vector.broadcast %230 : vector<1x32xf32> to vector<32x32xf32>
    %232 = arith.addf %228, %231 : vector<32x32xf32>
    %c1_144 = arith.constant 1 : index
    %c0_145 = arith.constant 0 : index
    %c0_146 = arith.constant 0 : index
    %233 = vector.load %arg26[%c1_144, %c0_145, %c0_146] : memref<3x32x32xbf16, #tpu.memory_space<vmem>>, vector<1x32x32xbf16>
    %234 = vector.shape_cast %233 : vector<1x32x32xbf16> to vector<32x32xbf16>
    %235 = arith.truncf %148 : vector<32x32xf32> to vector<32x32xbf16>
    %cst_147 = arith.constant dense<0.000000e+00> : vector<32x32xf32>
    %236 = tpu.matmul %235, %234, %cst_147 {dimension_numbers = #tpu.dot_dimension_numbers<[1], [0], [0], [1], [0, 0, 1, 1], [], []>} : vector<32x32xbf16>, vector<32x32xbf16>, vector<32x32xf32> -> vector<32x32xf32>
    %237 = arith.addf %232, %236 : vector<32x32xf32>
    %c1_148 = arith.constant 1 : index
    %c0_149 = arith.constant 0 : index
    %c0_150 = arith.constant 0 : index
    %238 = vector.load %arg28[%c1_148, %c0_149, %c0_150] : memref<3x1x32xf32, #tpu.memory_space<vmem>>, vector<1x1x32xf32>
    %239 = vector.shape_cast %238 : vector<1x1x32xf32> to vector<1x32xf32>
    %240 = vector.broadcast %239 : vector<1x32xf32> to vector<32x32xf32>
    %241 = arith.addf %237, %240 : vector<32x32xf32>
    %242 = arith.negf %241 : vector<32x32xf32>
    %243 = math.exp %242 : vector<32x32xf32>
    %cst_151 = arith.constant 1.000000e+00 : f32
    %244 = vector.broadcast %cst_151 : f32 to vector<32x32xf32>
    %245 = arith.addf %244, %243 : vector<32x32xf32>
    %246 = arith.divf %244, %245 : vector<32x32xf32>
    %c2 = arith.constant 2 : index
    %c0_152 = arith.constant 0 : index
    %c0_153 = arith.constant 0 : index
    %247 = vector.load %arg25[%c2, %c0_152, %c0_153] : memref<3x32x32xbf16, #tpu.memory_space<vmem>>, vector<1x32x32xbf16>
    %248 = vector.shape_cast %247 : vector<1x32x32xbf16> to vector<32x32xbf16>
    %249 = arith.truncf %202 : vector<32x32xf32> to vector<32x32xbf16>
    %cst_154 = arith.constant dense<0.000000e+00> : vector<32x32xf32>
    %250 = tpu.matmul %249, %248, %cst_154 {dimension_numbers = #tpu.dot_dimension_numbers<[1], [0], [0], [1], [0, 0, 1, 1], [], []>} : vector<32x32xbf16>, vector<32x32xbf16>, vector<32x32xf32> -> vector<32x32xf32>
    %c2_155 = arith.constant 2 : index
    %c0_156 = arith.constant 0 : index
    %c0_157 = arith.constant 0 : index
    %251 = vector.load %arg27[%c2_155, %c0_156, %c0_157] : memref<3x1x32xf32, #tpu.memory_space<vmem>>, vector<1x1x32xf32>
    %252 = vector.shape_cast %251 : vector<1x1x32xf32> to vector<1x32xf32>
    %253 = vector.broadcast %252 : vector<1x32xf32> to vector<32x32xf32>
    %254 = arith.addf %250, %253 : vector<32x32xf32>
    %c2_158 = arith.constant 2 : index
    %c0_159 = arith.constant 0 : index
    %c0_160 = arith.constant 0 : index
    %255 = vector.load %arg26[%c2_158, %c0_159, %c0_160] : memref<3x32x32xbf16, #tpu.memory_space<vmem>>, vector<1x32x32xbf16>
    %256 = vector.shape_cast %255 : vector<1x32x32xbf16> to vector<32x32xbf16>
    %257 = arith.truncf %148 : vector<32x32xf32> to vector<32x32xbf16>
    %cst_161 = arith.constant dense<0.000000e+00> : vector<32x32xf32>
    %258 = tpu.matmul %257, %256, %cst_161 {dimension_numbers = #tpu.dot_dimension_numbers<[1], [0], [0], [1], [0, 0, 1, 1], [], []>} : vector<32x32xbf16>, vector<32x32xbf16>, vector<32x32xf32> -> vector<32x32xf32>
    %c2_162 = arith.constant 2 : index
    %c0_163 = arith.constant 0 : index
    %c0_164 = arith.constant 0 : index
    %259 = vector.load %arg28[%c2_162, %c0_163, %c0_164] : memref<3x1x32xf32, #tpu.memory_space<vmem>>, vector<1x1x32xf32>
    %260 = vector.shape_cast %259 : vector<1x1x32xf32> to vector<1x32xf32>
    %261 = vector.broadcast %260 : vector<1x32xf32> to vector<32x32xf32>
    %262 = arith.addf %258, %261 : vector<32x32xf32>
    %263 = arith.mulf %224, %262 : vector<32x32xf32>
    %264 = arith.addf %254, %263 : vector<32x32xf32>
    %265 = math.tanh %264 : vector<32x32xf32>
    %cst_165 = arith.constant 1.000000e+00 : f32
    %266 = vector.broadcast %cst_165 : f32 to vector<32x32xf32>
    %267 = arith.subf %266, %246 : vector<32x32xf32>
    %268 = arith.mulf %267, %265 : vector<32x32xf32>
    %269 = arith.mulf %246, %148 : vector<32x32xf32>
    %270 = arith.addf %268, %269 : vector<32x32xf32>
    %c2_166 = arith.constant 2 : index
    %c0_167 = arith.constant 0 : index
    %c0_168 = arith.constant 0 : index
    %271 = vector.load %arg20[%c2_166, %c0_167, %c0_168] : memref<3x1x32xf32, #tpu.memory_space<vmem>>, vector<1x1x32xf32>
    %272 = vector.shape_cast %271 : vector<1x1x32xf32> to vector<1x32xf32>
    %c2_169 = arith.constant 2 : index
    %c0_170 = arith.constant 0 : index
    %c0_171 = arith.constant 0 : index
    %273 = vector.load %arg21[%c2_169, %c0_170, %c0_171] : memref<3x1x32xf32, #tpu.memory_space<vmem>>, vector<1x1x32xf32>
    %274 = vector.shape_cast %273 : vector<1x1x32xf32> to vector<1x32xf32>
    %cst_172 = arith.constant dense<0.000000e+00> : vector<32xf32>
    %275 = vector.multi_reduction <add>, %270, %cst_172 [1] : vector<32x32xf32> to vector<32xf32>
    %276 = vector.shape_cast %275 : vector<32xf32> to vector<32x1xf32>
    %cst_173 = arith.constant 3.200000e+01 : f32
    %277 = vector.broadcast %cst_173 : f32 to vector<32x1xf32>
    %278 = arith.divf %276, %277 : vector<32x1xf32>
    %279 = vector.broadcast %278 : vector<32x1xf32> to vector<32x32xf32>
    %280 = arith.subf %270, %279 : vector<32x32xf32>
    %281 = arith.mulf %280, %280 : vector<32x32xf32>
    %cst_174 = arith.constant dense<0.000000e+00> : vector<32xf32>
    %282 = vector.multi_reduction <add>, %281, %cst_174 [1] : vector<32x32xf32> to vector<32xf32>
    %283 = vector.shape_cast %282 : vector<32xf32> to vector<32x1xf32>
    %cst_175 = arith.constant 3.200000e+01 : f32
    %284 = vector.broadcast %cst_175 : f32 to vector<32x1xf32>
    %285 = arith.divf %283, %284 : vector<32x1xf32>
    %286 = vector.broadcast %278 : vector<32x1xf32> to vector<32x32xf32>
    %287 = arith.subf %270, %286 : vector<32x32xf32>
    %cst_176 = arith.constant 9.99999974E-6 : f32
    %288 = vector.broadcast %cst_176 : f32 to vector<32x1xf32>
    %289 = arith.addf %285, %288 : vector<32x1xf32>
    %290 = math.rsqrt %289 : vector<32x1xf32>
    %291 = vector.broadcast %290 : vector<32x1xf32> to vector<32x32xf32>
    %292 = arith.mulf %287, %291 : vector<32x32xf32>
    %293 = vector.broadcast %272 : vector<1x32xf32> to vector<32x32xf32>
    %294 = arith.mulf %292, %293 : vector<32x32xf32>
    %295 = vector.broadcast %274 : vector<1x32xf32> to vector<32x32xf32>
    %296 = arith.addf %294, %295 : vector<32x32xf32>
    %c0_177 = arith.constant 0 : index
    %c0_178 = arith.constant 0 : index
    %c0_179 = arith.constant 0 : index
    %297 = vector.load %arg29[%c0_177, %c0_178, %c0_179] : memref<2x32x32xbf16, #tpu.memory_space<vmem>>, vector<1x32x32xbf16>
    %298 = vector.shape_cast %297 : vector<1x32x32xbf16> to vector<32x32xbf16>
    %299 = arith.truncf %296 : vector<32x32xf32> to vector<32x32xbf16>
    %cst_180 = arith.constant dense<0.000000e+00> : vector<32x32xf32>
    %300 = tpu.matmul %299, %298, %cst_180 {dimension_numbers = #tpu.dot_dimension_numbers<[1], [0], [0], [1], [0, 0, 1, 1], [], []>} : vector<32x32xbf16>, vector<32x32xbf16>, vector<32x32xf32> -> vector<32x32xf32>
    %c0_181 = arith.constant 0 : index
    %c0_182 = arith.constant 0 : index
    %c0_183 = arith.constant 0 : index
    %301 = vector.load %arg30[%c0_181, %c0_182, %c0_183] : memref<2x1x32xf32, #tpu.memory_space<vmem>>, vector<1x1x32xf32>
    %302 = vector.shape_cast %301 : vector<1x1x32xf32> to vector<1x32xf32>
    %303 = vector.broadcast %302 : vector<1x32xf32> to vector<32x32xf32>
    %304 = arith.addf %300, %303 : vector<32x32xf32>
    %cst_184 = arith.constant 0.000000e+00 : f32
    %305 = vector.broadcast %cst_184 : f32 to vector<32x32xf32>
    %306 = arith.maximumf %304, %305 : vector<32x32xf32>
    %c1_185 = arith.constant 1 : index
    %c0_186 = arith.constant 0 : index
    %c0_187 = arith.constant 0 : index
    %307 = vector.load %arg29[%c1_185, %c0_186, %c0_187] : memref<2x32x32xbf16, #tpu.memory_space<vmem>>, vector<1x32x32xbf16>
    %308 = vector.shape_cast %307 : vector<1x32x32xbf16> to vector<32x32xbf16>
    %309 = arith.truncf %306 : vector<32x32xf32> to vector<32x32xbf16>
    %cst_188 = arith.constant dense<0.000000e+00> : vector<32x32xf32>
    %310 = tpu.matmul %309, %308, %cst_188 {dimension_numbers = #tpu.dot_dimension_numbers<[1], [0], [0], [1], [0, 0, 1, 1], [], []>} : vector<32x32xbf16>, vector<32x32xbf16>, vector<32x32xf32> -> vector<32x32xf32>
    %311 = arith.addf %270, %310 : vector<32x32xf32>
    %c1_189 = arith.constant 1 : index
    %c0_190 = arith.constant 0 : index
    %c0_191 = arith.constant 0 : index
    %312 = vector.load %arg30[%c1_189, %c0_190, %c0_191] : memref<2x1x32xf32, #tpu.memory_space<vmem>>, vector<1x1x32xf32>
    %313 = vector.shape_cast %312 : vector<1x1x32xf32> to vector<1x32xf32>
    %314 = vector.broadcast %313 : vector<1x32xf32> to vector<32x32xf32>
    %315 = arith.addf %311, %314 : vector<32x32xf32>
    %c1_192 = arith.constant 1 : index
    %c0_193 = arith.constant 0 : index
    %c0_194 = arith.constant 0 : index
    %316 = vector.load %arg20[%c1_192, %c0_193, %c0_194] : memref<3x1x32xf32, #tpu.memory_space<vmem>>, vector<1x1x32xf32>
    %317 = vector.shape_cast %316 : vector<1x1x32xf32> to vector<1x32xf32>
    %c1_195 = arith.constant 1 : index
    %c0_196 = arith.constant 0 : index
    %c0_197 = arith.constant 0 : index
    %318 = vector.load %arg21[%c1_195, %c0_196, %c0_197] : memref<3x1x32xf32, #tpu.memory_space<vmem>>, vector<1x1x32xf32>
    %319 = vector.shape_cast %318 : vector<1x1x32xf32> to vector<1x32xf32>
    %cst_198 = arith.constant dense<0.000000e+00> : vector<32xf32>
    %320 = vector.multi_reduction <add>, %315, %cst_198 [1] : vector<32x32xf32> to vector<32xf32>
    %321 = vector.shape_cast %320 : vector<32xf32> to vector<32x1xf32>
    %cst_199 = arith.constant 3.200000e+01 : f32
    %322 = vector.broadcast %cst_199 : f32 to vector<32x1xf32>
    %323 = arith.divf %321, %322 : vector<32x1xf32>
    %324 = vector.broadcast %323 : vector<32x1xf32> to vector<32x32xf32>
    %325 = arith.subf %315, %324 : vector<32x32xf32>
    %326 = arith.mulf %325, %325 : vector<32x32xf32>
    %cst_200 = arith.constant dense<0.000000e+00> : vector<32xf32>
    %327 = vector.multi_reduction <add>, %326, %cst_200 [1] : vector<32x32xf32> to vector<32xf32>
    %328 = vector.shape_cast %327 : vector<32xf32> to vector<32x1xf32>
    %cst_201 = arith.constant 3.200000e+01 : f32
    %329 = vector.broadcast %cst_201 : f32 to vector<32x1xf32>
    %330 = arith.divf %328, %329 : vector<32x1xf32>
    %331 = vector.broadcast %323 : vector<32x1xf32> to vector<32x32xf32>
    %332 = arith.subf %315, %331 : vector<32x32xf32>
    %cst_202 = arith.constant 9.99999974E-6 : f32
    %333 = vector.broadcast %cst_202 : f32 to vector<32x1xf32>
    %334 = arith.addf %330, %333 : vector<32x1xf32>
    %335 = math.rsqrt %334 : vector<32x1xf32>
    %336 = vector.broadcast %335 : vector<32x1xf32> to vector<32x32xf32>
    %337 = arith.mulf %332, %336 : vector<32x32xf32>
    %338 = vector.broadcast %317 : vector<1x32xf32> to vector<32x32xf32>
    %339 = arith.mulf %337, %338 : vector<32x32xf32>
    %340 = vector.broadcast %319 : vector<1x32xf32> to vector<32x32xf32>
    %341 = arith.addf %339, %340 : vector<32x32xf32>
    %c0_203 = arith.constant 0 : index
    %c0_204 = arith.constant 0 : index
    %342 = vector.load %arg22[%c0_203, %c0_204] : memref<32x32xbf16, #tpu.memory_space<vmem>>, vector<32x32xbf16>
    %343 = arith.truncf %341 : vector<32x32xf32> to vector<32x32xbf16>
    %cst_205 = arith.constant dense<0.000000e+00> : vector<32x32xf32>
    %344 = tpu.matmul %343, %342, %cst_205 {dimension_numbers = #tpu.dot_dimension_numbers<[1], [0], [0], [1], [0, 0, 1, 1], [], []>} : vector<32x32xbf16>, vector<32x32xbf16>, vector<32x32xf32> -> vector<32x32xf32>
    %345 = arith.truncf %344 : vector<32x32xf32> to vector<32x32xbf16>
    %346 = arith.truncf %136 : vector<72x32xf32> to vector<72x32xbf16>
    %cst_206 = arith.constant dense<0.000000e+00> : vector<32x72xf32>
    %347 = tpu.matmul %345, %346, %cst_206 {dimension_numbers = #tpu.dot_dimension_numbers<[1], [1], [0], [0], [0, 0, 1, 0], [], []>} : vector<32x32xbf16>, vector<72x32xbf16>, vector<32x72xf32> -> vector<32x72xf32>
    %cst_207 = arith.constant 0.176776692 : f32
    %348 = vector.broadcast %cst_207 : f32 to vector<32x72xf32>
    %349 = arith.mulf %347, %348 : vector<32x72xf32>
    %350 = arith.addf %349, %105 : vector<32x72xf32>
    %cst_208 = arith.constant dense<0xFF800000> : vector<72xf32>
    %351 = vector.multi_reduction <maximumf>, %350, %cst_208 [0] : vector<32x72xf32> to vector<72xf32>
    %352 = vector.shape_cast %351 : vector<72xf32> to vector<1x72xf32>
    %353 = vector.broadcast %352 : vector<1x72xf32> to vector<32x72xf32>
    %354 = arith.subf %350, %353 : vector<32x72xf32>
    %355 = math.exp %354 : vector<32x72xf32>
    %cst_209 = arith.constant dense<0.000000e+00> : vector<72xf32>
    %356 = vector.multi_reduction <add>, %355, %cst_209 [0] : vector<32x72xf32> to vector<72xf32>
    %357 = vector.shape_cast %356 : vector<72xf32> to vector<1x72xf32>
    %358 = tpu.reciprocal %357 {approx = true} : vector<1x72xf32> -> vector<1x72xf32>
    %359 = vector.broadcast %358 : vector<1x72xf32> to vector<32x72xf32>
    %360 = arith.mulf %355, %359 : vector<32x72xf32>
    %361 = arith.addf %360, %107 : vector<32x72xf32>
    %cst_210 = arith.constant dense<0.000000e+00> : vector<32xf32>
    %362 = vector.multi_reduction <add>, %361, %cst_210 [1] : vector<32x72xf32> to vector<32xf32>
    %363 = vector.shape_cast %362 : vector<32xf32> to vector<32x1xf32>
    %364 = tpu.reciprocal %363 {approx = true} : vector<32x1xf32> -> vector<32x1xf32>
    %365 = vector.broadcast %364 : vector<32x1xf32> to vector<32x72xf32>
    %366 = arith.mulf %361, %365 : vector<32x72xf32>
    %367 = arith.truncf %366 : vector<32x72xf32> to vector<32x72xbf16>
    %368 = arith.truncf %139 : vector<72x32xf32> to vector<72x32xbf16>
    %cst_211 = arith.constant dense<0.000000e+00> : vector<32x32xf32>
    %369 = tpu.matmul %367, %368, %cst_211 {dimension_numbers = #tpu.dot_dimension_numbers<[1], [0], [0], [1], [0, 0, 1, 1], [], []>} : vector<32x72xbf16>, vector<72x32xbf16>, vector<32x32xf32> -> vector<32x32xf32>
    %c0_212 = arith.constant 0 : index
    %c0_213 = arith.constant 0 : index
    %c0_214 = arith.constant 0 : index
    %370 = vector.load %arg25[%c0_212, %c0_213, %c0_214] : memref<3x32x32xbf16, #tpu.memory_space<vmem>>, vector<1x32x32xbf16>
    %371 = vector.shape_cast %370 : vector<1x32x32xbf16> to vector<32x32xbf16>
    %372 = arith.truncf %369 : vector<32x32xf32> to vector<32x32xbf16>
    %cst_215 = arith.constant dense<0.000000e+00> : vector<32x32xf32>
    %373 = tpu.matmul %372, %371, %cst_215 {dimension_numbers = #tpu.dot_dimension_numbers<[1], [0], [0], [1], [0, 0, 1, 1], [], []>} : vector<32x32xbf16>, vector<32x32xbf16>, vector<32x32xf32> -> vector<32x32xf32>
    %c0_216 = arith.constant 0 : index
    %c0_217 = arith.constant 0 : index
    %c0_218 = arith.constant 0 : index
    %374 = vector.load %arg27[%c0_216, %c0_217, %c0_218] : memref<3x1x32xf32, #tpu.memory_space<vmem>>, vector<1x1x32xf32>
    %375 = vector.shape_cast %374 : vector<1x1x32xf32> to vector<1x32xf32>
    %376 = vector.broadcast %375 : vector<1x32xf32> to vector<32x32xf32>
    %377 = arith.addf %373, %376 : vector<32x32xf32>
    %c0_219 = arith.constant 0 : index
    %c0_220 = arith.constant 0 : index
    %c0_221 = arith.constant 0 : index
    %378 = vector.load %arg26[%c0_219, %c0_220, %c0_221] : memref<3x32x32xbf16, #tpu.memory_space<vmem>>, vector<1x32x32xbf16>
    %379 = vector.shape_cast %378 : vector<1x32x32xbf16> to vector<32x32xbf16>
    %380 = arith.truncf %315 : vector<32x32xf32> to vector<32x32xbf16>
    %cst_222 = arith.constant dense<0.000000e+00> : vector<32x32xf32>
    %381 = tpu.matmul %380, %379, %cst_222 {dimension_numbers = #tpu.dot_dimension_numbers<[1], [0], [0], [1], [0, 0, 1, 1], [], []>} : vector<32x32xbf16>, vector<32x32xbf16>, vector<32x32xf32> -> vector<32x32xf32>
    %382 = arith.addf %377, %381 : vector<32x32xf32>
    %c0_223 = arith.constant 0 : index
    %c0_224 = arith.constant 0 : index
    %c0_225 = arith.constant 0 : index
    %383 = vector.load %arg28[%c0_223, %c0_224, %c0_225] : memref<3x1x32xf32, #tpu.memory_space<vmem>>, vector<1x1x32xf32>
    %384 = vector.shape_cast %383 : vector<1x1x32xf32> to vector<1x32xf32>
    %385 = vector.broadcast %384 : vector<1x32xf32> to vector<32x32xf32>
    %386 = arith.addf %382, %385 : vector<32x32xf32>
    %387 = arith.negf %386 : vector<32x32xf32>
    %388 = math.exp %387 : vector<32x32xf32>
    %cst_226 = arith.constant 1.000000e+00 : f32
    %389 = vector.broadcast %cst_226 : f32 to vector<32x32xf32>
    %390 = arith.addf %389, %388 : vector<32x32xf32>
    %391 = arith.divf %389, %390 : vector<32x32xf32>
    %c1_227 = arith.constant 1 : index
    %c0_228 = arith.constant 0 : index
    %c0_229 = arith.constant 0 : index
    %392 = vector.load %arg25[%c1_227, %c0_228, %c0_229] : memref<3x32x32xbf16, #tpu.memory_space<vmem>>, vector<1x32x32xbf16>
    %393 = vector.shape_cast %392 : vector<1x32x32xbf16> to vector<32x32xbf16>
    %394 = arith.truncf %369 : vector<32x32xf32> to vector<32x32xbf16>
    %cst_230 = arith.constant dense<0.000000e+00> : vector<32x32xf32>
    %395 = tpu.matmul %394, %393, %cst_230 {dimension_numbers = #tpu.dot_dimension_numbers<[1], [0], [0], [1], [0, 0, 1, 1], [], []>} : vector<32x32xbf16>, vector<32x32xbf16>, vector<32x32xf32> -> vector<32x32xf32>
    %c1_231 = arith.constant 1 : index
    %c0_232 = arith.constant 0 : index
    %c0_233 = arith.constant 0 : index
    %396 = vector.load %arg27[%c1_231, %c0_232, %c0_233] : memref<3x1x32xf32, #tpu.memory_space<vmem>>, vector<1x1x32xf32>
    %397 = vector.shape_cast %396 : vector<1x1x32xf32> to vector<1x32xf32>
    %398 = vector.broadcast %397 : vector<1x32xf32> to vector<32x32xf32>
    %399 = arith.addf %395, %398 : vector<32x32xf32>
    %c1_234 = arith.constant 1 : index
    %c0_235 = arith.constant 0 : index
    %c0_236 = arith.constant 0 : index
    %400 = vector.load %arg26[%c1_234, %c0_235, %c0_236] : memref<3x32x32xbf16, #tpu.memory_space<vmem>>, vector<1x32x32xbf16>
    %401 = vector.shape_cast %400 : vector<1x32x32xbf16> to vector<32x32xbf16>
    %402 = arith.truncf %315 : vector<32x32xf32> to vector<32x32xbf16>
    %cst_237 = arith.constant dense<0.000000e+00> : vector<32x32xf32>
    %403 = tpu.matmul %402, %401, %cst_237 {dimension_numbers = #tpu.dot_dimension_numbers<[1], [0], [0], [1], [0, 0, 1, 1], [], []>} : vector<32x32xbf16>, vector<32x32xbf16>, vector<32x32xf32> -> vector<32x32xf32>
    %404 = arith.addf %399, %403 : vector<32x32xf32>
    %c1_238 = arith.constant 1 : index
    %c0_239 = arith.constant 0 : index
    %c0_240 = arith.constant 0 : index
    %405 = vector.load %arg28[%c1_238, %c0_239, %c0_240] : memref<3x1x32xf32, #tpu.memory_space<vmem>>, vector<1x1x32xf32>
    %406 = vector.shape_cast %405 : vector<1x1x32xf32> to vector<1x32xf32>
    %407 = vector.broadcast %406 : vector<1x32xf32> to vector<32x32xf32>
    %408 = arith.addf %404, %407 : vector<32x32xf32>
    %409 = arith.negf %408 : vector<32x32xf32>
    %410 = math.exp %409 : vector<32x32xf32>
    %cst_241 = arith.constant 1.000000e+00 : f32
    %411 = vector.broadcast %cst_241 : f32 to vector<32x32xf32>
    %412 = arith.addf %411, %410 : vector<32x32xf32>
    %413 = arith.divf %411, %412 : vector<32x32xf32>
    %c2_242 = arith.constant 2 : index
    %c0_243 = arith.constant 0 : index
    %c0_244 = arith.constant 0 : index
    %414 = vector.load %arg25[%c2_242, %c0_243, %c0_244] : memref<3x32x32xbf16, #tpu.memory_space<vmem>>, vector<1x32x32xbf16>
    %415 = vector.shape_cast %414 : vector<1x32x32xbf16> to vector<32x32xbf16>
    %416 = arith.truncf %369 : vector<32x32xf32> to vector<32x32xbf16>
    %cst_245 = arith.constant dense<0.000000e+00> : vector<32x32xf32>
    %417 = tpu.matmul %416, %415, %cst_245 {dimension_numbers = #tpu.dot_dimension_numbers<[1], [0], [0], [1], [0, 0, 1, 1], [], []>} : vector<32x32xbf16>, vector<32x32xbf16>, vector<32x32xf32> -> vector<32x32xf32>
    %c2_246 = arith.constant 2 : index
    %c0_247 = arith.constant 0 : index
    %c0_248 = arith.constant 0 : index
    %418 = vector.load %arg27[%c2_246, %c0_247, %c0_248] : memref<3x1x32xf32, #tpu.memory_space<vmem>>, vector<1x1x32xf32>
    %419 = vector.shape_cast %418 : vector<1x1x32xf32> to vector<1x32xf32>
    %420 = vector.broadcast %419 : vector<1x32xf32> to vector<32x32xf32>
    %421 = arith.addf %417, %420 : vector<32x32xf32>
    %c2_249 = arith.constant 2 : index
    %c0_250 = arith.constant 0 : index
    %c0_251 = arith.constant 0 : index
    %422 = vector.load %arg26[%c2_249, %c0_250, %c0_251] : memref<3x32x32xbf16, #tpu.memory_space<vmem>>, vector<1x32x32xbf16>
    %423 = vector.shape_cast %422 : vector<1x32x32xbf16> to vector<32x32xbf16>
    %424 = arith.truncf %315 : vector<32x32xf32> to vector<32x32xbf16>
    %cst_252 = arith.constant dense<0.000000e+00> : vector<32x32xf32>
    %425 = tpu.matmul %424, %423, %cst_252 {dimension_numbers = #tpu.dot_dimension_numbers<[1], [0], [0], [1], [0, 0, 1, 1], [], []>} : vector<32x32xbf16>, vector<32x32xbf16>, vector<32x32xf32> -> vector<32x32xf32>
    %c2_253 = arith.constant 2 : index
    %c0_254 = arith.constant 0 : index
    %c0_255 = arith.constant 0 : index
    %426 = vector.load %arg28[%c2_253, %c0_254, %c0_255] : memref<3x1x32xf32, #tpu.memory_space<vmem>>, vector<1x1x32xf32>
    %427 = vector.shape_cast %426 : vector<1x1x32xf32> to vector<1x32xf32>
    %428 = vector.broadcast %427 : vector<1x32xf32> to vector<32x32xf32>
    %429 = arith.addf %425, %428 : vector<32x32xf32>
    %430 = arith.mulf %391, %429 : vector<32x32xf32>
    %431 = arith.addf %421, %430 : vector<32x32xf32>
    %432 = math.tanh %431 : vector<32x32xf32>
    %cst_256 = arith.constant 1.000000e+00 : f32
    %433 = vector.broadcast %cst_256 : f32 to vector<32x32xf32>
    %434 = arith.subf %433, %413 : vector<32x32xf32>
    %435 = arith.mulf %434, %432 : vector<32x32xf32>
    %436 = arith.mulf %413, %315 : vector<32x32xf32>
    %437 = arith.addf %435, %436 : vector<32x32xf32>
    %c2_257 = arith.constant 2 : index
    %c0_258 = arith.constant 0 : index
    %c0_259 = arith.constant 0 : index
    %438 = vector.load %arg20[%c2_257, %c0_258, %c0_259] : memref<3x1x32xf32, #tpu.memory_space<vmem>>, vector<1x1x32xf32>
    %439 = vector.shape_cast %438 : vector<1x1x32xf32> to vector<1x32xf32>
    %c2_260 = arith.constant 2 : index
    %c0_261 = arith.constant 0 : index
    %c0_262 = arith.constant 0 : index
    %440 = vector.load %arg21[%c2_260, %c0_261, %c0_262] : memref<3x1x32xf32, #tpu.memory_space<vmem>>, vector<1x1x32xf32>
    %441 = vector.shape_cast %440 : vector<1x1x32xf32> to vector<1x32xf32>
    %cst_263 = arith.constant dense<0.000000e+00> : vector<32xf32>
    %442 = vector.multi_reduction <add>, %437, %cst_263 [1] : vector<32x32xf32> to vector<32xf32>
    %443 = vector.shape_cast %442 : vector<32xf32> to vector<32x1xf32>
    %cst_264 = arith.constant 3.200000e+01 : f32
    %444 = vector.broadcast %cst_264 : f32 to vector<32x1xf32>
    %445 = arith.divf %443, %444 : vector<32x1xf32>
    %446 = vector.broadcast %445 : vector<32x1xf32> to vector<32x32xf32>
    %447 = arith.subf %437, %446 : vector<32x32xf32>
    %448 = arith.mulf %447, %447 : vector<32x32xf32>
    %cst_265 = arith.constant dense<0.000000e+00> : vector<32xf32>
    %449 = vector.multi_reduction <add>, %448, %cst_265 [1] : vector<32x32xf32> to vector<32xf32>
    %450 = vector.shape_cast %449 : vector<32xf32> to vector<32x1xf32>
    %cst_266 = arith.constant 3.200000e+01 : f32
    %451 = vector.broadcast %cst_266 : f32 to vector<32x1xf32>
    %452 = arith.divf %450, %451 : vector<32x1xf32>
    %453 = vector.broadcast %445 : vector<32x1xf32> to vector<32x32xf32>
    %454 = arith.subf %437, %453 : vector<32x32xf32>
    %cst_267 = arith.constant 9.99999974E-6 : f32
    %455 = vector.broadcast %cst_267 : f32 to vector<32x1xf32>
    %456 = arith.addf %452, %455 : vector<32x1xf32>
    %457 = math.rsqrt %456 : vector<32x1xf32>
    %458 = vector.broadcast %457 : vector<32x1xf32> to vector<32x32xf32>
    %459 = arith.mulf %454, %458 : vector<32x32xf32>
    %460 = vector.broadcast %439 : vector<1x32xf32> to vector<32x32xf32>
    %461 = arith.mulf %459, %460 : vector<32x32xf32>
    %462 = vector.broadcast %441 : vector<1x32xf32> to vector<32x32xf32>
    %463 = arith.addf %461, %462 : vector<32x32xf32>
    %c0_268 = arith.constant 0 : index
    %c0_269 = arith.constant 0 : index
    %c0_270 = arith.constant 0 : index
    %464 = vector.load %arg29[%c0_268, %c0_269, %c0_270] : memref<2x32x32xbf16, #tpu.memory_space<vmem>>, vector<1x32x32xbf16>
    %465 = vector.shape_cast %464 : vector<1x32x32xbf16> to vector<32x32xbf16>
    %466 = arith.truncf %463 : vector<32x32xf32> to vector<32x32xbf16>
    %cst_271 = arith.constant dense<0.000000e+00> : vector<32x32xf32>
    %467 = tpu.matmul %466, %465, %cst_271 {dimension_numbers = #tpu.dot_dimension_numbers<[1], [0], [0], [1], [0, 0, 1, 1], [], []>} : vector<32x32xbf16>, vector<32x32xbf16>, vector<32x32xf32> -> vector<32x32xf32>
    %c0_272 = arith.constant 0 : index
    %c0_273 = arith.constant 0 : index
    %c0_274 = arith.constant 0 : index
    %468 = vector.load %arg30[%c0_272, %c0_273, %c0_274] : memref<2x1x32xf32, #tpu.memory_space<vmem>>, vector<1x1x32xf32>
    %469 = vector.shape_cast %468 : vector<1x1x32xf32> to vector<1x32xf32>
    %470 = vector.broadcast %469 : vector<1x32xf32> to vector<32x32xf32>
    %471 = arith.addf %467, %470 : vector<32x32xf32>
    %cst_275 = arith.constant 0.000000e+00 : f32
    %472 = vector.broadcast %cst_275 : f32 to vector<32x32xf32>
    %473 = arith.maximumf %471, %472 : vector<32x32xf32>
    %c1_276 = arith.constant 1 : index
    %c0_277 = arith.constant 0 : index
    %c0_278 = arith.constant 0 : index
    %474 = vector.load %arg29[%c1_276, %c0_277, %c0_278] : memref<2x32x32xbf16, #tpu.memory_space<vmem>>, vector<1x32x32xbf16>
    %475 = vector.shape_cast %474 : vector<1x32x32xbf16> to vector<32x32xbf16>
    %476 = arith.truncf %473 : vector<32x32xf32> to vector<32x32xbf16>
    %cst_279 = arith.constant dense<0.000000e+00> : vector<32x32xf32>
    %477 = tpu.matmul %476, %475, %cst_279 {dimension_numbers = #tpu.dot_dimension_numbers<[1], [0], [0], [1], [0, 0, 1, 1], [], []>} : vector<32x32xbf16>, vector<32x32xbf16>, vector<32x32xf32> -> vector<32x32xf32>
    %478 = arith.addf %437, %477 : vector<32x32xf32>
    %c1_280 = arith.constant 1 : index
    %c0_281 = arith.constant 0 : index
    %c0_282 = arith.constant 0 : index
    %479 = vector.load %arg30[%c1_280, %c0_281, %c0_282] : memref<2x1x32xf32, #tpu.memory_space<vmem>>, vector<1x1x32xf32>
    %480 = vector.shape_cast %479 : vector<1x1x32xf32> to vector<1x32xf32>
    %481 = vector.broadcast %480 : vector<1x32xf32> to vector<32x32xf32>
    %482 = arith.addf %478, %481 : vector<32x32xf32>
    %c1_283 = arith.constant 1 : index
    %c0_284 = arith.constant 0 : index
    %c0_285 = arith.constant 0 : index
    %483 = vector.load %arg20[%c1_283, %c0_284, %c0_285] : memref<3x1x32xf32, #tpu.memory_space<vmem>>, vector<1x1x32xf32>
    %484 = vector.shape_cast %483 : vector<1x1x32xf32> to vector<1x32xf32>
    %c1_286 = arith.constant 1 : index
    %c0_287 = arith.constant 0 : index
    %c0_288 = arith.constant 0 : index
    %485 = vector.load %arg21[%c1_286, %c0_287, %c0_288] : memref<3x1x32xf32, #tpu.memory_space<vmem>>, vector<1x1x32xf32>
    %486 = vector.shape_cast %485 : vector<1x1x32xf32> to vector<1x32xf32>
    %cst_289 = arith.constant dense<0.000000e+00> : vector<32xf32>
    %487 = vector.multi_reduction <add>, %482, %cst_289 [1] : vector<32x32xf32> to vector<32xf32>
    %488 = vector.shape_cast %487 : vector<32xf32> to vector<32x1xf32>
    %cst_290 = arith.constant 3.200000e+01 : f32
    %489 = vector.broadcast %cst_290 : f32 to vector<32x1xf32>
    %490 = arith.divf %488, %489 : vector<32x1xf32>
    %491 = vector.broadcast %490 : vector<32x1xf32> to vector<32x32xf32>
    %492 = arith.subf %482, %491 : vector<32x32xf32>
    %493 = arith.mulf %492, %492 : vector<32x32xf32>
    %cst_291 = arith.constant dense<0.000000e+00> : vector<32xf32>
    %494 = vector.multi_reduction <add>, %493, %cst_291 [1] : vector<32x32xf32> to vector<32xf32>
    %495 = vector.shape_cast %494 : vector<32xf32> to vector<32x1xf32>
    %cst_292 = arith.constant 3.200000e+01 : f32
    %496 = vector.broadcast %cst_292 : f32 to vector<32x1xf32>
    %497 = arith.divf %495, %496 : vector<32x1xf32>
    %498 = vector.broadcast %490 : vector<32x1xf32> to vector<32x32xf32>
    %499 = arith.subf %482, %498 : vector<32x32xf32>
    %cst_293 = arith.constant 9.99999974E-6 : f32
    %500 = vector.broadcast %cst_293 : f32 to vector<32x1xf32>
    %501 = arith.addf %497, %500 : vector<32x1xf32>
    %502 = math.rsqrt %501 : vector<32x1xf32>
    %503 = vector.broadcast %502 : vector<32x1xf32> to vector<32x32xf32>
    %504 = arith.mulf %499, %503 : vector<32x32xf32>
    %505 = vector.broadcast %484 : vector<1x32xf32> to vector<32x32xf32>
    %506 = arith.mulf %504, %505 : vector<32x32xf32>
    %507 = vector.broadcast %486 : vector<1x32xf32> to vector<32x32xf32>
    %508 = arith.addf %506, %507 : vector<32x32xf32>
    %c0_294 = arith.constant 0 : index
    %c0_295 = arith.constant 0 : index
    %509 = vector.load %arg22[%c0_294, %c0_295] : memref<32x32xbf16, #tpu.memory_space<vmem>>, vector<32x32xbf16>
    %510 = arith.truncf %508 : vector<32x32xf32> to vector<32x32xbf16>
    %cst_296 = arith.constant dense<0.000000e+00> : vector<32x32xf32>
    %511 = tpu.matmul %510, %509, %cst_296 {dimension_numbers = #tpu.dot_dimension_numbers<[1], [0], [0], [1], [0, 0, 1, 1], [], []>} : vector<32x32xbf16>, vector<32x32xbf16>, vector<32x32xf32> -> vector<32x32xf32>
    %512 = arith.truncf %511 : vector<32x32xf32> to vector<32x32xbf16>
    %513 = arith.truncf %136 : vector<72x32xf32> to vector<72x32xbf16>
    %cst_297 = arith.constant dense<0.000000e+00> : vector<32x72xf32>
    %514 = tpu.matmul %512, %513, %cst_297 {dimension_numbers = #tpu.dot_dimension_numbers<[1], [1], [0], [0], [0, 0, 1, 0], [], []>} : vector<32x32xbf16>, vector<72x32xbf16>, vector<32x72xf32> -> vector<32x72xf32>
    %cst_298 = arith.constant 0.176776692 : f32
    %515 = vector.broadcast %cst_298 : f32 to vector<32x72xf32>
    %516 = arith.mulf %514, %515 : vector<32x72xf32>
    %517 = arith.addf %516, %105 : vector<32x72xf32>
    %cst_299 = arith.constant dense<0xFF800000> : vector<72xf32>
    %518 = vector.multi_reduction <maximumf>, %517, %cst_299 [0] : vector<32x72xf32> to vector<72xf32>
    %519 = vector.shape_cast %518 : vector<72xf32> to vector<1x72xf32>
    %520 = vector.broadcast %519 : vector<1x72xf32> to vector<32x72xf32>
    %521 = arith.subf %517, %520 : vector<32x72xf32>
    %522 = math.exp %521 : vector<32x72xf32>
    %cst_300 = arith.constant dense<0.000000e+00> : vector<72xf32>
    %523 = vector.multi_reduction <add>, %522, %cst_300 [0] : vector<32x72xf32> to vector<72xf32>
    %524 = vector.shape_cast %523 : vector<72xf32> to vector<1x72xf32>
    %525 = tpu.reciprocal %524 {approx = true} : vector<1x72xf32> -> vector<1x72xf32>
    %526 = vector.broadcast %525 : vector<1x72xf32> to vector<32x72xf32>
    %527 = arith.mulf %522, %526 : vector<32x72xf32>
    %528 = arith.addf %527, %107 : vector<32x72xf32>
    %cst_301 = arith.constant dense<0.000000e+00> : vector<32xf32>
    %529 = vector.multi_reduction <add>, %528, %cst_301 [1] : vector<32x72xf32> to vector<32xf32>
    %530 = vector.shape_cast %529 : vector<32xf32> to vector<32x1xf32>
    %531 = tpu.reciprocal %530 {approx = true} : vector<32x1xf32> -> vector<32x1xf32>
    %532 = vector.broadcast %531 : vector<32x1xf32> to vector<32x72xf32>
    %533 = arith.mulf %528, %532 : vector<32x72xf32>
    %534 = arith.truncf %533 : vector<32x72xf32> to vector<32x72xbf16>
    %535 = arith.truncf %139 : vector<72x32xf32> to vector<72x32xbf16>
    %cst_302 = arith.constant dense<0.000000e+00> : vector<32x32xf32>
    %536 = tpu.matmul %534, %535, %cst_302 {dimension_numbers = #tpu.dot_dimension_numbers<[1], [0], [0], [1], [0, 0, 1, 1], [], []>} : vector<32x72xbf16>, vector<72x32xbf16>, vector<32x32xf32> -> vector<32x32xf32>
    %c0_303 = arith.constant 0 : index
    %c0_304 = arith.constant 0 : index
    %c0_305 = arith.constant 0 : index
    %537 = vector.load %arg25[%c0_303, %c0_304, %c0_305] : memref<3x32x32xbf16, #tpu.memory_space<vmem>>, vector<1x32x32xbf16>
    %538 = vector.shape_cast %537 : vector<1x32x32xbf16> to vector<32x32xbf16>
    %539 = arith.truncf %536 : vector<32x32xf32> to vector<32x32xbf16>
    %cst_306 = arith.constant dense<0.000000e+00> : vector<32x32xf32>
    %540 = tpu.matmul %539, %538, %cst_306 {dimension_numbers = #tpu.dot_dimension_numbers<[1], [0], [0], [1], [0, 0, 1, 1], [], []>} : vector<32x32xbf16>, vector<32x32xbf16>, vector<32x32xf32> -> vector<32x32xf32>
    %c0_307 = arith.constant 0 : index
    %c0_308 = arith.constant 0 : index
    %c0_309 = arith.constant 0 : index
    %541 = vector.load %arg27[%c0_307, %c0_308, %c0_309] : memref<3x1x32xf32, #tpu.memory_space<vmem>>, vector<1x1x32xf32>
    %542 = vector.shape_cast %541 : vector<1x1x32xf32> to vector<1x32xf32>
    %543 = vector.broadcast %542 : vector<1x32xf32> to vector<32x32xf32>
    %544 = arith.addf %540, %543 : vector<32x32xf32>
    %c0_310 = arith.constant 0 : index
    %c0_311 = arith.constant 0 : index
    %c0_312 = arith.constant 0 : index
    %545 = vector.load %arg26[%c0_310, %c0_311, %c0_312] : memref<3x32x32xbf16, #tpu.memory_space<vmem>>, vector<1x32x32xbf16>
    %546 = vector.shape_cast %545 : vector<1x32x32xbf16> to vector<32x32xbf16>
    %547 = arith.truncf %482 : vector<32x32xf32> to vector<32x32xbf16>
    %cst_313 = arith.constant dense<0.000000e+00> : vector<32x32xf32>
    %548 = tpu.matmul %547, %546, %cst_313 {dimension_numbers = #tpu.dot_dimension_numbers<[1], [0], [0], [1], [0, 0, 1, 1], [], []>} : vector<32x32xbf16>, vector<32x32xbf16>, vector<32x32xf32> -> vector<32x32xf32>
    %549 = arith.addf %544, %548 : vector<32x32xf32>
    %c0_314 = arith.constant 0 : index
    %c0_315 = arith.constant 0 : index
    %c0_316 = arith.constant 0 : index
    %550 = vector.load %arg28[%c0_314, %c0_315, %c0_316] : memref<3x1x32xf32, #tpu.memory_space<vmem>>, vector<1x1x32xf32>
    %551 = vector.shape_cast %550 : vector<1x1x32xf32> to vector<1x32xf32>
    %552 = vector.broadcast %551 : vector<1x32xf32> to vector<32x32xf32>
    %553 = arith.addf %549, %552 : vector<32x32xf32>
    %554 = arith.negf %553 : vector<32x32xf32>
    %555 = math.exp %554 : vector<32x32xf32>
    %cst_317 = arith.constant 1.000000e+00 : f32
    %556 = vector.broadcast %cst_317 : f32 to vector<32x32xf32>
    %557 = arith.addf %556, %555 : vector<32x32xf32>
    %558 = arith.divf %556, %557 : vector<32x32xf32>
    %c1_318 = arith.constant 1 : index
    %c0_319 = arith.constant 0 : index
    %c0_320 = arith.constant 0 : index
    %559 = vector.load %arg25[%c1_318, %c0_319, %c0_320] : memref<3x32x32xbf16, #tpu.memory_space<vmem>>, vector<1x32x32xbf16>
    %560 = vector.shape_cast %559 : vector<1x32x32xbf16> to vector<32x32xbf16>
    %561 = arith.truncf %536 : vector<32x32xf32> to vector<32x32xbf16>
    %cst_321 = arith.constant dense<0.000000e+00> : vector<32x32xf32>
    %562 = tpu.matmul %561, %560, %cst_321 {dimension_numbers = #tpu.dot_dimension_numbers<[1], [0], [0], [1], [0, 0, 1, 1], [], []>} : vector<32x32xbf16>, vector<32x32xbf16>, vector<32x32xf32> -> vector<32x32xf32>
    %c1_322 = arith.constant 1 : index
    %c0_323 = arith.constant 0 : index
    %c0_324 = arith.constant 0 : index
    %563 = vector.load %arg27[%c1_322, %c0_323, %c0_324] : memref<3x1x32xf32, #tpu.memory_space<vmem>>, vector<1x1x32xf32>
    %564 = vector.shape_cast %563 : vector<1x1x32xf32> to vector<1x32xf32>
    %565 = vector.broadcast %564 : vector<1x32xf32> to vector<32x32xf32>
    %566 = arith.addf %562, %565 : vector<32x32xf32>
    %c1_325 = arith.constant 1 : index
    %c0_326 = arith.constant 0 : index
    %c0_327 = arith.constant 0 : index
    %567 = vector.load %arg26[%c1_325, %c0_326, %c0_327] : memref<3x32x32xbf16, #tpu.memory_space<vmem>>, vector<1x32x32xbf16>
    %568 = vector.shape_cast %567 : vector<1x32x32xbf16> to vector<32x32xbf16>
    %569 = arith.truncf %482 : vector<32x32xf32> to vector<32x32xbf16>
    %cst_328 = arith.constant dense<0.000000e+00> : vector<32x32xf32>
    %570 = tpu.matmul %569, %568, %cst_328 {dimension_numbers = #tpu.dot_dimension_numbers<[1], [0], [0], [1], [0, 0, 1, 1], [], []>} : vector<32x32xbf16>, vector<32x32xbf16>, vector<32x32xf32> -> vector<32x32xf32>
    %571 = arith.addf %566, %570 : vector<32x32xf32>
    %c1_329 = arith.constant 1 : index
    %c0_330 = arith.constant 0 : index
    %c0_331 = arith.constant 0 : index
    %572 = vector.load %arg28[%c1_329, %c0_330, %c0_331] : memref<3x1x32xf32, #tpu.memory_space<vmem>>, vector<1x1x32xf32>
    %573 = vector.shape_cast %572 : vector<1x1x32xf32> to vector<1x32xf32>
    %574 = vector.broadcast %573 : vector<1x32xf32> to vector<32x32xf32>
    %575 = arith.addf %571, %574 : vector<32x32xf32>
    %576 = arith.negf %575 : vector<32x32xf32>
    %577 = math.exp %576 : vector<32x32xf32>
    %cst_332 = arith.constant 1.000000e+00 : f32
    %578 = vector.broadcast %cst_332 : f32 to vector<32x32xf32>
    %579 = arith.addf %578, %577 : vector<32x32xf32>
    %580 = arith.divf %578, %579 : vector<32x32xf32>
    %c2_333 = arith.constant 2 : index
    %c0_334 = arith.constant 0 : index
    %c0_335 = arith.constant 0 : index
    %581 = vector.load %arg25[%c2_333, %c0_334, %c0_335] : memref<3x32x32xbf16, #tpu.memory_space<vmem>>, vector<1x32x32xbf16>
    %582 = vector.shape_cast %581 : vector<1x32x32xbf16> to vector<32x32xbf16>
    %583 = arith.truncf %536 : vector<32x32xf32> to vector<32x32xbf16>
    %cst_336 = arith.constant dense<0.000000e+00> : vector<32x32xf32>
    %584 = tpu.matmul %583, %582, %cst_336 {dimension_numbers = #tpu.dot_dimension_numbers<[1], [0], [0], [1], [0, 0, 1, 1], [], []>} : vector<32x32xbf16>, vector<32x32xbf16>, vector<32x32xf32> -> vector<32x32xf32>
    %c2_337 = arith.constant 2 : index
    %c0_338 = arith.constant 0 : index
    %c0_339 = arith.constant 0 : index
    %585 = vector.load %arg27[%c2_337, %c0_338, %c0_339] : memref<3x1x32xf32, #tpu.memory_space<vmem>>, vector<1x1x32xf32>
    %586 = vector.shape_cast %585 : vector<1x1x32xf32> to vector<1x32xf32>
    %587 = vector.broadcast %586 : vector<1x32xf32> to vector<32x32xf32>
    %588 = arith.addf %584, %587 : vector<32x32xf32>
    %c2_340 = arith.constant 2 : index
    %c0_341 = arith.constant 0 : index
    %c0_342 = arith.constant 0 : index
    %589 = vector.load %arg26[%c2_340, %c0_341, %c0_342] : memref<3x32x32xbf16, #tpu.memory_space<vmem>>, vector<1x32x32xbf16>
    %590 = vector.shape_cast %589 : vector<1x32x32xbf16> to vector<32x32xbf16>
    %591 = arith.truncf %482 : vector<32x32xf32> to vector<32x32xbf16>
    %cst_343 = arith.constant dense<0.000000e+00> : vector<32x32xf32>
    %592 = tpu.matmul %591, %590, %cst_343 {dimension_numbers = #tpu.dot_dimension_numbers<[1], [0], [0], [1], [0, 0, 1, 1], [], []>} : vector<32x32xbf16>, vector<32x32xbf16>, vector<32x32xf32> -> vector<32x32xf32>
    %c2_344 = arith.constant 2 : index
    %c0_345 = arith.constant 0 : index
    %c0_346 = arith.constant 0 : index
    %593 = vector.load %arg28[%c2_344, %c0_345, %c0_346] : memref<3x1x32xf32, #tpu.memory_space<vmem>>, vector<1x1x32xf32>
    %594 = vector.shape_cast %593 : vector<1x1x32xf32> to vector<1x32xf32>
    %595 = vector.broadcast %594 : vector<1x32xf32> to vector<32x32xf32>
    %596 = arith.addf %592, %595 : vector<32x32xf32>
    %597 = arith.mulf %558, %596 : vector<32x32xf32>
    %598 = arith.addf %588, %597 : vector<32x32xf32>
    %599 = math.tanh %598 : vector<32x32xf32>
    %cst_347 = arith.constant 1.000000e+00 : f32
    %600 = vector.broadcast %cst_347 : f32 to vector<32x32xf32>
    %601 = arith.subf %600, %580 : vector<32x32xf32>
    %602 = arith.mulf %601, %599 : vector<32x32xf32>
    %603 = arith.mulf %580, %482 : vector<32x32xf32>
    %604 = arith.addf %602, %603 : vector<32x32xf32>
    %c2_348 = arith.constant 2 : index
    %c0_349 = arith.constant 0 : index
    %c0_350 = arith.constant 0 : index
    %605 = vector.load %arg20[%c2_348, %c0_349, %c0_350] : memref<3x1x32xf32, #tpu.memory_space<vmem>>, vector<1x1x32xf32>
    %606 = vector.shape_cast %605 : vector<1x1x32xf32> to vector<1x32xf32>
    %c2_351 = arith.constant 2 : index
    %c0_352 = arith.constant 0 : index
    %c0_353 = arith.constant 0 : index
    %607 = vector.load %arg21[%c2_351, %c0_352, %c0_353] : memref<3x1x32xf32, #tpu.memory_space<vmem>>, vector<1x1x32xf32>
    %608 = vector.shape_cast %607 : vector<1x1x32xf32> to vector<1x32xf32>
    %cst_354 = arith.constant dense<0.000000e+00> : vector<32xf32>
    %609 = vector.multi_reduction <add>, %604, %cst_354 [1] : vector<32x32xf32> to vector<32xf32>
    %610 = vector.shape_cast %609 : vector<32xf32> to vector<32x1xf32>
    %cst_355 = arith.constant 3.200000e+01 : f32
    %611 = vector.broadcast %cst_355 : f32 to vector<32x1xf32>
    %612 = arith.divf %610, %611 : vector<32x1xf32>
    %613 = vector.broadcast %612 : vector<32x1xf32> to vector<32x32xf32>
    %614 = arith.subf %604, %613 : vector<32x32xf32>
    %615 = arith.mulf %614, %614 : vector<32x32xf32>
    %cst_356 = arith.constant dense<0.000000e+00> : vector<32xf32>
    %616 = vector.multi_reduction <add>, %615, %cst_356 [1] : vector<32x32xf32> to vector<32xf32>
    %617 = vector.shape_cast %616 : vector<32xf32> to vector<32x1xf32>
    %cst_357 = arith.constant 3.200000e+01 : f32
    %618 = vector.broadcast %cst_357 : f32 to vector<32x1xf32>
    %619 = arith.divf %617, %618 : vector<32x1xf32>
    %620 = vector.broadcast %612 : vector<32x1xf32> to vector<32x32xf32>
    %621 = arith.subf %604, %620 : vector<32x32xf32>
    %cst_358 = arith.constant 9.99999974E-6 : f32
    %622 = vector.broadcast %cst_358 : f32 to vector<32x1xf32>
    %623 = arith.addf %619, %622 : vector<32x1xf32>
    %624 = math.rsqrt %623 : vector<32x1xf32>
    %625 = vector.broadcast %624 : vector<32x1xf32> to vector<32x32xf32>
    %626 = arith.mulf %621, %625 : vector<32x32xf32>
    %627 = vector.broadcast %606 : vector<1x32xf32> to vector<32x32xf32>
    %628 = arith.mulf %626, %627 : vector<32x32xf32>
    %629 = vector.broadcast %608 : vector<1x32xf32> to vector<32x32xf32>
    %630 = arith.addf %628, %629 : vector<32x32xf32>
    %c0_359 = arith.constant 0 : index
    %c0_360 = arith.constant 0 : index
    %c0_361 = arith.constant 0 : index
    %631 = vector.load %arg29[%c0_359, %c0_360, %c0_361] : memref<2x32x32xbf16, #tpu.memory_space<vmem>>, vector<1x32x32xbf16>
    %632 = vector.shape_cast %631 : vector<1x32x32xbf16> to vector<32x32xbf16>
    %633 = arith.truncf %630 : vector<32x32xf32> to vector<32x32xbf16>
    %cst_362 = arith.constant dense<0.000000e+00> : vector<32x32xf32>
    %634 = tpu.matmul %633, %632, %cst_362 {dimension_numbers = #tpu.dot_dimension_numbers<[1], [0], [0], [1], [0, 0, 1, 1], [], []>} : vector<32x32xbf16>, vector<32x32xbf16>, vector<32x32xf32> -> vector<32x32xf32>
    %c0_363 = arith.constant 0 : index
    %c0_364 = arith.constant 0 : index
    %c0_365 = arith.constant 0 : index
    %635 = vector.load %arg30[%c0_363, %c0_364, %c0_365] : memref<2x1x32xf32, #tpu.memory_space<vmem>>, vector<1x1x32xf32>
    %636 = vector.shape_cast %635 : vector<1x1x32xf32> to vector<1x32xf32>
    %637 = vector.broadcast %636 : vector<1x32xf32> to vector<32x32xf32>
    %638 = arith.addf %634, %637 : vector<32x32xf32>
    %cst_366 = arith.constant 0.000000e+00 : f32
    %639 = vector.broadcast %cst_366 : f32 to vector<32x32xf32>
    %640 = arith.maximumf %638, %639 : vector<32x32xf32>
    %c1_367 = arith.constant 1 : index
    %c0_368 = arith.constant 0 : index
    %c0_369 = arith.constant 0 : index
    %641 = vector.load %arg29[%c1_367, %c0_368, %c0_369] : memref<2x32x32xbf16, #tpu.memory_space<vmem>>, vector<1x32x32xbf16>
    %642 = vector.shape_cast %641 : vector<1x32x32xbf16> to vector<32x32xbf16>
    %643 = arith.truncf %640 : vector<32x32xf32> to vector<32x32xbf16>
    %cst_370 = arith.constant dense<0.000000e+00> : vector<32x32xf32>
    %644 = tpu.matmul %643, %642, %cst_370 {dimension_numbers = #tpu.dot_dimension_numbers<[1], [0], [0], [1], [0, 0, 1, 1], [], []>} : vector<32x32xbf16>, vector<32x32xbf16>, vector<32x32xf32> -> vector<32x32xf32>
    %645 = arith.addf %604, %644 : vector<32x32xf32>
    %c1_371 = arith.constant 1 : index
    %c0_372 = arith.constant 0 : index
    %c0_373 = arith.constant 0 : index
    %646 = vector.load %arg30[%c1_371, %c0_372, %c0_373] : memref<2x1x32xf32, #tpu.memory_space<vmem>>, vector<1x1x32xf32>
    %647 = vector.shape_cast %646 : vector<1x1x32xf32> to vector<1x32xf32>
    %648 = vector.broadcast %647 : vector<1x32xf32> to vector<32x32xf32>
    %649 = arith.addf %645, %648 : vector<32x32xf32>
    %c0_374 = arith.constant 0 : index
    %c0_375 = arith.constant 0 : index
    %650 = vector.load %arg31[%c0_374, %c0_375] : memref<32x32xbf16, #tpu.memory_space<vmem>>, vector<32x32xbf16>
    %651 = arith.truncf %649 : vector<32x32xf32> to vector<32x32xbf16>
    %cst_376 = arith.constant dense<0.000000e+00> : vector<32x32xf32>
    %652 = tpu.matmul %651, %650, %cst_376 {dimension_numbers = #tpu.dot_dimension_numbers<[1], [0], [0], [1], [0, 0, 1, 1], [], []>} : vector<32x32xbf16>, vector<32x32xbf16>, vector<32x32xf32> -> vector<32x32xf32>
    %c0_377 = arith.constant 0 : index
    %c0_378 = arith.constant 0 : index
    %653 = vector.load %arg33[%c0_377, %c0_378] : memref<1x32xf32, #tpu.memory_space<vmem>>, vector<1x32xf32>
    %654 = vector.broadcast %653 : vector<1x32xf32> to vector<32x32xf32>
    %655 = arith.addf %652, %654 : vector<32x32xf32>
    %c0_379 = arith.constant 0 : index
    %c0_380 = arith.constant 0 : index
    %656 = vector.load %arg32[%c0_379, %c0_380] : memref<32x32xbf16, #tpu.memory_space<vmem>>, vector<32x32xbf16>
    %657 = arith.truncf %80 : vector<72x32xf32> to vector<72x32xbf16>
    %cst_381 = arith.constant dense<0.000000e+00> : vector<72x32xf32>
    %658 = tpu.matmul %657, %656, %cst_381 {dimension_numbers = #tpu.dot_dimension_numbers<[1], [0], [0], [1], [0, 0, 1, 1], [], []>} : vector<72x32xbf16>, vector<32x32xbf16>, vector<72x32xf32> -> vector<72x32xf32>
    %c0_382 = arith.constant 0 : index
    %c0_383 = arith.constant 0 : index
    %659 = vector.load %arg34[%c0_382, %c0_383] : memref<1x32xf32, #tpu.memory_space<vmem>>, vector<1x32xf32>
    %660 = vector.broadcast %659 : vector<1x32xf32> to vector<72x32xf32>
    %661 = arith.addf %658, %660 : vector<72x32xf32>
    %662 = vector.shape_cast %655 : vector<32x32xf32> to vector<32x1x32xf32>
    %c0_384 = arith.constant 0 : index
    %c0_385 = arith.constant 0 : index
    %663 = vector.load %arg35[%c0_384, %c0_385] : memref<8x32xf32, #tpu.memory_space<vmem>>, vector<8x32xf32>
    %664 = vector.shape_cast %663 : vector<8x32xf32> to vector<1x8x32xf32>
    %665 = vector.broadcast %662 : vector<32x1x32xf32> to vector<32x8x32xf32>
    %666 = vector.broadcast %664 : vector<1x8x32xf32> to vector<32x8x32xf32>
    %667 = arith.mulf %665, %666 : vector<32x8x32xf32>
    %668 = vector.shape_cast %667 : vector<32x8x32xf32> to vector<256x32xf32>
    %669 = arith.truncf %668 : vector<256x32xf32> to vector<256x32xbf16>
    %670 = arith.truncf %661 : vector<72x32xf32> to vector<72x32xbf16>
    %cst_386 = arith.constant dense<0.000000e+00> : vector<256x72xf32>
    %671 = tpu.matmul %669, %670, %cst_386 {dimension_numbers = #tpu.dot_dimension_numbers<[1], [1], [0], [0], [0, 0, 1, 0], [], []>} : vector<256x32xbf16>, vector<72x32xbf16>, vector<256x72xf32> -> vector<256x72xf32>
    %c0_387 = arith.constant 0 : index
    %c0_388 = arith.constant 0 : index
    %672 = vector.load %arg9[%c0_387, %c0_388] : memref<256x72xf32, #tpu.memory_space<vmem>>, vector<256x72xf32>
    %673 = arith.addf %671, %672 : vector<256x72xf32>
    %cst_389 = arith.constant dense<0xFF800000> : vector<256xf32>
    %674 = vector.multi_reduction <maximumf>, %673, %cst_389 [1] : vector<256x72xf32> to vector<256xf32>
    %675 = vector.shape_cast %674 : vector<256xf32> to vector<256x1xf32>
    %676 = vector.broadcast %675 : vector<256x1xf32> to vector<256x72xf32>
    %677 = arith.subf %673, %676 : vector<256x72xf32>
    %678 = math.exp %677 : vector<256x72xf32>
    %cst_390 = arith.constant dense<0.000000e+00> : vector<256xf32>
    %679 = vector.multi_reduction <add>, %678, %cst_390 [1] : vector<256x72xf32> to vector<256xf32>
    %680 = vector.shape_cast %679 : vector<256xf32> to vector<256x1xf32>
    %681 = tpu.reciprocal %680 {approx = true} : vector<256x1xf32> -> vector<256x1xf32>
    %682 = vector.broadcast %681 : vector<256x1xf32> to vector<256x72xf32>
    %683 = arith.mulf %678, %682 : vector<256x72xf32>
    %684 = vector.shape_cast %683 : vector<256x72xf32> to vector<32x8x72xf32>
    %cst_391 = arith.constant dense<0.000000e+00> : vector<32x72xf32>
    %685 = vector.multi_reduction <add>, %684, %cst_391 [1] : vector<32x8x72xf32> to vector<32x72xf32>
    %cst_392 = arith.constant 1.250000e-01 : f32
    %686 = vector.broadcast %cst_392 : f32 to vector<32x72xf32>
    %687 = arith.mulf %685, %686 : vector<32x72xf32>
    %688 = tpu.concatenate %533, %687, %99 in 0 : vector<32x72xf32>, vector<32x72xf32>, vector<8x72xf32> -> vector<72x72xf32>
    %c0_393 = arith.constant 0 : index
    %c0_394 = arith.constant 0 : index
    %c0_395 = arith.constant 0 : index
    %689 = vector.load %arg5[%c0_393, %c0_394, %c0_395] : memref<1x72x128xf32, #tpu.memory_space<vmem>>, vector<1x72x128xf32>
    %690 = vector.shape_cast %689 : vector<1x72x128xf32> to vector<72x128xf32>
    %cst_396 = arith.constant dense<0.000000e+00> : vector<72x128xf32>
    %691 = tpu.matmul %688, %690, %cst_396 {dimension_numbers = #tpu.dot_dimension_numbers<[1], [0], [0], [1], [0, 0, 1, 1], [], []>} : vector<72x72xf32>, vector<72x128xf32>, vector<72x128xf32> -> vector<72x128xf32>
    %c0_397 = arith.constant 0 : index
    %c0_398 = arith.constant 0 : index
    %c0_399 = arith.constant 0 : index
    %692 = vector.load %arg36[%c0_397, %c0_398, %c0_399] : memref<1x72x128xf32, #tpu.memory_space<vmem>>, vector<1x72x128xf32>
    %693 = vector.shape_cast %692 : vector<1x72x128xf32> to vector<72x128xf32>
    %694 = vector.shape_cast %691 : vector<72x128xf32> to vector<1x72x128xf32>
    tpu.vector_store %arg36[%c0_397, %c0_398, %c0_399], %694 {strides = array<i32>} : memref<1x72x128xf32, #tpu.memory_space<vmem>>, vector<1x72x128xf32>,
    return
  }
  func.func @transform_0(%arg0: i32) -> (i32, i32, i32) {
    %c0_i32 = arith.constant 0 : i32
    %c0_i32_0 = arith.constant 0 : i32
    %c0_i32_1 = arith.constant 0 : i32
    return %arg0, %c0_i32, %c0_i32_0 : i32, i32, i32
  }
  func.func @transform_1(%arg0: i32) -> (i32, i32, i32) {
    %c0_i32 = arith.constant 0 : i32
    %c0_i32_0 = arith.constant 0 : i32
    %c0_i32_1 = arith.constant 0 : i32
    return %arg0, %c0_i32, %c0_i32_0 : i32, i32, i32
  }
  func.func @transform_2(%arg0: i32) -> (i32, i32, i32) {
    %c0_i32 = arith.constant 0 : i32
    %c0_i32_0 = arith.constant 0 : i32
    %c0_i32_1 = arith.constant 0 : i32
    return %arg0, %c0_i32, %c0_i32_0 : i32, i32, i32
  }
  func.func @transform_3(%arg0: i32) -> (i32, i32, i32) {
    %c0_i32 = arith.constant 0 : i32
    %c0_i32_0 = arith.constant 0 : i32
    %c0_i32_1 = arith.constant 0 : i32
    return %arg0, %c0_i32, %c0_i32_0 : i32, i32, i32
  }
  func.func @transform_4(%arg0: i32) -> (i32, i32, i32) {
    %c0_i32 = arith.constant 0 : i32
    %c0_i32_0 = arith.constant 0 : i32
    %c0_i32_1 = arith.constant 0 : i32
    return %arg0, %c0_i32, %c0_i32_0 : i32, i32, i32
  }
  func.func @transform_5(%arg0: i32) -> (i32, i32, i32) {
    %c0_i32 = arith.constant 0 : i32
    %c0_i32_0 = arith.constant 0 : i32
    %c0_i32_1 = arith.constant 0 : i32
    return %arg0, %c0_i32, %c0_i32_0 : i32, i32, i32
  }
  func.func @transform_6(%arg0: i32) -> (i32, i32) {
    %c0_i32 = arith.constant 0 : i32
    %c0_i32_0 = arith.constant 0 : i32
    %c0_i32_1 = arith.constant 0 : i32
    return %c0_i32, %c0_i32_0 : i32, i32
  }
  func.func @transform_7(%arg0: i32) -> (i32, i32) {
    %c0_i32 = arith.constant 0 : i32
    %c0_i32_0 = arith.constant 0 : i32
    %c0_i32_1 = arith.constant 0 : i32
    return %c0_i32, %c0_i32_0 : i32, i32
  }
  func.func @transform_8(%arg0: i32) -> (i32, i32) {
    %c0_i32 = arith.constant 0 : i32
    %c0_i32_0 = arith.constant 0 : i32
    %c0_i32_1 = arith.constant 0 : i32
    return %c0_i32, %c0_i32_0 : i32, i32
  }
  func.func @transform_9(%arg0: i32) -> (i32, i32, i32) {
    %c0_i32 = arith.constant 0 : i32
    %c0_i32_0 = arith.constant 0 : i32
    %c0_i32_1 = arith.constant 0 : i32
    %c0_i32_2 = arith.constant 0 : i32
    return %c0_i32, %c0_i32_0, %c0_i32_1 : i32, i32, i32
  }
  func.func @transform_10(%arg0: i32) -> (i32, i32, i32) {
    %c0_i32 = arith.constant 0 : i32
    %c0_i32_0 = arith.constant 0 : i32
    %c0_i32_1 = arith.constant 0 : i32
    %c0_i32_2 = arith.constant 0 : i32
    return %c0_i32, %c0_i32_0, %c0_i32_1 : i32, i32, i32
  }
  func.func @transform_11(%arg0: i32) -> (i32, i32, i32) {
    %c0_i32 = arith.constant 0 : i32
    %c0_i32_0 = arith.constant 0 : i32
    %c0_i32_1 = arith.constant 0 : i32
    %c0_i32_2 = arith.constant 0 : i32
    return %c0_i32, %c0_i32_0, %c0_i32_1 : i32, i32, i32
  }
  func.func @transform_12(%arg0: i32) -> (i32, i32, i32) {
    %c0_i32 = arith.constant 0 : i32
    %c0_i32_0 = arith.constant 0 : i32
    %c0_i32_1 = arith.constant 0 : i32
    %c0_i32_2 = arith.constant 0 : i32
    return %c0_i32, %c0_i32_0, %c0_i32_1 : i32, i32, i32
  }
  func.func @transform_13(%arg0: i32) -> (i32, i32, i32) {
    %c0_i32 = arith.constant 0 : i32
    %c0_i32_0 = arith.constant 0 : i32
    %c0_i32_1 = arith.constant 0 : i32
    %c0_i32_2 = arith.constant 0 : i32
    return %c0_i32, %c0_i32_0, %c0_i32_1 : i32, i32, i32
  }
  func.func @transform_14(%arg0: i32) -> (i32, i32, i32) {
    %c0_i32 = arith.constant 0 : i32
    %c0_i32_0 = arith.constant 0 : i32
    %c0_i32_1 = arith.constant 0 : i32
    %c0_i32_2 = arith.constant 0 : i32
    return %c0_i32, %c0_i32_0, %c0_i32_1 : i32, i32, i32
  }
  func.func @transform_15(%arg0: i32) -> (i32, i32) {
    %c0_i32 = arith.constant 0 : i32
    %c0_i32_0 = arith.constant 0 : i32
    %c0_i32_1 = arith.constant 0 : i32
    return %c0_i32, %c0_i32_0 : i32, i32
  }
  func.func @transform_16(%arg0: i32) -> (i32, i32) {
    %c0_i32 = arith.constant 0 : i32
    %c0_i32_0 = arith.constant 0 : i32
    %c0_i32_1 = arith.constant 0 : i32
    return %c0_i32, %c0_i32_0 : i32, i32
  }
  func.func @transform_17(%arg0: i32) -> (i32, i32) {
    %c0_i32 = arith.constant 0 : i32
    %c0_i32_0 = arith.constant 0 : i32
    %c0_i32_1 = arith.constant 0 : i32
    return %c0_i32, %c0_i32_0 : i32, i32
  }
  func.func @transform_18(%arg0: i32) -> (i32, i32) {
    %c0_i32 = arith.constant 0 : i32
    %c0_i32_0 = arith.constant 0 : i32
    %c0_i32_1 = arith.constant 0 : i32
    return %c0_i32, %c0_i32_0 : i32, i32
  }
  func.func @transform_19(%arg0: i32) -> (i32, i32, i32) {
    %c0_i32 = arith.constant 0 : i32
    %c0_i32_0 = arith.constant 0 : i32
    %c0_i32_1 = arith.constant 0 : i32
    %c0_i32_2 = arith.constant 0 : i32
    return %c0_i32, %c0_i32_0, %c0_i32_1 : i32, i32, i32
  }
  func.func @transform_20(%arg0: i32) -> (i32, i32, i32) {
    %c0_i32 = arith.constant 0 : i32
    %c0_i32_0 = arith.constant 0 : i32
    %c0_i32_1 = arith.constant 0 : i32
    %c0_i32_2 = arith.constant 0 : i32
    return %c0_i32, %c0_i32_0, %c0_i32_1 : i32, i32, i32
  }
  func.func @transform_21(%arg0: i32) -> (i32, i32) {
    %c0_i32 = arith.constant 0 : i32
    %c0_i32_0 = arith.constant 0 : i32
    %c0_i32_1 = arith.constant 0 : i32
    return %c0_i32, %c0_i32_0 : i32, i32
  }
  func.func @transform_22(%arg0: i32) -> (i32, i32) {
    %c0_i32 = arith.constant 0 : i32
    %c0_i32_0 = arith.constant 0 : i32
    %c0_i32_1 = arith.constant 0 : i32
    return %c0_i32, %c0_i32_0 : i32, i32
  }
  func.func @transform_23(%arg0: i32) -> (i32, i32) {
    %c0_i32 = arith.constant 0 : i32
    %c0_i32_0 = arith.constant 0 : i32
    %c0_i32_1 = arith.constant 0 : i32
    return %c0_i32, %c0_i32_0 : i32, i32
  }
  func.func @transform_24(%arg0: i32) -> (i32, i32, i32) {
    %c0_i32 = arith.constant 0 : i32
    %c0_i32_0 = arith.constant 0 : i32
    %c0_i32_1 = arith.constant 0 : i32
    %c0_i32_2 = arith.constant 0 : i32
    return %c0_i32, %c0_i32_0, %c0_i32_1 : i32, i32, i32
  }
  func.func @transform_25(%arg0: i32) -> (i32, i32, i32) {
    %c0_i32 = arith.constant 0 : i32
    %c0_i32_0 = arith.constant 0 : i32
    %c0_i32_1 = arith.constant 0 : i32
    %c0_i32_2 = arith.constant 0 : i32
    return %c0_i32, %c0_i32_0, %c0_i32_1 : i32, i32, i32
  }
  func.func @transform_26(%arg0: i32) -> (i32, i32, i32) {
    %c0_i32 = arith.constant 0 : i32
    %c0_i32_0 = arith.constant 0 : i32
    %c0_i32_1 = arith.constant 0 : i32
    %c0_i32_2 = arith.constant 0 : i32
    return %c0_i32, %c0_i32_0, %c0_i32_1 : i32, i32, i32
  }
  func.func @transform_27(%arg0: i32) -> (i32, i32, i32) {
    %c0_i32 = arith.constant 0 : i32
    %c0_i32_0 = arith.constant 0 : i32
    %c0_i32_1 = arith.constant 0 : i32
    %c0_i32_2 = arith.constant 0 : i32
    return %c0_i32, %c0_i32_0, %c0_i32_1 : i32, i32, i32
  }
  func.func @transform_28(%arg0: i32) -> (i32, i32, i32) {
    %c0_i32 = arith.constant 0 : i32
    %c0_i32_0 = arith.constant 0 : i32
    %c0_i32_1 = arith.constant 0 : i32
    %c0_i32_2 = arith.constant 0 : i32
    return %c0_i32, %c0_i32_0, %c0_i32_1 : i32, i32, i32
  }
  func.func @transform_29(%arg0: i32) -> (i32, i32, i32) {
    %c0_i32 = arith.constant 0 : i32
    %c0_i32_0 = arith.constant 0 : i32
    %c0_i32_1 = arith.constant 0 : i32
    %c0_i32_2 = arith.constant 0 : i32
    return %c0_i32, %c0_i32_0, %c0_i32_1 : i32, i32, i32
  }
  func.func @transform_30(%arg0: i32) -> (i32, i32) {
    %c0_i32 = arith.constant 0 : i32
    %c0_i32_0 = arith.constant 0 : i32
    %c0_i32_1 = arith.constant 0 : i32
    return %c0_i32, %c0_i32_0 : i32, i32
  }
  func.func @transform_31(%arg0: i32) -> (i32, i32) {
    %c0_i32 = arith.constant 0 : i32
    %c0_i32_0 = arith.constant 0 : i32
    %c0_i32_1 = arith.constant 0 : i32
    return %c0_i32, %c0_i32_0 : i32, i32
  }
  func.func @transform_32(%arg0: i32) -> (i32, i32) {
    %c0_i32 = arith.constant 0 : i32
    %c0_i32_0 = arith.constant 0 : i32
    %c0_i32_1 = arith.constant 0 : i32
    return %c0_i32, %c0_i32_0 : i32, i32
  }
  func.func @transform_33(%arg0: i32) -> (i32, i32) {
    %c0_i32 = arith.constant 0 : i32
    %c0_i32_0 = arith.constant 0 : i32
    %c0_i32_1 = arith.constant 0 : i32
    return %c0_i32, %c0_i32_0 : i32, i32
  }
  func.func @transform_34(%arg0: i32) -> (i32, i32) {
    %c0_i32 = arith.constant 0 : i32
    %c0_i32_0 = arith.constant 0 : i32
    %c0_i32_1 = arith.constant 0 : i32
    return %c0_i32, %c0_i32_0 : i32, i32
  }
  func.func @transform_35(%arg0: i32) -> (i32, i32, i32) {
    %c0_i32 = arith.constant 0 : i32
    %c0_i32_0 = arith.constant 0 : i32
    %c0_i32_1 = arith.constant 0 : i32
    return %arg0, %c0_i32, %c0_i32_0 : i32, i32, i32
  }
}

</mosaic_0001>

<bundles_post_ra>
// kernel: eq.59
= control target key start
LH: loop header
LB: loop body
LE: loop exit
PB: predicated region body
PF: predicated region fallthrough
CT: control target
= control target key end

     0   :  { %s7_s6 = smov 3  ;;  %s21_s9 = smov 3  ;;  %vm4_vm0 = vcmask 64512   ;;  %vm11_vm1 = vcmask 1048512   ;;  %vm18_vm2 = vcmask 982912   ;;  %vm25_vm3 = vcmask 917312   ;;  %s225_s0 = inlined_call_operand.vmem [shape: s32[32,8], index: 0, kind: input, shape index: {}]   ;;  %s226_s1 = inlined_call_operand.vmem [shape: s32[256], index: 1, kind: output, shape index: {}]  }
   0x1   :  { %v119_v0 = vld [vmem:[%s225_s0 + $0xf] ss:$16 sm:%s7_s6]   ;;  %s149_s10 = smov 120   ;;  %v121_v1 = vld [vmem:[%s225_s0 + $0xd] ss:$16 sm:%s21_s9]   ;;  %s14_s13 = smov 3 }
   0x2   :  { %9 = vrot.lane.b32.xlu0 %v119_v0, %s149_s10  ;;  %s150_s14 = smov 104   ;;  %v120_v2 = vld [vmem:[%s225_s0 + $0xe] ss:$16 sm:%s14_s13]   ;;  %s28_s17 = smov 3  ;;  %vm32_vm4 = vcmask 851712   ;;  %vm39_vm5 = vcmask 786112  }
   0x3   :  { %23 = vrot.lane.b32.xlu1 %v121_v1, %s150_s14  ;;  %v122_v3 = vld [vmem:[%s225_s0 + $0xc] ss:$16 sm:%s28_s17]   ;;  %s35_s20 = smov 3  ;;  %s42_s21 = smov 3  ;;  %vm46_vm6 = vcmask 720512   ;;  %vm53_vm7 = vcmask 654912  }
   0x4   :  { %s151_s22 = smov 112   ;;  %s152_s23 = smov 96   ;;  %v123_v4 = vld [vmem:[%s225_s0 + $0xb] ss:$16 sm:%s35_s20]   ;;  %v124_v5 = vld [vmem:[%s225_s0 + $0xa] ss:$16 sm:%s42_s21]  }
   0x5   :  { %s49_s28 = smov 3  ;;  %s56_s29 = smov 3  ;;  %vm60_vm8 = vcmask 589312   ;;  %vm67_vm9 = vcmask 523712   ;;  %vm74_vm10 = vcmask 458112   ;;  %vm81_vm11 = vcmask 392512  }
   0x6   :  { %16 = vrot.lane.b32.xlu0 %v120_v2, %s151_s22  ;;  %s153_s30 = smov 88   ;;  %s154_s2 = smov 80   ;;  %v125_v6 = vld [vmem:[%s225_s0 + $0x9] ss:$16 sm:%s49_s28]   ;;  %vm88_vm12 = vcmask 326912   ;;  %vm95_vm13 = vcmask 261312  }
   0x7   :  { %30 = vrot.lane.b32.xlu1 %v122_v3, %s152_s23  ;;  %v126_v7 = vld [vmem:[%s225_s0 + $0x8] ss:$16 sm:%s56_s29]   ;;  %s63_s7 = smov 3  ;;  %s70_s8 = smov 3  ;;  %vm102_vm14 = vcmask 195712   ;;  %vm109_vm15 = vcmask 130112  }
   0x8   :  { %s155_s9 = smov 72   ;;  %s156_s10 = smov 64   ;;  %v127_v8 = vld [vmem:[%s225_s0 + $0x7] ss:$16 sm:%s63_s7]   ;;  %v128_v9 = vld [vmem:[%s225_s0 + $0x6] ss:$16 sm:%s70_s8]  }
   0x9   :  { %s2_s13 = smov 3  ;;  %s77_s16 = smov 3 }
   0xa   :  { %37 = vrot.lane.b32.xlu0 %v123_v4, %s153_s30  ;;  %v3_v10 = vld [vmem:[%s225_s0] ss:$16 sm:%s2_s13]   ;;  %s84_s19 = smov 3  ;;  %s157_s20 = smov 56  }
   0xb   :  { %44 = vrot.lane.b32.xlu1 %v124_v5, %s154_s2  ;;  %5 = vst.msk [vmem:[#allocation0] sm:$0x3] %vm4_vm0, %v3_v10   ;;  %s158_s21 = smov 48   ;;  %v129_v11 = vld [vmem:[%s225_s0 + $0x5] ss:$16 sm:%s77_s16]   ;;  %s91_s26 = smov 3 }
   0xc   :  { %v130_v12 = vld [vmem:[%s225_s0 + $0x4] ss:$16 sm:%s84_s19]   ;;  %s98_s27 = smov 3  ;;  %s159_s28 = smov 40   ;;  %v131_v13 = vld [vmem:[%s225_s0 + $0x3] ss:$16 sm:%s91_s26]  }
   0xd   :  { %s160_s29 = smov 32   ;;  %v132_v14 = vld [vmem:[%s225_s0 + $0x2] ss:$16 sm:%s98_s27]   ;;  %s105_s5 = smov 3 }
   0xe   :  { %51 = vrot.lane.b32.xlu0 %v125_v6, %s155_s9  ;;  %s161_s6 = smov 24   ;;  %s162_s7 = smov 16   ;;  %v133_v15 = vld [vmem:[%s225_s0 + $0x1] ss:$16 sm:%s105_s5]  }
   0xf   :  { %58 = vrot.lane.b32.xlu1 %v126_v7, %s156_s10  ;;  %s163_s0 = smov 8  }
  0x12   :  { %65 = vrot.lane.b32.xlu0 %v127_v8, %s157_s20 }
  0x13   :  { %72 = vrot.lane.b32.xlu1 %v128_v9, %s158_s21 }
  0x16   :  { %79 = vrot.lane.b32.xlu0 %v129_v11, %s159_s28 }
  0x17   :  { %86 = vrot.lane.b32.xlu1 %v130_v12, %s160_s29 }
  0x1a   :  { %93 = vrot.lane.b32.xlu0 %v131_v13, %s161_s6 }
  0x1b   :  { %100 = vrot.lane.b32.xlu1 %v132_v14, %s162_s7 }
  0x1e   :  { %107 = vrot.lane.b32.xlu0 %v133_v15, %s163_s0 }
  0x74   :  { %v10_v16 = vpop.permute.xlu0 %9  }
  0x75   :  { %12 = vst.msk [vmem:[#allocation0] sm:$0x3] %vm11_vm1, %v10_v16   ;;  %v24_v17 = vpop.permute.xlu1 %23  }
  0x78   :  { %v17_v18 = vpop.permute.xlu0 %16  }
  0x79   :  { %19 = vst.msk [vmem:[#allocation0] sm:$0x3] %vm18_vm2, %v17_v18   ;;  %v31_v19 = vpop.permute.xlu1 %30  }
  0x7a   :  { %26 = vst.msk [vmem:[#allocation0] sm:$0x3] %vm25_vm3, %v24_v17  }
  0x7b   :  { %33 = vst.msk [vmem:[#allocation0] sm:$0x3] %vm32_vm4, %v31_v19  }
  0x7c   :  { %v38_v20 = vpop.permute.xlu0 %37  }
  0x7d   :  { %40 = vst.msk [vmem:[#allocation0] sm:$0x3] %vm39_vm5, %v38_v20   ;;  %v45_v21 = vpop.permute.xlu1 %44  }
  0x7e   :  { %47 = vst.msk [vmem:[#allocation0] sm:$0x3] %vm46_vm6, %v45_v21  }
  0x80   :  { %v52_v22 = vpop.permute.xlu0 %51  }
  0x81   :  { %54 = vst.msk [vmem:[#allocation0] sm:$0x3] %vm53_vm7, %v52_v22   ;;  %v59_v23 = vpop.permute.xlu1 %58  }
  0x82   :  { %61 = vst.msk [vmem:[#allocation0] sm:$0x3] %vm60_vm8, %v59_v23  }
  0x84   :  { %v66_v24 = vpop.permute.xlu0 %65  }
  0x85   :  { %68 = vst.msk [vmem:[#allocation0] sm:$0x3] %vm67_vm9, %v66_v24   ;;  %v73_v25 = vpop.permute.xlu1 %72  }
  0x86   :  { %75 = vst.msk [vmem:[#allocation0] sm:$0x3] %vm74_vm10, %v73_v25  }
  0x88   :  { %v80_v26 = vpop.permute.xlu0 %79  }
  0x89   :  { %82 = vst.msk [vmem:[#allocation0] sm:$0x3] %vm81_vm11, %v80_v26   ;;  %v87_v27 = vpop.permute.xlu1 %86  }
  0x8a   :  { %89 = vst.msk [vmem:[#allocation0] sm:$0x3] %vm88_vm12, %v87_v27  }
  0x8c   :  { %v94_v28 = vpop.permute.xlu0 %93  }
  0x8d   :  { %96 = vst.msk [vmem:[#allocation0] sm:$0x3] %vm95_vm13, %v94_v28   ;;  %v101_v29 = vpop.permute.xlu1 %100  }
  0x8e   :  { %103 = vst.msk [vmem:[#allocation0] sm:$0x3] %vm102_vm14, %v101_v29  }
  0x90   :  { %v108_v30 = vpop.permute.xlu0 %107  }
  0x91   :  { %110 = vst.msk [vmem:[#allocation0] sm:$0x3] %vm109_vm15, %v108_v30  }
  0x98   :  { %v115_v31 = vld [vmem:[#allocation0] sm:$0x3] }
  0x99   :  { %118 = vst [vmem:[%s226_s1] sm:$0x3] %v115_v31 }

// kernel: gnn_par_attn_forward.1
= control target key start
LH: loop header
LB: loop body
LE: loop exit
PB: predicated region body
PF: predicated region fallthrough
CT: control target
= control target key end

     0   :  { %s8778_s6 = smov 2   ;;  %vm245_vm0 = vcmask 1043456   ;;  %s8779_s10 = smov 10   ;;  %vm226_vm1 = vcmask 588800   ;;  %vm386_vm2 = vcmask 261120   ;;  %v11043_v49 = vmov 0.0   ;;  %s11042_s0 = inlined_call_operand.smem [shape: u32[36], index: -1, kind: input, shape index: {}] }
   0x1   :  { %s1_s5 = sld [smem:[%s11042_s0]]   ;;  %s8780_s14 = smov 1   ;;  %vm8784_vm3 = vmmov 0  }
   0x2   :  { %s8829_s9 = sld [smem:[%s11042_s0 + %s8778_s6]]   ;;  %s8781_s18 = smov 9  }
   0x3   :  { %s8838_s13 = sld [smem:[%s11042_s0 + %s8779_s10]]   ;;  %s8783_s22 = smov 3  }
   0x4   :  { %s8850_s17 = sld [smem:[%s11042_s0 + %s8780_s14]]   ;;  %s8785_s26 = smov 12  }
   0x5   :  { %s8928_s21 = sld [smem:[%s11042_s0 + %s8781_s18]]   ;;  %s8786_s30 = smov 11  }
   0x6   :  { %s8943_s25 = sld [smem:[%s11042_s0 + %s8783_s22]]   ;;  %s8787_s4 = smov 13  }
   0x7   :  { %v157_v0 = vld [vmem:[%s1_s5 + $0x40] sm:$0xff]  ;;  %v155_v1 = vld [vmem:[%s1_s5 + $0x30] sm:$0xff]  ;;  %v156_v2 = vld [vmem:[%s1_s5 + $0x38] sm:$0xff]  ;;  %s8952_s29 = sld [smem:[%s11042_s0 + %s8785_s26]]   ;;  %s8788_s8 = smov 14  }
   0x8   :  { %v8831_v3 = vpack.c.bf16 %v157_v0, %v157_v0  ;;  %v8833_v4 = vpack.c.bf16 %v156_v2, %v155_v1  ;;  %v153_v5 = vld [vmem:[%s1_s5 + $0x20] sm:$0xff]  ;;  %v154_v6 = vld [vmem:[%s1_s5 + $0x28] sm:$0xff]  ;;  %v151_v10 = vld [vmem:[%s1_s5 + $0x10] sm:$0xff]  ;;  %s8961_s3 = sld [smem:[%s11042_s0 + %s8786_s30]]   ;;  %s8789_s12 = smov 18  }
   0x9   :  { %v8845_v8 = vld [vmem:[%s8829_s9] sm:$0xff]   ;;  %v8853_v9 = vpack.c.bf16 %v154_v6, %v153_v5  ;;  %v152_v11 = vld [vmem:[%s1_s5 + $0x18] sm:$0xff]  ;;  %v150_v13 = vld [vmem:[%s1_s5 + $0x8] sm:$0xff]  ;;  %s9049_s7 = sld [smem:[%s11042_s0 + %s8787_s4]]   ;;  %s8790_s16 = smov 5  }
   0xa   :  { %8248 = vmatprep.subr.msk.bf16.mxu0 %vm245_vm0, %v8831_v3  ;;  %v247_v7 = vsel %vm245_vm0, %v8831_v3, 0  ;;  %7497 = vmatprep.mubr.msk.bf16.mxu0 %vm226_vm1, %v8845_v8  ;;  %v149_v12 = vld [vmem:[%s1_s5] sm:$0xff]  ;;  %v8859_v14 = vpack.c.bf16 %v152_v11, %v151_v10  ;;  %v8320_v15 = vld [vmem:[%s8838_s13 + $0x8] sm:$0xff]   ;;  %v8877_v20 = vld [vmem:[%s8850_s17 + $0x10] sm:$0xff]   ;;  %s9079_s11 = sld [smem:[%s11042_s0 + %s8788_s8]]   ;;  %s8791_s20 = smov 17  }
   0xb   :  { %7488 = vmatpush3.bf16.msra.mxu0 %v247_v7  ;;  %v8321_v16 = vld [vmem:[%s8838_s13] sm:$0xff]   ;;  %7509 = vmatprep.subr.bf16.mxu1 %v8320_v15  ;;  %v8868_v18 = vpack.c.bf16 %v150_v13, %v149_v12  ;;  %v8873_v19 = vld [vmem:[%s8850_s17 + $0x8] sm:$0xff]   ;;  %v8887_v22 = vld [vmem:[%s8829_s9 + $0x10] sm:$0xff]   ;;  %s6819_s15 = sld [smem:[%s11042_s0 + %s8789_s12]]   ;;  %s8792_s24 = smov 22  }
   0xc   :  { %7489 = vmatprep.subr.bf16.mxu0 %v8833_v4  ;;  %v8864_v17 = vld [vmem:[%s8850_s17] sm:$0xff]   ;;  %7510 = vmatpush3.bf16.msra.mxu1 %v8320_v15  ;;  %v8881_v21 = vld [vmem:[%s8829_s9 + $0x8] sm:$0xff]   ;;  %v8894_v23 = vld [vmem:[%s8850_s17 + $0x18] sm:$0xff]   ;;  %s9255_s19 = sld [smem:[%s11042_s0 + %s8790_s16]]   ;;  %s8793_s28 = smov 15  }
   0xd   :  { %7511 = vmatprep.subr.bf16.mxu1 %v8321_v16  ;;  %7513 = vmatprep.mubr.msk.bf16.mxu1 %vm386_vm2, %v8864_v17  ;;  %v8899_v24 = vld [vmem:[%s8850_s17 + $0x20] sm:$0xff]   ;;  %v8902_v25 = vld [vmem:[%s8829_s9 + $0x18] sm:$0xff]   ;;  %v8914_v27 = vld [vmem:[%s8850_s17 + $0x28] sm:$0xff]   ;;  %s6818_s23 = sld [smem:[%s11042_s0 + %s8791_s20]]   ;;  %s8794_s2 = smov 23  }
   0xe   :  { %v8907_v26 = vld [vmem:[%s8829_s9 + $0x20] sm:$0xff]   ;;  %v8919_v28 = vld [vmem:[%s8829_s9 + $0x28] sm:$0xff]   ;;  %s9405_s27 = sld [smem:[%s11042_s0 + %s8792_s24]]   ;;  %s8795_s6 = smov 21  }
   0xf   :  { %7490 = vmatpush3.bf16.msra.mxu0 %v8833_v4  ;;  %v8328_v29 = vld [vmem:[%s8928_s21 + $0x8] sm:$0xff]   ;;  %v8329_v30 = vld [vmem:[%s8928_s21] sm:$0xff]   ;;  %s6816_s1 = sld [smem:[%s11042_s0 + %s8793_s28]]   ;;  %s8796_s10 = smov 19  }
  0x10   :  { %7491 = vmatprep.subr.bf16.mxu0 %v8853_v9  ;;  %7512 = vmatpush3.bf16.msra.mxu1 %v8321_v16  ;;  %v8964_v12 = vld [vmem:[%s8961_s3] ss:$0 sm:$0xff]  ;;  %s6824_s5 = sld [smem:[%s11042_s0 + %s8794_s2]]   ;;  %s8797_s14 = smov 20  }
  0x11   :  { %7525 = vmatprep.subr.bf16.mxu1 %v8328_v29  ;;  %s9447_s9 = sld [smem:[%s11042_s0 + %s8795_s6]]   ;;  %s8798_s18 = smov 7  }
  0x12   :  { %s9461_s17 = sld [smem:[%s11042_s0 + %s8797_s14]]   ;;  %s8800_s22 = smov 24  }
  0x13   :  { %7492 = vmatpush3.bf16.msra.mxu0 %v8853_v9  ;;  %7514 = vmatmul.mubr.msk.bf16.vlgmr.msra.gmra.mxu1 %vm386_vm2, %v8873_v19  ;;  %s8801_s26 = smov 25   ;;  %s8802_s30 = smov 28  }
  0x14   :  { %7493 = vmatprep.subr.bf16.mxu0 %v8859_v14  ;;  %7517 = vmatprep.mubr.msk.bf16.mxu1 %vm386_vm2, %v8877_v20  ;;  %s8803_s4 = smov 26   ;;  %s8804_s8 = smov 27  }
  0x15   :  { %7526 = vmatpush3.bf16.msra.mxu1 %v8328_v29  ;;  %s9758_s12 = sld [smem:[%s11042_s0 + %s8804_s8]]   ;;  %s8805_s14 = smov 29  }
  0x16   :  { %7527 = vmatprep.subr.bf16.mxu1 %v8329_v30  ;;  %s8810_s28 = smov 30   ;;  %s8811_s2 = smov 33  }
  0x17   :  { %7494 = vmatpush3.bf16.msra.mxu0 %v8859_v14  ;;  %s8812_s6 = smov 35   ;;  %s8815_s16 = smov 34  }
  0x18   :  { %7495 = vmatprep.subr.bf16.mxu0 %v8868_v18  ;;  %s8816_s20 = smov 8  }
  0x19   :  { %7528 = vmatpush3.bf16.msra.mxu1 %v8329_v30 }
  0x1a   :  { %8236 = vmatprep.subr.bf16.mxu1 %v11043_v49 }
  0x1b   :  { %7496 = vmatpush3.bf16.msra.mxu0 %v8868_v18  ;;  %7518 = vmatmul.mubr.msk.bf16.gmra.mxu1 %vm386_vm2, %v8894_v23 }
  0x1c   :  { %7521 = vmatprep.mubr.msk.bf16.mxu1 %vm386_vm2, %v8899_v24  ;;  %7541 = vmatprep.subr.bf16.mxu0 %v11043_v49 }
  0x1e   :  { %7498 = vmatmul.mubr.msk.bf16.vlgmr.msra.gmra.mxu0 %vm226_vm1, %v8881_v21 }
  0x1f   :  { %7501 = vmatprep.mubr.msk.bf16.mxu0 %vm226_vm1, %v8887_v22 }
  0x23   :  { %7522 = vmatmul.mubr.msk.bf16.gmra.mxu1 %vm386_vm2, %v8914_v27 }
  0x26   :  { %7502 = vmatmul.mubr.msk.bf16.gmra.mxu0 %vm226_vm1, %v8902_v25 }
  0x27   :  { %7505 = vmatprep.mubr.msk.bf16.mxu0 %vm226_vm1, %v8907_v26 }
  0x2e   :  { %7506 = vmatmul.mubr.msk.bf16.gmra.mxu0 %vm226_vm1, %v8919_v28 }
  0x2f   :  { %7553 = vmatprep.mubr.msk.bf16.mxu0 %vm8784_vm3, %v11043_v49 }
  0xd3   :  { %v7515_v50 = vpop.f32.mrf.mxu1 }
  0xd5   :  { %v8954_v51 = vpop.f32.mrf.mxu1 }
  0xd7   :  { %v7516_v52 = vpop.f32.mrf.mxu1 }
  0xd9   :  { %v8956_v53 = vpop.f32.mrf.mxu1 }
  0xdb   :  { %v7519_v54 = vpop.f32.mrf.mxu1 }
  0xdd   :  { %v455_v55 = vpop.f32.mrf.mxu1 }
  0xde   :  { %v7499_v31 = vpop.f32.mrf.mxu0 }
  0xdf   :  { %v7520_v56 = vpop.f32.mrf.mxu1 }
  0xe0   :  { %v283_v32 = vpop.f32.mrf.mxu0 }
  0xe1   :  { %v458_v57 = vpop.f32.mrf.mxu1 }
  0xe2   :  { %v7500_v33 = vpop.f32.mrf.mxu0 }
  0xe3   :  { %v335_v36 = vpack.c.bf16 %v7500_v33, %v7499_v31  ;;  %v7523_v58 = vpop.f32.mrf.mxu1 }
  0xe4   :  { %v286_v34 = vpop.f32.mrf.mxu0 }
  0xe5   :  { %v334_v35 = vpack.c.bf16 %v286_v34, %v283_v32  ;;  %v471_v59 = vpop.f32.mrf.mxu1 }
  0xe6   :  { %v7503_v37 = vpop.f32.mrf.mxu0 }
  0xe7   :  { %7529 = vmatprep.mubr.msk.bf16.mxu1 %vm386_vm2, %v334_v35  ;;  %v7524_v60 = vpop.f32.mrf.mxu1 }
  0xe8   :  { %v299_v38 = vpop.f32.mrf.mxu0  ;;  %7530 = vmatmul.mubr.msk.bf16.vlgmr.msra.gmra.mxu1 %vm386_vm2, %v335_v36 }
  0xe9   :  { %v474_v61 = vpop.f32.mrf.mxu1 }
  0xea   :  { %v7504_v39 = vpop.f32.mrf.mxu0 }
  0xeb   :  { %v337_v42 = vpack.c.bf16 %v7504_v39, %v7503_v37 }
  0xec   :  { %v302_v40 = vpop.f32.mrf.mxu0 }
  0xed   :  { %v336_v41 = vpack.c.bf16 %v302_v40, %v299_v38 }
  0xee   :  { %v7507_v43 = vpop.f32.mrf.mxu0 }
  0xef   :  { %7533 = vmatprep.mubr.msk.bf16.mxu1 %vm386_vm2, %v336_v41 }
  0xf0   :  { %v315_v44 = vpop.f32.mrf.mxu0  ;;  %7534 = vmatmul.mubr.msk.bf16.gmra.mxu1 %vm386_vm2, %v337_v42 }
  0xf2   :  { %v7508_v45 = vpop.f32.mrf.mxu0 }
  0xf3   :  { %v339_v48 = vpack.c.bf16 %v7508_v45, %v7507_v43 }
  0xf4   :  { %v318_v46 = vpop.f32.mrf.mxu0 }
  0xf5   :  { %v338_v47 = vpack.c.bf16 %v318_v46, %v315_v44 }
  0xf7   :  { %7537 = vmatprep.mubr.msk.bf16.mxu1 %vm386_vm2, %v338_v47 }
  0xf8   :  { %7538 = vmatmul.mubr.msk.bf16.gmra.mxu1 %vm386_vm2, %v339_v48 }
  0xf9   :  { %7569 = vmatprep.mubr.msk.bf16.mxu1 %vm8784_vm3, %v11043_v49 }
 0x1a8   :  { %v7531_v62 = vpop.f32.mrf.mxu1 }
 0x1aa   :  { %v550_v63 = vpop.f32.mrf.mxu1 }
 0x1ac   :  { %v7532_v0 = vpop.f32.mrf.mxu1 }
 0x1ae   :  { %v553_v1 = vpop.f32.mrf.mxu1 }
 0x1b0   :  { %v7535_v2 = vpop.f32.mrf.mxu1 }
 0x1b1   :  { %v575_v32 = vadd.f32 %v7535_v2, %v7519_v54  ;;  %v562_v54 = vadd.f32 %v7532_v0, %v7516_v52  ;;  %v554_v0 = vadd.f32 %v553_v1, %v8956_v53 }
 0x1b2   :  { %v566_v5 = vpop.f32.mrf.mxu1 }
 0x1b3   :  { %v610_v41 = vadd.f32 %v8964_v12, %v575_v32  ;;  %v567_v43 = vadd.f32 %v566_v5, %v455_v55  ;;  %v607_v52 = vadd.f32 %v8964_v12, %v562_v54  ;;  %v605_v53 = vadd.f32 %v8964_v12, %v554_v0 }
 0x1b4   :  { %v7536_v6 = vpop.f32.mrf.mxu1 }
 0x1b5   :  { %v578_v30 = vadd.f32 %v7536_v6, %v7520_v56  ;;  %vm622_vm9 = vcmp.gt.f32.partialorder %v610_v41, 0.0  ;;  %vm619_vm12 = vcmp.gt.f32.partialorder %v607_v52, 0.0  ;;  %vm617_vm14 = vcmp.gt.f32.partialorder %v605_v53, 0.0 }
 0x1b6   :  { %v569_v7 = vpop.f32.mrf.mxu1 }
 0x1b7   :  { %v611_v38 = vadd.f32 %v8964_v12, %v578_v30  ;;  %v570_v39 = vadd.f32 %v569_v7, %v458_v57  ;;  %v629_v30 = vmul.f32 0.01, %v605_v53 }
 0x1b8   :  { %v7539_v10 = vpop.f32.mrf.mxu1 }
 0x1b9   :  { %v591_v11 = vadd.f32 %v7539_v10, %v7523_v58  ;;  %v635_v56 = vmul.f32 0.01, %v611_v38  ;;  %v609_v58 = vadd.f32 %v8964_v12, %v570_v39  ;;  %vm623_vm8 = vcmp.gt.f32.partialorder %v611_v38, 0.0  ;;  %v8336_v39 = vld [vmem:[%s8952_s29] sm:$0xff]  }
 0x1ba   :  { %v582_v13 = vpop.f32.mrf.mxu1 }
 0x1bb   :  { %v614_v15 = vadd.f32 %v8964_v12, %v591_v11  ;;  %v583_v16 = vadd.f32 %v582_v13, %v471_v59  ;;  %v559_v59 = vadd.f32 %v7531_v62, %v7515_v50  ;;  %v647_v5 = vsel %vm623_vm8, %v611_v38, %v635_v56  ;;  %v8335_v38 = vld [vmem:[%s8952_s29 + $0x8] sm:$0xff]  }
 0x1bc   :  { %v7540_v29 = vpop.f32.mrf.mxu1  ;;  %v633_v6 = vmul.f32 0.01, %v609_v58  ;;  %vm621_vm10 = vcmp.gt.f32.partialorder %v609_v58, 0.0  ;;  %v551_v62 = vadd.f32 %v550_v63, %v8954_v51  ;;  %v631_v13 = vmul.f32 0.01, %v607_v52 }
 0x1bd   :  { %v594_v31 = vadd.f32 %v7540_v29, %v7524_v60  ;;  %v638_v34 = vmul.f32 0.01, %v614_v15  ;;  %v612_v35 = vadd.f32 %v8964_v12, %v583_v16  ;;  %vm626_vm4 = vcmp.gt.f32.partialorder %v614_v15, 0.0 }
 0x1be   :  { %v585_v33 = vpop.f32.mrf.mxu1  ;;  %v634_v60 = vmul.f32 0.01, %v610_v41  ;;  %v606_v50 = vadd.f32 %v8964_v12, %v559_v59  ;;  %v645_v1 = vsel %vm621_vm10, %v609_v58, %v633_v6  ;;  %v604_v16 = vadd.f32 %v8964_v12, %v551_v62 }
 0x1bf   :  { %v615_v36 = vadd.f32 %v8964_v12, %v594_v31  ;;  %v586_v37 = vadd.f32 %v585_v33, %v474_v61  ;;  %v650_v44 = vsel %vm626_vm4, %v614_v15, %v638_v34  ;;  %v636_v45 = vmul.f32 0.01, %v612_v35 }
 0x1c0   :  { %vm624_vm6 = vcmp.gt.f32.partialorder %v612_v35, 0.0  ;;  %v608_v61 = vadd.f32 %v8964_v12, %v567_v43  ;;  %v646_v7 = vsel %vm622_vm9, %v610_v41, %v634_v60  ;;  %v630_v15 = vmul.f32 0.01, %v606_v50  ;;  %v9017_v41 = vld [vmem:[%s8943_s25 + $0x10] sm:$0xff]  }
 0x1c1   :  { %vm627_vm5 = vcmp.gt.f32.partialorder %v615_v36, 0.0  ;;  %v639_v40 = vmul.f32 0.01, %v615_v36  ;;  %v613_v42 = vadd.f32 %v8964_v12, %v586_v37  ;;  %v648_v55 = vsel %vm624_vm6, %v612_v35, %v636_v45  ;;  %v8994_v37 = vld [vmem:[%s8943_s25 + $0x20] ss:$0 sps:$4 sm:$0xff]  }
 0x1c2   :  { %v632_v10 = vmul.f32 0.01, %v608_v61  ;;  %vm620_vm11 = vcmp.gt.f32.partialorder %v608_v61, 0.0  ;;  %v655_v11 = vpack.c.bf16 %v647_v5, %v646_v7  ;;  %vm618_vm13 = vcmp.gt.f32.partialorder %v606_v50, 0.0 }
 0x1c3   :  { %v651_v46 = vsel %vm627_vm5, %v615_v36, %v639_v40  ;;  %vm625_vm7 = vcmp.gt.f32.partialorder %v613_v42, 0.0  ;;  %v637_v47 = vmul.f32 0.01, %v613_v42  ;;  %v643_v63 = vsel %vm619_vm12, %v607_v52, %v631_v13  ;;  %v8991_v36 = vld [vmem:[%s8943_s25] sm:$0xff]   ;;  %v9010_v40 = vld [vmem:[%s8943_s25 + $0x8] sm:$0xff]  }
 0x1c4   :  { %v657_v48 = vpack.c.bf16 %v651_v46, %v650_v44  ;;  %v644_v29 = vsel %vm620_vm11, %v608_v61, %v632_v10  ;;  %v642_v31 = vsel %vm618_vm13, %v606_v50, %v630_v15  ;;  %v628_v32 = vmul.f32 0.01, %v604_v16 }
 0x1c5   :  { %v649_v57 = vsel %vm625_vm7, %v613_v42, %v637_v47  ;;  %v654_v51 = vpack.c.bf16 %v645_v1, %v644_v29  ;;  %vm616_vm15 = vcmp.gt.f32.partialorder %v604_v16, 0.0  ;;  %v653_v12 = vpack.c.bf16 %v643_v63, %v642_v31  ;;  %v9024_v42 = vld [vmem:[%s8943_s25 + $0x18] sm:$0xff]   ;;  %s9678_s25 = sld [smem:[%s11042_s0 + %s8800_s22]]  }
 0x1c6   :  { %7542 = vmatpush3.bf16.msra.mxu0 %v657_v48  ;;  %8242 = vmatpush3.bf16.msra.mxu1 %v657_v48  ;;  %v656_v2 = vpack.c.bf16 %v649_v57, %v648_v55  ;;  %v641_v33 = vsel %vm617_vm14, %v605_v53, %v629_v30  ;;  %v640_v34 = vsel %vm616_vm15, %v604_v16, %v628_v32  ;;  %vm681_vm4 = vcmask 785408   ;;  %s10579_s22 = sld [smem:[%s11042_s0 + %s8816_s20]]  }
 0x1c7   :  { %7543 = vmatprep.subr.bf16.mxu0 %v11043_v49  ;;  %8237 = vmatprep.subr.bf16.mxu1 %v11043_v49  ;;  %v652_v35 = vpack.c.bf16 %v641_v33, %v640_v34 }
 0x1ca   :  { %7544 = vmatpush3.bf16.msra.mxu0 %v656_v2  ;;  %8243 = vmatpush3.bf16.msra.mxu1 %v656_v2 }
 0x1cb   :  { %7545 = vmatprep.subr.bf16.mxu0 %v11043_v49  ;;  %8238 = vmatprep.subr.bf16.mxu1 %v11043_v49 }
 0x1ce   :  { %7546 = vmatpush3.bf16.msra.mxu0 %v655_v11  ;;  %8244 = vmatpush3.bf16.msra.mxu1 %v655_v11 }
 0x1cf   :  { %7547 = vmatprep.subr.bf16.mxu0 %v11043_v49  ;;  %8239 = vmatprep.subr.bf16.mxu1 %v11043_v49 }
 0x1d2   :  { %7548 = vmatpush3.bf16.msra.mxu0 %v654_v51  ;;  %8245 = vmatpush3.bf16.msra.mxu1 %v654_v51 }
 0x1d3   :  { %7549 = vmatprep.subr.bf16.mxu0 %v11043_v49  ;;  %8240 = vmatprep.subr.bf16.mxu1 %v11043_v49 }
 0x1d6   :  { %7550 = vmatpush3.bf16.msra.mxu0 %v653_v12  ;;  %8246 = vmatpush3.bf16.msra.mxu1 %v653_v12 }
 0x1d7   :  { %7551 = vmatprep.subr.bf16.mxu0 %v11043_v49  ;;  %8241 = vmatprep.subr.bf16.mxu1 %v11043_v49 }
 0x1da   :  { %7552 = vmatpush3.bf16.msra.mxu0 %v652_v35  ;;  %8247 = vmatpush3.bf16.msra.mxu1 %v652_v35 }
 0x1db   :  { %7597 = vmatprep.subr.bf16.mxu0 %v11043_v49  ;;  %7573 = vmatprep.subr.bf16.mxu1 %v11043_v49 }
 0x1dd   :  { %7554 = vmatmul.mubr.msk.bf16.vlgmr.msra.gmra.mxu0 %vm681_vm4, %v8991_v36  ;;  %7570 = vmatmul.mubr.msk.bf16.vlgmr.msra.gmra.mxu1 %vm681_vm4, %v8994_v37 }
 0x1de   :  { %7557 = vmatprep.mubr.msk.bf16.mxu0 %vm8784_vm3, %v11043_v49  ;;  %7598 = vmatpush3.bf16.msra.mxu0 %v8335_v38 }
 0x1df   :  { %7599 = vmatprep.subr.bf16.mxu0 %v11043_v49  ;;  %7577 = vmatprep.mubr.msk.bf16.mxu1 %vm8784_vm3, %v11043_v49 }
 0x1e2   :  { %7600 = vmatpush3.bf16.msra.mxu0 %v8336_v39 }
 0x1e5   :  { %7558 = vmatmul.mubr.msk.bf16.gmra.mxu0 %vm681_vm4, %v9010_v40 }
 0x1e6   :  { %7561 = vmatprep.mubr.msk.bf16.mxu0 %vm8784_vm3, %v11043_v49 }
 0x1ed   :  { %7562 = vmatmul.mubr.msk.bf16.gmra.mxu0 %vm681_vm4, %v9017_v41 }
 0x1ee   :  { %7565 = vmatprep.mubr.msk.bf16.mxu0 %vm8784_vm3, %v11043_v49 }
 0x1f5   :  { %7566 = vmatmul.mubr.msk.bf16.gmra.mxu0 %vm681_vm4, %v9024_v42 }
 0x1f6   :  { %7601 = vmatprep.mubr.msk.bf16.mxu0 %vm8784_vm3, %v11043_v49 }
 0x1fd   :  { %7602 = vmatmul.mubr.msk.bf16.vlgmr.msra.gmra.mxu0 %vm386_vm2, %v8868_v18 }
 0x1fe   :  { %7605 = vmatprep.mubr.msk.bf16.mxu0 %vm8784_vm3, %v11043_v49 }
 0x205   :  { %7606 = vmatmul.mubr.msk.bf16.gmra.mxu0 %vm386_vm2, %v8859_v14  ;;  %v8337_v14 = vld [vmem:[%s9049_s7 + $0x8] sm:$0xff]  }
 0x206   :  { %7609 = vmatprep.mubr.msk.bf16.mxu0 %vm8784_vm3, %v11043_v49  ;;  %7574 = vmatpush3.bf16.msra.mxu1 %v8337_v14 }
 0x207   :  { %7575 = vmatprep.subr.bf16.mxu1 %v11043_v49 }
 0x20d   :  { %7610 = vmatmul.mubr.msk.bf16.gmra.mxu0 %vm386_vm2, %v8853_v9  ;;  %v8338_v9 = vld [vmem:[%s9049_s7] sm:$0xff]  }
 0x20e   :  { %7613 = vmatprep.mubr.msk.bf16.mxu0 %vm8784_vm3, %v11043_v49  ;;  %7576 = vmatpush3.bf16.msra.mxu1 %v8338_v9  ;;  %v8339_v9 = vld [vmem:[%s8928_s21 + $0x18] sm:$0xff]  }
 0x20f   :  { %7659 = vmatprep.subr.bf16.mxu0 %v8339_v9 }
 0x210   :  { %7660 = vmatpush3.bf16.msra.mxu0 %v8339_v9  ;;  %v8341_v9 = vld [vmem:[%s8838_s13 + $0x10] sm:$0xff]  }
 0x215   :  { %7614 = vmatmul.mubr.msk.bf16.gmra.mxu0 %vm386_vm2, %v8833_v4 }
 0x216   :  { %7617 = vmatprep.mubr.msk.bf16.mxu0 %vm8784_vm3, %v11043_v49 }
 0x21d   :  { %7618 = vmatmul.mubr.msk.bf16.gmra.mxu0 %vm386_vm2, %v8831_v3 }
 0x29d   :  { %v731_v4 = vpop.f32.mrf.mxu0  ;;  %v763_v18 = vpop.f32.mrf.mxu1 }
 0x29e   :  { %v781_v11 = vpack.c.bf16 %v763_v18, %v763_v18 }
 0x29f   :  { %v7555_v43 = vpop.f32.mrf.mxu0  ;;  %v7571_v44 = vpop.f32.mrf.mxu1 }
 0x2a1   :  { %v734_v45 = vpop.f32.mrf.mxu0  ;;  %v766_v46 = vpop.f32.mrf.mxu1 }
 0x2a2   :  { %v777_v47 = vpack.c.bf16 %v734_v45, %v731_v4 }
 0x2a3   :  { %v7556_v48 = vpop.f32.mrf.mxu0  ;;  %v7572_v54 = vpop.f32.mrf.mxu1 }
 0x2a4   :  { %7578 = vmatmul.mubr.msk.bf16.vlgmr.msra.gmra.mxu1 %vm386_vm2, %v777_v47 }
 0x2a5   :  { %v739_v56 = vpop.f32.mrf.mxu0  ;;  %7581 = vmatprep.mubr.msk.bf16.mxu1 %vm8784_vm3, %v11043_v49 }
 0x2a7   :  { %v7559_v3 = vpop.f32.mrf.mxu0 }
 0x2a9   :  { %v742_v58 = vpop.f32.mrf.mxu0 }
 0x2aa   :  { %v778_v57 = vpack.c.bf16 %v742_v58, %v739_v56 }
 0x2ab   :  { %v7560_v59 = vpop.f32.mrf.mxu0 }
 0x2ac   :  { %7582 = vmatmul.mubr.msk.bf16.gmra.mxu1 %vm386_vm2, %v778_v57 }
 0x2ad   :  { %v747_v60 = vpop.f32.mrf.mxu0  ;;  %7585 = vmatprep.mubr.msk.bf16.mxu1 %vm8784_vm3, %v11043_v49 }
 0x2af   :  { %v7563_v61 = vpop.f32.mrf.mxu0 }
 0x2b1   :  { %v750_v55 = vpop.f32.mrf.mxu0 }
 0x2b2   :  { %v779_v2 = vpack.c.bf16 %v750_v55, %v747_v60 }
 0x2b3   :  { %v7564_v52 = vpop.f32.mrf.mxu0 }
 0x2b4   :  { %7586 = vmatmul.mubr.msk.bf16.gmra.mxu1 %vm386_vm2, %v779_v2 }
 0x2b5   :  { %v755_v0 = vpop.f32.mrf.mxu0  ;;  %7589 = vmatprep.mubr.msk.bf16.mxu1 %vm8784_vm3, %v11043_v49 }
 0x2b7   :  { %v7567_v5 = vpop.f32.mrf.mxu0 }
 0x2b9   :  { %v758_v6 = vpop.f32.mrf.mxu0 }
 0x2ba   :  { %v780_v50 = vpack.c.bf16 %v758_v6, %v755_v0  ;;  %v6896_v0 = vld [vmem:[%s9079_s11] ss:$0 sm:$0xff] }
 0x2bb   :  { %v7568_v62 = vpop.f32.mrf.mxu0 }
 0x2bc   :  { %7590 = vmatmul.mubr.msk.bf16.gmra.mxu1 %vm386_vm2, %v780_v50 }
 0x2bd   :  { %7593 = vmatprep.mubr.msk.bf16.mxu1 %vm8784_vm3, %v11043_v49  ;;  %v9068_v7 = vpop.f32.mrf.mxu0 }
 0x2bf   :  { %v7603_v10 = vpop.f32.mrf.mxu0 }
 0x2c1   :  { %v9070_v13 = vpop.f32.mrf.mxu0 }
 0x2c3   :  { %v7604_v53 = vpop.f32.mrf.mxu0 }
 0x2c4   :  { %7594 = vmatmul.mubr.msk.bf16.gmra.mxu1 %vm386_vm2, %v781_v11 }
 0x2c5   :  { %7631 = vmatprep.mubr.msk.bf16.mxu1 %vm226_vm1, %v8845_v8  ;;  %v949_v1 = vpop.f32.mrf.mxu0 }
 0x2c7   :  { %v7607_v15 = vpop.f32.mrf.mxu0 }
 0x2c9   :  { %v952_v16 = vpop.f32.mrf.mxu0 }
 0x2cb   :  { %v7608_v29 = vpop.f32.mrf.mxu0 }
 0x2cd   :  { %v957_v51 = vpop.f32.mrf.mxu0 }
 0x2cf   :  { %v7611_v63 = vpop.f32.mrf.mxu0 }
 0x2d1   :  { %v960_v30 = vpop.f32.mrf.mxu0 }
 0x2d3   :  { %v7612_v31 = vpop.f32.mrf.mxu0 }
 0x2d5   :  { %v965_v32 = vpop.f32.mrf.mxu0 }
 0x2d7   :  { %v7615_v12 = vpop.f32.mrf.mxu0 }
 0x2d9   :  { %v968_v33 = vpop.f32.mrf.mxu0 }
 0x2db   :  { %v7616_v34 = vpop.f32.mrf.mxu0 }
 0x2dd   :  { %v973_v35 = vpop.f32.mrf.mxu0 }
 0x2df   :  { %v7619_v38 = vpop.f32.mrf.mxu0 }
 0x2e1   :  { %v976_v39 = vpop.f32.mrf.mxu0 }
 0x2e3   :  { %v7620_v14 = vpop.f32.mrf.mxu0 }
 0x364   :  { %v843_v8 = vpop.f32.mrf.mxu1 }
 0x366   :  { %v7579_v4 = vpop.f32.mrf.mxu1 }
 0x368   :  { %v846_v18 = vpop.f32.mrf.mxu1 }
 0x36a   :  { %v7580_v43 = vpop.f32.mrf.mxu1 }
 0x36c   :  { %v851_v44 = vpop.f32.mrf.mxu1 }
 0x36e   :  { %v7583_v45 = vpop.f32.mrf.mxu1 }
 0x370   :  { %v854_v46 = vpop.f32.mrf.mxu1 }
 0x371   :  { %v953_v63 = vadd.f32 %v952_v16, %v854_v46  ;;  %v942_v16 = vadd.f32 %v9068_v7, %v843_v8  ;;  %v8340_v7 = vld [vmem:[%s8838_s13 + $0x18] sm:$0xff]   ;;  %s9456_s13 = sld [smem:[%s11042_s0 + %s8796_s10]]  }
 0x372   :  { %v7584_v47 = vpop.f32.mrf.mxu1  ;;  %s10435_s10 = sld [smem:[%s11042_s0 + %s8812_s6]]  }
 0x373   :  { %v989_v34 = vadd.f32 %v6896_v0, %v953_v63 }
 0x374   :  { %v859_v48 = vpop.f32.mrf.mxu1 }
 0x375   :  { %v958_v11 = vadd.f32 %v957_v51, %v859_v48  ;;  %v945_v51 = vadd.f32 %v9070_v13, %v846_v18 }
 0x376   :  { %v7587_v54 = vpop.f32.mrf.mxu1 }
 0x377   :  { %v987_v39 = vadd.f32 %v6896_v0, %v945_v51 }
 0x378   :  { %v862_v56 = vpop.f32.mrf.mxu1 }
 0x379   :  { %v961_v6 = vadd.f32 %v960_v30, %v862_v56  ;;  %v950_v30 = vadd.f32 %v949_v1, %v851_v44  ;;  %v986_v1 = vadd.f32 %v6896_v0, %v942_v16 }
 0x37a   :  { %v7588_v3 = vpop.f32.mrf.mxu1 }
 0x37b   :  { %v991_v31 = vadd.f32 %v6896_v0, %v961_v6  ;;  %v988_v38 = vadd.f32 %v6896_v0, %v950_v30  ;;  %v9101_v13 = vpack.c.bf16 %v987_v39, %v986_v1 }
 0x37c   :  { %v867_v58 = vpop.f32.mrf.mxu1 }
 0x37d   :  { %v966_v2 = vadd.f32 %v965_v32, %v867_v58  ;;  %v9097_v14 = vpack.c.bf16 %v989_v34, %v988_v38 }
 0x37e   :  { %v7591_v57 = vpop.f32.mrf.mxu1 }
 0x37f   :  { %v992_v53 = vadd.f32 %v6896_v0, %v966_v2 }
 0x380   :  { %v870_v59 = vpop.f32.mrf.mxu1 }
 0x381   :  { %v969_v61 = vadd.f32 %v968_v33, %v870_v59  ;;  %v990_v33 = vadd.f32 %v6896_v0, %v958_v11 }
 0x382   :  { %v7592_v60 = vpop.f32.mrf.mxu1 }
 0x383   :  { %v993_v50 = vadd.f32 %v6896_v0, %v969_v61 }
 0x384   :  { %v875_v55 = vpop.f32.mrf.mxu1 }
 0x385   :  { %v974_v52 = vadd.f32 %v973_v35, %v875_v55  ;;  %v9088_v12 = vpack.c.bf16 %v993_v50, %v992_v53  ;;  %v9092_v35 = vpack.c.bf16 %v991_v31, %v990_v33 }
 0x386   :  { %v7595_v5 = vpop.f32.mrf.mxu1 }
 0x387   :  { %v994_v62 = vadd.f32 %v6896_v0, %v974_v52 }
 0x388   :  { %v878_v10 = vpop.f32.mrf.mxu1 }
 0x389   :  { %v9082_v15 = vpack.c.bf16 %v994_v62, %v994_v62 }
 0x38a   :  { %v7596_v29 = vpop.f32.mrf.mxu1 }
 0x38b   :  { %8249 = vmatprep.subr.msk.bf16.mxu1 %vm245_vm0, %v9082_v15  ;;  %v1001_v32 = vsel %vm245_vm0, %v9082_v15, 0  ;;  %v6928_v29 = vld [vmem:[%s8961_s3 + $0x1] ss:$0 sm:$0xff]  ;;  %s9698_s3 = sld [smem:[%s11042_s0 + %s8802_s30]]  }
 0x38c   :  { %7622 = vmatpush3.bf16.msra.mxu1 %v1001_v32 }
 0x38d   :  { %7623 = vmatprep.subr.bf16.mxu1 %v9088_v12 }
 0x390   :  { %7624 = vmatpush3.bf16.msra.mxu1 %v9088_v12 }
 0x391   :  { %7625 = vmatprep.subr.bf16.mxu1 %v9092_v35 }
 0x394   :  { %7626 = vmatpush3.bf16.msra.mxu1 %v9092_v35 }
 0x395   :  { %7627 = vmatprep.subr.bf16.mxu1 %v9097_v14 }
 0x398   :  { %7628 = vmatpush3.bf16.msra.mxu1 %v9097_v14 }
 0x399   :  { %7629 = vmatprep.subr.bf16.mxu1 %v9101_v13 }
 0x39c   :  { %7630 = vmatpush3.bf16.msra.mxu1 %v9101_v13 }
 0x39d   :  { %7643 = vmatprep.subr.bf16.mxu1 %v8340_v7 }
 0x39f   :  { %7632 = vmatmul.mubr.msk.bf16.vlgmr.msra.gmra.mxu1 %vm226_vm1, %v8881_v21  ;;  %v8342_v21 = vld [vmem:[%s8928_s21 + $0x10] sm:$0xff]   ;;  %s6808_s21 = sld [smem:[%s11042_s0 + %s8798_s18]]  }
 0x3a0   :  { %7635 = vmatprep.mubr.msk.bf16.mxu1 %vm226_vm1, %v8887_v22  ;;  %7644 = vmatpush3.bf16.msra.mxu1 %v8340_v7  ;;  %s9871_s18 = sld [smem:[%s11042_s0 + %s8805_s14]]  }
 0x3a1   :  { %7645 = vmatprep.subr.bf16.mxu1 %v8341_v9  ;;  %7661 = vmatprep.subr.bf16.mxu0 %v8342_v21 }
 0x3a2   :  { %7662 = vmatpush3.bf16.msra.mxu0 %v8342_v21 }
 0x3a3   :  { %7707 = vmatprep.subr.bf16.mxu0 %v11043_v49 }
 0x3a4   :  { %7646 = vmatpush3.bf16.msra.mxu1 %v8341_v9 }
 0x3a5   :  { %7675 = vmatprep.subr.bf16.mxu1 %v11043_v49 }
 0x3a7   :  { %7636 = vmatmul.mubr.msk.bf16.gmra.mxu1 %vm226_vm1, %v8902_v25 }
 0x3a8   :  { %7639 = vmatprep.mubr.msk.bf16.mxu1 %vm226_vm1, %v8907_v26 }
 0x3af   :  { %7640 = vmatmul.mubr.msk.bf16.gmra.mxu1 %vm226_vm1, %v8919_v28 }
 0x3b0   :  { %7647 = vmatprep.mubr.msk.bf16.mxu1 %vm386_vm2, %v8864_v17 }
 0x3b7   :  { %7648 = vmatmul.mubr.msk.bf16.vlgmr.msra.gmra.mxu1 %vm386_vm2, %v8873_v19 }
 0x3b8   :  { %7651 = vmatprep.mubr.msk.bf16.mxu1 %vm386_vm2, %v8877_v20 }
 0x3bf   :  { %7652 = vmatmul.mubr.msk.bf16.gmra.mxu1 %vm386_vm2, %v8894_v23 }
 0x3c0   :  { %7655 = vmatprep.mubr.msk.bf16.mxu1 %vm386_vm2, %v8899_v24 }
 0x3c7   :  { %7656 = vmatmul.mubr.msk.bf16.gmra.mxu1 %vm386_vm2, %v8914_v27 }
 0x3c8   :  { %7687 = vmatprep.mubr.msk.bf16.mxu1 %vm8784_vm3, %v11043_v49 }
 0x45f   :  { %v7633_v17 = vpop.f32.mrf.mxu1 }
 0x461   :  { %v1037_v19 = vpop.f32.mrf.mxu1 }
 0x463   :  { %v7634_v22 = vpop.f32.mrf.mxu1 }
 0x464   :  { %v1090_v26 = vpack.c.bf16 %v7634_v22, %v7633_v17 }
 0x465   :  { %v1040_v20 = vpop.f32.mrf.mxu1 }
 0x466   :  { %v1089_v25 = vpack.c.bf16 %v1040_v20, %v1037_v19 }
 0x467   :  { %v7637_v28 = vpop.f32.mrf.mxu1 }
 0x468   :  { %7663 = vmatprep.mubr.msk.bf16.mxu0 %vm386_vm2, %v1089_v25 }
 0x469   :  { %v1053_v8 = vpop.f32.mrf.mxu1  ;;  %7664 = vmatmul.mubr.msk.bf16.vlgmr.msra.gmra.mxu0 %vm386_vm2, %v1090_v26 }
 0x46b   :  { %v7638_v23 = vpop.f32.mrf.mxu1 }
 0x46c   :  { %v1092_v18 = vpack.c.bf16 %v7638_v23, %v7637_v28 }
 0x46d   :  { %v1056_v24 = vpop.f32.mrf.mxu1 }
 0x46e   :  { %v1091_v4 = vpack.c.bf16 %v1056_v24, %v1053_v8 }
 0x46f   :  { %v7641_v27 = vpop.f32.mrf.mxu1 }
 0x470   :  { %7667 = vmatprep.mubr.msk.bf16.mxu0 %vm386_vm2, %v1091_v4 }
 0x471   :  { %v1069_v43 = vpop.f32.mrf.mxu1  ;;  %7668 = vmatmul.mubr.msk.bf16.gmra.mxu0 %vm386_vm2, %v1092_v18 }
 0x473   :  { %v7642_v44 = vpop.f32.mrf.mxu1 }
 0x474   :  { %v1094_v47 = vpack.c.bf16 %v7642_v44, %v7641_v27 }
 0x475   :  { %v1072_v45 = vpop.f32.mrf.mxu1 }
 0x476   :  { %v1093_v46 = vpack.c.bf16 %v1072_v45, %v1069_v43 }
 0x477   :  { %v7649_v48 = vpop.f32.mrf.mxu1 }
 0x478   :  { %7671 = vmatprep.mubr.msk.bf16.mxu0 %vm386_vm2, %v1093_v46 }
 0x479   :  { %7672 = vmatmul.mubr.msk.bf16.gmra.mxu0 %vm386_vm2, %v1094_v47  ;;  %v9143_v54 = vpop.f32.mrf.mxu1 }
 0x47a   :  { %7711 = vmatprep.mubr.msk.bf16.mxu0 %vm8784_vm3, %v11043_v49 }
 0x47b   :  { %v7650_v56 = vpop.f32.mrf.mxu1 }
 0x47d   :  { %v1149_v3 = vpop.f32.mrf.mxu1 }
 0x47f   :  { %v7653_v58 = vpop.f32.mrf.mxu1 }
 0x481   :  { %v1162_v57 = vpop.f32.mrf.mxu1 }
 0x483   :  { %v7654_v61 = vpop.f32.mrf.mxu1 }
 0x485   :  { %v1165_v52 = vpop.f32.mrf.mxu1 }
 0x487   :  { %v7657_v6 = vpop.f32.mrf.mxu1 }
 0x489   :  { %v1178_v10 = vpop.f32.mrf.mxu1 }
 0x48b   :  { %v7658_v30 = vpop.f32.mrf.mxu1 }
 0x48d   :  { %v1181_v9 = vpop.f32.mrf.mxu1 }
 0x529   :  { %v7665_v59 = vpop.f32.mrf.mxu0 }
 0x52a   :  { %v1266_v45 = vadd.f32 %v7665_v59, %v7649_v48 }
 0x52b   :  { %v9145_v60 = vpop.f32.mrf.mxu0 }
 0x52d   :  { %v7666_v55 = vpop.f32.mrf.mxu0 }
 0x52e   :  { %v1269_v18 = vadd.f32 %v7666_v55, %v7650_v56  ;;  %v1314_v56 = vadd.f32 %v6928_v29, %v1266_v45  ;;  %v1258_v55 = vadd.f32 %v9145_v60, %v9143_v54 }
 0x52f   :  { %v1260_v2 = vpop.f32.mrf.mxu0 }
 0x530   :  { %vm1326_vm14 = vcmp.gt.f32.partialorder %v1314_v56, 0.0 }
 0x531   :  { %v7669_v0 = vpop.f32.mrf.mxu0 }
 0x532   :  { %v1282_v16 = vadd.f32 %v7669_v0, %v7653_v58 }
 0x533   :  { %v1273_v5 = vpop.f32.mrf.mxu0 }
 0x534   :  { %v1318_v20 = vadd.f32 %v6928_v29, %v1282_v16  ;;  %v1274_v26 = vadd.f32 %v1273_v5, %v1162_v57 }
 0x535   :  { %v7670_v50 = vpop.f32.mrf.mxu0 }
 0x536   :  { %v1285_v51 = vadd.f32 %v7670_v50, %v7654_v61  ;;  %v1342_v46 = vmul.f32 0.01, %v1318_v20  ;;  %v1316_v47 = vadd.f32 %v6928_v29, %v1274_v26  ;;  %vm1330_vm10 = vcmp.gt.f32.partialorder %v1318_v20, 0.0 }
 0x537   :  { %v1276_v62 = vpop.f32.mrf.mxu0  ;;  %v1315_v61 = vadd.f32 %v6928_v29, %v1269_v18 }
 0x538   :  { %v1319_v17 = vadd.f32 %v6928_v29, %v1285_v51  ;;  %v1277_v19 = vadd.f32 %v1276_v62, %v1165_v52  ;;  %v1261_v52 = vadd.f32 %v1260_v2, %v1149_v3  ;;  %v1340_v50 = vmul.f32 0.01, %v1316_v47  ;;  %v8343_v51 = vld [vmem:[%s8952_s29 + $0x18] sm:$0xff]  }
 0x539   :  { %v7673_v11 = vpop.f32.mrf.mxu0  ;;  %vm1328_vm12 = vcmp.gt.f32.partialorder %v1316_v47, 0.0  ;;  %v1339_v59 = vmul.f32 0.01, %v1315_v61  ;;  %vm1327_vm13 = vcmp.gt.f32.partialorder %v1315_v61, 0.0  ;;  %v1338_v3 = vmul.f32 0.01, %v1314_v56 }
 0x53a   :  { %v1298_v53 = vadd.f32 %v7673_v11, %v7657_v6  ;;  %v1343_v27 = vmul.f32 0.01, %v1319_v17  ;;  %v1317_v43 = vadd.f32 %v6928_v29, %v1277_v19  ;;  %vm1331_vm9 = vcmp.gt.f32.partialorder %v1319_v17, 0.0 }
 0x53b   :  { %v1289_v63 = vpop.f32.mrf.mxu0  ;;  %v1354_v6 = vsel %vm1330_vm10, %v1318_v20, %v1342_v46  ;;  %v1313_v62 = vadd.f32 %v6928_v29, %v1261_v52  ;;  %v1312_v2 = vadd.f32 %v6928_v29, %v1258_v55  ;;  %v1352_v11 = vsel %vm1328_vm12, %v1316_v47, %v1340_v50 }
 0x53c   :  { %v1322_v31 = vadd.f32 %v6928_v29, %v1298_v53  ;;  %v1290_v32 = vadd.f32 %v1289_v63, %v1178_v10  ;;  %v1355_v0 = vsel %vm1331_vm9, %v1319_v17, %v1343_v27  ;;  %v1341_v5 = vmul.f32 0.01, %v1317_v43 }
 0x53d   :  { %v7674_v33 = vpop.f32.mrf.mxu0  ;;  %vm1329_vm11 = vcmp.gt.f32.partialorder %v1317_v43, 0.0  ;;  %v1363_v48 = vpack.c.bf16 %v1355_v0, %v1354_v6  ;;  %v1351_v54 = vsel %vm1327_vm13, %v1315_v61, %v1339_v59  ;;  %v1337_v60 = vmul.f32 0.01, %v1313_v62 }
 0x53e   :  { %v1301_v34 = vadd.f32 %v7674_v33, %v7658_v30  ;;  %v1346_v39 = vmul.f32 0.01, %v1322_v31  ;;  %v1320_v1 = vadd.f32 %v6928_v29, %v1290_v32  ;;  %vm1334_vm5 = vcmp.gt.f32.partialorder %v1322_v31, 0.0 }
 0x53f   :  { %v1292_v38 = vpop.f32.mrf.mxu0  ;;  %v1353_v10 = vsel %vm1329_vm11, %v1317_v43, %v1341_v5  ;;  %vm1325_vm15 = vcmp.gt.f32.partialorder %v1313_v62, 0.0  ;;  %v1350_v63 = vsel %vm1326_vm14, %v1314_v56, %v1338_v3 }
 0x540   :  { %v1323_v7 = vadd.f32 %v6928_v29, %v1301_v34  ;;  %v1293_v21 = vadd.f32 %v1292_v38, %v1181_v9  ;;  %v1358_v28 = vsel %vm1334_vm5, %v1322_v31, %v1346_v39  ;;  %v1344_v8 = vmul.f32 0.01, %v1320_v1  ;;  %v8344_v34 = vld [vmem:[%s8952_s29 + $0x10] sm:$0xff]   ;;  %s9688_s29 = sld [smem:[%s11042_s0 + %s8801_s26]]  }
 0x541   :  { %vm1332_vm7 = vcmp.gt.f32.partialorder %v1320_v1, 0.0  ;;  %v1362_v53 = vpack.c.bf16 %v1353_v10, %v1352_v11  ;;  %v1336_v31 = vmul.f32 0.01, %v1312_v2  ;;  %vm1324_vm5 = vcmp.gt.f32.partialorder %v1312_v2, 0.0  ;;  %v9229_v10 = vld [vmem:[%s9079_s11 + $0x1] ss:$0 sm:$0xff] }
 0x542   :  { %vm1335_vm6 = vcmp.gt.f32.partialorder %v1323_v7, 0.0  ;;  %v1347_v22 = vmul.f32 0.01, %v1323_v7  ;;  %v1321_v25 = vadd.f32 %v6928_v29, %v1293_v21  ;;  %v1356_v58 = vsel %vm1332_vm7, %v1320_v1, %v1344_v8  ;;  %s8813_s11 = smov 32  }
 0x543   :  { %v1361_v32 = vpack.c.bf16 %v1351_v54, %v1350_v63  ;;  %v1349_v30 = vsel %vm1325_vm15, %v1313_v62, %v1337_v60  ;;  %v1348_v29 = vsel %vm1324_vm5, %v1312_v2, %v1336_v31 }
 0x544   :  { %v1359_v23 = vsel %vm1335_vm6, %v1323_v7, %v1347_v22  ;;  %vm1333_vm8 = vcmp.gt.f32.partialorder %v1321_v25, 0.0  ;;  %v1345_v24 = vmul.f32 0.01, %v1321_v25  ;;  %v1360_v33 = vpack.c.bf16 %v1349_v30, %v1348_v29 }
 0x545   :  { %v1365_v4 = vpack.c.bf16 %v1359_v23, %v1358_v28 }
 0x546   :  { %v1357_v44 = vsel %vm1333_vm8, %v1321_v25, %v1345_v24 }
 0x547   :  { %7676 = vmatpush3.bf16.msra.mxu1 %v1365_v4  ;;  %v1364_v57 = vpack.c.bf16 %v1357_v44, %v1356_v58 }
 0x548   :  { %7677 = vmatprep.subr.bf16.mxu1 %v11043_v49 }
 0x54b   :  { %7678 = vmatpush3.bf16.msra.mxu1 %v1364_v57 }
 0x54c   :  { %7679 = vmatprep.subr.bf16.mxu1 %v11043_v49 }
 0x54f   :  { %7680 = vmatpush3.bf16.msra.mxu1 %v1363_v48 }
 0x550   :  { %7681 = vmatprep.subr.bf16.mxu1 %v11043_v49 }
 0x553   :  { %7682 = vmatpush3.bf16.msra.mxu1 %v1362_v53  ;;  %v2148_v53 = vld [vmem:[%s6819_s15] sm:$0x1]  ;;  %s6833_s15 = sld [smem:[%s11042_s0 + %s8813_s11]]  }
 0x554   :  { %7683 = vmatprep.subr.bf16.mxu1 %v11043_v49 }
 0x557   :  { %7684 = vmatpush3.bf16.msra.mxu1 %v1361_v32  ;;  %v2149_v32 = vmul.f32 1.442695, %v2148_v53 }
 0x558   :  { %7685 = vmatprep.subr.bf16.mxu1 %v11043_v49 }
 0x559   :  { %8373 = vpow2.f32 %v2149_v32 }
 0x55b   :  { %7686 = vmatpush3.bf16.msra.mxu1 %v1360_v33 }
 0x55c   :  { %7731 = vmatprep.subr.bf16.mxu1 %v11043_v49 }
 0x55e   :  { %7688 = vmatmul.mubr.msk.bf16.vlgmr.msra.gmra.mxu1 %vm681_vm4, %v8991_v36  ;;  %v8345_v36 = vld [vmem:[%s9049_s7 + $0x18] sm:$0xff]  }
 0x55f   :  { %7691 = vmatprep.mubr.msk.bf16.mxu1 %vm8784_vm3, %v11043_v49  ;;  %7732 = vmatpush3.bf16.msra.mxu1 %v8343_v51 }
 0x560   :  { %7733 = vmatprep.subr.bf16.mxu1 %v11043_v49  ;;  %7708 = vmatpush3.bf16.msra.mxu0 %v8345_v36 }
 0x561   :  { %7709 = vmatprep.subr.bf16.mxu0 %v11043_v49 }
 0x563   :  { %7734 = vmatpush3.bf16.msra.mxu1 %v8344_v34 }
 0x564   :  { %7755 = vmatprep.subr.bf16.mxu1 %v11043_v49 }
 0x566   :  { %7692 = vmatmul.mubr.msk.bf16.gmra.mxu1 %vm681_vm4, %v9010_v40 }
 0x567   :  { %7695 = vmatprep.mubr.msk.bf16.mxu1 %vm8784_vm3, %v11043_v49 }
 0x56e   :  { %7696 = vmatmul.mubr.msk.bf16.gmra.mxu1 %vm681_vm4, %v9017_v41 }
 0x56f   :  { %7699 = vmatprep.mubr.msk.bf16.mxu1 %vm8784_vm3, %v11043_v49 }
 0x576   :  { %7700 = vmatmul.mubr.msk.bf16.gmra.mxu1 %vm681_vm4, %v9024_v42 }
 0x577   :  { %7703 = vmatprep.mubr.msk.bf16.mxu1 %vm8784_vm3, %v11043_v49 }
 0x57e   :  { %7704 = vmatmul.mubr.msk.bf16.gmra.mxu1 %vm681_vm4, %v8994_v37  ;;  %v8346_v37 = vld [vmem:[%s9049_s7 + $0x10] sm:$0xff]   ;;  %s9753_s7 = sld [smem:[%s11042_s0 + %s8803_s4]]  }
 0x57f   :  { %7735 = vmatprep.mubr.msk.bf16.mxu1 %vm8784_vm3, %v11043_v49  ;;  %7710 = vmatpush3.bf16.msra.mxu0 %v8346_v37 }
 0x580   :  { %7769 = vmatprep.subr.bf16.mxu0 %v11043_v49 }
 0x586   :  { %7736 = vmatmul.mubr.msk.bf16.vlgmr.msra.gmra.mxu1 %vm386_vm2, %v9101_v13 }
 0x587   :  { %7739 = vmatprep.mubr.msk.bf16.mxu1 %vm8784_vm3, %v11043_v49 }
 0x58e   :  { %7740 = vmatmul.mubr.msk.bf16.gmra.mxu1 %vm386_vm2, %v9097_v14 }
 0x58f   :  { %7743 = vmatprep.mubr.msk.bf16.mxu1 %vm8784_vm3, %v11043_v49 }
 0x596   :  { %7744 = vmatmul.mubr.msk.bf16.gmra.mxu1 %vm386_vm2, %v9092_v35 }
 0x597   :  { %7747 = vmatprep.mubr.msk.bf16.mxu1 %vm8784_vm3, %v11043_v49 }
 0x59e   :  { %7748 = vmatmul.mubr.msk.bf16.gmra.mxu1 %vm386_vm2, %v9088_v12 }
 0x59f   :  { %7751 = vmatprep.mubr.msk.bf16.mxu1 %vm8784_vm3, %v11043_v49 }
 0x5a6   :  { %7752 = vmatmul.mubr.msk.bf16.gmra.mxu1 %vm386_vm2, %v9082_v15 }
 0x5a7   :  { %7765 = vmatprep.mubr.msk.bf16.mxu1 %vm8784_vm3, %v11043_v49 }
 0x61e   :  { %v1400_v40 = vpop.f32.mrf.mxu1 }
 0x620   :  { %v7689_v41 = vpop.f32.mrf.mxu1 }
 0x622   :  { %v1403_v42 = vpop.f32.mrf.mxu1 }
 0x623   :  { %v1448_v12 = vpack.c.bf16 %v1403_v42, %v1400_v40 }
 0x624   :  { %v7690_v35 = vpop.f32.mrf.mxu1 }
 0x625   :  { %7712 = vmatmul.mubr.msk.bf16.vlgmr.msra.gmra.mxu0 %vm386_vm2, %v1448_v12 }
 0x626   :  { %v1408_v14 = vpop.f32.mrf.mxu1  ;;  %7715 = vmatprep.mubr.msk.bf16.mxu0 %vm8784_vm3, %v11043_v49 }
 0x628   :  { %v7693_v13 = vpop.f32.mrf.mxu1 }
 0x62a   :  { %v1411_v16 = vpop.f32.mrf.mxu1 }
 0x62b   :  { %v1449_v38 = vpack.c.bf16 %v1411_v16, %v1408_v14  ;;  %v1706_v16 = vlaneseq }
 0x62c   :  { %v7694_v39 = vpop.f32.mrf.mxu1 }
 0x62d   :  { %7716 = vmatmul.mubr.msk.bf16.gmra.mxu0 %vm386_vm2, %v1449_v38 }
 0x62e   :  { %v1416_v15 = vpop.f32.mrf.mxu1  ;;  %7719 = vmatprep.mubr.msk.bf16.mxu0 %vm8784_vm3, %v11043_v49 }
 0x630   :  { %v7697_v1 = vpop.f32.mrf.mxu1 }
 0x632   :  { %v1419_v7 = vpop.f32.mrf.mxu1 }
 0x633   :  { %v1450_v9 = vpack.c.bf16 %v1419_v7, %v1416_v15 }
 0x634   :  { %v7698_v21 = vpop.f32.mrf.mxu1 }
 0x635   :  { %7720 = vmatmul.mubr.msk.bf16.gmra.mxu0 %vm386_vm2, %v1450_v9 }
 0x636   :  { %v1424_v17 = vpop.f32.mrf.mxu1  ;;  %7723 = vmatprep.mubr.msk.bf16.mxu0 %vm8784_vm3, %v11043_v49 }
 0x638   :  { %v7701_v19 = vpop.f32.mrf.mxu1 }
 0x63a   :  { %v1427_v22 = vpop.f32.mrf.mxu1 }
 0x63b   :  { %v1451_v20 = vpack.c.bf16 %v1427_v22, %v1424_v17  ;;  %v9247_v17 = vshrl.u32 %v1706_v16, 7 }
 0x63c   :  { %v7702_v25 = vpop.f32.mrf.mxu1 }
 0x63d   :  { %7724 = vmatmul.mubr.msk.bf16.gmra.mxu0 %vm386_vm2, %v1451_v20  ;;  %11065 = vst [vmem:[#allocation3_spill] sm:$0xff] %v9247_v17 }
 0x63e   :  { %v1432_v26 = vpop.f32.mrf.mxu1  ;;  %7727 = vmatprep.mubr.msk.bf16.mxu0 %vm8784_vm3, %v11043_v49 }
 0x63f   :  { %v1452_v8 = vpack.c.bf16 %v1432_v26, %v1432_v26 }
 0x640   :  { %v7705_v28 = vpop.f32.mrf.mxu1 }
 0x642   :  { %v1435_v23 = vpop.f32.mrf.mxu1 }
 0x643   :  { %v9260_v23 = vsub.s32 0, %v9247_v17 }
 0x644   :  { %v7706_v24 = vpop.f32.mrf.mxu1 }
 0x645   :  { %7728 = vmatmul.mubr.msk.bf16.gmra.mxu0 %vm386_vm2, %v1452_v8  ;;  %11066 = vst [vmem:[#allocation4_spill] sm:$0xff] %v9260_v23  ;;  %v8374_v24 = vpop.eup %8373 }
 0x646   :  { %v1612_v4 = vpop.f32.mrf.mxu1  ;;  %7773 = vmatprep.mubr.msk.bf16.mxu0 %vm8784_vm3, %v11043_v49 }
 0x648   :  { %v7737_v18 = vpop.f32.mrf.mxu1 }
 0x64a   :  { %v1615_v27 = vpop.f32.mrf.mxu1 }
 0x64c   :  { %v7738_v43 = vpop.f32.mrf.mxu1 }
 0x64e   :  { %v1620_v44 = vpop.f32.mrf.mxu1 }
 0x650   :  { %v7741_v45 = vpop.f32.mrf.mxu1 }
 0x652   :  { %v1623_v46 = vpop.f32.mrf.mxu1 }
 0x654   :  { %v7742_v47 = vpop.f32.mrf.mxu1 }
 0x655   :  { %v2159_v47 = vrot.slane %v8374_v24, %v9260_v23 }
 0x656   :  { %v1628_v58 = vpop.f32.mrf.mxu1 }
 0x658   :  { %v7745_v57 = vpop.f32.mrf.mxu1 }
 0x65a   :  { %v1631_v61 = vpop.f32.mrf.mxu1 }
 0x65c   :  { %v7746_v52 = vpop.f32.mrf.mxu1 }
 0x65e   :  { %v9219_v0 = vpop.f32.mrf.mxu1 }
 0x660   :  { %v7749_v5 = vpop.f32.mrf.mxu1 }
 0x662   :  { %v9221_v56 = vpop.f32.mrf.mxu1 }
 0x664   :  { %v7750_v55 = vpop.f32.mrf.mxu1 }
 0x666   :  { %v9223_v6 = vpop.f32.mrf.mxu1 }
 0x668   :  { %v7753_v50 = vpop.f32.mrf.mxu1 }
 0x66a   :  { %v1647_v48 = vpop.f32.mrf.mxu1 }
 0x66c   :  { %v7754_v59 = vpop.f32.mrf.mxu1 }
 0x6e5   :  { %v1514_v62 = vpop.f32.mrf.mxu0 }
 0x6e6   :  { %v1613_v3 = vadd.f32 %v1612_v4, %v1514_v62 }
 0x6e7   :  { %v7713_v2 = vpop.f32.mrf.mxu0 }
 0x6e8   :  { %v1658_v11 = vadd.f32 %v9229_v10, %v1613_v3  ;;  %v6975_v3 = vld [vmem:[%s6818_s23] ss:$0 sm:$0xff]  ;;  %v2153_v2 = vld [vmem:[%s9255_s19 + $0x10] sm:$0xff]  ;;  %s8817_s23 = smov 6  }
 0x6e9   :  { %v1517_v54 = vpop.f32.mrf.mxu0 }
 0x6ea   :  { %v1616_v60 = vadd.f32 %v1615_v27, %v1517_v54  ;;  %vm1667_vm4 = vcmp.gt.f32.partialorder %v1658_v11, 0.0  ;;  %v1676_v63 = vmul.f32 0.01, %v1658_v11 }
 0x6eb   :  { %v7714_v31 = vpop.f32.mrf.mxu0 }
 0x6ec   :  { %v1659_v30 = vadd.f32 %v9229_v10, %v1616_v60  ;;  %v9233_v29 = vsel %vm1667_vm4, %v1658_v11, %v1676_v63  ;;  %v2152_v11 = vld [vmem:[%s9255_s19 + $0x8] sm:$0xff]  ;;  %v2163_v31 = vmul.f32 %v2159_v47, %v2153_v2 }
 0x6ed   :  { %v1522_v33 = vpop.f32.mrf.mxu0  ;;  %v1803_v51 = vsel %vm386_vm2, %v9233_v29, 0.0  ;;  %v2162_v32 = vmul.f32 %v2159_v47, %v2152_v11 }
 0x6ee   :  { %v1677_v34 = vmul.f32 0.01, %v1659_v30  ;;  %v1621_v36 = vadd.f32 %v1620_v44, %v1522_v33  ;;  %1804 = vadd.xlane.f32.xlu0 %v1803_v51  ;;  %vm1668_vm6 = vcmp.gt.f32.partialorder %v1659_v30, 0.0 }
 0x6ef   :  { %v7717_v37 = vpop.f32.mrf.mxu0 }
 0x6f0   :  { %v1660_v40 = vadd.f32 %v9229_v10, %v1621_v36  ;;  %v9238_v41 = vsel %vm1668_vm6, %v1659_v30, %v1677_v34  ;;  %v2154_v34 = vld [vmem:[%s9255_s19 + $0x18] sm:$0xff]  ;;  %vm6616_vm6 = vcmask 1043459  }
 0x6f1   :  { %v1525_v42 = vpop.f32.mrf.mxu0  ;;  %v1806_v12 = vsel %vm386_vm2, %v9238_v41, 0.0 }
 0x6f2   :  { %v1624_v35 = vadd.f32 %v1623_v46, %v1525_v42  ;;  %1807 = vadd.xlane.f32.xlu0 %v1806_v12  ;;  %vm1669_vm7 = vcmp.gt.f32.partialorder %v1660_v40, 0.0  ;;  %v1678_v14 = vmul.f32 0.01, %v1660_v40  ;;  %v9297_v42 = vadd.f32 %v6975_v3, %v2163_v31 }
 0x6f3   :  { %v7718_v13 = vpop.f32.mrf.mxu0  ;;  %v9299_v12 = vadd.f32 %v6975_v3, %v2162_v32 }
 0x6f4   :  { %v1661_v38 = vadd.f32 %v9229_v10, %v1624_v35  ;;  %v9243_v39 = vsel %vm1669_vm7, %v1660_v40, %v1678_v14  ;;  %v2164_v35 = vmul.f32 %v2159_v47, %v2154_v34  ;;  %vm6618_vm7 = vcmask 1044484  }
 0x6f5   :  { %v1530_v15 = vpop.f32.mrf.mxu0  ;;  %v1809_v1 = vsel %vm386_vm2, %v9243_v39, 0.0 }
 0x6f6   :  { %v1679_v7 = vmul.f32 0.01, %v1661_v38  ;;  %v1629_v9 = vadd.f32 %v1628_v58, %v1530_v15  ;;  %1810 = vadd.xlane.f32.xlu1 %v1809_v1  ;;  %vm1670_vm8 = vcmp.gt.f32.partialorder %v1661_v38, 0.0  ;;  %v2185_v15 = vsel %vm386_vm2, %v9297_v42, 0.0 }
 0x6f7   :  { %v7721_v21 = vpop.f32.mrf.mxu0  ;;  %v2182_v1 = vsel %vm386_vm2, %v9299_v12, 0.0 }
 0x6f8   :  { %v1662_v19 = vadd.f32 %v9229_v10, %v1629_v9  ;;  %v9250_v22 = vsel %vm1670_vm8, %v1661_v38, %v1679_v7  ;;  %v9315_v7 = vadd.f32 %v6975_v3, %v2164_v35  ;;  %vm6620_vm8 = vcmask 1045509  }
 0x6f9   :  { %v1533_v20 = vpop.f32.mrf.mxu0  ;;  %v1812_v25 = vsel %vm386_vm2, %v9250_v22, 0.0 }
 0x6fa   :  { %v1680_v26 = vmul.f32 0.01, %v1662_v19  ;;  %v1632_v28 = vadd.f32 %v1631_v61, %v1533_v20  ;;  %1813 = vadd.xlane.f32.xlu1 %v1812_v25  ;;  %vm1671_vm9 = vcmp.gt.f32.partialorder %v1662_v19, 0.0  ;;  %v2151_v61 = vld [vmem:[%s9255_s19] sm:$0xff]  ;;  %v2188_v21 = vsel %vm386_vm2, %v9315_v7, 0.0  ;;  %s6835_s19 = sld [smem:[%s11042_s0 + %s8815_s16]]  }
 0x6fb   :  { %v7722_v8 = vpop.f32.mrf.mxu0  ;;  %v2161_v48 = vmul.f32 %v2159_v47, %v2151_v61 }
 0x6fc   :  { %v1663_v4 = vadd.f32 %v9229_v10, %v1632_v28  ;;  %v9263_v18 = vsel %vm1671_vm9, %v1662_v19, %v1680_v26  ;;  %v9336_v26 = vpack.c.bf16 %v9250_v22, %v9243_v39  ;;  %v9343_v8 = vpack.c.bf16 %v9238_v41, %v9233_v29 }
 0x6fd   :  { %v1538_v27 = vpop.f32.mrf.mxu0  ;;  %v1815_v43 = vsel %vm386_vm2, %v9263_v18, 0.0  ;;  %vm6622_vm9 = vcmask 1046534  }
 0x6fe   :  { %v1681_v44 = vmul.f32 0.01, %v1663_v4  ;;  %v1637_v45 = vadd.f32 %v9219_v0, %v1538_v27  ;;  %1816 = vadd.xlane.f32.xlu0 %v1815_v43  ;;  %vm1672_vm10 = vcmp.gt.f32.partialorder %v1663_v4, 0.0  ;;  %11070 = vst [vmem:[#allocation8_spill] sm:$0xff] %v9336_v26  ;;  %v1717_v28 = vsel %vm386_vm2, %v9336_v26, 0  ;;  %11071 = vst [vmem:[#allocation9_spill] sm:$0xff] %v9343_v8 }
 0x6ff   :  { %v7725_v46 = vpop.f32.mrf.mxu0  ;;  %v1714_v24 = vsel %vm386_vm2, %v9343_v8, 0 }
 0x700   :  { %v1664_v58 = vadd.f32 %v9229_v10, %v1637_v45  ;;  %v9273_v57 = vsel %vm1672_vm10, %v1663_v4, %v1681_v44  ;;  %vm6624_vm10 = vcmask 1047559  }
 0x701   :  { %v1541_v52 = vpop.f32.mrf.mxu0  ;;  %v1818_v5 = vsel %vm386_vm2, %v9273_v57, 0.0  ;;  %v9329_v20 = vpack.c.bf16 %v9273_v57, %v9263_v18 }
 0x702   :  { %v1682_v55 = vmul.f32 0.01, %v1664_v58  ;;  %v1640_v50 = vadd.f32 %v9221_v56, %v1541_v52  ;;  %1819 = vadd.xlane.f32.xlu1 %v1818_v5  ;;  %vm1673_vm11 = vcmp.gt.f32.partialorder %v1664_v58, 0.0  ;;  %v9287_v56 = vadd.f32 %v6975_v3, %v2161_v48 }
 0x703   :  { %v7726_v0 = vpop.f32.mrf.mxu0  ;;  %11069 = vst [vmem:[#allocation7_spill] sm:$0xff] %v9329_v20  ;;  %v1720_v25 = vsel %vm386_vm2, %v9329_v20, 0 }
 0x704   :  { %v1665_v59 = vadd.f32 %v9229_v10, %v1640_v50  ;;  %v9280_v62 = vsel %vm1673_vm11, %v1664_v58, %v1682_v55 }
 0x705   :  { %v1546_v53 = vpop.f32.mrf.mxu0  ;;  %v1821_v54 = vsel %vm386_vm2, %v9280_v62, 0.0 }
 0x706   :  { %v1683_v60 = vmul.f32 0.01, %v1665_v59  ;;  %v1645_v63 = vadd.f32 %v9223_v6, %v1546_v53  ;;  %1822 = vadd.xlane.f32.xlu0 %v1821_v54  ;;  %vm1674_vm12 = vcmp.gt.f32.partialorder %v1665_v59, 0.0  ;;  %v2179_v6 = vsel %vm386_vm2, %v9287_v56, 0.0 }
 0x707   :  { %v7729_v30 = vpop.f32.mrf.mxu0 }
 0x708   :  { %v1666_v33 = vadd.f32 %v9229_v10, %v1645_v63  ;;  %v9290_v51 = vsel %vm1674_vm12, %v1665_v59, %v1683_v60 }
 0x709   :  { %v1824_v36 = vsel %vm386_vm2, %v9290_v51, 0.0  ;;  %v1549_v37 = vpop.f32.mrf.mxu0  ;;  %v9320_v9 = vpack.c.bf16 %v9290_v51, %v9280_v62 }
 0x70a   :  { %v1684_v40 = vmul.f32 0.01, %v1666_v33  ;;  %1825 = vadd.xlane.f32.xlu1 %v1824_v36  ;;  %vm1675_vm13 = vcmp.gt.f32.partialorder %v1666_v33, 0.0 }
 0x70b   :  { %v7730_v14 = vpop.f32.mrf.mxu0  ;;  %11068 = vst [vmem:[#allocation6_spill] sm:$0xff] %v9320_v9  ;;  %v1723_v19 = vsel %vm386_vm2, %v9320_v9, 0 }
 0x70c   :  { %v9301_v10 = vsel %vm1675_vm13, %v1666_v33, %v1684_v40 }
 0x70d   :  { %v1827_v13 = vsel %vm386_vm2, %v9301_v10, 0.0  ;;  %v9307_v16 = vpack.c.bf16 %v9301_v10, %v9301_v10 }
 0x70e   :  { %2180 = vadd.xlane.f32.xlu1 %v2179_v6  ;;  %1828 = vadd.xlane.f32.xlu0 %v1827_v13 }
 0x70f   :  { %11067 = vst [vmem:[#allocation5_spill] sm:$0xff] %v9307_v16  ;;  %v1726_v38 = vsel %vm386_vm2, %v9307_v16, 0 }
 0x710   :  { %7756 = vmatpush3.bf16.xpose.msra.mxu1 %v1726_v38 }
 0x711   :  { %7757 = vmatprep.subr.bf16.mxu1 %v11043_v49 }
 0x712   :  { %2186 = vadd.xlane.f32.xlu1 %v2185_v15  ;;  %2183 = vadd.xlane.f32.xlu0 %v2182_v1 }
 0x716   :  { %2189 = vadd.xlane.f32.xlu0 %v2188_v21 }
 0x718   :  { %7758 = vmatpush3.bf16.xpose.msra.mxu1 %v1723_v19 }
 0x719   :  { %7759 = vmatprep.subr.bf16.mxu1 %v11043_v49 }
 0x720   :  { %7760 = vmatpush3.bf16.xpose.msra.mxu1 %v1720_v25 }
 0x721   :  { %7761 = vmatprep.subr.bf16.mxu1 %v11043_v49 }
 0x728   :  { %7762 = vmatpush3.bf16.xpose.msra.mxu1 %v1717_v28 }
 0x729   :  { %7763 = vmatprep.subr.bf16.mxu1 %v11043_v49 }
 0x730   :  { %7764 = vmatpush3.bf16.xpose.msra.mxu1 %v1714_v24 }
 0x731   :  { %7793 = vmatprep.subr.bf16.mxu1 %v11043_v49 }
 0x777   :  { %v1805_v4 = vpop.xlane.xlu0 %1804 }
 0x778   :  { %v1831_v27 = vmul.f32 0.03125, %v1805_v4 }
 0x77a   :  { %v9349_v43 = vsub.f32 %v9233_v29, %v1831_v27 }
 0x77b   :  { %v1808_v44 = vpop.xlane.xlu0 %1807 }
 0x77c   :  { %v1832_v45 = vmul.f32 0.03125, %v1808_v44  ;;  %v1849_v46 = vmul.f32 %v9349_v43, %v9349_v43 }
 0x77e   :  { %v9354_v47 = vsub.f32 %v9238_v41, %v1832_v45  ;;  %v1858_v58 = vsel %vm386_vm2, %v1849_v46, 0.0 }
 0x77f   :  { %v1811_v61 = vpop.xlane.xlu1 %1810  ;;  %1859 = vadd.xlane.f32.xlu1 %v1858_v58 }
 0x780   :  { %v1833_v52 = vmul.f32 0.03125, %v1811_v61  ;;  %v1850_v5 = vmul.f32 %v9354_v47, %v9354_v47 }
 0x782   :  { %v9360_v55 = vsub.f32 %v9243_v39, %v1833_v52  ;;  %v1861_v29 = vsel %vm386_vm2, %v1850_v5, 0.0  ;;  %v8347_v5 = vld [vmem:[%s9405_s27 + $0x8] sm:$0xff]  }
 0x783   :  { %v1814_v50 = vpop.xlane.xlu1 %1813  ;;  %1862 = vadd.xlane.f32.xlu0 %v1861_v29  ;;  %v1694_v29 = vld [vmem:[%s6816_s1] sm:$0x1]  ;;  %7770 = vmatpush3.bf16.msra.mxu0 %v8347_v5  ;;  %s6831_s1 = sld [smem:[%s11042_s0 + %s8810_s28]]  }
 0x784   :  { %v1834_v0 = vmul.f32 0.03125, %v1814_v50  ;;  %v1851_v41 = vmul.f32 %v9360_v55, %v9360_v55  ;;  %7766 = vmatmul.mubr.msk.bf16.vlgmr.msra.gmra.mxu1 %vm386_vm2, %v1694_v29  ;;  %7771 = vmatprep.subr.bf16.mxu0 %v11043_v49 }
 0x785   :  { %7797 = vmatprep.mubr.msk.bf16.mxu1 %vm8784_vm3, %v11043_v49 }
 0x786   :  { %v9366_v48 = vsub.f32 %v9250_v22, %v1834_v0  ;;  %v1864_v59 = vsel %vm386_vm2, %v1851_v41, 0.0 }
 0x787   :  { %v1817_v3 = vpop.xlane.xlu0 %1816  ;;  %1865 = vadd.xlane.f32.xlu1 %v1864_v59  ;;  %v8348_v59 = vld [vmem:[%s6824_s5 + $0x8] sm:$0xff]  }
 0x788   :  { %v1835_v2 = vmul.f32 0.03125, %v1817_v3  ;;  %v1852_v39 = vmul.f32 %v9366_v48, %v9366_v48  ;;  %7794 = vmatpush3.bf16.msra.mxu1 %v8348_v59 }
 0x789   :  { %7795 = vmatprep.subr.bf16.mxu1 %v11043_v49 }
 0x78a   :  { %v9372_v11 = vsub.f32 %v9263_v18, %v1835_v2  ;;  %v1867_v53 = vsel %vm386_vm2, %v1852_v39, 0.0  ;;  %v8349_v2 = vld [vmem:[%s9405_s27] sm:$0xff]  }
 0x78b   :  { %v1820_v54 = vpop.xlane.xlu1 %1819  ;;  %1868 = vadd.xlane.f32.xlu0 %v1867_v53  ;;  %v8350_v39 = vld [vmem:[%s6824_s5] sm:$0xff]   ;;  %7772 = vmatpush3.bf16.msra.mxu0 %v8349_v2  ;;  %s6834_s5 = sld [smem:[%s11042_s0 + %s8811_s2]]  }
 0x78c   :  { %v1836_v60 = vmul.f32 0.03125, %v1820_v54  ;;  %v1853_v22 = vmul.f32 %v9372_v11, %v9372_v11  ;;  %7796 = vmatpush3.bf16.msra.mxu1 %v8350_v39  ;;  %v9450_v54 = vld [vmem:[%s9447_s9 + $0x8] sm:$0xff]   ;;  %v8352_v39 = vld [vmem:[%s9447_s9] sm:$0xff]  }
 0x78d   :  { %7817 = vmatprep.subr.bf16.mxu0 %v9450_v54 }
 0x78e   :  { %v9378_v63 = vsub.f32 %v9273_v57, %v1836_v60  ;;  %v1870_v31 = vsel %vm386_vm2, %v1853_v22, 0.0 }
 0x78f   :  { %v1823_v32 = vpop.xlane.xlu0 %1822  ;;  %1871 = vadd.xlane.f32.xlu1 %v1870_v31 }
 0x790   :  { %v1837_v30 = vmul.f32 0.03125, %v1823_v32  ;;  %v1854_v18 = vmul.f32 %v9378_v63, %v9378_v63 }
 0x792   :  { %v9384_v33 = vsub.f32 %v9280_v62, %v1837_v30  ;;  %v1873_v34 = vsel %vm386_vm2, %v1854_v18, 0.0 }
 0x793   :  { %v1826_v36 = vpop.xlane.xlu1 %1825  ;;  %1874 = vadd.xlane.f32.xlu0 %v1873_v34 }
 0x794   :  { %v1838_v37 = vmul.f32 0.03125, %v1826_v36  ;;  %v1855_v57 = vmul.f32 %v9384_v33, %v9384_v33 }
 0x796   :  { %v9390_v40 = vsub.f32 %v9290_v51, %v1838_v37  ;;  %v1876_v6 = vsel %vm386_vm2, %v1855_v57, 0.0 }
 0x797   :  { %1877 = vadd.xlane.f32.xlu1 %v1876_v6  ;;  %v2181_v35 = vpop.xlane.xlu1 %2180  ;;  %v1829_v14 = vpop.xlane.xlu0 %1828 }
 0x798   :  { %v2191_v13 = vmul.f32 0.03125, %v2181_v35  ;;  %v1839_v38 = vmul.f32 0.03125, %v1829_v14  ;;  %v1856_v62 = vmul.f32 %v9390_v40, %v9390_v40 }
 0x79a   :  { %v9396_v15 = vsub.f32 %v9287_v56, %v2191_v13  ;;  %v9399_v1 = vsub.f32 %v9301_v10, %v1839_v38  ;;  %v1879_v21 = vsel %vm386_vm2, %v1856_v62, 0.0 }
 0x79b   :  { %v2187_v51 = vpop.xlane.xlu1 %2186  ;;  %1880 = vadd.xlane.f32.xlu0 %v1879_v21  ;;  %v2184_v19 = vpop.xlane.xlu0 %2183 }
 0x79c   :  { %v2193_v25 = vmul.f32 0.03125, %v2187_v51  ;;  %v2192_v10 = vmul.f32 0.03125, %v2184_v19  ;;  %v2199_v28 = vmul.f32 %v9396_v15, %v9396_v15  ;;  %v1857_v24 = vmul.f32 %v9399_v1, %v9399_v1  ;;  %v9465_v51 = vld [vmem:[%s9456_s13] ss:$0 sm:$0xff] }
 0x79e   :  { %v9418_v4 = vsub.f32 %v9297_v42, %v2193_v25  ;;  %v9421_v27 = vsub.f32 %v9299_v12, %v2192_v10  ;;  %v2203_v44 = vsel %vm386_vm2, %v2199_v28, 0.0  ;;  %v1882_v45 = vsel %vm386_vm2, %v1857_v24, 0.0 }
 0x79f   :  { %2204 = vadd.xlane.f32.xlu0 %v2203_v44  ;;  %1883 = vadd.xlane.f32.xlu1 %v1882_v45  ;;  %v2190_v46 = vpop.xlane.xlu0 %2189 }
 0x7a0   :  { %v2194_v58 = vmul.f32 0.03125, %v2190_v46  ;;  %v2201_v61 = vmul.f32 %v9418_v4, %v9418_v4  ;;  %v2200_v52 = vmul.f32 %v9421_v27, %v9421_v27  ;;  %v9470_v46 = vld [vmem:[%s9461_s17] ss:$0 sm:$0xff] }
 0x7a2   :  { %v9431_v50 = vsub.f32 %v9315_v7, %v2194_v58  ;;  %v2209_v0 = vsel %vm386_vm2, %v2201_v61, 0.0  ;;  %v2206_v41 = vsel %vm386_vm2, %v2200_v52, 0.0 }
 0x7a3   :  { %2210 = vadd.xlane.f32.xlu0 %v2209_v0  ;;  %2207 = vadd.xlane.f32.xlu1 %v2206_v41 }
 0x7a4   :  { %v2202_v3 = vmul.f32 %v9431_v50, %v9431_v50 }
 0x7a6   :  { %v2212_v53 = vsel %vm386_vm2, %v2202_v3, 0.0 }
 0x7a7   :  { %2213 = vadd.xlane.f32.xlu1 %v2212_v53 }
 0x808   :  { %v1860_v60 = vpop.xlane.xlu1 %1859 }
 0x809   :  { %v1885_v22 = vmul.f32 0.03125, %v1860_v60 }
 0x80b   :  { %v1894_v31 = vadd.f32 1e-05, %v1885_v22 }
 0x80c   :  { %v1863_v32 = vpop.xlane.xlu0 %1862 }
 0x80d   :  { %8375 = vrsqrt.f32 %v1894_v31  ;;  %v1886_v30 = vmul.f32 0.03125, %v1863_v32 }
 0x80f   :  { %v1895_v18 = vadd.f32 1e-05, %v1886_v30 }
 0x810   :  { %v1866_v34 = vpop.xlane.xlu1 %1865 }
 0x811   :  { %8377 = vrsqrt.f32 %v1895_v18  ;;  %v1887_v36 = vmul.f32 0.03125, %v1866_v34 }
 0x813   :  { %v1896_v37 = vadd.f32 1e-05, %v1887_v36 }
 0x814   :  { %v1869_v57 = vpop.xlane.xlu0 %1868 }
 0x815   :  { %8379 = vrsqrt.f32 %v1896_v37  ;;  %v1888_v6 = vmul.f32 0.03125, %v1869_v57 }
 0x817   :  { %v1897_v35 = vadd.f32 1e-05, %v1888_v6 }
 0x818   :  { %v1872_v14 = vpop.xlane.xlu1 %1871 }
 0x819   :  { %8381 = vrsqrt.f32 %v1897_v35  ;;  %v1889_v13 = vmul.f32 0.03125, %v1872_v14 }
 0x81a   :  { %v8376_v38 = vpop.eup %8375 }
 0x81b   :  { %v1912_v62 = vmul.f32 %v8376_v38, %v9349_v43  ;;  %v1898_v21 = vadd.f32 1e-05, %v1889_v13 }
 0x81c   :  { %v1875_v19 = vpop.xlane.xlu0 %1874 }
 0x81d   :  { %8383 = vrsqrt.f32 %v1898_v21  ;;  %v1890_v25 = vmul.f32 0.03125, %v1875_v19  ;;  %v1927_v28 = vmul.f32 %v9465_v51, %v1912_v62 }
 0x81e   :  { %v8378_v10 = vpop.eup %8377 }
 0x81f   :  { %v1913_v24 = vmul.f32 %v8378_v10, %v9354_v47  ;;  %v1899_v44 = vadd.f32 1e-05, %v1890_v25  ;;  %v1942_v5 = vadd.f32 %v9470_v46, %v1927_v28 }
 0x820   :  { %v1878_v45 = vpop.xlane.xlu1 %1877 }
 0x821   :  { %v1928_v58 = vmul.f32 %v9465_v51, %v1913_v24  ;;  %8385 = vrsqrt.f32 %v1899_v44  ;;  %v1891_v43 = vmul.f32 0.03125, %v1878_v45 }
 0x822   :  { %v8380_v61 = vpop.eup %8379 }
 0x823   :  { %v1900_v52 = vadd.f32 1e-05, %v1891_v43  ;;  %v1943_v29 = vadd.f32 %v9470_v46, %v1928_v58  ;;  %v1914_v0 = vmul.f32 %v8380_v61, %v9360_v55 }
 0x824   :  { %v1881_v41 = vpop.xlane.xlu0 %1880 }
 0x825   :  { %8387 = vrsqrt.f32 %v1900_v52  ;;  %v1892_v47 = vmul.f32 0.03125, %v1881_v41  ;;  %v1955_v59 = vpack.c.bf16 %v1943_v29, %v1942_v5  ;;  %v1929_v2 = vmul.f32 %v9465_v51, %v1914_v0 }
 0x826   :  { %v8382_v3 = vpop.eup %8381 }
 0x827   :  { %v1901_v53 = vadd.f32 1e-05, %v1892_v47  ;;  %7774 = vmatmul.mubr.msk.bf16.vlgmr.msra.gmra.mxu0 %vm386_vm2, %v1955_v59  ;;  %7798 = vmatmul.mubr.msk.bf16.vlgmr.msra.gmra.mxu1 %vm386_vm2, %v1955_v59  ;;  %v1915_v60 = vmul.f32 %v8382_v3, %v9366_v48  ;;  %v1944_v34 = vadd.f32 %v9470_v46, %v1929_v2 }
 0x828   :  { %v1884_v22 = vpop.xlane.xlu1 %1883  ;;  %v2205_v31 = vpop.xlane.xlu0 %2204  ;;  %7777 = vmatprep.mubr.msk.bf16.mxu0 %vm8784_vm3, %v11043_v49  ;;  %7801 = vmatprep.mubr.msk.bf16.mxu1 %vm8784_vm3, %v11043_v49 }
 0x829   :  { %8389 = vrsqrt.f32 %v1901_v53  ;;  %v1893_v55 = vmul.f32 0.03125, %v1884_v22  ;;  %v2215_v32 = vmul.f32 0.03125, %v2205_v31  ;;  %v1930_v30 = vmul.f32 %v9465_v51, %v1915_v60  ;;  %7818 = vmatpush3.bf16.msra.mxu0 %v9450_v54 }
 0x82a   :  { %v8384_v18 = vpop.eup %8383  ;;  %7819 = vmatprep.subr.bf16.mxu0 %v8352_v39 }
 0x82b   :  { %v1902_v48 = vadd.f32 1e-05, %v1893_v55  ;;  %v2219_v36 = vadd.f32 1e-05, %v2215_v32  ;;  %v1945_v37 = vadd.f32 %v9470_v46, %v1930_v30  ;;  %v1916_v57 = vmul.f32 %v8384_v18, %v9372_v11 }
 0x82c   :  { %v2208_v6 = vpop.xlane.xlu1 %2207  ;;  %v2211_v35 = vpop.xlane.xlu0 %2210 }
 0x82d   :  { %8391 = vrsqrt.f32 %v1902_v48  ;;  %v2216_v14 = vmul.f32 0.03125, %v2208_v6  ;;  %v2217_v13 = vmul.f32 0.03125, %v2211_v35  ;;  %v1956_v38 = vpack.c.bf16 %v1945_v37, %v1944_v34  ;;  %7820 = vmatpush3.bf16.msra.mxu0 %v8352_v39 }
 0x82e   :  { %v8386_v62 = vpop.eup %8385  ;;  %8393 = vrsqrt.f32 %v2219_v36  ;;  %v1931_v54 = vmul.f32 %v9465_v51, %v1916_v57 }
 0x82f   :  { %v2220_v21 = vadd.f32 1e-05, %v2216_v14  ;;  %v2221_v19 = vadd.f32 1e-05, %v2217_v13  ;;  %7778 = vmatmul.mubr.msk.bf16.gmra.mxu0 %vm386_vm2, %v1956_v38  ;;  %7802 = vmatmul.mubr.msk.bf16.gmra.mxu1 %vm386_vm2, %v1956_v38  ;;  %v1917_v25 = vmul.f32 %v8386_v62, %v9378_v63 }
 0x830   :  { %v2214_v11 = vpop.xlane.xlu1 %2213  ;;  %7781 = vmatprep.mubr.msk.bf16.mxu0 %vm8784_vm3, %v11043_v49  ;;  %7805 = vmatprep.mubr.msk.bf16.mxu1 %vm8784_vm3, %v11043_v49  ;;  %v1946_v44 = vadd.f32 %v9470_v46, %v1931_v54 }
 0x831   :  { %8395 = vrsqrt.f32 %v2220_v21  ;;  %v2218_v10 = vmul.f32 0.03125, %v2214_v11  ;;  %v1932_v28 = vmul.f32 %v9465_v51, %v1917_v25 }
 0x832   :  { %v8388_v24 = vpop.eup %8387  ;;  %8397 = vrsqrt.f32 %v2221_v19 }
 0x833   :  { %v2222_v45 = vadd.f32 1e-05, %v2218_v10  ;;  %v1947_v58 = vadd.f32 %v9470_v46, %v1932_v28  ;;  %v1918_v63 = vmul.f32 %v8388_v24, %v9384_v33 }
 0x835   :  { %8399 = vrsqrt.f32 %v2222_v45  ;;  %v1957_v43 = vpack.c.bf16 %v1947_v58, %v1946_v44  ;;  %v1933_v5 = vmul.f32 %v9465_v51, %v1918_v63 }
 0x836   :  { %v8390_v61 = vpop.eup %8389 }
 0x837   :  { %7782 = vmatmul.mubr.msk.bf16.gmra.mxu0 %vm386_vm2, %v1957_v43  ;;  %7806 = vmatmul.mubr.msk.bf16.gmra.mxu1 %vm386_vm2, %v1957_v43  ;;  %v1919_v52 = vmul.f32 %v8390_v61, %v9390_v40  ;;  %v1948_v41 = vadd.f32 %v9470_v46, %v1933_v5  ;;  %v6978_v40 = vld [vmem:[%s9456_s13 + $0x1] ss:$0 sm:$0xff] }
 0x838   :  { %7785 = vmatprep.mubr.msk.bf16.mxu0 %vm8784_vm3, %v11043_v49  ;;  %7809 = vmatprep.mubr.msk.bf16.mxu1 %vm8784_vm3, %v11043_v49 }
 0x839   :  { %v1934_v33 = vmul.f32 %v9465_v51, %v1919_v52 }
 0x83a   :  { %v8392_v29 = vpop.eup %8391 }
 0x83b   :  { %v8394_v0 = vpop.eup %8393  ;;  %v1949_v47 = vadd.f32 %v9470_v46, %v1934_v33  ;;  %v1920_v59 = vmul.f32 %v8392_v29, %v9399_v1  ;;  %v6979_v1 = vld [vmem:[%s9461_s17 + $0x1] ss:$0 sm:$0xff] }
 0x83c   :  { %v2227_v3 = vmul.f32 %v8394_v0, %v9396_v15 }
 0x83d   :  { %v1958_v2 = vpack.c.bf16 %v1949_v47, %v1948_v41  ;;  %v1935_v39 = vmul.f32 %v9465_v51, %v1920_v59 }
 0x83e   :  { %v8396_v53 = vpop.eup %8395  ;;  %v2237_v22 = vmul.f32 %v6978_v40, %v2227_v3 }
 0x83f   :  { %7786 = vmatmul.mubr.msk.bf16.gmra.mxu0 %vm386_vm2, %v1958_v2  ;;  %7810 = vmatmul.mubr.msk.bf16.gmra.mxu1 %vm386_vm2, %v1958_v2  ;;  %v2228_v60 = vmul.f32 %v8396_v53, %v9421_v27  ;;  %v8398_v31 = vpop.eup %8397  ;;  %v1950_v15 = vadd.f32 %v9470_v46, %v1935_v39 }
 0x840   :  { %7789 = vmatprep.mubr.msk.bf16.mxu0 %vm8784_vm3, %v11043_v49  ;;  %7813 = vmatprep.mubr.msk.bf16.mxu1 %vm8784_vm3, %v11043_v49  ;;  %v2229_v32 = vmul.f32 %v8398_v31, %v9418_v4  ;;  %v2247_v18 = vadd.f32 %v6979_v1, %v2237_v22 }
 0x841   :  { %v2238_v55 = vmul.f32 %v6978_v40, %v2228_v60  ;;  %v1959_v48 = vpack.c.bf16 %v1950_v15, %v1950_v15 }
 0x842   :  { %v8400_v51 = vpop.eup %8399  ;;  %v2239_v37 = vmul.f32 %v6978_v40, %v2229_v32 }
 0x843   :  { %v2230_v30 = vmul.f32 %v8400_v51, %v9431_v50  ;;  %v2248_v34 = vadd.f32 %v6979_v1, %v2238_v55 }
 0x844   :  { %v2249_v46 = vadd.f32 %v6979_v1, %v2239_v37  ;;  %v9532_v4 = vpop.f32.mrf.mxu1 }
 0x845   :  { %v2240_v27 = vmul.f32 %v6978_v40, %v2230_v30  ;;  %v2255_v36 = vpack.c.bf16 %v2248_v34, %v2247_v18  ;;  %11072 = vst [vmem:[#allocation10_spill] sm:$0xff] %v9532_v4 }
 0x846   :  { %v7767_v50 = vpop.f32.mrf.mxu1 }
 0x847   :  { %7790 = vmatmul.mubr.msk.bf16.gmra.mxu0 %vm386_vm2, %v1959_v48  ;;  %7814 = vmatmul.mubr.msk.bf16.gmra.mxu1 %vm386_vm2, %v1959_v48  ;;  %v2250_v57 = vadd.f32 %v6979_v1, %v2240_v27 }
 0x848   :  { %7821 = vmatprep.mubr.msk.bf16.mxu0 %vm386_vm2, %v2255_v36  ;;  %v1765_v35 = vpop.f32.mrf.mxu1 }
 0x849   :  { %v2256_v6 = vpack.c.bf16 %v2250_v57, %v2249_v46 }
 0x84a   :  { %v7768_v14 = vpop.f32.mrf.mxu1 }
 0x84f   :  { %7822 = vmatmul.mubr.msk.bf16.vlgmr.msra.gmra.mxu0 %vm386_vm2, %v2256_v6 }
 0x8e7   :  { %v9534_v13 = vpop.f32.mrf.mxu0  ;;  %v9536_v38 = vpop.f32.mrf.mxu1 }
 0x8e9   :  { %v7775_v62 = vpop.f32.mrf.mxu0  ;;  %v7799_v54 = vpop.f32.mrf.mxu1 }
 0x8eb   :  { %v9538_v21 = vpop.f32.mrf.mxu0  ;;  %v2112_v19 = vpop.f32.mrf.mxu1 }
 0x8ed   :  { %v7776_v25 = vpop.f32.mrf.mxu0  ;;  %v7800_v11 = vpop.f32.mrf.mxu1 }
 0x8ee   :  { %v9585_v11 = vpack.c.bf16 %v2112_v19, %v9536_v38  ;;  %v9603_v38 = vpack.c.bf16 %v9538_v21, %v9534_v13  ;;  %v9621_v13 = vld [vmem:[%s6808_s21 + $0x10] sm:$0xff]  ;;  %v9623_v21 = vld [vmem:[%s6808_s21] sm:$0xff] }
 0x8ef   :  { %v9540_v10 = vpop.f32.mrf.mxu0  ;;  %v2117_v28 = vpop.f32.mrf.mxu1  ;;  %vm1791_vm14 = vcmp.gt.f32.partialorder %v9621_v13, 0.5  ;;  %vm1789_vm15 = vcmp.gt.f32.partialorder %v9623_v21, 0.5 }
 0x8f0   :  { %11074 = vst [vmem:[#allocation12_spill] sm:$0xff] %v9603_v38 }
 0x8f1   :  { %v7779_v24 = vpop.f32.mrf.mxu0  ;;  %v7803_v44 = vpop.f32.mrf.mxu1 }
 0x8f3   :  { %v2032_v45 = vpop.f32.mrf.mxu0  ;;  %v2120_v58 = vpop.f32.mrf.mxu1 }
 0x8f4   :  { %v9571_v35 = vpack.c.bf16 %v2120_v58, %v2117_v28  ;;  %v9591_v24 = vpack.c.bf16 %v2032_v45, %v9540_v10  ;;  %v9614_v10 = vsel %vm386_vm2, %v9603_v38, 0  ;;  %v9625_v58 = vld [vmem:[%s6808_s21 + $0x18] sm:$0xff] }
 0x8f5   :  { %v7780_v63 = vpop.f32.mrf.mxu0  ;;  %v7804_v43 = vpop.f32.mrf.mxu1  ;;  %11076 = vst [vmem:[#allocation14_spill] sm:$0xff] %v9614_v10  ;;  %vm1792_vm5 = vcmp.gt.f32.partialorder %v9625_v58, 0.5 }
 0x8f6   :  { %11073 = vst [vmem:[#allocation11_spill] sm:$0xff] %v9591_v24  ;;  %v9607_v19 = vsel %vm386_vm2, %v9591_v24, 0  ;;  %v9627_v43 = vld [vmem:[%s6808_s21 + $0x8] sm:$0xff] }
 0x8f7   :  { %v2037_v61 = vpop.f32.mrf.mxu0  ;;  %v2125_v52 = vpop.f32.mrf.mxu1  ;;  %11075 = vst [vmem:[#allocation13_spill] sm:$0xff] %v9607_v19  ;;  %vm1790_vm4 = vcmp.gt.f32.partialorder %v9627_v43, 0.5 }
 0x8f9   :  { %v7783_v5 = vpop.f32.mrf.mxu0  ;;  %v7807_v33 = vpop.f32.mrf.mxu1 }
 0x8fa   :  { %v8799_v33 = vmov -1e+30  }
 0x8fb   :  { %v2040_v29 = vpop.f32.mrf.mxu0  ;;  %v2128_v0 = vpop.f32.mrf.mxu1 }
 0x8fc   :  { %v9567_v46 = vpack.c.bf16 %v2128_v0, %v2125_v52  ;;  %v9573_v14 = vpack.c.bf16 %v2040_v29, %v2037_v61  ;;  %v9633_v29 = vsel %vm1791_vm14, 0.0, %v8799_v33  ;;  %v9635_v0 = vsel %vm1789_vm15, 0.0, %v8799_v33 }
 0x8fd   :  { %v7784_v41 = vpop.f32.mrf.mxu0  ;;  %v7808_v47 = vpop.f32.mrf.mxu1 }
 0x8fe   :  { %v9595_v44 = vsel %vm386_vm2, %v9573_v14, 0  ;;  %v9637_v41 = vsel %vm1792_vm5, 0.0, %v8799_v33 }
 0x8ff   :  { %v2045_v59 = vpop.f32.mrf.mxu0  ;;  %v2133_v40 = vpop.f32.mrf.mxu1 }
 0x901   :  { %v7787_v3 = vpop.f32.mrf.mxu0  ;;  %v7811_v2 = vpop.f32.mrf.mxu1 }
 0x903   :  { %v2048_v39 = vpop.f32.mrf.mxu0  ;;  %v2136_v53 = vpop.f32.mrf.mxu1 }
 0x904   :  { %v9546_v30 = vpack.c.bf16 %v2048_v39, %v2045_v59  ;;  %v9548_v18 = vpack.c.bf16 %v2136_v53, %v2133_v40  ;;  %v9639_v40 = vsel %vm1790_vm4, 0.0, %v8799_v33 }
 0x905   :  { %v7788_v60 = vpop.f32.mrf.mxu0  ;;  %v7812_v22 = vpop.f32.mrf.mxu1 }
 0x906   :  { %v9577_v62 = vsel %vm386_vm2, %v9546_v30, 0 }
 0x907   :  { %v2053_v31 = vpop.f32.mrf.mxu0  ;;  %v2141_v1 = vpop.f32.mrf.mxu1 }
 0x908   :  { %v9542_v15 = vpack.c.bf16 %v2053_v31, %v2053_v31  ;;  %v9544_v55 = vpack.c.bf16 %v2141_v1, %v2141_v1 }
 0x909   :  { %v7791_v51 = vpop.f32.mrf.mxu0  ;;  %v7815_v32 = vpop.f32.mrf.mxu1 }
 0x90a   :  { %8250 = vmatprep.subr.msk.bf16.mxu1 %vm386_vm2, %v9542_v15  ;;  %8255 = vmatprep.subr.msk.bf16.mxu0 %vm245_vm0, %v9544_v55  ;;  %v9556_v34 = vsel %vm386_vm2, %v9542_v15, 0  ;;  %v9560_v27 = vsel %vm245_vm0, %v9544_v55, 0 }
 0x90b   :  { %v2056_v48 = vpop.f32.mrf.mxu0  ;;  %v2144_v36 = vpop.f32.mrf.mxu1  ;;  %7826 = vmatpush3.bf16.xpose.msra.mxu1 %v9556_v34  ;;  %7840 = vmatpush3.bf16.msra.mxu0 %v9560_v27 }
 0x90c   :  { %8251 = vmatprep.subr.msk.bf16.mxu1 %vm386_vm2, %v9546_v30  ;;  %7841 = vmatprep.subr.bf16.mxu0 %v9548_v18 }
 0x90d   :  { %v7792_v37 = vpop.f32.mrf.mxu0  ;;  %v7816_v57 = vpop.f32.mrf.mxu1 }
 0x90f   :  { %v7823_v6 = vpop.f32.mrf.mxu0  ;;  %7842 = vmatpush3.bf16.msra.mxu0 %v9548_v18 }
 0x910   :  { %7843 = vmatprep.subr.bf16.mxu0 %v9567_v46 }
 0x911   :  { %v2309_v50 = vpop.f32.mrf.mxu0 }
 0x913   :  { %v7824_v54 = vpop.f32.mrf.mxu0  ;;  %7828 = vmatpush3.bf16.xpose.msra.mxu1 %v9577_v62  ;;  %7844 = vmatpush3.bf16.msra.mxu0 %v9567_v46 }
 0x914   :  { %8252 = vmatprep.subr.msk.bf16.mxu1 %vm386_vm2, %v9573_v14  ;;  %7845 = vmatprep.subr.bf16.mxu0 %v9571_v35  ;;  %v2325_v45 = vpack.c.bf16 %v7824_v54, %v7823_v6 }
 0x915   :  { %v2312_v25 = vpop.f32.mrf.mxu0 }
 0x916   :  { %v2324_v28 = vpack.c.bf16 %v2312_v25, %v2309_v50 }
 0x917   :  { %7846 = vmatpush3.bf16.msra.mxu0 %v9571_v35 }
 0x918   :  { %7835 = vmatprep.mubr.msk.bf16.mxu1 %vm386_vm2, %v2324_v28  ;;  %7847 = vmatprep.subr.bf16.mxu0 %v9585_v11 }
 0x91b   :  { %7830 = vmatpush3.bf16.xpose.msra.mxu1 %v9595_v44  ;;  %7848 = vmatpush3.bf16.msra.mxu0 %v9585_v11 }
 0x91c   :  { %8253 = vmatprep.subr.msk.bf16.mxu1 %vm386_vm2, %v9591_v24 }
 0x923   :  { %7832 = vmatpush3.bf16.xpose.msra.mxu1 %v9607_v19 }
 0x924   :  { %8254 = vmatprep.subr.msk.bf16.mxu1 %vm386_vm2, %v9603_v38 }
 0x92b   :  { %7834 = vmatpush3.bf16.xpose.msra.mxu1 %v9614_v10 }
 0x932   :  { %7836 = vmatmul.mubr.msk.bf16.vlgmr.msra.gmra.mxu1 %vm386_vm2, %v2325_v45 }
 0x9f2   :  { %v7837_v63 = vpop.f32.mrf.mxu1 }
 0x9f3   :  { %v2403_v52 = vmul.f32 0.17677669, %v7837_v63 }
 0x9f4   :  { %v2386_v61 = vpop.f32.mrf.mxu1 }
 0x9f5   :  { %v2401_v5 = vmul.f32 0.17677669, %v2386_v61  ;;  %v2407_v2 = vadd.f32 %v2403_v52, %v9633_v29 }
 0x9f6   :  { %v7838_v47 = vpop.f32.mrf.mxu1 }
 0x9f7   :  { %v2404_v59 = vmul.f32 0.17677669, %v7838_v47  ;;  %v2405_v39 = vadd.f32 %v2401_v5, %v9635_v0  ;;  %v2411_v1 = vsel %vm226_vm1, %v2407_v2, -inf }
 0x9f8   :  { %v2389_v3 = vpop.f32.mrf.mxu1 }
 0x9f9   :  { %v2408_v53 = vadd.f32 %v2404_v59, %v9637_v41  ;;  %v2402_v60 = vmul.f32 0.17677669, %v2389_v3  ;;  %v2409_v51 = vsel %vm226_vm1, %v2405_v39, -inf }
 0x9fb   :  { %v2412_v22 = vsel %vm226_vm1, %v2408_v53, -inf  ;;  %v2406_v31 = vadd.f32 %v2402_v60, %v9639_v40 }
 0x9fc   :  { %v2414_v48 = vmax.f32 %v2411_v1, %v2412_v22 }
 0x9fd   :  { %v2410_v32 = vsel %vm226_vm1, %v2406_v31, -inf }
 0x9fe   :  { %v2413_v36 = vmax.f32 %v2409_v51, %v2410_v32 }
 0xa00   :  { %v2415_v37 = vmax.f32 %v2413_v36, %v2414_v48 }
 0xa02   :  { %v2416_v57 = vrot.slane %v2415_v37, 4 }
 0xa04   :  { %v2417_v6 = vmax.f32 %v2415_v37, %v2416_v57 }
 0xa06   :  { %v2418_v50 = vrot.slane %v2417_v6, 2 }
 0xa08   :  { %v2419_v54 = vmax.f32 %v2417_v6, %v2418_v50 }
 0xa0a   :  { %v2420_v25 = vrot.slane %v2419_v54, 1 }
 0xa0c   :  { %v2421_v28 = vmax.f32 %v2419_v54, %v2420_v25  ;;  %v9654_v25 = vmul.f32 1e-08, %v9627_v43 }
 0xa0e   :  { %v2422_v45 = vsub.f32 %v2405_v39, %v2421_v28  ;;  %v2423_v63 = vsub.f32 %v2406_v31, %v2421_v28  ;;  %v2424_v61 = vsub.f32 %v2407_v2, %v2421_v28  ;;  %v2425_v52 = vsub.f32 %v2408_v53, %v2421_v28 }
 0xa0f   :  { %v9657_v28 = vmul.f32 1e-08, %v9623_v21 }
 0xa10   :  { %v2426_v5 = vmul.f32 1.442695, %v2422_v45  ;;  %v2428_v33 = vmul.f32 1.442695, %v2423_v63  ;;  %v2430_v47 = vmul.f32 1.442695, %v2424_v61 }
 0xa11   :  { %v2432_v59 = vmul.f32 1.442695, %v2425_v52  ;;  %v9660_v63 = vmul.f32 1e-08, %v9625_v58  ;;  %v9663_v61 = vmul.f32 1e-08, %v9621_v13 }
 0xa12   :  { %8401 = vpow2.f32 %v2426_v5 }
 0xa13   :  { %8403 = vpow2.f32 %v2428_v33 }
 0xa14   :  { %8405 = vpow2.f32 %v2430_v47 }
 0xa15   :  { %8407 = vpow2.f32 %v2432_v59 }
 0xa1f   :  { %v8402_v3 = vpop.eup %8401 }
 0xa20   :  { %v8404_v60 = vpop.eup %8403  ;;  %v2434_v22 = vsel %vm226_vm1, %v8402_v3, 0.0 }
 0xa21   :  { %v8406_v1 = vpop.eup %8405  ;;  %v2435_v51 = vsel %vm226_vm1, %v8404_v60, 0.0 }
 0xa22   :  { %v8408_v32 = vpop.eup %8407  ;;  %v2436_v39 = vadd.f32 %v2435_v51, %v2434_v22  ;;  %v2437_v2 = vsel %vm226_vm1, %v8406_v1, 0.0 }
 0xa23   :  { %v2439_v31 = vsel %vm226_vm1, %v8408_v32, 0.0 }
 0xa24   :  { %v2438_v53 = vadd.f32 %v2437_v2, %v2436_v39 }
 0xa26   :  { %v2440_v48 = vadd.f32 %v2439_v31, %v2438_v53 }
 0xa28   :  { %v2441_v36 = vrot.slane %v2440_v48, 4 }
 0xa2a   :  { %v2442_v37 = vadd.f32 %v2441_v36, %v2440_v48 }
 0xa2c   :  { %v2443_v57 = vrot.slane %v2442_v37, 2 }
 0xa2e   :  { %v2444_v6 = vadd.f32 %v2443_v57, %v2442_v37 }
 0xa30   :  { %v2445_v50 = vrot.slane %v2444_v6, 1 }
 0xa32   :  { %v2446_v54 = vadd.f32 %v2445_v50, %v2444_v6 }
 0xa34   :  { %8409 = vrcp.f32 %v2446_v54 }
 0xa41   :  { %v8410_v45 = vpop.eup %8409 }
 0xa42   :  { %v2449_v52 = vmul.f32 %v8410_v45, %v8404_v60  ;;  %v2448_v5 = vmul.f32 %v8410_v45, %v8402_v3  ;;  %v2451_v33 = vmul.f32 %v8410_v45, %v8408_v32  ;;  %v2450_v47 = vmul.f32 %v8410_v45, %v8406_v1  ;;  %v9681_v45 = vld [vmem:[%s9678_s25 + $0x8] sm:$0xff]  }
 0xa43   :  { %7853 = vmatprep.subr.bf16.mxu0 %v9681_v45 }
 0xa44   :  { %v2453_v59 = vadd.f32 %v2449_v52, %v9654_v25  ;;  %v2452_v22 = vadd.f32 %v2448_v5, %v9657_v28  ;;  %v2455_v51 = vadd.f32 %v2451_v33, %v9660_v63  ;;  %v2454_v58 = vadd.f32 %v2450_v47, %v9663_v61  ;;  %v8354_v52 = vld [vmem:[%s9678_s25 + $0x18] sm:$0xff]   ;;  %v8355_v5 = vld [vmem:[%s9678_s25] sm:$0xff]   ;;  %v8356_v33 = vld [vmem:[%s9678_s25 + $0x10] sm:$0xff]  }
 0xa45   :  { %7869 = vmatprep.subr.bf16.mxu1 %v8354_v52  ;;  %v8357_v47 = vld [vmem:[%s9688_s29 + $0x8] sm:$0xff]  }
 0xa46   :  { %v2459_v43 = vsel %vm226_vm1, %v2453_v59, 0.0  ;;  %v2456_v21 = vsel %vm226_vm1, %v2452_v22, 0.0  ;;  %v2465_v13 = vsel %vm226_vm1, %v2455_v51, 0.0  ;;  %v2462_v3 = vsel %vm226_vm1, %v2454_v58, 0.0  ;;  %7870 = vmatpush3.bf16.msra.mxu1 %v8354_v52 }
 0xa47   :  { %2460 = vadd.xlane.f32.xlu1 %v2459_v43  ;;  %2457 = vadd.xlane.f32.xlu0 %v2456_v21 }
 0xa48   :  { %7871 = vmatprep.subr.bf16.mxu1 %v8356_v33 }
 0xa4a   :  { %7872 = vmatpush3.bf16.msra.mxu1 %v8356_v33 }
 0xa4b   :  { %2466 = vadd.xlane.f32.xlu1 %v2465_v13  ;;  %2463 = vadd.xlane.f32.xlu0 %v2462_v3  ;;  %v8359_v3 = vld [vmem:[%s9688_s29] sm:$0xff]  }
 0xad0   :  { %v2461_v60 = vpop.xlane.xlu1 %2460  ;;  %v2458_v1 = vpop.xlane.xlu0 %2457 }
 0xad1   :  { %8411 = vrcp.f32 %v2461_v60  ;;  %v8360_v60 = vld [vmem:[%s9678_s25 + $0x20] sm:$0xff]  }
 0xad2   :  { %8413 = vrcp.f32 %v2458_v1  ;;  %v2625_v1 = vpack.c.bf16 %v9299_v12, %v9287_v56 }
 0xad4   :  { %v2467_v32 = vpop.xlane.xlu1 %2466  ;;  %v2464_v39 = vpop.xlane.xlu0 %2463 }
 0xad5   :  { %8415 = vrcp.f32 %v2467_v32  ;;  %v9710_v32 = vld [vmem:[%s9688_s29 + $0x18] sm:$0xff]  }
 0xad6   :  { %8417 = vrcp.f32 %v2464_v39  ;;  %v2626_v39 = vpack.c.bf16 %v9315_v7, %v9297_v42 }
 0xade   :  { %v8412_v2 = vpop.eup %8411 }
 0xadf   :  { %v8414_v53 = vpop.eup %8413  ;;  %v2473_v31 = vmul.f32 %v8412_v2, %v2453_v59  ;;  %v8358_v59 = vld [vmem:[%s9678_s25 + $0x28] sm:$0xff]   ;;  %v9717_v2 = vld [vmem:[%s9688_s29 + $0x10] sm:$0xff]  }
 0xae0   :  { %v2472_v48 = vmul.f32 %v8414_v53, %v2452_v22  ;;  %7885 = vmatprep.subr.bf16.mxu1 %v8358_v59  ;;  %v9725_v53 = vld [vmem:[%s9688_s29 + $0x28] sm:$0xff]  }
 0xae2   :  { %v8416_v36 = vpop.eup %8415  ;;  %v2476_v37 = vpack.c.bf16 %v2473_v31, %v2472_v48  ;;  %v9730_v31 = vld [vmem:[%s9688_s29 + $0x20] sm:$0xff]   ;;  %v9737_v48 = vld [vmem:[%s9698_s3 + $0x18] sm:$0xff]  }
 0xae3   :  { %v8418_v57 = vpop.eup %8417  ;;  %v2475_v6 = vmul.f32 %v8416_v36, %v2455_v51  ;;  %v9742_v36 = vld [vmem:[%s9698_s3 + $0x10] sm:$0xff]  }
 0xae4   :  { %7849 = vmatprep.mubr.msk.bf16.mxu0 %vm226_vm1, %v2476_v37  ;;  %v2474_v50 = vmul.f32 %v8418_v57, %v2454_v58 }
 0xae6   :  { %v2477_v54 = vpack.c.bf16 %v2475_v6, %v2474_v50  ;;  %v9761_v6 = vld [vmem:[%s9753_s7] ss:$0 sm:$0xff] }
 0xae8   :  { %7850 = vmatmul.mubr.msk.bf16.vlgmr.msra.gmra.mxu0 %vm226_vm1, %v2477_v54 }
 0xae9   :  { %7854 = vmatpush3.bf16.msra.mxu0 %v9681_v45 }
 0xaea   :  { %7855 = vmatprep.subr.bf16.mxu0 %v8355_v5 }
 0xaed   :  { %7856 = vmatpush3.bf16.msra.mxu0 %v8355_v5 }
 0xaee   :  { %7861 = vmatprep.subr.bf16.mxu0 %v8357_v47 }
 0xba8   :  { %v7851_v22 = vpop.f32.mrf.mxu0 }
 0xbaa   :  { %v2526_v43 = vpop.f32.mrf.mxu0 }
 0xbac   :  { %v7852_v21 = vpop.f32.mrf.mxu0 }
 0xbad   :  { %v2546_v13 = vpack.c.bf16 %v7852_v21, %v7851_v22 }
 0xbae   :  { %v2529_v51 = vpop.f32.mrf.mxu0 }
 0xbaf   :  { %v2545_v58 = vpack.c.bf16 %v2529_v51, %v2526_v43  ;;  %v9769_v51 = vld [vmem:[%s9753_s7 + $0x1] ss:$0 sm:$0xff] }
 0xbb1   :  { %7857 = vmatprep.mubr.msk.bf16.mxu0 %vm386_vm2, %v2545_v58  ;;  %7873 = vmatprep.mubr.msk.bf16.mxu1 %vm386_vm2, %v2545_v58 }
 0xbb2   :  { %7858 = vmatmul.mubr.msk.bf16.vlgmr.msra.gmra.mxu0 %vm386_vm2, %v2546_v13  ;;  %7874 = vmatmul.mubr.msk.bf16.vlgmr.msra.gmra.mxu1 %vm386_vm2, %v2546_v13 }
 0xbb3   :  { %7862 = vmatpush3.bf16.msra.mxu0 %v8357_v47  ;;  %7886 = vmatpush3.bf16.msra.mxu1 %v8358_v59  ;;  %v9765_v47 = vld [vmem:[%s9758_s12] ss:$0 sm:$0xff] }
 0xbb4   :  { %7889 = vmatprep.mubr.msk.bf16.mxu1 %vm386_vm2, %v2545_v58  ;;  %7863 = vmatprep.subr.bf16.mxu0 %v8359_v3 }
 0xbb5   :  { %7887 = vmatprep.subr.bf16.mxu1 %v8360_v60  ;;  %7865 = vmatprep.mubr.msk.bf16.mxu0 %vm386_vm2, %v2625_v1 }
 0xbb7   :  { %7864 = vmatpush3.bf16.msra.mxu0 %v8359_v3  ;;  %7888 = vmatpush3.bf16.msra.mxu1 %v8360_v60 }
 0xbb8   :  { %7877 = vmatprep.subr.bf16.mxu0 %v9710_v32 }
 0xbba   :  { %7866 = vmatmul.mubr.msk.bf16.vlgmr.msra.gmra.mxu0 %vm386_vm2, %v2626_v39  ;;  %7890 = vmatmul.mubr.msk.bf16.vlgmr.msra.gmra.mxu1 %vm386_vm2, %v2546_v13 }
 0xbbb   :  { %7878 = vmatpush3.bf16.msra.mxu0 %v9710_v32  ;;  %7881 = vmatprep.mubr.msk.bf16.mxu0 %vm386_vm2, %v2625_v1 }
 0xbbc   :  { %7879 = vmatprep.subr.bf16.mxu0 %v9717_v2 }
 0xbbf   :  { %7880 = vmatpush3.bf16.msra.mxu0 %v9717_v2 }
 0xbc0   :  { %7893 = vmatprep.subr.bf16.mxu0 %v9725_v53 }
 0xbc2   :  { %7882 = vmatmul.mubr.msk.bf16.vlgmr.msra.gmra.mxu0 %vm386_vm2, %v2626_v39 }
 0xbc3   :  { %7894 = vmatpush3.bf16.msra.mxu0 %v9725_v53  ;;  %7897 = vmatprep.mubr.msk.bf16.mxu0 %vm386_vm2, %v2625_v1 }
 0xbc4   :  { %7895 = vmatprep.subr.bf16.mxu0 %v9730_v31 }
 0xbc7   :  { %7896 = vmatpush3.bf16.msra.mxu0 %v9730_v31 }
 0xbc8   :  { %7909 = vmatprep.subr.bf16.mxu0 %v9737_v48 }
 0xbca   :  { %7898 = vmatmul.mubr.msk.bf16.vlgmr.msra.gmra.mxu0 %vm386_vm2, %v2626_v39 }
 0xbcb   :  { %7910 = vmatpush3.bf16.msra.mxu0 %v9737_v48 }
 0xbcc   :  { %7911 = vmatprep.subr.bf16.mxu0 %v9742_v36 }
 0xbcf   :  { %7912 = vmatpush3.bf16.msra.mxu0 %v9742_v36 }
 0xbd0   :  { %8256 = vmatprep.subr.msk.bf16.mxu0 %vm386_vm2, %v9542_v15 }
 0xc72   :  { %v7859_v37 = vpop.f32.mrf.mxu0  ;;  %v7875_v54 = vpop.f32.mrf.mxu1 }
 0xc73   :  { %v2615_v5 = vadd.f32 %v7859_v37, %v9761_v6 }
 0xc74   :  { %v2606_v57 = vpop.f32.mrf.mxu0  ;;  %v2792_v43 = vpop.f32.mrf.mxu1 }
 0xc75   :  { %v2607_v59 = vadd.f32 %v9761_v6, %v2606_v57  ;;  %v2801_v57 = vadd.f32 %v7875_v54, %v9769_v51 }
 0xc76   :  { %v7860_v50 = vpop.f32.mrf.mxu0 }
 0xc77   :  { %v2618_v58 = vadd.f32 %v7860_v50, %v9761_v6 }
 0xc78   :  { %v2609_v52 = vpop.f32.mrf.mxu0 }
 0xc79   :  { %v2610_v1 = vadd.f32 %v9761_v6, %v2609_v52 }
 0xc7a   :  { %v7867_v33 = vpop.f32.mrf.mxu0 }
 0xc7b   :  { %v2696_v22 = vadd.f32 %v7867_v33, %v2615_v5  ;;  %v7876_v5 = vpop.f32.mrf.mxu1 }
 0xc7c   :  { %v2679_v21 = vpop.f32.mrf.mxu0 }
 0xc7d   :  { %v2707_v13 = vadd.f32 %v9765_v47, %v2696_v22  ;;  %v2694_v3 = vadd.f32 %v2679_v21, %v2607_v59  ;;  %v2793_v22 = vadd.f32 %v9769_v51, %v2792_v43  ;;  %v9779_v59 = vld [vmem:[%s9758_s12 + $0x1] ss:$0 sm:$0xff]  ;;  %v2795_v54 = vpop.f32.mrf.mxu1 }
 0xc7e   :  { %v7868_v60 = vpop.f32.mrf.mxu0  ;;  %11077 = vst [vmem:[#allocation15_spill] sm:$0xff] %v9779_v59  ;;  %v2796_v43 = vadd.f32 %v9769_v51, %v2795_v54 }
 0xc7f   :  { %v7000_v39 = vmul.f32 -1.442695, %v2707_v13  ;;  %v2705_v37 = vadd.f32 %v9765_v47, %v2694_v3  ;;  %v2697_v49 = vadd.f32 %v7868_v60, %v2618_v58  ;;  %v2804_v58 = vadd.f32 %v7876_v5, %v9769_v51 }
 0xc80   :  { %v2682_v33 = vpop.f32.mrf.mxu0 }
 0xc81   :  { %8419 = vpow2.f32 %v7000_v39  ;;  %v6998_v4 = vmul.f32 -1.442695, %v2705_v37  ;;  %v2708_v23 = vadd.f32 %v9765_v47, %v2697_v49  ;;  %v2695_v50 = vadd.f32 %v2682_v33, %v2610_v1 }
 0xc82   :  { %v7883_v17 = vpop.f32.mrf.mxu0 }
 0xc83   :  { %8421 = vpow2.f32 %v6998_v4  ;;  %v7001_v52 = vmul.f32 -1.442695, %v2708_v23  ;;  %v2706_v21 = vadd.f32 %v9765_v47, %v2695_v50  ;;  %v2875_v13 = vadd.f32 %v7883_v17, %v2801_v57 }
 0xc84   :  { %v2858_v3 = vpop.f32.mrf.mxu0 }
 0xc85   :  { %8423 = vpow2.f32 %v7001_v52  ;;  %v6999_v60 = vmul.f32 -1.442695, %v2706_v21  ;;  %v2887_v39 = vadd.f32 %v9779_v59, %v2875_v13  ;;  %v2873_v49 = vadd.f32 %v2858_v3, %v2793_v22 }
 0xc86   :  { %v7884_v1 = vpop.f32.mrf.mxu0 }
 0xc87   :  { %8425 = vpow2.f32 %v6999_v60  ;;  %v2885_v37 = vadd.f32 %v9779_v59, %v2873_v49  ;;  %v2876_v4 = vadd.f32 %v7884_v1, %v2804_v58  ;;  %v7024_v23 = vmul.f32 -1.442695, %v2887_v39 }
 0xc88   :  { %v2861_v33 = vpop.f32.mrf.mxu0 }
 0xc89   :  { %v7022_v50 = vmul.f32 -1.442695, %v2885_v37  ;;  %v2888_v17 = vadd.f32 %v9779_v59, %v2876_v4  ;;  %v2874_v57 = vadd.f32 %v2861_v33, %v2796_v43  ;;  %8427 = vpow2.f32 %v7024_v23  ;;  %v7891_v43 = vpop.f32.mrf.mxu1  ;;  %v9789_v37 = vld [vmem:[%s9758_s12 + $0x2] ss:$0 sm:$0xff] }
 0xc8a   :  { %v7899_v49 = vpop.f32.mrf.mxu0 }
 0xc8b   :  { %v7025_v5 = vmul.f32 -1.442695, %v2888_v17  ;;  %v2886_v52 = vadd.f32 %v9779_v59, %v2874_v57  ;;  %8429 = vpow2.f32 %v7022_v50  ;;  %v2972_v50 = vpop.f32.mrf.mxu1  ;;  %v3055_v57 = vadd.f32 %v7899_v49, %v9789_v37 }
 0xc8c   :  { %v3046_v4 = vpop.f32.mrf.mxu0 }
 0xc8d   :  { %v7023_v21 = vmul.f32 -1.442695, %v2886_v52  ;;  %8431 = vpow2.f32 %v7025_v5  ;;  %v9793_v5 = vld [vmem:[%s9753_s7 + $0x2] ss:$0 sm:$0xff] }
 0xc8e   :  { %v8420_v22 = vpop.eup %8419  ;;  %v2973_v9 = vadd.f32 %v9793_v5, %v2972_v50 }
 0xc8f   :  { %v2723_v13 = vadd.f32 1.0, %v8420_v22  ;;  %8433 = vpow2.f32 %v7023_v21  ;;  %v7900_v21 = vpop.f32.mrf.mxu0 }
 0xc90   :  { %v8422_v54 = vpop.eup %8421  ;;  %v3058_v8 = vadd.f32 %v7900_v21, %v9789_v37 }
 0xc91   :  { %8435 = vrcp.f32 %v2723_v13  ;;  %v2721_v58 = vadd.f32 1.0, %v8422_v54  ;;  %v3049_v49 = vpop.f32.mrf.mxu0 }
 0xc92   :  { %v8424_v3 = vpop.eup %8423 }
 0xc93   :  { %8437 = vrcp.f32 %v2721_v58  ;;  %v2724_v60 = vadd.f32 1.0, %v8424_v3  ;;  %v7892_v58 = vpop.f32.mrf.mxu1 }
 0xc94   :  { %v8426_v39 = vpop.eup %8425  ;;  %v2984_v59 = vadd.f32 %v7892_v58, %v9793_v5 }
 0xc95   :  { %8439 = vrcp.f32 %v2724_v60  ;;  %v2722_v1 = vadd.f32 1.0, %v8426_v39  ;;  %v2981_v60 = vadd.f32 %v7891_v43, %v9793_v5 }
 0xc96   :  { %v8428_v23 = vpop.eup %8427 }
 0xc97   :  { %8441 = vrcp.f32 %v2722_v1  ;;  %v2903_v52 = vadd.f32 1.0, %v8428_v23  ;;  %v3047_v1 = vadd.f32 %v9789_v37, %v3046_v4  ;;  %v3050_v4 = vadd.f32 %v9789_v37, %v3049_v49 }
 0xc98   :  { %v8430_v33 = vpop.eup %8429 }
 0xc99   :  { %v2901_v13 = vadd.f32 1.0, %v8430_v33  ;;  %8443 = vrcp.f32 %v2903_v52 }
 0xc9a   :  { %v8432_v17 = vpop.eup %8431 }
 0xc9b   :  { %v2904_v3 = vadd.f32 1.0, %v8432_v17  ;;  %8445 = vrcp.f32 %v2901_v13  ;;  %v2975_v17 = vpop.f32.mrf.mxu1 }
 0xc9c   :  { %v8434_v22 = vpop.eup %8433  ;;  %v2976_v50 = vadd.f32 %v9793_v5, %v2975_v17 }
 0xc9d   :  { %v2902_v20 = vadd.f32 1.0, %v8434_v22  ;;  %8447 = vrcp.f32 %v2904_v3 }
 0xc9e   :  { %v8436_v54 = vpop.eup %8435 }
 0xc9f   :  { %v3063_v39 = vmul.f32 %v8436_v54, %v3055_v57 }
 0xca0   :  { %v8438_v16 = vpop.eup %8437 }
 0xca1   :  { %v3067_v26 = vadd.f32 %v3063_v39, %v2981_v60  ;;  %v3061_v23 = vmul.f32 %v8438_v16, %v3047_v1 }
 0xca2   :  { %v8440_v33 = vpop.eup %8439 }
 0xca3   :  { %8449 = vtanh.f32 %v3067_v26  ;;  %v3065_v43 = vadd.f32 %v3061_v23, %v2973_v9  ;;  %v3064_v57 = vmul.f32 %v8440_v33, %v3058_v8 }
 0xca4   :  { %v8442_v54 = vpop.eup %8441  ;;  %8451 = vrcp.f32 %v2902_v20 }
 0xca5   :  { %8453 = vtanh.f32 %v3065_v43  ;;  %v3068_v52 = vadd.f32 %v3064_v57, %v2984_v59  ;;  %v3062_v22 = vmul.f32 %v8442_v54, %v3050_v4 }
 0xca6   :  { %v8444_v21 = vpop.eup %8443 }
 0xca7   :  { %8455 = vtanh.f32 %v3068_v52  ;;  %v3066_v16 = vadd.f32 %v3062_v22, %v2976_v50  ;;  %v3075_v9 = vsub.f32 1.0, %v8444_v21  ;;  %v3083_v33 = vmul.f32 %v8444_v21, %v9297_v42 }
 0xca8   :  { %v8446_v13 = vpop.eup %8445 }
 0xca9   :  { %8457 = vtanh.f32 %v3066_v16  ;;  %v3073_v26 = vsub.f32 1.0, %v8446_v13  ;;  %v3081_v1 = vmul.f32 %v8446_v13, %v9287_v56 }
 0xcaa   :  { %v8448_v58 = vpop.eup %8447 }
 0xcab   :  { %v3076_v17 = vsub.f32 1.0, %v8448_v58  ;;  %v3084_v22 = vmul.f32 %v8448_v58, %v9315_v7 }
 0xcb0   :  { %v8450_v60 = vpop.eup %8449 }
 0xcb1   :  { %v8452_v3 = vpop.eup %8451  ;;  %v3079_v20 = vmul.f32 %v8450_v60, %v3075_v9 }
 0xcb2   :  { %v8454_v8 = vpop.eup %8453  ;;  %v3074_v59 = vsub.f32 1.0, %v8452_v3  ;;  %v3082_v57 = vmul.f32 %v8452_v3, %v9299_v12 }
 0xcb3   :  { %v3077_v39 = vmul.f32 %v8454_v8, %v3073_v26  ;;  %v9809_v50 = vadd.f32 %v3083_v33, %v3079_v20 }
 0xcb4   :  { %v8456_v49 = vpop.eup %8455 }
 0xcb5   :  { %v9803_v23 = vadd.f32 %v3081_v1, %v3077_v39  ;;  %v3080_v52 = vmul.f32 %v8456_v49, %v3076_v17  ;;  %v3099_v42 = vsel %vm386_vm2, %v9809_v50, 0.0 }
 0xcb6   :  { %v8458_v43 = vpop.eup %8457 }
 0xcb7   :  { %v3093_v4 = vsel %vm386_vm2, %v9803_v23, 0.0  ;;  %v3078_v54 = vmul.f32 %v8458_v43, %v3074_v59  ;;  %v9818_v21 = vadd.f32 %v3084_v22, %v3080_v52  ;;  %v9831_v22 = vld [vmem:[%s9698_s3 + $0x8] sm:$0xff]  }
 0xcb8   :  { %3094 = vadd.xlane.f32.xlu0 %v3093_v4  ;;  %7901 = vmatprep.subr.bf16.mxu1 %v9831_v22 }
 0xcb9   :  { %v9811_v56 = vadd.f32 %v3082_v57, %v3078_v54  ;;  %v3102_v12 = vsel %vm386_vm2, %v9818_v21, 0.0  ;;  %7902 = vmatpush3.bf16.msra.mxu1 %v9831_v22 }
 0xcbb   :  { %v3096_v16 = vsel %vm386_vm2, %v9811_v56, 0.0 }
 0xcbc   :  { %3097 = vadd.xlane.f32.xlu1 %v3096_v16  ;;  %3100 = vadd.xlane.f32.xlu0 %v3099_v42  ;;  %v9836_v16 = vld [vmem:[%s9698_s3] sm:$0xff]   ;;  %v9841_v42 = vld [vmem:[%s9447_s9 + $0x8] sm:$0xff]  }
 0xcbd   :  { %7903 = vmatprep.subr.bf16.mxu1 %v9836_v16 }
 0xcbe   :  { %7904 = vmatpush3.bf16.msra.mxu1 %v9836_v16 }
 0xcbf   :  { %7917 = vmatprep.subr.bf16.mxu1 %v9841_v42 }
 0xcc0   :  { %3103 = vadd.xlane.f32.xlu1 %v3102_v12 }
 0xd41   :  { %v3095_v13 = vpop.xlane.xlu0 %3094 }
 0xd42   :  { %v3105_v60 = vmul.f32 0.03125, %v3095_v13 }
 0xd44   :  { %v3109_v3 = vsub.f32 %v9803_v23, %v3105_v60 }
 0xd45   :  { %v3098_v26 = vpop.xlane.xlu1 %3097  ;;  %v3101_v7 = vpop.xlane.xlu0 %3100 }
 0xd46   :  { %v3106_v58 = vmul.f32 0.03125, %v3098_v26  ;;  %v3107_v9 = vmul.f32 0.03125, %v3101_v7  ;;  %v3113_v8 = vmul.f32 %v3109_v3, %v3109_v3 }
 0xd48   :  { %v3110_v39 = vsub.f32 %v9811_v56, %v3106_v58  ;;  %v3111_v1 = vsub.f32 %v9809_v50, %v3107_v9  ;;  %v3117_v20 = vsel %vm386_vm2, %v3113_v8, 0.0 }
 0xd49   :  { %v3104_v49 = vpop.xlane.xlu1 %3103  ;;  %3118 = vadd.xlane.f32.xlu0 %v3117_v20 }
 0xd4a   :  { %v3108_v59 = vmul.f32 0.03125, %v3104_v49  ;;  %v3114_v33 = vmul.f32 %v3110_v39, %v3110_v39  ;;  %v3115_v17 = vmul.f32 %v3111_v1, %v3111_v1 }
 0xd4c   :  { %v3112_v43 = vsub.f32 %v9818_v21, %v3108_v59  ;;  %v3120_v57 = vsel %vm386_vm2, %v3114_v33, 0.0  ;;  %v3123_v4 = vsel %vm386_vm2, %v3115_v17, 0.0 }
 0xd4d   :  { %3121 = vadd.xlane.f32.xlu1 %v3120_v57  ;;  %3124 = vadd.xlane.f32.xlu0 %v3123_v4  ;;  %v9845_v4 = vld [vmem:[%s9456_s13 + $0x2] ss:$0 sm:$0xff] }
 0xd4e   :  { %v3116_v54 = vmul.f32 %v3112_v43, %v3112_v43 }
 0xd50   :  { %v3126_v52 = vsel %vm386_vm2, %v3116_v54, 0.0 }
 0xd51   :  { %3127 = vadd.xlane.f32.xlu1 %v3126_v52 }
 0xdd2   :  { %v3119_v12 = vpop.xlane.xlu0 %3118 }
 0xdd3   :  { %v3129_v13 = vmul.f32 0.03125, %v3119_v12 }
 0xdd5   :  { %v3133_v60 = vadd.f32 1e-05, %v3129_v13 }
 0xdd6   :  { %v3122_v26 = vpop.xlane.xlu1 %3121  ;;  %v3125_v7 = vpop.xlane.xlu0 %3124 }
 0xdd7   :  { %8459 = vrsqrt.f32 %v3133_v60  ;;  %v3130_v58 = vmul.f32 0.03125, %v3122_v26  ;;  %v3131_v9 = vmul.f32 0.03125, %v3125_v7  ;;  %v9849_v26 = vld [vmem:[%s9461_s17 + $0x2] ss:$0 sm:$0xff] }
 0xdd9   :  { %v3134_v8 = vadd.f32 1e-05, %v3130_v58  ;;  %v3135_v20 = vadd.f32 1e-05, %v3131_v9 }
 0xdda   :  { %v3128_v49 = vpop.xlane.xlu1 %3127 }
 0xddb   :  { %8461 = vrsqrt.f32 %v3134_v8  ;;  %v3132_v59 = vmul.f32 0.03125, %v3128_v49 }
 0xddc   :  { %8463 = vrsqrt.f32 %v3135_v20 }
 0xddd   :  { %v3136_v33 = vadd.f32 1e-05, %v3132_v59 }
 0xddf   :  { %8465 = vrsqrt.f32 %v3136_v33 }
 0xde4   :  { %v8460_v17 = vpop.eup %8459 }
 0xde5   :  { %v3141_v57 = vmul.f32 %v8460_v17, %v3109_v3  ;;  %v9862_v17 = vld [vmem:[%s9447_s9] sm:$0xff]  }
 0xde7   :  { %v3151_v13 = vmul.f32 %v9845_v4, %v3141_v57 }
 0xde8   :  { %v8462_v54 = vpop.eup %8461 }
 0xde9   :  { %v8464_v52 = vpop.eup %8463  ;;  %v3142_v12 = vmul.f32 %v8462_v54, %v3110_v39  ;;  %v3161_v20 = vadd.f32 %v9849_v26, %v3151_v13  ;;  %v9874_v54 = vld [vmem:[%s9871_s18] ss:$0 sm:$0xff] }
 0xdea   :  { %v3143_v60 = vmul.f32 %v8464_v52, %v3111_v1 }
 0xdeb   :  { %v3152_v7 = vmul.f32 %v9845_v4, %v3142_v12 }
 0xdec   :  { %v8466_v58 = vpop.eup %8465  ;;  %v3153_v9 = vmul.f32 %v9845_v4, %v3143_v60 }
 0xded   :  { %v3144_v8 = vmul.f32 %v8466_v58, %v3112_v43  ;;  %v3162_v3 = vadd.f32 %v9849_v26, %v3152_v7 }
 0xdee   :  { %v3163_v39 = vadd.f32 %v9849_v26, %v3153_v9 }
 0xdef   :  { %v3154_v49 = vmul.f32 %v9845_v4, %v3144_v8  ;;  %v3169_v59 = vpack.c.bf16 %v3162_v3, %v3161_v20 }
 0xdf1   :  { %7905 = vmatprep.mubr.msk.bf16.mxu1 %vm386_vm2, %v3169_v59  ;;  %v3164_v1 = vadd.f32 %v9849_v26, %v3154_v49 }
 0xdf3   :  { %v3170_v33 = vpack.c.bf16 %v3164_v1, %v3163_v39 }
 0xdf5   :  { %7906 = vmatmul.mubr.msk.bf16.vlgmr.msra.gmra.mxu1 %vm386_vm2, %v3170_v33 }
 0xdf6   :  { %7918 = vmatpush3.bf16.msra.mxu1 %v9841_v42 }
 0xdf7   :  { %7919 = vmatprep.subr.bf16.mxu1 %v9862_v17 }
 0xdfa   :  { %7920 = vmatpush3.bf16.msra.mxu1 %v9862_v17 }
 0xdfb   :  { %8261 = vmatprep.subr.msk.bf16.mxu1 %vm245_vm0, %v9544_v55 }
 0xeb5   :  { %v7907_v43 = vpop.f32.mrf.mxu1 }
 0xeb6   :  { %v3239_v60 = vadd.f32 %v7907_v43, %v9874_v54 }
 0xeb7   :  { %v3230_v57 = vpop.f32.mrf.mxu1 }
 0xeb8   :  { %v3231_v12 = vadd.f32 %v9874_v54, %v3230_v57  ;;  %v3247_v3 = vmax.f32 %v3239_v60, 0.0  ;;  %v9899_v57 = vld [vmem:[%s9871_s18 + $0x1] ss:$0 sm:$0xff] }
 0xeb9   :  { %v7908_v52 = vpop.f32.mrf.mxu1  ;;  %11078 = vst [vmem:[#allocation16_spill] sm:$0xff] %v9899_v57 }
 0xeba   :  { %v3242_v13 = vadd.f32 %v7908_v52, %v9874_v54  ;;  %v3245_v8 = vmax.f32 %v3231_v12, 0.0 }
 0xebb   :  { %v3233_v7 = vpop.f32.mrf.mxu1 }
 0xebc   :  { %v3234_v58 = vadd.f32 %v9874_v54, %v3233_v7  ;;  %v3248_v9 = vmax.f32 %v3242_v13, 0.0 }
 0xebe   :  { %v3246_v20 = vmax.f32 %v3234_v58, 0.0  ;;  %v3255_v59 = vpack.c.bf16 %v3248_v9, %v3247_v3 }
 0xec0   :  { %v3254_v49 = vpack.c.bf16 %v3246_v20, %v3245_v8 }
 0xec2   :  { %7913 = vmatprep.mubr.msk.bf16.mxu0 %vm386_vm2, %v3254_v49 }
 0xec3   :  { %7914 = vmatmul.mubr.msk.bf16.vlgmr.msra.gmra.mxu0 %vm386_vm2, %v3255_v59 }
 0xec4   :  { %7926 = vmatpush3.bf16.xpose.msra.mxu0 %v9556_v34 }
 0xec5   :  { %8257 = vmatprep.subr.msk.bf16.mxu0 %vm386_vm2, %v9546_v30 }
 0xecc   :  { %7928 = vmatpush3.bf16.xpose.msra.mxu0 %v9577_v62 }
 0xecd   :  { %8258 = vmatprep.subr.msk.bf16.mxu0 %vm386_vm2, %v9573_v14 }
 0xed4   :  { %7930 = vmatpush3.bf16.xpose.msra.mxu0 %v9595_v44 }
 0xed5   :  { %8259 = vmatprep.subr.msk.bf16.mxu0 %vm386_vm2, %v9591_v24  ;;  %v9932_v24 = vld [vmem:[%s9456_s13 + $0x1] ss:$0 sm:$0xff] }
 0xedc   :  { %7932 = vmatpush3.bf16.xpose.msra.mxu0 %v9607_v19 }
 0xedd   :  { %8260 = vmatprep.subr.msk.bf16.mxu0 %vm386_vm2, %v9603_v38 }
 0xee4   :  { %7934 = vmatpush3.bf16.xpose.msra.mxu0 %v9614_v10 }
 0xee5   :  { %7977 = vmatprep.subr.bf16.mxu0 %v9710_v32 }
 0xf83   :  { %v7915_v39 = vpop.f32.mrf.mxu0 }
 0xf84   :  { %v3325_v33 = vadd.f32 %v7915_v39, %v9809_v50 }
 0xf85   :  { %v3308_v1 = vpop.f32.mrf.mxu0 }
 0xf86   :  { %v3323_v43 = vadd.f32 %v3308_v1, %v9803_v23  ;;  %v9905_v60 = vadd.f32 %v9899_v57, %v3325_v33 }
 0xf87   :  { %v7916_v52 = vpop.f32.mrf.mxu0 }
 0xf88   :  { %v9902_v12 = vadd.f32 %v9899_v57, %v3323_v43  ;;  %v3326_v7 = vadd.f32 %v7916_v52, %v9818_v21  ;;  %v3345_v8 = vsel %vm386_vm2, %v9905_v60, 0.0 }
 0xf89   :  { %v3311_v13 = vpop.f32.mrf.mxu0 }
 0xf8a   :  { %v3324_v58 = vadd.f32 %v3311_v13, %v9811_v56  ;;  %v3339_v9 = vsel %vm386_vm2, %v9902_v12, 0.0  ;;  %v9915_v50 = vadd.f32 %v9899_v57, %v3326_v7 }
 0xf8b   :  { %3340 = vadd.xlane.f32.xlu0 %v3339_v9 }
 0xf8c   :  { %v9912_v23 = vadd.f32 %v9899_v57, %v3324_v58  ;;  %v3348_v56 = vsel %vm386_vm2, %v9915_v50, 0.0 }
 0xf8e   :  { %v3342_v20 = vsel %vm386_vm2, %v9912_v23, 0.0 }
 0xf8f   :  { %3346 = vadd.xlane.f32.xlu0 %v3345_v8  ;;  %3343 = vadd.xlane.f32.xlu1 %v3342_v20 }
 0xf93   :  { %3349 = vadd.xlane.f32.xlu1 %v3348_v56 }
0x1014   :  { %v3341_v21 = vpop.xlane.xlu0 %3340 }
0x1015   :  { %v3351_v3 = vmul.f32 0.03125, %v3341_v21 }
0x1017   :  { %v3355_v49 = vsub.f32 %v9902_v12, %v3351_v3 }
0x1018   :  { %v3347_v59 = vpop.xlane.xlu0 %3346  ;;  %v3344_v39 = vpop.xlane.xlu1 %3343 }
0x1019   :  { %v3353_v1 = vmul.f32 0.03125, %v3347_v59  ;;  %v3352_v33 = vmul.f32 0.03125, %v3344_v39  ;;  %v3359_v43 = vmul.f32 %v3355_v49, %v3355_v49 }
0x101b   :  { %v3357_v52 = vsub.f32 %v9905_v60, %v3353_v1  ;;  %v3356_v13 = vsub.f32 %v9912_v23, %v3352_v33  ;;  %v3363_v7 = vsel %vm386_vm2, %v3359_v43, 0.0 }
0x101c   :  { %3364 = vadd.xlane.f32.xlu0 %v3363_v7  ;;  %v3350_v58 = vpop.xlane.xlu1 %3349 }
0x101d   :  { %v3354_v9 = vmul.f32 0.03125, %v3350_v58  ;;  %v3361_v8 = vmul.f32 %v3357_v52, %v3357_v52  ;;  %v3360_v20 = vmul.f32 %v3356_v13, %v3356_v13 }
0x101f   :  { %v3358_v56 = vsub.f32 %v9915_v50, %v3354_v9  ;;  %v3369_v21 = vsel %vm386_vm2, %v3361_v8, 0.0  ;;  %v3366_v3 = vsel %vm386_vm2, %v3360_v20, 0.0 }
0x1020   :  { %3370 = vadd.xlane.f32.xlu0 %v3369_v21  ;;  %3367 = vadd.xlane.f32.xlu1 %v3366_v3 }
0x1021   :  { %v3362_v59 = vmul.f32 %v3358_v56, %v3358_v56 }
0x1023   :  { %v3372_v39 = vsel %vm386_vm2, %v3362_v59, 0.0 }
0x1024   :  { %3373 = vadd.xlane.f32.xlu1 %v3372_v39 }
0x10a5   :  { %v3365_v1 = vpop.xlane.xlu0 %3364 }
0x10a6   :  { %v3375_v33 = vmul.f32 0.03125, %v3365_v1 }
0x10a8   :  { %v3379_v43 = vadd.f32 1e-05, %v3375_v33 }
0x10a9   :  { %v3371_v7 = vpop.xlane.xlu0 %3370  ;;  %v3368_v57 = vpop.xlane.xlu1 %3367 }
0x10aa   :  { %8467 = vrsqrt.f32 %v3379_v43  ;;  %v3377_v58 = vmul.f32 0.03125, %v3371_v7  ;;  %v3376_v10 = vmul.f32 0.03125, %v3368_v57 }
0x10ac   :  { %v3381_v9 = vadd.f32 1e-05, %v3377_v58  ;;  %v3380_v38 = vadd.f32 1e-05, %v3376_v10 }
0x10ad   :  { %v3374_v8 = vpop.xlane.xlu1 %3373 }
0x10ae   :  { %8469 = vrsqrt.f32 %v3381_v9  ;;  %v3378_v20 = vmul.f32 0.03125, %v3374_v8  ;;  %v9938_v9 = vld [vmem:[%s9461_s17 + $0x1] ss:$0 sm:$0xff] }
0x10af   :  { %8471 = vrsqrt.f32 %v3380_v38 }
0x10b0   :  { %v3382_v21 = vadd.f32 1e-05, %v3378_v20 }
0x10b2   :  { %8473 = vrsqrt.f32 %v3382_v21 }
0x10b7   :  { %v8468_v3 = vpop.eup %8467 }
0x10b8   :  { %v3387_v59 = vmul.f32 %v8468_v3, %v3355_v49 }
0x10ba   :  { %v3391_v43 = vmul.f32 %v9932_v24, %v3387_v59 }
0x10bb   :  { %v8470_v39 = vpop.eup %8469 }
0x10bc   :  { %v8472_v1 = vpop.eup %8471  ;;  %v3389_v33 = vmul.f32 %v8470_v39, %v3357_v52  ;;  %v3395_v38 = vadd.f32 %v9938_v9, %v3391_v43 }
0x10bd   :  { %v3388_v19 = vmul.f32 %v8472_v1, %v3356_v13 }
0x10be   :  { %v3393_v7 = vmul.f32 %v9932_v24, %v3389_v33  ;;  %v9960_v33 = vpack.c.bf16 %v9912_v23, %v9902_v12 }
0x10bf   :  { %v8474_v57 = vpop.eup %8473  ;;  %v3392_v10 = vmul.f32 %v9932_v24, %v3388_v19 }
0x10c0   :  { %v3390_v58 = vmul.f32 %v8474_v57, %v3358_v56  ;;  %v3397_v13 = vadd.f32 %v9938_v9, %v3393_v7 }
0x10c1   :  { %v3396_v49 = vadd.f32 %v9938_v9, %v3392_v10 }
0x10c2   :  { %v3394_v8 = vmul.f32 %v9932_v24, %v3390_v58 }
0x10c3   :  { %v3399_v52 = vpack.c.bf16 %v3396_v49, %v3395_v38 }
0x10c4   :  { %v3398_v20 = vadd.f32 %v9938_v9, %v3394_v8 }
0x10c5   :  { %7921 = vmatprep.mubr.msk.bf16.mxu1 %vm386_vm2, %v3399_v52 }
0x10c6   :  { %v3400_v21 = vpack.c.bf16 %v3398_v20, %v3397_v13 }
0x10c8   :  { %7922 = vmatmul.mubr.msk.bf16.vlgmr.msra.gmra.mxu1 %vm386_vm2, %v3400_v21 }
0x10c9   :  { %7940 = vmatpush3.bf16.msra.mxu1 %v9560_v27 }
0x10ca   :  { %7941 = vmatprep.subr.bf16.mxu1 %v9548_v18 }
0x10cd   :  { %7942 = vmatpush3.bf16.msra.mxu1 %v9548_v18 }
0x10ce   :  { %7943 = vmatprep.subr.bf16.mxu1 %v9567_v46 }
0x10d1   :  { %7944 = vmatpush3.bf16.msra.mxu1 %v9567_v46 }
0x10d2   :  { %7945 = vmatprep.subr.bf16.mxu1 %v9571_v35 }
0x10d5   :  { %7946 = vmatpush3.bf16.msra.mxu1 %v9571_v35 }
0x10d6   :  { %7947 = vmatprep.subr.bf16.mxu1 %v9585_v11 }
0x10d9   :  { %7948 = vmatpush3.bf16.msra.mxu1 %v9585_v11 }
0x10da   :  { %7953 = vmatprep.subr.bf16.mxu1 %v9681_v45  ;;  %v9970_v45 = vpack.c.bf16 %v9915_v50, %v9905_v60 }
0x1188   :  { %v7923_v19 = vpop.f32.mrf.mxu1 }
0x118a   :  { %v3441_v56 = vpop.f32.mrf.mxu1 }
0x118c   :  { %v7924_v3 = vpop.f32.mrf.mxu1 }
0x118d   :  { %v3457_v1 = vpack.c.bf16 %v7924_v3, %v7923_v19 }
0x118e   :  { %v3444_v59 = vpop.f32.mrf.mxu1 }
0x118f   :  { %v3456_v39 = vpack.c.bf16 %v3444_v59, %v3441_v56 }
0x1191   :  { %7935 = vmatprep.mubr.msk.bf16.mxu0 %vm386_vm2, %v3456_v39 }
0x1192   :  { %7936 = vmatmul.mubr.msk.bf16.vlgmr.msra.gmra.mxu0 %vm386_vm2, %v3457_v1 }
0x1193   :  { %7978 = vmatpush3.bf16.msra.mxu0 %v9710_v32  ;;  %7981 = vmatprep.mubr.msk.bf16.mxu0 %vm386_vm2, %v9960_v33 }
0x1194   :  { %7979 = vmatprep.subr.bf16.mxu0 %v9717_v2 }
0x1197   :  { %7980 = vmatpush3.bf16.msra.mxu0 %v9717_v2 }
0x1198   :  { %7993 = vmatprep.subr.bf16.mxu0 %v9725_v53 }
0x119a   :  { %7982 = vmatmul.mubr.msk.bf16.vlgmr.msra.gmra.mxu0 %vm386_vm2, %v9970_v45 }
0x119b   :  { %7994 = vmatpush3.bf16.msra.mxu0 %v9725_v53  ;;  %7997 = vmatprep.mubr.msk.bf16.mxu0 %vm386_vm2, %v9960_v33 }
0x119c   :  { %7995 = vmatprep.subr.bf16.mxu0 %v9730_v31 }
0x119f   :  { %7996 = vmatpush3.bf16.msra.mxu0 %v9730_v31 }
0x11a0   :  { %8009 = vmatprep.subr.bf16.mxu0 %v9737_v48 }
0x11a2   :  { %7998 = vmatmul.mubr.msk.bf16.vlgmr.msra.gmra.mxu0 %vm386_vm2, %v9970_v45 }
0x11a3   :  { %8010 = vmatpush3.bf16.msra.mxu0 %v9737_v48 }
0x11a4   :  { %8011 = vmatprep.subr.bf16.mxu0 %v9742_v36 }
0x11a7   :  { %8012 = vmatpush3.bf16.msra.mxu0 %v9742_v36 }
0x11a8   :  { %8262 = vmatprep.subr.msk.bf16.mxu0 %vm386_vm2, %v9542_v15 }
0x1252   :  { %v7937_v32 = vpop.f32.mrf.mxu0 }
0x1253   :  { %v3515_v53 = vmul.f32 0.17677669, %v7937_v32 }
0x1254   :  { %v3498_v2 = vpop.f32.mrf.mxu0 }
0x1255   :  { %v3513_v43 = vmul.f32 0.17677669, %v3498_v2  ;;  %v3519_v7 = vadd.f32 %v3515_v53, %v9633_v29 }
0x1256   :  { %v7938_v57 = vpop.f32.mrf.mxu0 }
0x1257   :  { %v3516_v31 = vmul.f32 0.17677669, %v7938_v57  ;;  %v3517_v58 = vadd.f32 %v3513_v43, %v9635_v0  ;;  %v3523_v15 = vsel %vm226_vm1, %v3519_v7, -inf }
0x1258   :  { %v3501_v10 = vpop.f32.mrf.mxu0 }
0x1259   :  { %v3520_v48 = vadd.f32 %v3516_v31, %v9637_v41  ;;  %v3514_v38 = vmul.f32 0.17677669, %v3501_v10  ;;  %v3521_v8 = vsel %vm226_vm1, %v3517_v58, -inf }
0x125b   :  { %v3524_v49 = vsel %vm226_vm1, %v3520_v48, -inf  ;;  %v3518_v36 = vadd.f32 %v3514_v38, %v9639_v40 }
0x125c   :  { %v3526_v13 = vmax.f32 %v3523_v15, %v3524_v49 }
0x125d   :  { %v3522_v52 = vsel %vm226_vm1, %v3518_v36, -inf }
0x125e   :  { %v3525_v20 = vmax.f32 %v3521_v8, %v3522_v52 }
0x1260   :  { %v3527_v21 = vmax.f32 %v3525_v20, %v3526_v13 }
0x1262   :  { %v3528_v19 = vrot.slane %v3527_v21, 4 }
0x1264   :  { %v3529_v56 = vmax.f32 %v3527_v21, %v3528_v19 }
0x1266   :  { %v3530_v3 = vrot.slane %v3529_v56, 2 }
0x1268   :  { %v3531_v59 = vmax.f32 %v3529_v56, %v3530_v3 }
0x126a   :  { %v3532_v39 = vrot.slane %v3531_v59, 1 }
0x126c   :  { %v3533_v1 = vmax.f32 %v3531_v59, %v3532_v39 }
0x126e   :  { %v3534_v32 = vsub.f32 %v3517_v58, %v3533_v1  ;;  %v3535_v2 = vsub.f32 %v3518_v36, %v3533_v1  ;;  %v3536_v53 = vsub.f32 %v3519_v7, %v3533_v1  ;;  %v3537_v43 = vsub.f32 %v3520_v48, %v3533_v1 }
0x1270   :  { %v3538_v57 = vmul.f32 1.442695, %v3534_v32  ;;  %v3540_v31 = vmul.f32 1.442695, %v3535_v2  ;;  %v3542_v10 = vmul.f32 1.442695, %v3536_v53 }
0x1271   :  { %v3544_v38 = vmul.f32 1.442695, %v3537_v43 }
0x1272   :  { %8475 = vpow2.f32 %v3538_v57 }
0x1273   :  { %8477 = vpow2.f32 %v3540_v31 }
0x1274   :  { %8479 = vpow2.f32 %v3542_v10 }
0x1275   :  { %8481 = vpow2.f32 %v3544_v38 }
0x127f   :  { %v8476_v49 = vpop.eup %8475 }
0x1280   :  { %v8478_v15 = vpop.eup %8477  ;;  %v3546_v8 = vsel %vm226_vm1, %v8476_v49, 0.0 }
0x1281   :  { %v8480_v52 = vpop.eup %8479  ;;  %v3547_v13 = vsel %vm226_vm1, %v8478_v15, 0.0 }
0x1282   :  { %v8482_v20 = vpop.eup %8481  ;;  %v3548_v58 = vadd.f32 %v3547_v13, %v3546_v8  ;;  %v3549_v7 = vsel %vm226_vm1, %v8480_v52, 0.0 }
0x1283   :  { %v3551_v36 = vsel %vm226_vm1, %v8482_v20, 0.0 }
0x1284   :  { %v3550_v48 = vadd.f32 %v3549_v7, %v3548_v58 }
0x1286   :  { %v3552_v21 = vadd.f32 %v3551_v36, %v3550_v48 }
0x1288   :  { %v3553_v19 = vrot.slane %v3552_v21, 4 }
0x128a   :  { %v3554_v56 = vadd.f32 %v3553_v19, %v3552_v21 }
0x128c   :  { %v3555_v3 = vrot.slane %v3554_v56, 2 }
0x128e   :  { %v3556_v59 = vadd.f32 %v3555_v3, %v3554_v56 }
0x1290   :  { %v3557_v39 = vrot.slane %v3556_v59, 1 }
0x1292   :  { %v3558_v1 = vadd.f32 %v3557_v39, %v3556_v59 }
0x1294   :  { %8483 = vrcp.f32 %v3558_v1 }
0x12a1   :  { %v8484_v32 = vpop.eup %8483 }
0x12a2   :  { %v3561_v2 = vmul.f32 %v8484_v32, %v8478_v15  ;;  %v3560_v53 = vmul.f32 %v8484_v32, %v8476_v49  ;;  %v3563_v43 = vmul.f32 %v8484_v32, %v8482_v20  ;;  %v3562_v57 = vmul.f32 %v8484_v32, %v8480_v52 }
0x12a4   :  { %v3565_v31 = vadd.f32 %v3561_v2, %v9654_v25  ;;  %v3564_v10 = vadd.f32 %v3560_v53, %v9657_v28  ;;  %v3567_v13 = vadd.f32 %v3563_v43, %v9660_v63  ;;  %v3566_v58 = vadd.f32 %v3562_v57, %v9663_v61  ;;  %v10011_v53 = vld [vmem:[%s9678_s25 + $0x8] sm:$0xff]   ;;  %v10015_v43 = vld [vmem:[%s9678_s25] sm:$0xff]  }
0x12a5   :  { %v10020_v57 = vld [vmem:[%s9688_s29 + $0x8] sm:$0xff]  }
0x12a6   :  { %v3571_v38 = vsel %vm226_vm1, %v3565_v31, 0.0  ;;  %v3568_v8 = vsel %vm226_vm1, %v3564_v10, 0.0  ;;  %v3577_v7 = vsel %vm226_vm1, %v3567_v13, 0.0  ;;  %v3574_v49 = vsel %vm226_vm1, %v3566_v58, 0.0 }
0x12a7   :  { %3572 = vadd.xlane.f32.xlu1 %v3571_v38  ;;  %3569 = vadd.xlane.f32.xlu0 %v3568_v8 }
0x12ab   :  { %3578 = vadd.xlane.f32.xlu1 %v3577_v7  ;;  %3575 = vadd.xlane.f32.xlu0 %v3574_v49  ;;  %v10029_v7 = vld [vmem:[%s9688_s29] sm:$0xff]   ;;  %v10034_v49 = vld [vmem:[%s9678_s25 + $0x18] sm:$0xff]  }
0x1330   :  { %v3573_v15 = vpop.xlane.xlu1 %3572  ;;  %v3570_v52 = vpop.xlane.xlu0 %3569 }
0x1331   :  { %8485 = vrcp.f32 %v3573_v15  ;;  %v10042_v15 = vld [vmem:[%s9678_s25 + $0x10] sm:$0xff]  }
0x1332   :  { %8487 = vrcp.f32 %v3570_v52 }
0x1334   :  { %v3579_v20 = vpop.xlane.xlu1 %3578  ;;  %v3576_v48 = vpop.xlane.xlu0 %3575 }
0x1335   :  { %8489 = vrcp.f32 %v3579_v20 }
0x1336   :  { %8491 = vrcp.f32 %v3576_v48 }
0x133e   :  { %v8486_v36 = vpop.eup %8485 }
0x133f   :  { %v8488_v21 = vpop.eup %8487  ;;  %v3585_v19 = vmul.f32 %v8486_v36, %v3565_v31 }
0x1340   :  { %v3584_v56 = vmul.f32 %v8488_v21, %v3564_v10 }
0x1342   :  { %v8490_v3 = vpop.eup %8489  ;;  %v3588_v59 = vpack.c.bf16 %v3585_v19, %v3584_v56 }
0x1343   :  { %v8492_v39 = vpop.eup %8491  ;;  %v3587_v1 = vmul.f32 %v8490_v3, %v3567_v13 }
0x1344   :  { %v3586_v32 = vmul.f32 %v8492_v39, %v3566_v58  ;;  %7949 = vmatprep.mubr.msk.bf16.mxu1 %vm226_vm1, %v3588_v59 }
0x1346   :  { %v3589_v2 = vpack.c.bf16 %v3587_v1, %v3586_v32 }
0x1348   :  { %7950 = vmatmul.mubr.msk.bf16.vlgmr.msra.gmra.mxu1 %vm226_vm1, %v3589_v2 }
0x1349   :  { %7954 = vmatpush3.bf16.msra.mxu1 %v10011_v53 }
0x134a   :  { %7955 = vmatprep.subr.bf16.mxu1 %v10015_v43 }
0x134d   :  { %7956 = vmatpush3.bf16.msra.mxu1 %v10015_v43 }
0x134e   :  { %7961 = vmatprep.subr.bf16.mxu1 %v10020_v57 }
0x1408   :  { %v7951_v31 = vpop.f32.mrf.mxu1 }
0x140a   :  { %v3630_v10 = vpop.f32.mrf.mxu1 }
0x140c   :  { %v7952_v38 = vpop.f32.mrf.mxu1 }
0x140d   :  { %v3646_v58 = vpack.c.bf16 %v7952_v38, %v7951_v31 }
0x140e   :  { %v3633_v8 = vpop.f32.mrf.mxu1 }
0x140f   :  { %v3645_v13 = vpack.c.bf16 %v3633_v8, %v3630_v10 }
0x1411   :  { %7957 = vmatprep.mubr.msk.bf16.mxu1 %vm386_vm2, %v3645_v13 }
0x1412   :  { %7958 = vmatmul.mubr.msk.bf16.vlgmr.msra.gmra.mxu1 %vm386_vm2, %v3646_v58 }
0x1413   :  { %7962 = vmatpush3.bf16.msra.mxu1 %v10020_v57  ;;  %7965 = vmatprep.mubr.msk.bf16.mxu1 %vm386_vm2, %v9960_v33  ;;  %v10047_v33 = vld [vmem:[%s9678_s25 + $0x28] sm:$0xff]  }
0x1414   :  { %7963 = vmatprep.subr.bf16.mxu1 %v10029_v7 }
0x1417   :  { %7964 = vmatpush3.bf16.msra.mxu1 %v10029_v7 }
0x1418   :  { %7969 = vmatprep.subr.bf16.mxu1 %v10034_v49 }
0x141a   :  { %7966 = vmatmul.mubr.msk.bf16.vlgmr.msra.gmra.mxu1 %vm386_vm2, %v9970_v45  ;;  %v10054_v45 = vld [vmem:[%s9678_s25 + $0x20] sm:$0xff]   ;;  %s6807_s25 = sld [smem:[%s11042_s0 + %s8817_s23]]  }
0x141b   :  { %7970 = vmatpush3.bf16.msra.mxu1 %v10034_v49  ;;  %7973 = vmatprep.mubr.msk.bf16.mxu1 %vm386_vm2, %v3645_v13 }
0x141c   :  { %7971 = vmatprep.subr.bf16.mxu1 %v10042_v15 }
0x141f   :  { %7972 = vmatpush3.bf16.msra.mxu1 %v10042_v15 }
0x1420   :  { %7985 = vmatprep.subr.bf16.mxu1 %v10047_v33 }
0x1422   :  { %7974 = vmatmul.mubr.msk.bf16.vlgmr.msra.gmra.mxu1 %vm386_vm2, %v3646_v58 }
0x1423   :  { %7986 = vmatpush3.bf16.msra.mxu1 %v10047_v33  ;;  %7989 = vmatprep.mubr.msk.bf16.mxu1 %vm386_vm2, %v3645_v13 }
0x1424   :  { %7987 = vmatprep.subr.bf16.mxu1 %v10054_v45 }
0x1427   :  { %7988 = vmatpush3.bf16.msra.mxu1 %v10054_v45 }
0x1428   :  { %8001 = vmatprep.subr.bf16.mxu1 %v9831_v22 }
0x142a   :  { %7990 = vmatmul.mubr.msk.bf16.vlgmr.msra.gmra.mxu1 %vm386_vm2, %v3646_v58 }
0x142b   :  { %8002 = vmatpush3.bf16.msra.mxu1 %v9831_v22 }
0x142c   :  { %8003 = vmatprep.subr.bf16.mxu1 %v9836_v16 }
0x142f   :  { %8004 = vmatpush3.bf16.msra.mxu1 %v9836_v16  ;;  %v7983_v16 = vpop.f32.mrf.mxu0 }
0x1430   :  { %8017 = vmatprep.subr.bf16.mxu1 %v9841_v42 }
0x14d2   :  { %v7959_v52 = vpop.f32.mrf.mxu1 }
0x14d3   :  { %v3696_v21 = vadd.f32 %v7959_v52, %v9761_v6  ;;  %v3874_v52 = vpop.f32.mrf.mxu0 }
0x14d4   :  { %v3687_v20 = vpop.f32.mrf.mxu1 }
0x14d5   :  { %v3688_v56 = vadd.f32 %v9761_v6, %v3687_v20 }
0x14d6   :  { %v7960_v48 = vpop.f32.mrf.mxu1 }
0x14d7   :  { %v3699_v39 = vadd.f32 %v7960_v48, %v9761_v6 }
0x14d8   :  { %v3690_v36 = vpop.f32.mrf.mxu1 }
0x14d9   :  { %v3691_v42 = vadd.f32 %v9761_v6, %v3690_v36 }
0x14da   :  { %v7967_v19 = vpop.f32.mrf.mxu1 }
0x14db   :  { %v3761_v3 = vadd.f32 %v7967_v19, %v3696_v21  ;;  %v10072_v21 = vld [vmem:[%s9758_s12] ss:$0 sm:$0xff] }
0x14dc   :  { %v3744_v59 = vpop.f32.mrf.mxu1 }
0x14dd   :  { %v3765_v22 = vadd.f32 %v9765_v47, %v3761_v3  ;;  %v3759_v1 = vadd.f32 %v3744_v59, %v3688_v56  ;;  %v10077_v59 = vld [vmem:[%s9753_s7 + $0x1] ss:$0 sm:$0xff] }
0x14de   :  { %v7968_v32 = vpop.f32.mrf.mxu1  ;;  %11079 = vst [vmem:[#allocation17_spill] sm:$0xff] %v10077_v59 }
0x14df   :  { %v7077_v2 = vmul.f32 -1.442695, %v3765_v22  ;;  %v3763_v31 = vadd.f32 %v9765_v47, %v3759_v1  ;;  %v3762_v10 = vadd.f32 %v7968_v32, %v3699_v39  ;;  %v11080_v1 = vld [vmem:[#allocation15_spill] sm:$0xff] }
0x14e0   :  { %v3747_v38 = vpop.f32.mrf.mxu1 }
0x14e1   :  { %8493 = vpow2.f32 %v7077_v2  ;;  %v7075_v8 = vmul.f32 -1.442695, %v3763_v31  ;;  %v3766_v13 = vadd.f32 %v9765_v47, %v3762_v10  ;;  %v3760_v58 = vadd.f32 %v3747_v38, %v3691_v42  ;;  %v7984_v47 = vpop.f32.mrf.mxu0 }
0x14e2   :  { %v7975_v20 = vpop.f32.mrf.mxu1 }
0x14e3   :  { %8495 = vpow2.f32 %v7075_v8  ;;  %v7078_v48 = vmul.f32 -1.442695, %v3766_v13  ;;  %v3764_v19 = vadd.f32 %v10072_v21, %v3760_v58  ;;  %v3834_v6 = vadd.f32 %v7975_v20, %v9769_v51  ;;  %v3877_v8 = vpop.f32.mrf.mxu0 }
0x14e4   :  { %v3825_v36 = vpop.f32.mrf.mxu1 }
0x14e5   :  { %8497 = vpow2.f32 %v7078_v48  ;;  %v7076_v56 = vmul.f32 -1.442695, %v3764_v19  ;;  %v3891_v3 = vadd.f32 %v7983_v16, %v3834_v6  ;;  %v3826_v39 = vadd.f32 %v10077_v59, %v3825_v36  ;;  %v10086_v19 = vld [vmem:[%s9758_s12 + $0x1] ss:$0 sm:$0xff] }
0x14e6   :  { %v7976_v22 = vpop.f32.mrf.mxu1  ;;  %11081 = vst [vmem:[#allocation15_spill] sm:$0xff] %v10086_v19 }
0x14e7   :  { %8499 = vpow2.f32 %v7076_v56  ;;  %v3895_v32 = vadd.f32 %v11080_v1, %v3891_v3  ;;  %v3889_v42 = vadd.f32 %v3874_v52, %v3826_v39  ;;  %v3837_v2 = vadd.f32 %v10077_v59, %v7976_v22  ;;  %v7999_v22 = vpop.f32.mrf.mxu0 }
0x14e8   :  { %v3828_v31 = vpop.f32.mrf.mxu1 }
0x14e9   :  { %v7085_v10 = vmul.f32 -1.442695, %v3895_v32  ;;  %v3893_v51 = vadd.f32 %v11080_v1, %v3889_v42  ;;  %v3892_v38 = vadd.f32 %v7984_v47, %v3837_v2  ;;  %v3829_v16 = vadd.f32 %v10077_v59, %v3828_v31  ;;  %v4004_v31 = vpop.f32.mrf.mxu0 }
0x14ea   :  { %v7991_v2 = vpop.f32.mrf.mxu1 }
0x14eb   :  { %v7083_v13 = vmul.f32 -1.442695, %v3893_v51  ;;  %v3896_v58 = vadd.f32 %v11080_v1, %v3892_v38  ;;  %v3890_v20 = vadd.f32 %v3877_v8, %v3829_v16  ;;  %8501 = vpow2.f32 %v7085_v10  ;;  %v8000_v16 = vpop.f32.mrf.mxu0 }
0x14ec   :  { %v3955_v38 = vpop.f32.mrf.mxu1 }
0x14ed   :  { %8503 = vpow2.f32 %v7083_v13  ;;  %v7086_v48 = vmul.f32 -1.442695, %v3896_v58  ;;  %v3894_v52 = vadd.f32 %v10086_v19, %v3890_v20  ;;  %v4013_v58 = vadd.f32 %v7999_v22, %v9789_v37  ;;  %v10095_v19 = vld [vmem:[%s9758_s12 + $0x2] ss:$0 sm:$0xff] }
0x14ee   :  { %v8494_v6 = vpop.eup %8493 }
0x14ef   :  { %v3781_v36 = vadd.f32 1.0, %v8494_v6  ;;  %8505 = vpow2.f32 %v7086_v48  ;;  %v7084_v56 = vmul.f32 -1.442695, %v3894_v52  ;;  %v7992_v6 = vpop.f32.mrf.mxu1 }
0x14f0   :  { %v8496_v3 = vpop.eup %8495 }
0x14f1   :  { %8507 = vrcp.f32 %v3781_v36  ;;  %v3779_v39 = vadd.f32 1.0, %v8496_v3  ;;  %v4007_v3 = vpop.f32.mrf.mxu0  ;;  %v3958_v59 = vpop.f32.mrf.mxu1 }
0x14f2   :  { %v8498_v47 = vpop.eup %8497  ;;  %8509 = vpow2.f32 %v7084_v56  ;;  %v4005_v56 = vadd.f32 %v9789_v37, %v4004_v31  ;;  %v4008_v31 = vadd.f32 %v10095_v19, %v4007_v3 }
0x14f3   :  { %8511 = vrcp.f32 %v3779_v39  ;;  %v3782_v1 = vadd.f32 1.0, %v8498_v47  ;;  %v3964_v39 = vadd.f32 %v7991_v2, %v9793_v5 }
0x14f4   :  { %v8500_v32 = vpop.eup %8499 }
0x14f5   :  { %8513 = vrcp.f32 %v3782_v1  ;;  %v3780_v42 = vadd.f32 1.0, %v8500_v32  ;;  %v4016_v32 = vadd.f32 %v8000_v16, %v9789_v37 }
0x14f7   :  { %8515 = vrcp.f32 %v3780_v42 }
0x14f8   :  { %v8502_v10 = vpop.eup %8501 }
0x14f9   :  { %v3911_v13 = vadd.f32 1.0, %v8502_v10  ;;  %v3956_v10 = vadd.f32 %v9793_v5, %v3955_v38 }
0x14fa   :  { %v8504_v51 = vpop.eup %8503 }
0x14fb   :  { %v3909_v20 = vadd.f32 1.0, %v8504_v51  ;;  %8517 = vrcp.f32 %v3911_v13 }
0x14fc   :  { %v8506_v8 = vpop.eup %8505 }
0x14fd   :  { %v3912_v52 = vadd.f32 1.0, %v8506_v8  ;;  %8519 = vrcp.f32 %v3909_v20 }
0x14fe   :  { %v8508_v48 = vpop.eup %8507 }
0x14ff   :  { %v8510_v36 = vpop.eup %8509  ;;  %v4021_v47 = vmul.f32 %v8508_v48, %v4013_v58  ;;  %8521 = vrcp.f32 %v3912_v52  ;;  %v10099_v58 = vld [vmem:[%s9753_s7 + $0x2] ss:$0 sm:$0xff] }
0x1500   :  { %v8512_v1 = vpop.eup %8511  ;;  %v3910_v42 = vadd.f32 1.0, %v8510_v36  ;;  %v3967_v37 = vadd.f32 %v10099_v58, %v7992_v6  ;;  %v3959_v5 = vadd.f32 %v10099_v58, %v3958_v59 }
0x1501   :  { %v4025_v22 = vadd.f32 %v4021_v47, %v3964_v39  ;;  %v4019_v51 = vmul.f32 %v8512_v1, %v4005_v56 }
0x1502   :  { %v8514_v8 = vpop.eup %8513 }
0x1503   :  { %8523 = vtanh.f32 %v4025_v22  ;;  %v4023_v2 = vadd.f32 %v4019_v51, %v3956_v10  ;;  %v4022_v16 = vmul.f32 %v8514_v8, %v4016_v32 }
0x1504   :  { %v8516_v13 = vpop.eup %8515  ;;  %8525 = vrcp.f32 %v3910_v42 }
0x1505   :  { %8527 = vtanh.f32 %v4023_v2  ;;  %v4026_v20 = vadd.f32 %v4022_v16, %v3967_v37  ;;  %v4020_v38 = vmul.f32 %v8516_v13, %v4008_v31 }
0x1507   :  { %8529 = vtanh.f32 %v4026_v20  ;;  %v4024_v48 = vadd.f32 %v4020_v38, %v3959_v5 }
0x1508   :  { %v8518_v36 = vpop.eup %8517 }
0x1509   :  { %8531 = vtanh.f32 %v4024_v48  ;;  %v4033_v1 = vsub.f32 1.0, %v8518_v36  ;;  %v4041_v8 = vmul.f32 %v8518_v36, %v9905_v60 }
0x150a   :  { %v8520_v52 = vpop.eup %8519 }
0x150b   :  { %v4031_v47 = vsub.f32 1.0, %v8520_v52  ;;  %v4039_v32 = vmul.f32 %v8520_v52, %v9902_v12 }
0x150c   :  { %v8522_v56 = vpop.eup %8521 }
0x150d   :  { %v4034_v31 = vsub.f32 1.0, %v8522_v56  ;;  %v4042_v38 = vmul.f32 %v8522_v56, %v9915_v50 }
0x1510   :  { %v8524_v3 = vpop.eup %8523 }
0x1511   :  { %v8526_v39 = vpop.eup %8525  ;;  %v4037_v42 = vmul.f32 %v8524_v3, %v4033_v1 }
0x1512   :  { %v8528_v22 = vpop.eup %8527  ;;  %v4032_v59 = vsub.f32 1.0, %v8526_v39  ;;  %v4040_v37 = vmul.f32 %v8526_v39, %v9912_v23 }
0x1513   :  { %v4035_v6 = vmul.f32 %v8528_v22, %v4031_v47  ;;  %v10110_v20 = vadd.f32 %v4041_v8, %v4037_v42 }
0x1514   :  { %v8530_v10 = vpop.eup %8529 }
0x1515   :  { %v10104_v51 = vadd.f32 %v4039_v32, %v4035_v6  ;;  %v4038_v5 = vmul.f32 %v8530_v10, %v4034_v31  ;;  %v4053_v60 = vsel %vm386_vm2, %v10110_v20, 0.0 }
0x1516   :  { %v8532_v2 = vpop.eup %8531 }
0x1517   :  { %v4047_v16 = vsel %vm386_vm2, %v10104_v51, 0.0  ;;  %v4036_v13 = vmul.f32 %v8532_v2, %v4032_v59  ;;  %v10119_v36 = vadd.f32 %v4042_v38, %v4038_v5 }
0x1518   :  { %4048 = vadd.xlane.f32.xlu0 %v4047_v16 }
0x1519   :  { %v10112_v12 = vadd.f32 %v4040_v37, %v4036_v13  ;;  %v4056_v23 = vsel %vm386_vm2, %v10119_v36, 0.0 }
0x151b   :  { %v4050_v48 = vsel %vm386_vm2, %v10112_v12, 0.0 }
0x151c   :  { %4051 = vadd.xlane.f32.xlu1 %v4050_v48  ;;  %4054 = vadd.xlane.f32.xlu0 %v4053_v60 }
0x1520   :  { %4057 = vadd.xlane.f32.xlu1 %v4056_v23 }
0x15a1   :  { %v4049_v52 = vpop.xlane.xlu0 %4048 }
0x15a2   :  { %v4059_v3 = vmul.f32 0.03125, %v4049_v52 }
0x15a4   :  { %v4063_v39 = vsub.f32 %v10104_v51, %v4059_v3 }
0x15a5   :  { %v4052_v47 = vpop.xlane.xlu1 %4051  ;;  %v4055_v50 = vpop.xlane.xlu0 %4054 }
0x15a6   :  { %v4060_v56 = vmul.f32 0.03125, %v4052_v47  ;;  %v4061_v1 = vmul.f32 0.03125, %v4055_v50  ;;  %v4067_v22 = vmul.f32 %v4063_v39, %v4063_v39 }
0x15a8   :  { %v4064_v6 = vsub.f32 %v10112_v12, %v4060_v56  ;;  %v4065_v32 = vsub.f32 %v10110_v20, %v4061_v1  ;;  %v4071_v42 = vsel %vm386_vm2, %v4067_v22, 0.0 }
0x15a9   :  { %v4058_v10 = vpop.xlane.xlu1 %4057  ;;  %4072 = vadd.xlane.f32.xlu0 %v4071_v42 }
0x15aa   :  { %v4062_v59 = vmul.f32 0.03125, %v4058_v10  ;;  %v4068_v8 = vmul.f32 %v4064_v6, %v4064_v6  ;;  %v4069_v31 = vmul.f32 %v4065_v32, %v4065_v32 }
0x15ac   :  { %v4066_v2 = vsub.f32 %v10119_v36, %v4062_v59  ;;  %v4074_v37 = vsel %vm386_vm2, %v4068_v8, 0.0  ;;  %v4077_v16 = vsel %vm386_vm2, %v4069_v31, 0.0 }
0x15ad   :  { %4075 = vadd.xlane.f32.xlu1 %v4074_v37  ;;  %4078 = vadd.xlane.f32.xlu0 %v4077_v16 }
0x15ae   :  { %v4070_v13 = vmul.f32 %v4066_v2, %v4066_v2 }
0x15b0   :  { %v4080_v5 = vsel %vm386_vm2, %v4070_v13, 0.0 }
0x15b1   :  { %4081 = vadd.xlane.f32.xlu1 %v4080_v5 }
0x1632   :  { %v4073_v38 = vpop.xlane.xlu0 %4072 }
0x1633   :  { %v4083_v48 = vmul.f32 0.03125, %v4073_v38 }
0x1635   :  { %v4087_v60 = vadd.f32 1e-05, %v4083_v48 }
0x1636   :  { %v4076_v23 = vpop.xlane.xlu1 %4075  ;;  %v4079_v52 = vpop.xlane.xlu0 %4078 }
0x1637   :  { %8533 = vrsqrt.f32 %v4087_v60  ;;  %v4084_v3 = vmul.f32 0.03125, %v4076_v23  ;;  %v4085_v47 = vmul.f32 0.03125, %v4079_v52 }
0x1639   :  { %v4088_v50 = vadd.f32 1e-05, %v4084_v3  ;;  %v4089_v56 = vadd.f32 1e-05, %v4085_v47 }
0x163a   :  { %v4082_v1 = vpop.xlane.xlu1 %4081 }
0x163b   :  { %8535 = vrsqrt.f32 %v4088_v50  ;;  %v4086_v22 = vmul.f32 0.03125, %v4082_v1  ;;  %v8764_v50 = vld [vmem:[%s9447_s9 + $0x8] sm:$0xff]   ;;  %s8807_s9 = smov 16  }
0x163c   :  { %8537 = vrsqrt.f32 %v4089_v56  ;;  %s6817_s21 = sld [smem:[%s11042_s0 + %s8807_s9]]  }
0x163d   :  { %v4090_v42 = vadd.f32 1e-05, %v4086_v22 }
0x163f   :  { %8539 = vrsqrt.f32 %v4090_v42 }
0x1644   :  { %v8534_v10 = vpop.eup %8533 }
0x1645   :  { %v4095_v59 = vmul.f32 %v8534_v10, %v4063_v39 }
0x1647   :  { %v4099_v16 = vmul.f32 %v9845_v4, %v4095_v59 }
0x1648   :  { %v8536_v8 = vpop.eup %8535 }
0x1649   :  { %v8538_v31 = vpop.eup %8537  ;;  %v4096_v37 = vmul.f32 %v8536_v8, %v4064_v6  ;;  %v4103_v23 = vadd.f32 %v9849_v26, %v4099_v16 }
0x164a   :  { %v4097_v13 = vmul.f32 %v8538_v31, %v4065_v32 }
0x164b   :  { %v4100_v5 = vmul.f32 %v9845_v4, %v4096_v37 }
0x164c   :  { %v8540_v38 = vpop.eup %8539  ;;  %v4101_v48 = vmul.f32 %v9845_v4, %v4097_v13  ;;  %v11084_v13 = vld [vmem:[#allocation12_spill] sm:$0xff] }
0x164d   :  { %v4098_v60 = vmul.f32 %v8540_v38, %v4066_v2  ;;  %v4104_v52 = vadd.f32 %v9849_v26, %v4100_v5  ;;  %v11085_v5 = vld [vmem:[#allocation14_spill] sm:$0xff] }
0x164e   :  { %v4105_v6 = vadd.f32 %v9849_v26, %v4101_v48 }
0x164f   :  { %v4102_v3 = vmul.f32 %v9845_v4, %v4098_v60  ;;  %v4107_v39 = vpack.c.bf16 %v4104_v52, %v4103_v23 }
0x1651   :  { %8005 = vmatprep.mubr.msk.bf16.mxu1 %vm386_vm2, %v4107_v39  ;;  %v4106_v47 = vadd.f32 %v9849_v26, %v4102_v3 }
0x1653   :  { %v4108_v32 = vpack.c.bf16 %v4106_v47, %v4105_v6 }
0x1655   :  { %8006 = vmatmul.mubr.msk.bf16.vlgmr.msra.gmra.mxu1 %vm386_vm2, %v4108_v32 }
0x1656   :  { %8018 = vmatpush3.bf16.msra.mxu1 %v8764_v50 }
0x1657   :  { %8019 = vmatprep.subr.bf16.mxu1 %v9862_v17 }
0x165a   :  { %8020 = vmatpush3.bf16.msra.mxu1 %v9862_v17 }
0x165b   :  { %8267 = vmatprep.subr.msk.bf16.mxu1 %vm245_vm0, %v9544_v55  ;;  %v11082_v55 = vld [vmem:[#allocation11_spill] sm:$0xff]  ;;  %vm6612_vm0 = vcmask 1041409  }
0x1715   :  { %v8007_v4 = vpop.f32.mrf.mxu1 }
0x1716   :  { %v4158_v26 = vadd.f32 %v8007_v4, %v9874_v54 }
0x1717   :  { %v4149_v2 = vpop.f32.mrf.mxu1 }
0x1718   :  { %v4150_v1 = vadd.f32 %v9874_v54, %v4149_v2  ;;  %v4166_v37 = vmax.f32 %v4158_v26, 0.0 }
0x1719   :  { %v8008_v56 = vpop.f32.mrf.mxu1 }
0x171a   :  { %v4161_v22 = vadd.f32 %v8008_v56, %v9874_v54  ;;  %v4164_v8 = vmax.f32 %v4150_v1, 0.0 }
0x171b   :  { %v4152_v42 = vpop.f32.mrf.mxu1 }
0x171c   :  { %v4153_v10 = vadd.f32 %v9874_v54, %v4152_v42  ;;  %v4167_v59 = vmax.f32 %v4161_v22, 0.0  ;;  %v11083_v54 = vld [vmem:[#allocation13_spill] sm:$0xff] }
0x171e   :  { %v4165_v31 = vmax.f32 %v4153_v10, 0.0  ;;  %v4169_v16 = vpack.c.bf16 %v4167_v59, %v4166_v37 }
0x1720   :  { %v4168_v17 = vpack.c.bf16 %v4165_v31, %v4164_v8 }
0x1722   :  { %8013 = vmatprep.mubr.msk.bf16.mxu0 %vm386_vm2, %v4168_v17 }
0x1723   :  { %8014 = vmatmul.mubr.msk.bf16.vlgmr.msra.gmra.mxu0 %vm386_vm2, %v4169_v16 }
0x1724   :  { %8026 = vmatpush3.bf16.xpose.msra.mxu0 %v9556_v34 }
0x1725   :  { %8263 = vmatprep.subr.msk.bf16.mxu0 %vm386_vm2, %v9546_v30 }
0x172c   :  { %8028 = vmatpush3.bf16.xpose.msra.mxu0 %v9577_v62 }
0x172d   :  { %8264 = vmatprep.subr.msk.bf16.mxu0 %vm386_vm2, %v9573_v14 }
0x1734   :  { %8030 = vmatpush3.bf16.xpose.msra.mxu0 %v9595_v44  ;;  %v11086_v44 = vld [vmem:[#allocation16_spill] sm:$0xff] }
0x1735   :  { %8265 = vmatprep.subr.msk.bf16.mxu0 %vm386_vm2, %v11082_v55 }
0x173c   :  { %8032 = vmatpush3.bf16.xpose.msra.mxu0 %v11083_v54 }
0x173d   :  { %8266 = vmatprep.subr.msk.bf16.mxu0 %vm386_vm2, %v11084_v13 }
0x1744   :  { %8034 = vmatpush3.bf16.xpose.msra.mxu0 %v11085_v5 }
0x1745   :  { %8069 = vmatprep.subr.bf16.mxu0 %v10034_v49 }
0x17e3   :  { %v8015_v30 = vpop.f32.mrf.mxu0 }
0x17e4   :  { %v4227_v62 = vadd.f32 %v8015_v30, %v10110_v20 }
0x17e5   :  { %v4210_v34 = vpop.f32.mrf.mxu0 }
0x17e6   :  { %v4225_v14 = vadd.f32 %v4210_v34, %v10104_v51  ;;  %v10172_v23 = vadd.f32 %v11086_v44, %v4227_v62 }
0x17e7   :  { %v8016_v38 = vpop.f32.mrf.mxu0 }
0x17e8   :  { %v10169_v48 = vadd.f32 %v11086_v44, %v4225_v14  ;;  %v4228_v52 = vadd.f32 %v8016_v38, %v10119_v36  ;;  %v4239_v6 = vsel %vm386_vm2, %v10172_v23, 0.0 }
0x17e9   :  { %v4213_v60 = vpop.f32.mrf.mxu0 }
0x17ea   :  { %v4226_v3 = vadd.f32 %v4213_v60, %v10112_v12  ;;  %v4233_v39 = vsel %vm386_vm2, %v10169_v48, 0.0  ;;  %v10182_v51 = vadd.f32 %v11086_v44, %v4228_v52 }
0x17eb   :  { %4234 = vadd.xlane.f32.xlu0 %v4233_v39 }
0x17ec   :  { %v10179_v20 = vadd.f32 %v11086_v44, %v4226_v3  ;;  %v4242_v12 = vsel %vm386_vm2, %v10182_v51, 0.0 }
0x17ee   :  { %v4236_v47 = vsel %vm386_vm2, %v10179_v20, 0.0 }
0x17ef   :  { %4240 = vadd.xlane.f32.xlu0 %v4239_v6  ;;  %4237 = vadd.xlane.f32.xlu1 %v4236_v47 }
0x17f3   :  { %4243 = vadd.xlane.f32.xlu1 %v4242_v12 }
0x1874   :  { %v4235_v36 = vpop.xlane.xlu0 %4234 }
0x1875   :  { %v4245_v32 = vmul.f32 0.03125, %v4235_v36 }
0x1877   :  { %v4249_v50 = vsub.f32 %v10169_v48, %v4245_v32 }
0x1878   :  { %v4241_v4 = vpop.xlane.xlu0 %4240  ;;  %v4238_v2 = vpop.xlane.xlu1 %4237 }
0x1879   :  { %v4247_v56 = vmul.f32 0.03125, %v4241_v4  ;;  %v4246_v1 = vmul.f32 0.03125, %v4238_v2  ;;  %v4253_v22 = vmul.f32 %v4249_v50, %v4249_v50 }
0x187b   :  { %v4251_v26 = vsub.f32 %v10172_v23, %v4247_v56  ;;  %v4250_v42 = vsub.f32 %v10179_v20, %v4246_v1  ;;  %v4257_v10 = vsel %vm386_vm2, %v4253_v22, 0.0 }
0x187c   :  { %4258 = vadd.xlane.f32.xlu0 %v4257_v10  ;;  %v4244_v59 = vpop.xlane.xlu1 %4243 }
0x187d   :  { %v4248_v8 = vmul.f32 0.03125, %v4244_v59  ;;  %v4255_v31 = vmul.f32 %v4251_v26, %v4251_v26  ;;  %v4254_v37 = vmul.f32 %v4250_v42, %v4250_v42 }
0x187f   :  { %v4252_v17 = vsub.f32 %v10182_v51, %v4248_v8  ;;  %v4263_v16 = vsel %vm386_vm2, %v4255_v31, 0.0  ;;  %v4260_v55 = vsel %vm386_vm2, %v4254_v37, 0.0 }
0x1880   :  { %4264 = vadd.xlane.f32.xlu0 %v4263_v16  ;;  %4261 = vadd.xlane.f32.xlu1 %v4260_v55 }
0x1881   :  { %v4256_v54 = vmul.f32 %v4252_v17, %v4252_v17 }
0x1883   :  { %v4266_v13 = vsel %vm386_vm2, %v4256_v54, 0.0 }
0x1884   :  { %4267 = vadd.xlane.f32.xlu1 %v4266_v13 }
0x1905   :  { %v4259_v5 = vpop.xlane.xlu0 %4258 }
0x1906   :  { %v4269_v30 = vmul.f32 0.03125, %v4259_v5 }
0x1908   :  { %v4273_v34 = vadd.f32 1e-05, %v4269_v30 }
0x1909   :  { %v4265_v62 = vpop.xlane.xlu0 %4264  ;;  %v4262_v14 = vpop.xlane.xlu1 %4261 }
0x190a   :  { %8541 = vrsqrt.f32 %v4273_v34  ;;  %v4271_v38 = vmul.f32 0.03125, %v4265_v62  ;;  %v4270_v44 = vmul.f32 0.03125, %v4262_v14 }
0x190c   :  { %v4275_v60 = vadd.f32 1e-05, %v4271_v38  ;;  %v4274_v52 = vadd.f32 1e-05, %v4270_v44 }
0x190d   :  { %v4268_v3 = vpop.xlane.xlu1 %4267 }
0x190e   :  { %8543 = vrsqrt.f32 %v4275_v60  ;;  %v4272_v39 = vmul.f32 0.03125, %v4268_v3 }
0x190f   :  { %8545 = vrsqrt.f32 %v4274_v52 }
0x1910   :  { %v4276_v6 = vadd.f32 1e-05, %v4272_v39 }
0x1912   :  { %8547 = vrsqrt.f32 %v4276_v6 }
0x1917   :  { %v8542_v47 = vpop.eup %8541 }
0x1918   :  { %v4281_v12 = vmul.f32 %v8542_v47, %v4249_v50 }
0x191a   :  { %v4285_v56 = vmul.f32 %v9932_v24, %v4281_v12 }
0x191b   :  { %v8544_v36 = vpop.eup %8543 }
0x191c   :  { %v8546_v32 = vpop.eup %8545  ;;  %v4283_v4 = vmul.f32 %v8544_v36, %v4251_v26  ;;  %v4289_v8 = vadd.f32 %v9938_v9, %v4285_v56 }
0x191d   :  { %v4282_v2 = vmul.f32 %v8546_v32, %v4250_v42 }
0x191e   :  { %v4287_v10 = vmul.f32 %v9932_v24, %v4283_v4 }
0x191f   :  { %v8548_v1 = vpop.eup %8547  ;;  %v4286_v22 = vmul.f32 %v9932_v24, %v4282_v2 }
0x1920   :  { %v4284_v59 = vmul.f32 %v8548_v1, %v4252_v17  ;;  %v4291_v50 = vadd.f32 %v9938_v9, %v4287_v10 }
0x1921   :  { %v4290_v31 = vadd.f32 %v9938_v9, %v4286_v22 }
0x1922   :  { %v4288_v37 = vmul.f32 %v9932_v24, %v4284_v59 }
0x1923   :  { %v4293_v16 = vpack.c.bf16 %v4290_v31, %v4289_v8 }
0x1924   :  { %v4292_v26 = vadd.f32 %v9938_v9, %v4288_v37 }
0x1925   :  { %8021 = vmatprep.mubr.msk.bf16.mxu1 %vm386_vm2, %v4293_v16 }
0x1926   :  { %v4294_v42 = vpack.c.bf16 %v4292_v26, %v4291_v50 }
0x1928   :  { %8022 = vmatmul.mubr.msk.bf16.vlgmr.msra.gmra.mxu1 %vm386_vm2, %v4294_v42 }
0x1929   :  { %8040 = vmatpush3.bf16.msra.mxu1 %v9560_v27 }
0x192a   :  { %8041 = vmatprep.subr.bf16.mxu1 %v9548_v18 }
0x192d   :  { %8042 = vmatpush3.bf16.msra.mxu1 %v9548_v18 }
0x192e   :  { %8043 = vmatprep.subr.bf16.mxu1 %v9567_v46 }
0x1931   :  { %8044 = vmatpush3.bf16.msra.mxu1 %v9567_v46 }
0x1932   :  { %8045 = vmatprep.subr.bf16.mxu1 %v9571_v35 }
0x1935   :  { %8046 = vmatpush3.bf16.msra.mxu1 %v9571_v35 }
0x1936   :  { %8047 = vmatprep.subr.bf16.mxu1 %v9585_v11 }
0x1939   :  { %8048 = vmatpush3.bf16.msra.mxu1 %v9585_v11 }
0x193a   :  { %8053 = vmatprep.subr.bf16.mxu1 %v10011_v53 }
0x19e8   :  { %v8023_v24 = vpop.f32.mrf.mxu1 }
0x19ea   :  { %v4335_v27 = vpop.f32.mrf.mxu1 }
0x19ec   :  { %v8024_v9 = vpop.f32.mrf.mxu1 }
0x19ed   :  { %v4351_v18 = vpack.c.bf16 %v8024_v9, %v8023_v24 }
0x19ee   :  { %v4338_v17 = vpop.f32.mrf.mxu1 }
0x19ef   :  { %v4350_v55 = vpack.c.bf16 %v4338_v17, %v4335_v27 }
0x19f1   :  { %8035 = vmatprep.mubr.msk.bf16.mxu0 %vm386_vm2, %v4350_v55 }
0x19f2   :  { %8036 = vmatmul.mubr.msk.bf16.vlgmr.msra.gmra.mxu0 %vm386_vm2, %v4351_v18 }
0x19f3   :  { %8070 = vmatpush3.bf16.msra.mxu0 %v10034_v49 }
0x19f4   :  { %8071 = vmatprep.subr.bf16.mxu0 %v10042_v15 }
0x19f7   :  { %8072 = vmatpush3.bf16.msra.mxu0 %v10042_v15 }
0x19f8   :  { %8085 = vmatprep.subr.bf16.mxu0 %v10047_v33 }
0x1ab2   :  { %v8037_v46 = vpop.f32.mrf.mxu0 }
0x1ab3   :  { %v4409_v11 = vmul.f32 0.17677669, %v8037_v46 }
0x1ab4   :  { %v4392_v35 = vpop.f32.mrf.mxu0 }
0x1ab5   :  { %v4407_v54 = vmul.f32 0.17677669, %v4392_v35  ;;  %v4413_v34 = vadd.f32 %v4409_v11, %v9633_v29 }
0x1ab6   :  { %v8038_v13 = vpop.f32.mrf.mxu0 }
0x1ab7   :  { %v4410_v5 = vmul.f32 0.17677669, %v8038_v13  ;;  %v4411_v62 = vadd.f32 %v4407_v54, %v9635_v0  ;;  %v4417_v44 = vsel %vm226_vm1, %v4413_v34, -inf }
0x1ab8   :  { %v4395_v30 = vpop.f32.mrf.mxu0 }
0x1ab9   :  { %v4414_v14 = vadd.f32 %v4410_v5, %v9637_v41  ;;  %v4408_v49 = vmul.f32 0.17677669, %v4395_v30  ;;  %v4415_v60 = vsel %vm226_vm1, %v4411_v62, -inf }
0x1abb   :  { %v4418_v38 = vsel %vm226_vm1, %v4414_v14, -inf  ;;  %v4412_v15 = vadd.f32 %v4408_v49, %v9639_v40 }
0x1abc   :  { %v4420_v3 = vmax.f32 %v4417_v44, %v4418_v38 }
0x1abd   :  { %v4416_v52 = vsel %vm226_vm1, %v4412_v15, -inf }
0x1abe   :  { %v4419_v39 = vmax.f32 %v4415_v60, %v4416_v52 }
0x1ac0   :  { %v4421_v6 = vmax.f32 %v4419_v39, %v4420_v3 }
0x1ac2   :  { %v4422_v47 = vrot.slane %v4421_v6, 4 }
0x1ac4   :  { %v4423_v29 = vmax.f32 %v4421_v6, %v4422_v47 }
0x1ac6   :  { %v4424_v12 = vrot.slane %v4423_v29, 2 }
0x1ac8   :  { %v4425_v0 = vmax.f32 %v4423_v29, %v4424_v12 }
0x1aca   :  { %v4426_v36 = vrot.slane %v4425_v0, 1 }
0x1acc   :  { %v4427_v41 = vmax.f32 %v4425_v0, %v4426_v36 }
0x1ace   :  { %v4428_v32 = vsub.f32 %v4411_v62, %v4427_v41  ;;  %v4429_v4 = vsub.f32 %v4412_v15, %v4427_v41  ;;  %v4430_v2 = vsub.f32 %v4413_v34, %v4427_v41  ;;  %v4431_v56 = vsub.f32 %v4414_v14, %v4427_v41 }
0x1ad0   :  { %v4432_v40 = vmul.f32 1.442695, %v4428_v32  ;;  %v4434_v1 = vmul.f32 1.442695, %v4429_v4  ;;  %v4436_v22 = vmul.f32 1.442695, %v4430_v2 }
0x1ad1   :  { %v4438_v10 = vmul.f32 1.442695, %v4431_v56 }
0x1ad2   :  { %8549 = vpow2.f32 %v4432_v40 }
0x1ad3   :  { %8551 = vpow2.f32 %v4434_v1 }
0x1ad4   :  { %8553 = vpow2.f32 %v4436_v22 }
0x1ad5   :  { %8555 = vpow2.f32 %v4438_v10  ;;  %v8766_v10 = vld [vmem:[%s9698_s3 + $0x8] sm:$0xff]  }
0x1adf   :  { %v8550_v59 = vpop.eup %8549 }
0x1ae0   :  { %v8552_v8 = vpop.eup %8551  ;;  %v4440_v31 = vsel %vm226_vm1, %v8550_v59, 0.0 }
0x1ae1   :  { %v8554_v37 = vpop.eup %8553  ;;  %v4441_v16 = vsel %vm226_vm1, %v8552_v8, 0.0 }
0x1ae2   :  { %v8556_v50 = vpop.eup %8555  ;;  %v4442_v26 = vadd.f32 %v4441_v16, %v4440_v31  ;;  %v4443_v42 = vsel %vm226_vm1, %v8554_v37, 0.0  ;;  %v8772_v31 = vld [vmem:[%s9698_s3 + $0x10] sm:$0xff]  }
0x1ae3   :  { %v4445_v27 = vsel %vm226_vm1, %v8556_v50, 0.0 }
0x1ae4   :  { %v4444_v24 = vadd.f32 %v4443_v42, %v4442_v26 }
0x1ae6   :  { %v4446_v9 = vadd.f32 %v4445_v27, %v4444_v24  ;;  %v8773_v27 = vld [vmem:[%s9753_s7] ss:$0 sm:$0xff] }
0x1ae8   :  { %v4447_v17 = vrot.slane %v4446_v9, 4 }
0x1aea   :  { %v4448_v55 = vadd.f32 %v4447_v17, %v4446_v9 }
0x1aec   :  { %v4449_v18 = vrot.slane %v4448_v55, 2 }
0x1aee   :  { %v4450_v46 = vadd.f32 %v4449_v18, %v4448_v55 }
0x1af0   :  { %v4451_v35 = vrot.slane %v4450_v46, 1 }
0x1af2   :  { %v4452_v11 = vadd.f32 %v4451_v35, %v4450_v46 }
0x1af4   :  { %8557 = vrcp.f32 %v4452_v11 }
0x1b01   :  { %v8558_v54 = vpop.eup %8557 }
0x1b02   :  { %v4455_v13 = vmul.f32 %v8558_v54, %v8552_v8  ;;  %v4454_v5 = vmul.f32 %v8558_v54, %v8550_v59  ;;  %v4457_v30 = vmul.f32 %v8558_v54, %v8556_v50  ;;  %v4456_v34 = vmul.f32 %v8558_v54, %v8554_v37  ;;  %v8770_v59 = vld [vmem:[%s9688_s29 + $0x20] sm:$0xff]   ;;  %v8771_v8 = vld [vmem:[%s9698_s3 + $0x18] sm:$0xff]  }
0x1b03   :  { %v11087_v37 = vmov 0.0  }
0x1b04   :  { %v4459_v62 = vadd.f32 %v4455_v13, %v9654_v25  ;;  %v4458_v14 = vadd.f32 %v4454_v5, %v9657_v28  ;;  %v4461_v15 = vadd.f32 %v4457_v30, %v9660_v63  ;;  %v4460_v44 = vadd.f32 %v4456_v34, %v9663_v61 }
0x1b06   :  { %v4465_v49 = vsel %vm226_vm1, %v4459_v62, 0.0  ;;  %v4462_v38 = vsel %vm226_vm1, %v4458_v14, 0.0  ;;  %v4471_v60 = vsel %vm226_vm1, %v4461_v15, 0.0  ;;  %v4468_v52 = vsel %vm226_vm1, %v4460_v44, 0.0 }
0x1b07   :  { %4466 = vadd.xlane.f32.xlu1 %v4465_v49  ;;  %4463 = vadd.xlane.f32.xlu0 %v4462_v38  ;;  %v11088_v49 = vld [vmem:[#allocation17_spill] sm:$0xff] }
0x1b0b   :  { %4472 = vadd.xlane.f32.xlu1 %v4471_v60  ;;  %4469 = vadd.xlane.f32.xlu0 %v4468_v52 }
0x1b90   :  { %v4467_v3 = vpop.xlane.xlu1 %4466  ;;  %v4464_v25 = vpop.xlane.xlu0 %4463 }
0x1b91   :  { %8559 = vrcp.f32 %v4467_v3 }
0x1b92   :  { %8561 = vrcp.f32 %v4464_v25 }
0x1b94   :  { %v4473_v28 = vpop.xlane.xlu1 %4472  ;;  %v4470_v39 = vpop.xlane.xlu0 %4469 }
0x1b95   :  { %8563 = vrcp.f32 %v4473_v28 }
0x1b96   :  { %8565 = vrcp.f32 %v4470_v39 }
0x1b9e   :  { %v8560_v6 = vpop.eup %8559 }
0x1b9f   :  { %v8562_v63 = vpop.eup %8561  ;;  %v10244_v47 = vmul.f32 %v8560_v6, %v4459_v62 }
0x1ba0   :  { %v10246_v61 = vmul.f32 %v8562_v63, %v4458_v14 }
0x1ba2   :  { %v8564_v29 = vpop.eup %8563  ;;  %v4482_v12 = vpack.c.bf16 %v10244_v47, %v10246_v61 }
0x1ba3   :  { %v8566_v0 = vpop.eup %8565  ;;  %v10250_v36 = vmul.f32 %v8564_v29, %v4461_v15 }
0x1ba4   :  { %v10252_v41 = vmul.f32 %v8566_v0, %v4460_v44  ;;  %8049 = vmatprep.mubr.msk.bf16.mxu1 %vm226_vm1, %v4482_v12 }
0x1ba6   :  { %v4483_v32 = vpack.c.bf16 %v10250_v36, %v10252_v41 }
0x1ba8   :  { %8050 = vmatmul.mubr.msk.bf16.vlgmr.msra.gmra.mxu1 %vm226_vm1, %v4483_v32 }
0x1ba9   :  { %8054 = vmatpush3.bf16.msra.mxu1 %v10011_v53  ;;  %v4596_v53 = vpack.c.bf16 %v10179_v20, %v10169_v48 }
0x1baa   :  { %8055 = vmatprep.subr.bf16.mxu1 %v10015_v43 }
0x1bad   :  { %8056 = vmatpush3.bf16.msra.mxu1 %v10015_v43  ;;  %v4597_v43 = vpack.c.bf16 %v10182_v51, %v10172_v23 }
0x1bae   :  { %8061 = vmatprep.subr.bf16.mxu1 %v10020_v57 }
0x1c68   :  { %v8051_v4 = vpop.f32.mrf.mxu1 }
0x1c6a   :  { %v4524_v2 = vpop.f32.mrf.mxu1 }
0x1c6c   :  { %v8052_v56 = vpop.f32.mrf.mxu1 }
0x1c6d   :  { %v4540_v22 = vpack.c.bf16 %v8052_v56, %v8051_v4  ;;  %v11089_v4 = vld [vmem:[#allocation15_spill] sm:$0xff] }
0x1c6e   :  { %v4527_v40 = vpop.f32.mrf.mxu1 }
0x1c6f   :  { %v4539_v1 = vpack.c.bf16 %v4527_v40, %v4524_v2 }
0x1c71   :  { %8057 = vmatprep.mubr.msk.bf16.mxu1 %vm386_vm2, %v4539_v1  ;;  %8073 = vmatprep.mubr.msk.bf16.mxu0 %vm386_vm2, %v4539_v1 }
0x1c72   :  { %8058 = vmatmul.mubr.msk.bf16.vlgmr.msra.gmra.mxu1 %vm386_vm2, %v4540_v22  ;;  %8074 = vmatmul.mubr.msk.bf16.vlgmr.msra.gmra.mxu0 %vm386_vm2, %v4540_v22 }
0x1c73   :  { %8062 = vmatpush3.bf16.msra.mxu1 %v10020_v57  ;;  %8065 = vmatprep.mubr.msk.bf16.mxu1 %vm386_vm2, %v4596_v53  ;;  %v8765_v57 = vld [vmem:[%s9688_s29 + $0x18] sm:$0xff]  }
0x1c74   :  { %8086 = vmatpush3.bf16.msra.mxu0 %v10047_v33  ;;  %8089 = vmatprep.mubr.msk.bf16.mxu0 %vm386_vm2, %v4539_v1  ;;  %v8768_v33 = vld [vmem:[%s9698_s3] sm:$0xff]  }
0x1c75   :  { %8063 = vmatprep.subr.bf16.mxu1 %v10029_v7  ;;  %8087 = vmatprep.subr.bf16.mxu0 %v10054_v45 }
0x1c77   :  { %8064 = vmatpush3.bf16.msra.mxu1 %v10029_v7  ;;  %v8767_v7 = vld [vmem:[%s9688_s29 + $0x10] sm:$0xff]  }
0x1c78   :  { %8088 = vmatpush3.bf16.msra.mxu0 %v10054_v45  ;;  %8077 = vmatprep.subr.bf16.mxu1 %v8765_v57  ;;  %v8769_v45 = vld [vmem:[%s9688_s29 + $0x28] sm:$0xff]  }
0x1c79   :  { %8101 = vmatprep.subr.bf16.mxu0 %v8766_v10 }
0x1c7a   :  { %8066 = vmatmul.mubr.msk.bf16.vlgmr.msra.gmra.mxu1 %vm386_vm2, %v4597_v43 }
0x1c7b   :  { %8090 = vmatmul.mubr.msk.bf16.vlgmr.msra.gmra.mxu0 %vm386_vm2, %v4540_v22  ;;  %8078 = vmatpush3.bf16.msra.mxu1 %v8765_v57 }
0x1c7c   :  { %8081 = vmatprep.mubr.msk.bf16.mxu1 %vm386_vm2, %v4596_v53  ;;  %8079 = vmatprep.subr.bf16.mxu1 %v8767_v7 }
0x1c7d   :  { %8102 = vmatpush3.bf16.msra.mxu0 %v8766_v10 }
0x1c7e   :  { %8103 = vmatprep.subr.bf16.mxu0 %v8768_v33 }
0x1c7f   :  { %8080 = vmatpush3.bf16.msra.mxu1 %v8767_v7 }
0x1c80   :  { %8093 = vmatprep.subr.bf16.mxu1 %v8769_v45 }
0x1c81   :  { %8104 = vmatpush3.bf16.msra.mxu0 %v8768_v33 }
0x1c82   :  { %8082 = vmatmul.mubr.msk.bf16.vlgmr.msra.gmra.mxu1 %vm386_vm2, %v4597_v43 }
0x1c83   :  { %8094 = vmatpush3.bf16.msra.mxu1 %v8769_v45  ;;  %8097 = vmatprep.mubr.msk.bf16.mxu1 %vm386_vm2, %v4596_v53 }
0x1c84   :  { %8095 = vmatprep.subr.bf16.mxu1 %v8770_v59 }
0x1c87   :  { %8096 = vmatpush3.bf16.msra.mxu1 %v8770_v59 }
0x1c88   :  { %8109 = vmatprep.subr.bf16.mxu1 %v8771_v8 }
0x1c8a   :  { %8098 = vmatmul.mubr.msk.bf16.vlgmr.msra.gmra.mxu1 %vm386_vm2, %v4597_v43 }
0x1c8b   :  { %8110 = vmatpush3.bf16.msra.mxu1 %v8771_v8 }
0x1c8c   :  { %8111 = vmatprep.subr.bf16.mxu1 %v8772_v31 }
0x1c8f   :  { %8112 = vmatpush3.bf16.msra.mxu1 %v8772_v31 }
0x1c90   :  { %8125 = vmatprep.subr.bf16.mxu1 %v11087_v37 }
0x1d32   :  { %v8059_v16 = vpop.f32.mrf.mxu1  ;;  %v8075_v42 = vpop.f32.mrf.mxu0 }
0x1d33   :  { %v4590_v9 = vadd.f32 %v8773_v27, %v8059_v16  ;;  %v4728_v38 = vadd.f32 %v11088_v49, %v8075_v42 }
0x1d34   :  { %v4581_v50 = vpop.f32.mrf.mxu1  ;;  %v4719_v46 = vpop.f32.mrf.mxu0 }
0x1d35   :  { %v4582_v55 = vadd.f32 %v8773_v27, %v4581_v50  ;;  %v4720_v25 = vadd.f32 %v11088_v49, %v4719_v46 }
0x1d36   :  { %v8060_v26 = vpop.f32.mrf.mxu1  ;;  %v8076_v15 = vpop.f32.mrf.mxu0 }
0x1d37   :  { %v4593_v11 = vadd.f32 %v8773_v27, %v8060_v26  ;;  %v4731_v29 = vadd.f32 %v11088_v49, %v8076_v15 }
0x1d38   :  { %v4584_v24 = vpop.f32.mrf.mxu1  ;;  %v4722_v12 = vpop.f32.mrf.mxu0 }
0x1d39   :  { %v4585_v30 = vadd.f32 %v8773_v27, %v4584_v24  ;;  %v4723_v1 = vadd.f32 %v11088_v49, %v4722_v12 }
0x1d3a   :  { %v8067_v17 = vpop.f32.mrf.mxu1 }
0x1d3b   :  { %v4655_v18 = vadd.f32 %v8067_v17, %v4590_v9  ;;  %v8091_v17 = vpop.f32.mrf.mxu0 }
0x1d3c   :  { %v4638_v35 = vpop.f32.mrf.mxu1 }
0x1d3d   :  { %v4659_v54 = vadd.f32 %v10072_v21, %v4655_v18  ;;  %v4653_v13 = vadd.f32 %v4638_v35, %v4582_v55  ;;  %v4849_v35 = vpop.f32.mrf.mxu0 }
0x1d3e   :  { %v8068_v5 = vpop.f32.mrf.mxu1 }
0x1d3f   :  { %v7107_v34 = vmul.f32 -1.442695, %v4659_v54  ;;  %v4657_v62 = vadd.f32 %v10072_v21, %v4653_v13  ;;  %v4656_v14 = vadd.f32 %v8068_v5, %v4593_v11 }
0x1d40   :  { %v4641_v44 = vpop.f32.mrf.mxu1 }
0x1d41   :  { %8567 = vpow2.f32 %v7107_v34  ;;  %v7105_v60 = vmul.f32 -1.442695, %v4657_v62  ;;  %v4660_v52 = vadd.f32 %v10072_v21, %v4656_v14  ;;  %v4654_v3 = vadd.f32 %v4641_v44, %v4585_v30  ;;  %v8092_v14 = vpop.f32.mrf.mxu0 }
0x1d42   :  { %v8083_v28 = vpop.f32.mrf.mxu1 }
0x1d43   :  { %8569 = vpow2.f32 %v7105_v60  ;;  %v7108_v39 = vmul.f32 -1.442695, %v4660_v52  ;;  %v4658_v6 = vadd.f32 %v10072_v21, %v4654_v3  ;;  %v4785_v63 = vadd.f32 %v8083_v28, %v4728_v38  ;;  %v4852_v12 = vpop.f32.mrf.mxu0 }
0x1d44   :  { %v4768_v0 = vpop.f32.mrf.mxu1  ;;  %v4858_v38 = vadd.f32 %v10099_v58, %v8091_v17  ;;  %v4850_v52 = vadd.f32 %v10099_v58, %v4849_v35 }
0x1d45   :  { %8571 = vpow2.f32 %v7108_v39  ;;  %v7106_v32 = vmul.f32 -1.442695, %v4658_v6  ;;  %v4789_v2 = vadd.f32 %v11089_v4, %v4785_v63  ;;  %v4783_v56 = vadd.f32 %v4768_v0, %v4720_v25 }
0x1d46   :  { %v8084_v40 = vpop.f32.mrf.mxu1 }
0x1d47   :  { %8573 = vpow2.f32 %v7106_v32  ;;  %v4787_v22 = vadd.f32 %v11089_v4, %v4783_v56  ;;  %v4786_v53 = vadd.f32 %v8084_v40, %v4731_v29  ;;  %v7115_v43 = vmul.f32 -1.442695, %v4789_v2 }
0x1d48   :  { %v4771_v57 = vpop.f32.mrf.mxu1  ;;  %v4861_v29 = vadd.f32 %v10099_v58, %v8092_v14  ;;  %v4853_v56 = vadd.f32 %v10099_v58, %v4852_v12 }
0x1d49   :  { %v7113_v21 = vmul.f32 -1.442695, %v4787_v22  ;;  %v4790_v10 = vadd.f32 %v11089_v4, %v4786_v53  ;;  %v4784_v7 = vadd.f32 %v4771_v57, %v4723_v1  ;;  %8575 = vpow2.f32 %v7115_v43 }
0x1d4a   :  { %v8099_v27 = vpop.f32.mrf.mxu1 }
0x1d4b   :  { %v7116_v33 = vmul.f32 -1.442695, %v4790_v10  ;;  %v4788_v45 = vadd.f32 %v11089_v4, %v4784_v7  ;;  %8577 = vpow2.f32 %v7113_v21  ;;  %v4907_v34 = vadd.f32 %v10095_v19, %v8099_v27 }
0x1d4c   :  { %v4898_v55 = vpop.f32.mrf.mxu1 }
0x1d4d   :  { %v7114_v59 = vmul.f32 -1.442695, %v4788_v45  ;;  %8579 = vpow2.f32 %v7116_v33  ;;  %v4899_v44 = vadd.f32 %v10095_v19, %v4898_v55 }
0x1d4e   :  { %v8568_v8 = vpop.eup %8567  ;;  %v8100_v13 = vpop.f32.mrf.mxu1 }
0x1d4f   :  { %v4675_v31 = vadd.f32 1.0, %v8568_v8  ;;  %8581 = vpow2.f32 %v7114_v59  ;;  %v4910_v6 = vadd.f32 %v10095_v19, %v8100_v13 }
0x1d50   :  { %v8570_v16 = vpop.eup %8569  ;;  %v4901_v25 = vpop.f32.mrf.mxu1 }
0x1d51   :  { %8583 = vrcp.f32 %v4675_v31  ;;  %v4673_v50 = vadd.f32 1.0, %v8570_v16  ;;  %v4902_v4 = vadd.f32 %v10095_v19, %v4901_v25 }
0x1d52   :  { %v8572_v26 = vpop.eup %8571 }
0x1d53   :  { %8585 = vrcp.f32 %v4673_v50  ;;  %v4676_v42 = vadd.f32 1.0, %v8572_v26 }
0x1d54   :  { %v8574_v24 = vpop.eup %8573 }
0x1d55   :  { %8587 = vrcp.f32 %v4676_v42  ;;  %v4674_v9 = vadd.f32 1.0, %v8574_v24 }
0x1d56   :  { %v8576_v18 = vpop.eup %8575 }
0x1d57   :  { %8589 = vrcp.f32 %v4674_v9  ;;  %v4805_v54 = vadd.f32 1.0, %v8576_v18 }
0x1d58   :  { %v8578_v46 = vpop.eup %8577 }
0x1d59   :  { %v4803_v30 = vadd.f32 1.0, %v8578_v46  ;;  %8591 = vrcp.f32 %v4805_v54 }
0x1d5a   :  { %v8580_v11 = vpop.eup %8579 }
0x1d5b   :  { %v4806_v49 = vadd.f32 1.0, %v8580_v11  ;;  %8593 = vrcp.f32 %v4803_v30  ;;  %v8806_v11 = vmov 0  }
0x1d5c   :  { %v8582_v5 = vpop.eup %8581  ;;  %8313 = vset.pattern.permute.xlu0 %v8806_v11 }
0x1d5d   :  { %v4804_v3 = vadd.f32 1.0, %v8582_v5  ;;  %8595 = vrcp.f32 %v4806_v49 }
0x1d5e   :  { %v8584_v62 = vpop.eup %8583 }
0x1d5f   :  { %v4915_v15 = vmul.f32 %v8584_v62, %v4907_v34 }
0x1d60   :  { %v8586_v60 = vpop.eup %8585 }
0x1d61   :  { %v4919_v28 = vadd.f32 %v4915_v15, %v4858_v38  ;;  %v4913_v39 = vmul.f32 %v8586_v60, %v4899_v44 }
0x1d62   :  { %v8588_v63 = vpop.eup %8587 }
0x1d63   :  { %8597 = vtanh.f32 %v4919_v28  ;;  %v4917_v0 = vadd.f32 %v4913_v39, %v4850_v52  ;;  %v4916_v32 = vmul.f32 %v8588_v63, %v4910_v6 }
0x1d64   :  { %v8590_v2 = vpop.eup %8589  ;;  %8599 = vrcp.f32 %v4804_v3 }
0x1d65   :  { %8601 = vtanh.f32 %v4917_v0  ;;  %v4920_v40 = vadd.f32 %v4916_v32, %v4861_v29  ;;  %v4914_v1 = vmul.f32 %v8590_v2, %v4902_v4 }
0x1d66   :  { %v8592_v53 = vpop.eup %8591 }
0x1d67   :  { %8603 = vtanh.f32 %v4920_v40  ;;  %v4918_v22 = vadd.f32 %v4914_v1, %v4853_v56  ;;  %v4927_v33 = vsub.f32 1.0, %v8592_v53  ;;  %v4935_v50 = vmul.f32 %v8592_v53, %v10172_v23 }
0x1d68   :  { %v8594_v43 = vpop.eup %8593 }
0x1d69   :  { %8605 = vtanh.f32 %v4918_v22  ;;  %v4925_v7 = vsub.f32 1.0, %v8594_v43  ;;  %v4933_v19 = vmul.f32 %v8594_v43, %v10169_v48 }
0x1d6a   :  { %v8596_v57 = vpop.eup %8595 }
0x1d6b   :  { %v4928_v26 = vsub.f32 1.0, %v8596_v57  ;;  %v4936_v18 = vmul.f32 %v8596_v57, %v10182_v51  ;;  %v76_v51 = vstv %s6817_s21 }
0x1d6c   :  { %77 = vst [vmem:[#allocation2] sm:$0x1] %v76_v51 }
0x1d70   :  { %v8598_v21 = vpop.eup %8597 }
0x1d71   :  { %v8600_v10 = vpop.eup %8599  ;;  %v4931_v8 = vmul.f32 %v8598_v21, %v4927_v33 }
0x1d72   :  { %v8602_v45 = vpop.eup %8601  ;;  %v4926_v16 = vsub.f32 1.0, %v8600_v10  ;;  %v4934_v24 = vmul.f32 %v8600_v10, %v10179_v20 }
0x1d73   :  { %v4929_v59 = vmul.f32 %v8602_v45, %v4925_v7  ;;  %v10321_v17 = vadd.f32 %v4935_v50, %v4931_v8  ;;  %v1700_v12 = vld [vmem:[#allocation2] sm:$0x1] }
0x1d74   :  { %v8604_v31 = vpop.eup %8603 }
0x1d75   :  { %v10315_v58 = vadd.f32 %v4933_v19, %v4929_v59  ;;  %v4932_v55 = vmul.f32 %v8604_v31, %v4928_v26  ;;  %v4947_v23 = vsel %vm386_vm2, %v10321_v17, 0.0  ;;  %v8774_v19 = vld [vmem:[%s9456_s13 + $0x2] ss:$0 sm:$0xff]  ;;  %s8808_s13 = smov 31  }
0x1d76   :  { %v8606_v42 = vpop.eup %8605  ;;  %s6832_s24 = sld [smem:[%s11042_s0 + %s8808_s13]]  }
0x1d77   :  { %v4941_v27 = vsel %vm386_vm2, %v10315_v58, 0.0  ;;  %v4930_v9 = vmul.f32 %v8606_v42, %v4926_v16  ;;  %v10330_v35 = vadd.f32 %v4936_v18, %v4932_v55 }
0x1d78   :  { %4942 = vadd.xlane.f32.xlu0 %v4941_v27 }
0x1d79   :  { %v10323_v48 = vadd.f32 %v4934_v24, %v4930_v9  ;;  %v4950_v20 = vsel %vm386_vm2, %v10330_v35, 0.0  ;;  %v8775_v24 = vld [vmem:[%s9461_s17 + $0x2] ss:$0 sm:$0xff]  ;;  %s8809_s17 = smov 4  }
0x1d7a   :  { %s10356_s27 = sld [smem:[%s11042_s0 + %s8809_s17]]  }
0x1d7b   :  { %v4944_v46 = vsel %vm386_vm2, %v10323_v48, 0.0 }
0x1d7c   :  { %4945 = vadd.xlane.f32.xlu1 %v4944_v46  ;;  %4948 = vadd.xlane.f32.xlu0 %v4947_v23 }
0x1d80   :  { %4951 = vadd.xlane.f32.xlu1 %v4950_v20 }
0x1e01   :  { %v4943_v54 = vpop.xlane.xlu0 %4942 }
0x1e02   :  { %v4953_v13 = vmul.f32 0.03125, %v4943_v54 }
0x1e04   :  { %v4957_v5 = vsub.f32 %v10315_v58, %v4953_v13  ;;  %v8776_v13 = vld [vmem:[%s9871_s18] ss:$0 sm:$0xff] }
0x1e05   :  { %v4946_v30 = vpop.xlane.xlu1 %4945  ;;  %v4949_v34 = vpop.xlane.xlu0 %4948 }
0x1e06   :  { %v4954_v62 = vmul.f32 0.03125, %v4946_v30  ;;  %v4955_v14 = vmul.f32 0.03125, %v4949_v34  ;;  %v4961_v49 = vmul.f32 %v4957_v5, %v4957_v5 }
0x1e08   :  { %v4958_v38 = vsub.f32 %v10323_v48, %v4954_v62  ;;  %v4959_v15 = vsub.f32 %v10321_v17, %v4955_v14  ;;  %v4965_v44 = vsel %vm386_vm2, %v4961_v49, 0.0 }
0x1e09   :  { %v4952_v60 = vpop.xlane.xlu1 %4951  ;;  %4966 = vadd.xlane.f32.xlu0 %v4965_v44 }
0x1e0a   :  { %v4956_v52 = vmul.f32 0.03125, %v4952_v60  ;;  %v4962_v3 = vmul.f32 %v4958_v38, %v4958_v38  ;;  %v4963_v25 = vmul.f32 %v4959_v15, %v4959_v15 }
0x1e0c   :  { %v4960_v28 = vsub.f32 %v10330_v35, %v4956_v52  ;;  %v4968_v39 = vsel %vm386_vm2, %v4962_v3, 0.0  ;;  %v4971_v6 = vsel %vm386_vm2, %v4963_v25, 0.0  ;;  %v8369_v52 = vld [vmem:[%s6832_s24 + $0x8] sm:$0xff]   ;;  %v8370_v25 = vld [vmem:[%s6832_s24] sm:$0xff]  }
0x1e0d   :  { %4969 = vadd.xlane.f32.xlu1 %v4968_v39  ;;  %4972 = vadd.xlane.f32.xlu0 %v4971_v6  ;;  %v11090_v39 = vld [vmem:[#allocation9_spill] sm:$0xff] }
0x1e0e   :  { %v4964_v63 = vmul.f32 %v4960_v28, %v4960_v28  ;;  %v6654_v6 = vld [vmem:[%s10356_s27 + $0x38] sm:$0xff] }
0x1e10   :  { %v4974_v29 = vsel %vm386_vm2, %v4964_v63, 0.0  ;;  %v6653_v63 = vld [vmem:[%s10356_s27 + $0x30] sm:$0xff] }
0x1e11   :  { %4975 = vadd.xlane.f32.xlu1 %v4974_v29  ;;  %v6652_v29 = vld [vmem:[%s10356_s27 + $0x28] sm:$0xff] }
0x1e23   :  { %1703 = vperm.xlu0 %8313, %v1700_v12   ;;  %v6651_v12 = vld [vmem:[%s10356_s27 + $0x20] sm:$0xff] }
0x1e92   :  { %v4967_v0 = vpop.xlane.xlu0 %4966 }
0x1e93   :  { %v4977_v32 = vmul.f32 0.03125, %v4967_v0  ;;  %v11091_v0 = vld [vmem:[#allocation8_spill] sm:$0xff] }
0x1e95   :  { %v4981_v4 = vadd.f32 1e-05, %v4977_v32  ;;  %v6650_v32 = vld [vmem:[%s10356_s27 + $0x18] sm:$0xff] }
0x1e96   :  { %v4970_v2 = vpop.xlane.xlu1 %4969  ;;  %v4973_v56 = vpop.xlane.xlu0 %4972 }
0x1e97   :  { %8607 = vrsqrt.f32 %v4981_v4  ;;  %v4978_v40 = vmul.f32 0.03125, %v4970_v2  ;;  %v4979_v1 = vmul.f32 0.03125, %v4973_v56  ;;  %v6649_v4 = vld [vmem:[%s10356_s27 + $0x10] sm:$0xff]  ;;  %v6648_v2 = vld [vmem:[%s10356_s27 + $0x8] sm:$0xff]  ;;  %v6647_v56 = vld [vmem:[%s10356_s27] sm:$0xff] }
0x1e99   :  { %v4982_v22 = vadd.f32 1e-05, %v4978_v40  ;;  %v4983_v53 = vadd.f32 1e-05, %v4979_v1  ;;  %v11092_v40 = vld [vmem:[#allocation7_spill] sm:$0xff]  ;;  %v11093_v1 = vld [vmem:[#allocation6_spill] sm:$0xff] }
0x1e9a   :  { %v4976_v43 = vpop.xlane.xlu1 %4975 }
0x1e9b   :  { %8609 = vrsqrt.f32 %v4982_v22  ;;  %v4980_v57 = vmul.f32 0.03125, %v4976_v43  ;;  %v11094_v22 = vld [vmem:[#allocation5_spill] sm:$0xff] }
0x1e9c   :  { %8611 = vrsqrt.f32 %v4983_v53 }
0x1e9d   :  { %v4984_v21 = vadd.f32 1e-05, %v4980_v57 }
0x1e9f   :  { %8613 = vrsqrt.f32 %v4984_v21 }
0x1ea4   :  { %v8608_v10 = vpop.eup %8607 }
0x1ea5   :  { %v4989_v7 = vmul.f32 %v8608_v10, %v4957_v5 }
0x1ea7   :  { %v4993_v8 = vmul.f32 %v8774_v19, %v4989_v7 }
0x1ea8   :  { %v8610_v33 = vpop.eup %8609 }
0x1ea9   :  { %v8612_v45 = vpop.eup %8611  ;;  %v4990_v59 = vmul.f32 %v8610_v33, %v4958_v38  ;;  %v4997_v27 = vadd.f32 %v8775_v24, %v4993_v8  ;;  %v8777_v33 = vld [vmem:[%s9871_s18 + $0x1] ss:$0 sm:$0xff] }
0x1eaa   :  { %v4991_v31 = vmul.f32 %v8612_v45, %v4959_v15 }
0x1eab   :  { %v4994_v16 = vmul.f32 %v8774_v19, %v4990_v59 }
0x1eac   :  { %v8614_v50 = vpop.eup %8613  ;;  %v4995_v26 = vmul.f32 %v8774_v19, %v4991_v31 }
0x1ead   :  { %v4992_v42 = vmul.f32 %v8614_v50, %v4960_v28  ;;  %v4998_v9 = vadd.f32 %v8775_v24, %v4994_v16  ;;  %v6655_v28 = vld [vmem:[%s10356_s27 + $0x40] sm:$0xff] }
0x1eae   :  { %v4999_v46 = vadd.f32 %v8775_v24, %v4995_v26 }
0x1eaf   :  { %v4996_v55 = vmul.f32 %v8774_v19, %v4992_v42  ;;  %v5001_v18 = vpack.c.bf16 %v4998_v9, %v4997_v27 }
0x1eb1   :  { %8105 = vmatprep.mubr.msk.bf16.mxu0 %vm386_vm2, %v5001_v18  ;;  %v5000_v23 = vadd.f32 %v8775_v24, %v4996_v55 }
0x1eb3   :  { %v5002_v20 = vpack.c.bf16 %v5000_v23, %v4999_v46 }
0x1eb5   :  { %8106 = vmatmul.mubr.msk.bf16.vlgmr.msra.gmra.mxu0 %vm386_vm2, %v5002_v20 }
0x1f75   :  { %v8107_v11 = vpop.f32.mrf.mxu0 }
0x1f76   :  { %v5052_v34 = vadd.f32 %v8776_v13, %v8107_v11 }
0x1f77   :  { %v5043_v51 = vpop.f32.mrf.mxu0 }
0x1f78   :  { %v5044_v5 = vadd.f32 %v8776_v13, %v5043_v51  ;;  %v5060_v44 = vmax.f32 %v5052_v34, 0.0  ;;  %v7130_v51 = vld [vmem:[%s6834_s5] ss:$0 sm:$0xff] }
0x1f79   :  { %v8108_v54 = vpop.f32.mrf.mxu0 }
0x1f7a   :  { %v5055_v30 = vadd.f32 %v8776_v13, %v8108_v54  ;;  %v5058_v38 = vmax.f32 %v5044_v5, 0.0 }
0x1f7b   :  { %v5046_v62 = vpop.f32.mrf.mxu0 }
0x1f7c   :  { %v5047_v14 = vadd.f32 %v8776_v13, %v5046_v62  ;;  %v5061_v49 = vmax.f32 %v5055_v30, 0.0 }
0x1f7e   :  { %v5059_v15 = vmax.f32 %v5047_v14, 0.0  ;;  %v5063_v3 = vpack.c.bf16 %v5061_v49, %v5060_v44 }
0x1f80   :  { %v5062_v60 = vpack.c.bf16 %v5059_v15, %v5058_v38 }
0x1f82   :  { %8113 = vmatprep.mubr.msk.bf16.mxu1 %vm386_vm2, %v5062_v60 }
0x1f83   :  { %8114 = vmatmul.mubr.msk.bf16.vlgmr.msra.gmra.mxu1 %vm386_vm2, %v5063_v3 }
0x1f84   :  { %8126 = vmatpush3.bf16.msra.mxu1 %v8369_v52  ;;  %8129 = vmatprep.mubr.msk.bf16.mxu1 %vm8784_vm3, %v11087_v37 }
0x1f85   :  { %8127 = vmatprep.subr.bf16.mxu1 %v11087_v37 }
0x1f88   :  { %8128 = vmatpush3.bf16.msra.mxu1 %v8370_v25 }
0x1f89   :  { %8191 = vmatprep.subr.mxu1 %v11087_v37 }
0x1f8b   :  { %8130 = vmatmul.mubr.msk.bf16.vlgmr.msra.gmra.mxu1 %vm386_vm2, %v11090_v39 }
0x1f8c   :  { %8133 = vmatprep.mubr.msk.bf16.mxu1 %vm8784_vm3, %v11087_v37  ;;  %8192 = vmatpush3.msra.mxu1 %v6655_v28 }
0x1f8d   :  { %8193 = vmatprep.subr.mxu1 %v11087_v37 }
0x1f8e   :  { %8194 = vmatpush3.msra.mxu1 %v6654_v6 }
0x1f8f   :  { %8195 = vmatprep.subr.mxu1 %v11087_v37 }
0x1f90   :  { %8196 = vmatpush3.msra.mxu1 %v6653_v63 }
0x1f91   :  { %8197 = vmatprep.subr.mxu1 %v11087_v37 }
0x1f92   :  { %8198 = vmatpush3.msra.mxu1 %v6652_v29 }
0x1f93   :  { %8134 = vmatmul.mubr.msk.bf16.gmra.mxu1 %vm386_vm2, %v11091_v0  ;;  %8199 = vmatprep.subr.mxu1 %v11087_v37 }
0x1f94   :  { %8137 = vmatprep.mubr.msk.bf16.mxu1 %vm8784_vm3, %v11087_v37  ;;  %8200 = vmatpush3.msra.mxu1 %v6651_v12 }
0x1f95   :  { %8201 = vmatprep.subr.mxu1 %v11087_v37 }
0x1f96   :  { %8202 = vmatpush3.msra.mxu1 %v6650_v32 }
0x1f97   :  { %8203 = vmatprep.subr.mxu1 %v11087_v37 }
0x1f98   :  { %8204 = vmatpush3.msra.mxu1 %v6649_v4 }
0x1f99   :  { %8205 = vmatprep.subr.mxu1 %v11087_v37 }
0x1f9a   :  { %8206 = vmatpush3.msra.mxu1 %v6648_v2 }
0x1f9b   :  { %8138 = vmatmul.mubr.msk.bf16.gmra.mxu1 %vm386_vm2, %v11092_v40  ;;  %8207 = vmatprep.subr.mxu1 %v11087_v37 }
0x1f9c   :  { %8141 = vmatprep.mubr.msk.bf16.mxu1 %vm8784_vm3, %v11087_v37  ;;  %8208 = vmatpush3.msra.mxu1 %v6647_v56 }
0x1fa3   :  { %8142 = vmatmul.mubr.msk.bf16.gmra.mxu1 %vm386_vm2, %v11093_v1 }
0x1fa4   :  { %8145 = vmatprep.mubr.msk.bf16.mxu1 %vm8784_vm3, %v11087_v37 }
0x1fab   :  { %8146 = vmatmul.mubr.msk.bf16.gmra.mxu1 %vm386_vm2, %v11094_v22 }
0x1fac   :  { %8209 = vmatprep.mubr.msk.f32.mxu1 %vm8784_vm3, %v11087_v37 }
0x1fb3   :  { %8210 = vmatmul.mubr.msk.f32.vlgmr.msra.gmra.mxu1 %vm226_vm1, %v10246_v61  ;;  %v8372_v61 = vld [vmem:[%s6831_s1] sm:$0xff]  }
0x1fb4   :  { %8212 = vmatprep.mubr.msk.f32.mxu1 %vm8784_vm3, %v11087_v37 }
0x1fb7   :  { %8213 = vmatmul.mubr.msk.f32.gmra.mxu1 %vm226_vm1, %v10244_v47  ;;  %v8371_v47 = vld [vmem:[%s6831_s1 + $0x8] sm:$0xff]  }
0x1fb8   :  { %8215 = vmatprep.mubr.msk.f32.mxu1 %vm8784_vm3, %v11087_v37  ;;  %8117 = vmatprep.subr.bf16.mxu0 %v8371_v47 }
0x1fb9   :  { %8118 = vmatpush3.bf16.msra.mxu0 %v8371_v47 }
0x1fba   :  { %8119 = vmatprep.subr.bf16.mxu0 %v8372_v61 }
0x1fbb   :  { %8216 = vmatmul.mubr.msk.f32.gmra.mxu1 %vm226_vm1, %v10252_v41 }
0x1fbc   :  { %8218 = vmatprep.mubr.msk.f32.mxu1 %vm8784_vm3, %v11087_v37 }
0x1fbd   :  { %8120 = vmatpush3.bf16.msra.mxu0 %v8372_v61 }
0x1fbf   :  { %8219 = vmatmul.mubr.msk.f32.gmra.mxu1 %vm226_vm1, %v10250_v36 }
0x1fc0   :  { %8221 = vmatprep.mubr.msk.f32.mxu1 %vm8784_vm3, %v11087_v37 }
0x2043   :  { %v8115_v41 = vpop.f32.mrf.mxu1 }
0x2044   :  { %v5121_v21 = vadd.f32 %v8115_v41, %v10321_v17  ;;  %v8814_v41 = vmov 1966171168  }
0x2045   :  { %v5104_v53 = vpop.f32.mrf.mxu1 }
0x2046   :  { %v5119_v36 = vadd.f32 %v5104_v53, %v10315_v58  ;;  %v5125_v31 = vadd.f32 %v8777_v33, %v5121_v21  ;;  %v5308_v53 = vunpack.c.l.s4 %v8814_v41 }
0x2047   :  { %v8116_v43 = vpop.f32.mrf.mxu1 }
0x2048   :  { %v5122_v57 = vadd.f32 %v8116_v43, %v10330_v35  ;;  %v5123_v19 = vadd.f32 %v8777_v33, %v5119_v36  ;;  %v5309_v36 = vunpack.c.0.s8 %v5308_v53 }
0x2049   :  { %v5107_v10 = vpop.f32.mrf.mxu1 }
0x204a   :  { %v5120_v7 = vadd.f32 %v5107_v10, %v10323_v48  ;;  %v5126_v45 = vadd.f32 %v8777_v33, %v5122_v57  ;;  %v10455_v57 = vld [vmem:[%s6833_s15] ss:$0 sm:$0xff] }
0x204b   :  { %v10425_v59 = vpop.f32.mrf.mxu1 }
0x204c   :  { %v5124_v8 = vadd.f32 %v8777_v33, %v5120_v7  ;;  %v5132_v26 = vpack.c.bf16 %v5126_v45, %v5125_v31  ;;  %v5265_v1 = vadd.f32 %v7130_v51, %v10425_v59  ;;  %v11095_v7 = vld [vmem:[#allocation3_spill] sm:$0xff] }
0x204d   :  { %v8131_v16 = vpop.f32.mrf.mxu1  ;;  %v10459_v33 = vsub.s32 %v5309_v36, %v11095_v7 }
0x204e   :  { %v5131_v50 = vpack.c.bf16 %v5124_v8, %v5123_v19 }
0x204f   :  { %v5267_v42 = vpop.f32.mrf.mxu1 }
0x2050   :  { %8121 = vmatprep.mubr.msk.bf16.mxu0 %vm386_vm2, %v5131_v50  ;;  %v5268_v40 = vadd.f32 %v7130_v51, %v5267_v42 }
0x2051   :  { %8122 = vmatmul.mubr.msk.bf16.vlgmr.msra.gmra.mxu0 %vm386_vm2, %v5132_v26  ;;  %v8132_v58 = vpop.f32.mrf.mxu1 }
0x2052   :  { %v5711_v22 = vpack.c.bf16 %v5268_v40, %v5265_v1  ;;  %v11096_v58 = vld [vmem:[#allocation4_spill] sm:$0xff] }
0x2053   :  { %v5272_v17 = vpop.f32.mrf.mxu1 }
0x2054   :  { %v5273_v0 = vadd.f32 %v7130_v51, %v5272_v17  ;;  %v5797_v61 = vsel %vm386_vm2, %v5711_v22, 0 }
0x2055   :  { %v8135_v35 = vpop.f32.mrf.mxu1 }
0x2057   :  { %v5275_v24 = vpop.f32.mrf.mxu1 }
0x2058   :  { %v5276_v29 = vadd.f32 %v7130_v51, %v5275_v24 }
0x2059   :  { %v8136_v48 = vpop.f32.mrf.mxu1 }
0x205a   :  { %v5712_v4 = vpack.c.bf16 %v5276_v29, %v5273_v0 }
0x205b   :  { %v5280_v27 = vpop.f32.mrf.mxu1 }
0x205c   :  { %v5281_v3 = vadd.f32 %v7130_v51, %v5280_v27  ;;  %v5800_v47 = vsel %vm386_vm2, %v5712_v4, 0 }
0x205d   :  { %v8139_v9 = vpop.f32.mrf.mxu1 }
0x205f   :  { %v5283_v55 = vpop.f32.mrf.mxu1 }
0x2060   :  { %v5284_v60 = vadd.f32 %v7130_v51, %v5283_v55  ;;  %v10474_v55 = vld [vmem:[%s6835_s19] sm:$0xff] }
0x2061   :  { %v8140_v18 = vpop.f32.mrf.mxu1 }
0x2062   :  { %v5713_v28 = vpack.c.bf16 %v5284_v60, %v5281_v3 }
0x2063   :  { %v5288_v46 = vpop.f32.mrf.mxu1 }
0x2064   :  { %v5289_v34 = vadd.f32 %v7130_v51, %v5288_v46  ;;  %v5803_v2 = vsel %vm386_vm2, %v5713_v28, 0 }
0x2065   :  { %v8143_v23 = vpop.f32.mrf.mxu1 }
0x2067   :  { %v5291_v20 = vpop.f32.mrf.mxu1 }
0x2068   :  { %v5292_v13 = vadd.f32 %v7130_v51, %v5291_v20 }
0x2069   :  { %v8144_v11 = vpop.f32.mrf.mxu1 }
0x206a   :  { %v5714_v49 = vpack.c.bf16 %v5292_v13, %v5289_v34 }
0x206b   :  { %v5296_v54 = vpop.f32.mrf.mxu1 }
0x206c   :  { %v5297_v5 = vadd.f32 %v7130_v51, %v5296_v54  ;;  %v5806_v39 = vsel %vm386_vm2, %v5714_v49, 0 }
0x206d   :  { %v8147_v30 = vpop.f32.mrf.mxu1 }
0x206e   :  { %v5715_v62 = vpack.c.bf16 %v5297_v5, %v5297_v5 }
0x206f   :  { %v5299_v14 = vpop.f32.mrf.mxu1 }
0x2070   :  { %v5809_v38 = vsel %vm386_vm2, %v5715_v62, 0  ;;  %8268 = vmatprep.subr.msk.bf16.mxu0 %vm386_vm2, %v5715_v62 }
0x2071   :  { %v8148_v15 = vpop.f32.mrf.mxu1  ;;  %8150 = vmatpush3.bf16.xpose.msra.mxu0 %v5809_v38 }
0x2072   :  { %8269 = vmatprep.subr.msk.bf16.mxu0 %vm386_vm2, %v5714_v49 }
0x2073   :  { %v6745_v44 = vpop.f32.mrf.mxu1 }
0x2074   :  { %6789 = vst [vmem:[%s10435_s10] sm:$0xff] %v6745_v44 }
0x2075   :  { %v8211_v52 = vpop.f32.mrf.mxu1 }
0x2077   :  { %v6750_v25 = vpop.f32.mrf.mxu1 }
0x2078   :  { %6790 = vst [vmem:[%s10435_s10 + $0x8] sm:$0xff] %v6750_v25 }
0x2079   :  { %8152 = vmatpush3.bf16.xpose.msra.mxu0 %v5806_v39  ;;  %v8214_v6 = vpop.f32.mrf.mxu1 }
0x207a   :  { %8270 = vmatprep.subr.msk.bf16.mxu0 %vm386_vm2, %v5713_v28 }
0x207b   :  { %v6755_v63 = vpop.f32.mrf.mxu1 }
0x207c   :  { %6791 = vst [vmem:[%s10435_s10 + $0x10] sm:$0xff] %v6755_v63 }
0x207d   :  { %v8217_v12 = vpop.f32.mrf.mxu1 }
0x207f   :  { %v6760_v32 = vpop.f32.mrf.mxu1 }
0x2080   :  { %6792 = vst [vmem:[%s10435_s10 + $0x18] sm:$0xff] %v6760_v32 }
0x2081   :  { %8154 = vmatpush3.bf16.xpose.msra.mxu0 %v5803_v2  ;;  %v8220_v56 = vpop.f32.mrf.mxu1 }
0x2082   :  { %8271 = vmatprep.subr.msk.bf16.mxu0 %vm386_vm2, %v5712_v4 }
0x2089   :  { %8156 = vmatpush3.bf16.xpose.msra.mxu0 %v5800_v47 }
0x208a   :  { %8272 = vmatprep.subr.msk.bf16.mxu0 %vm386_vm2, %v5711_v22 }
0x2091   :  { %8158 = vmatpush3.bf16.xpose.msra.mxu0 %v5797_v61 }
0x2111   :  { %v8123_v43 = vpop.f32.mrf.mxu0 }
0x2112   :  { %v5201_v52 = vadd.f32 %v8123_v43, %v10455_v57 }
0x2113   :  { %v5192_v21 = vpop.f32.mrf.mxu0 }
0x2114   :  { %v5193_v10 = vadd.f32 %v10455_v57, %v5192_v21  ;;  %v5411_v32 = vrot.slane %v5201_v52, %v10459_v33  ;;  %v5404_v43 = vcombine.high %v5201_v52, %v5201_v52 }
0x2115   :  { %v10466_v31 = vpop.f32.mrf.mxu0 }
0x2116   :  { %v5313_v45 = vrot.slane %v5193_v10, %v10459_v33  ;;  %v5306_v59 = vcombine.high %v5193_v10, %v5193_v10  ;;  %v5419_v36 = vcombine.high %v5411_v32, %v5411_v32 }
0x2117   :  { %v5195_v35 = vpop.f32.mrf.mxu0 }
0x2118   :  { %v5321_v19 = vcombine.high %v5313_v45, %v5313_v45  ;;  %v5329_v8 = vrot.slane %v5313_v45, %v10459_v33  ;;  %v5320_v16 = vrot.slane %v5306_v59, %v10459_v33  ;;  %v5196_v46 = vadd.f32 %v10455_v57, %v5195_v35 }
0x211a   :  { %v5343_v50 = vrot.slane %v5321_v19, %v10459_v33  ;;  %v5351_v26 = vcombine.high %v5329_v8, %v5329_v8  ;;  %v5506_v17 = vrot.slane %v5329_v8, %v11096_v58  ;;  %v5322_v24 = vcombine.high %v5320_v16, %v5320_v16 }
0x211b   :  { %v5336_v18 = vrot.slane %v5320_v16, %v10459_v33  ;;  %v5355_v13 = vcombine.high %v5196_v46, %v5196_v46  ;;  %v5362_v30 = vrot.slane %v5196_v46, %v10459_v33  ;;  %v5418_v8 = vrot.slane %v5404_v43, %v10459_v33 }
0x211c   :  { %v5353_v42 = vcombine.high %v5343_v50, %v5343_v50  ;;  %v5510_v48 = vrot.slane %v5343_v50, %v11096_v58  ;;  %v5514_v27 = vrot.slane %v5351_v26, %v11096_v58  ;;  %v5663_v23 = vmul.f32 %v5506_v17, %v10474_v55 }
0x211d   :  { %v5350_v54 = vrot.slane %v5322_v24, %v10459_v33  ;;  %v5352_v62 = vcombine.high %v5336_v18, %v5336_v18  ;;  %v5369_v14 = vrot.slane %v5355_v13, %v10459_v33  ;;  %v5370_v49 = vcombine.high %v5362_v30, %v5362_v30 }
0x211e   :  { %v5518_v9 = vrot.slane %v5353_v42, %v11096_v58  ;;  %v5665_v20 = vmul.f32 %v5514_v27, %v10474_v55  ;;  %v5664_v51 = vmul.f32 %v5510_v48, %v10474_v55  ;;  %v5378_v44 = vrot.slane %v5362_v30, %v10459_v33 }
0x211f   :  { %v5354_v38 = vcombine.high %v5350_v54, %v5350_v54  ;;  %v5526_v15 = vrot.slane %v5350_v54, %v11096_v58  ;;  %v5522_v60 = vrot.slane %v5336_v18, %v11096_v58  ;;  %v5530_v3 = vrot.slane %v5352_v62, %v11096_v58 }
0x2120   :  { %v5666_v11 = vmul.f32 %v5518_v9, %v10474_v55  ;;  %v5695_v34 = vpack.c.bf16 %v5664_v51, %v5663_v23  ;;  %v5371_v25 = vcombine.high %v5369_v14, %v5369_v14  ;;  %v5392_v28 = vrot.slane %v5370_v49, %v10459_v33 }
0x2121   :  { %v5534_v39 = vrot.slane %v5354_v38, %v11096_v58  ;;  %v5668_v6 = vmul.f32 %v5526_v15, %v10474_v55  ;;  %v5538_v63 = vrot.slane %v5378_v44, %v11096_v58  ;;  %v5667_v0 = vmul.f32 %v5522_v60, %v10474_v55 }
0x2122   :  { %v5696_v5 = vpack.c.bf16 %v5666_v11, %v5665_v20  ;;  %8159 = vmatprep.mubr.msk.bf16.mxu0 %vm386_vm2, %v5695_v34  ;;  %v5402_v29 = vcombine.high %v5392_v28, %v5392_v28  ;;  %v5542_v12 = vrot.slane %v5392_v28, %v11096_v58  ;;  %v5669_v4 = vmul.f32 %v5530_v3, %v10474_v55 }
0x2123   :  { %v5399_v2 = vrot.slane %v5371_v25, %v10459_v33  ;;  %v5400_v56 = vcombine.high %v5378_v44, %v5378_v44  ;;  %v5697_v40 = vpack.c.bf16 %v5668_v6, %v5667_v0  ;;  %v5670_v1 = vmul.f32 %v5534_v39, %v10474_v55 }
0x2124   :  { %8160 = vmatmul.mubr.msk.bf16.vlgmr.msra.gmra.mxu0 %vm386_vm2, %v5696_v5  ;;  %v5672_v22 = vmul.f32 %v5542_v12, %v10474_v55  ;;  %v5385_v47 = vrot.slane %v5369_v14, %v10459_v33  ;;  %v5671_v61 = vmul.f32 %v5538_v63, %v10474_v55  ;;  %v5550_v41 = vrot.slane %v5402_v29, %v11096_v58 }
0x2125   :  { %8163 = vmatprep.mubr.msk.bf16.mxu0 %vm386_vm2, %v5697_v40  ;;  %v5698_v53 = vpack.c.bf16 %v5670_v1, %v5669_v4  ;;  %v5558_v21 = vrot.slane %v5399_v2, %v11096_v58  ;;  %v5546_v7 = vrot.slane %v5400_v56, %v11096_v58  ;;  %v5403_v59 = vcombine.high %v5399_v2, %v5399_v2 }
0x2126   :  { %v5699_v10 = vpack.c.bf16 %v5672_v22, %v5671_v61  ;;  %v5554_v45 = vrot.slane %v5385_v47, %v11096_v58  ;;  %v5674_v19 = vmul.f32 %v5550_v41, %v10474_v55  ;;  %v5441_v16 = vrot.slane %v5419_v36, %v10459_v33 }
0x2127   :  { %v5676_v50 = vmul.f32 %v5558_v21, %v10474_v55  ;;  %v5401_v26 = vcombine.high %v5385_v47, %v5385_v47  ;;  %v5673_v42 = vmul.f32 %v5546_v7, %v10474_v55  ;;  %v5427_v17 = vrot.slane %v5411_v32, %v10459_v33 }
0x2128   :  { %v5675_v35 = vmul.f32 %v5554_v45, %v10474_v55  ;;  %v5566_v24 = vrot.slane %v5403_v59, %v11096_v58  ;;  %v5420_v27 = vcombine.high %v5418_v8, %v5418_v8  ;;  %v5574_v9 = vrot.slane %v5441_v16, %v11096_v58 }
0x2129   :  { %v5700_v48 = vpack.c.bf16 %v5674_v19, %v5673_v42  ;;  %v5204_v18 = vadd.f32 %v10466_v31, %v10455_v57  ;;  %v5562_v23 = vrot.slane %v5401_v26, %v11096_v58  ;;  %v5570_v20 = vrot.slane %v5427_v17, %v11096_v58 }
0x212a   :  { %v5701_v46 = vpack.c.bf16 %v5676_v50, %v5675_v35  ;;  %v5451_v11 = vcombine.high %v5441_v16, %v5441_v16  ;;  %v5678_v51 = vmul.f32 %v5566_v24, %v10474_v55  ;;  %v5448_v54 = vrot.slane %v5420_v27, %v10459_v33 }
0x212b   :  { %v5460_v13 = vrot.slane %v5204_v18, %v10459_v33  ;;  %v5680_v5 = vmul.f32 %v5574_v9, %v10474_v55  ;;  %v5449_v30 = vcombine.high %v5427_v17, %v5427_v17  ;;  %v5677_v57 = vmul.f32 %v5562_v23, %v10474_v55 }
0x212c   :  { %8164 = vmatmul.mubr.msk.bf16.gmra.mxu0 %vm386_vm2, %v5698_v53  ;;  %v5434_v31 = vrot.slane %v5418_v8, %v10459_v33  ;;  %v5679_v34 = vmul.f32 %v5570_v20, %v10474_v55  ;;  %v5582_v62 = vrot.slane %v5451_v11, %v11096_v58  ;;  %v5590_v49 = vrot.slane %v5448_v54, %v11096_v58  ;;  %v5718_v20 = vld [vmem:[%s10579_s22 + $0x10] sm:$0xff] }
0x212d   :  { %8167 = vmatprep.mubr.msk.bf16.mxu0 %vm386_vm2, %v5699_v10  ;;  %v5702_v14 = vpack.c.bf16 %v5678_v51, %v5677_v57  ;;  %v5453_v38 = vcombine.high %v5204_v18, %v5204_v18  ;;  %v5468_v15 = vcombine.high %v5460_v13, %v5460_v13  ;;  %v5578_v60 = vrot.slane %v5449_v30, %v11096_v58  ;;  %v5716_v51 = vld [vmem:[%s10579_s22] sm:$0xff]  ;;  %v5719_v30 = vld [vmem:[%s10579_s22 + $0x18] sm:$0xff] }
0x212e   :  { %v5703_v44 = vpack.c.bf16 %v5680_v5, %v5679_v34  ;;  %v5586_v52 = vrot.slane %v5434_v31, %v11096_v58  ;;  %v5452_v3 = vcombine.high %v5448_v54, %v5448_v54  ;;  %v5682_v25 = vmul.f32 %v5582_v62, %v10474_v55 }
0x212f   :  { %v5467_v28 = vrot.slane %v5453_v38, %v10459_v33  ;;  %v5490_v39 = vrot.slane %v5468_v15, %v10459_v33  ;;  %v5684_v6 = vmul.f32 %v5590_v49, %v10474_v55  ;;  %v5450_v63 = vcombine.high %v5434_v31, %v5434_v31  ;;  %v5722_v15 = vld [vmem:[%s10579_s22 + $0x30] sm:$0xff] }
0x2130   :  { %v5681_v29 = vmul.f32 %v5578_v60, %v10474_v55  ;;  %v5476_v12 = vrot.slane %v5460_v13, %v10459_v33  ;;  %v5683_v0 = vmul.f32 %v5586_v52, %v10474_v55  ;;  %v5598_v32 = vrot.slane %v5452_v3, %v11096_v58 }
0x2131   :  { %v5469_v2 = vcombine.high %v5467_v28, %v5467_v28  ;;  %v5606_v56 = vrot.slane %v5490_v39, %v11096_v58  ;;  %v5594_v1 = vrot.slane %v5450_v63, %v11096_v58  ;;  %v5500_v47 = vcombine.high %v5490_v39, %v5490_v39 }
0x2132   :  { %v5704_v4 = vpack.c.bf16 %v5682_v25, %v5681_v29  ;;  %v5705_v40 = vpack.c.bf16 %v5684_v6, %v5683_v0  ;;  %v5602_v22 = vrot.slane %v5476_v12, %v11096_v58  ;;  %v5686_v61 = vmul.f32 %v5598_v32, %v10474_v55  ;;  %v5720_v25 = vld [vmem:[%s10579_s22 + $0x20] sm:$0xff]  ;;  %v5723_v29 = vld [vmem:[%s10579_s22 + $0x38] sm:$0xff] }
0x2133   :  { %v5497_v41 = vrot.slane %v5469_v2, %v10459_v33  ;;  %v5688_v53 = vmul.f32 %v5606_v56, %v10474_v55  ;;  %v5685_v43 = vmul.f32 %v5594_v1, %v10474_v55  ;;  %v5498_v36 = vcombine.high %v5476_v12, %v5476_v12  ;;  %v5727_v32 = vld [vmem:[%s10579_s22 + $0x58] sm:$0xff]  ;;  %v5721_v56 = vld [vmem:[%s10579_s22 + $0x28] sm:$0xff] }
0x2134   :  { %8168 = vmatmul.mubr.msk.bf16.gmra.mxu0 %vm386_vm2, %v5700_v48  ;;  %v5483_v21 = vrot.slane %v5467_v28, %v10459_v33  ;;  %v5687_v10 = vmul.f32 %v5602_v22, %v10474_v55  ;;  %v5614_v7 = vrot.slane %v5500_v47, %v11096_v58 }
0x2135   :  { %8171 = vmatprep.mubr.msk.bf16.mxu0 %vm386_vm2, %v5701_v46  ;;  %v5706_v45 = vpack.c.bf16 %v5686_v61, %v5685_v43  ;;  %v5622_v59 = vrot.slane %v5497_v41, %v11096_v58  ;;  %v5610_v8 = vrot.slane %v5498_v36, %v11096_v58  ;;  %v5501_v50 = vcombine.high %v5497_v41, %v5497_v41 }
0x2136   :  { %v5707_v19 = vpack.c.bf16 %v5688_v53, %v5687_v10  ;;  %v5618_v16 = vrot.slane %v5483_v21, %v11096_v58  ;;  %v5690_v26 = vmul.f32 %v5614_v7, %v10474_v55  ;;  %v5499_v42 = vcombine.high %v5483_v21, %v5483_v21  ;;  %v5726_v53 = vld [vmem:[%s10579_s22 + $0x50] sm:$0xff]  ;;  %v5724_v7 = vld [vmem:[%s10579_s22 + $0x40] sm:$0xff] }
0x2137   :  { %v5692_v33 = vmul.f32 %v5622_v59, %v10474_v55  ;;  %v5689_v17 = vmul.f32 %v5610_v8, %v10474_v55  ;;  %v5630_v24 = vrot.slane %v5501_v50, %v11096_v58 }
0x2138   :  { %v5691_v35 = vmul.f32 %v5618_v16, %v10474_v55  ;;  %v5626_v9 = vrot.slane %v5499_v42, %v11096_v58  ;;  %v5725_v16 = vld [vmem:[%s10579_s22 + $0x48] sm:$0xff] }
0x2139   :  { %v5708_v48 = vpack.c.bf16 %v5690_v26, %v5689_v17  ;;  %v5694_v18 = vmul.f32 %v5630_v24, %v10474_v55  ;;  %v5730_v17 = vld [vmem:[%s10579_s22 + $0x70] sm:$0xff] }
0x213a   :  { %v5709_v27 = vpack.c.bf16 %v5692_v33, %v5691_v35  ;;  %v5693_v46 = vmul.f32 %v5626_v9, %v10474_v55 }
0x213c   :  { %8172 = vmatmul.mubr.msk.bf16.gmra.mxu0 %vm386_vm2, %v5702_v14  ;;  %v5710_v23 = vpack.c.bf16 %v5694_v18, %v5693_v46  ;;  %v5717_v14 = vld [vmem:[%s10579_s22 + $0x8] sm:$0xff]  ;;  %v5728_v18 = vld [vmem:[%s10579_s22 + $0x60] sm:$0xff] }
0x213d   :  { %8175 = vmatprep.mubr.msk.bf16.mxu0 %vm386_vm2, %v5703_v44 }
0x2144   :  { %8176 = vmatmul.mubr.msk.bf16.gmra.mxu0 %vm386_vm2, %v5704_v4 }
0x2145   :  { %8179 = vmatprep.mubr.msk.bf16.mxu0 %vm386_vm2, %v5705_v40 }
0x214c   :  { %8180 = vmatmul.mubr.msk.bf16.gmra.mxu0 %vm386_vm2, %v5706_v45 }
0x214d   :  { %8183 = vmatprep.mubr.msk.bf16.mxu0 %vm386_vm2, %v5707_v19 }
0x2154   :  { %8184 = vmatmul.mubr.msk.bf16.gmra.mxu0 %vm386_vm2, %v5708_v48  ;;  %v5738_v48 = vld [vmem:[%s10579_s22 + $0xb0] sm:$0xff] }
0x2155   :  { %8187 = vmatprep.mubr.msk.bf16.mxu0 %vm386_vm2, %v5709_v27 }
0x215c   :  { %8188 = vmatmul.mubr.msk.bf16.gmra.mxu0 %vm386_vm2, %v5710_v23  ;;  %v5736_v23 = vld [vmem:[%s10579_s22 + $0xa0] sm:$0xff]  ;;  %vm6614_vm2 = vcmask 1042434  }
0x21e4   :  { %v8161_v11 = vpop.f32.mrf.mxu0 }
0x21e5   :  { %v10583_v54 = vadd.f32 %v8161_v11, %v5718_v20 }
0x21e6   :  { %v5845_v55 = vpop.f32.mrf.mxu0 }
0x21e7   :  { %v10585_v13 = vadd.f32 %v5845_v55, %v5716_v51  ;;  %v5978_v5 = vsel %vm226_vm1, %v10583_v54, -inf }
0x21e8   :  { %5979 = vmax.xlane.f32.xlu1 %v5978_v5  ;;  %v8162_v57 = vpop.f32.mrf.mxu0 }
0x21e9   :  { %v10590_v31 = vadd.f32 %v8162_v57, %v5719_v30  ;;  %v5972_v34 = vsel %vm226_vm1, %v10585_v13, -inf  ;;  %v5731_v57 = vld [vmem:[%s10579_s22 + $0x78] sm:$0xff] }
0x21ea   :  { %v5848_v62 = vpop.f32.mrf.mxu0 }
0x21eb   :  { %v10595_v49 = vadd.f32 %v5848_v62, %v5717_v14  ;;  %v5981_v38 = vsel %vm226_vm1, %v10590_v31, -inf }
0x21ec   :  { %5973 = vmax.xlane.f32.xlu1 %v5972_v34  ;;  %v8165_v44 = vpop.f32.mrf.mxu0  ;;  %v5739_v34 = vld [vmem:[%s10579_s22 + $0xb8] sm:$0xff] }
0x21ed   :  { %v10600_v52 = vadd.f32 %v8165_v44, %v5722_v15  ;;  %v5975_v3 = vsel %vm226_vm1, %v10595_v49, -inf }
0x21ee   :  { %v5861_v60 = vpop.f32.mrf.mxu0 }
0x21ef   :  { %v10605_v6 = vadd.f32 %v5861_v60, %v5720_v25  ;;  %v5990_v63 = vsel %vm226_vm1, %v10600_v52, -inf }
0x21f0   :  { %5982 = vmax.xlane.f32.xlu1 %v5981_v38  ;;  %v8166_v28 = vpop.f32.mrf.mxu0 }
0x21f1   :  { %v10611_v4 = vadd.f32 %v8166_v28, %v5723_v29  ;;  %v5984_v2 = vsel %vm226_vm1, %v10605_v6, -inf  ;;  %v5740_v28 = vld [vmem:[%s10579_s22 + $0xc0] sm:$0xff] }
0x21f2   :  { %v5864_v39 = vpop.f32.mrf.mxu0 }
0x21f3   :  { %v10618_v47 = vadd.f32 %v5864_v39, %v5721_v56  ;;  %v5993_v41 = vsel %vm226_vm1, %v10611_v4, -inf  ;;  %v1704_v39 = vpop.permute.xlu0 %1703 }
0x21f4   :  { %5976 = vmax.xlane.f32.xlu1 %v5975_v3  ;;  %v8169_v12 = vpop.f32.mrf.mxu0  ;;  %v5729_v3 = vld [vmem:[%s10579_s22 + $0x68] sm:$0xff] }
0x21f5   :  { %v10625_v21 = vadd.f32 %v8169_v12, %v5726_v53  ;;  %v5987_v10 = vsel %vm226_vm1, %v10618_v47, -inf }
0x21f6   :  { %v5877_v0 = vpop.f32.mrf.mxu0 }
0x21f7   :  { %v10630_v19 = vadd.f32 %v5877_v0, %v5724_v7  ;;  %v6002_v8 = vsel %vm226_vm1, %v10625_v21, -inf  ;;  %v11097_v7 = vld [vmem:[#allocation10_spill] sm:$0xff] }
0x21f8   :  { %5991 = vmax.xlane.f32.xlu1 %v5990_v63  ;;  %v8170_v40 = vpop.f32.mrf.mxu0 }
0x21f9   :  { %v10616_v1 = vadd.f32 %v8170_v40, %v5727_v32  ;;  %v5996_v42 = vsel %vm226_vm1, %v10630_v19, -inf  ;;  %v1709_v40 = vrot.slane %v1704_v39, %v11096_v58 }
0x21fa   :  { %v5880_v22 = vpop.f32.mrf.mxu0 }
0x21fb   :  { %v6005_v61 = vsel %vm226_vm1, %v10616_v1, -inf  ;;  %v10635_v33 = vadd.f32 %v5880_v22, %v5725_v16 }
0x21fc   :  { %5985 = vmax.xlane.f32.xlu1 %v5984_v2  ;;  %6006 = vmax.xlane.f32.xlu0 %v6005_v61  ;;  %v8173_v43 = vpop.f32.mrf.mxu0  ;;  %v5734_v2 = vld [vmem:[%s10579_s22 + $0x90] sm:$0xff] }
0x21fd   :  { %v10645_v27 = vadd.f32 %v8173_v43, %v5730_v17  ;;  %v5999_v9 = vsel %vm226_vm1, %v10635_v33, -inf  ;;  %v5732_v43 = vld [vmem:[%s10579_s22 + $0x80] sm:$0xff]  ;;  %v5735_v17 = vld [vmem:[%s10579_s22 + $0x98] sm:$0xff] }
0x21fe   :  { %v5893_v36 = vpop.f32.mrf.mxu0 }
0x21ff   :  { %v10653_v51 = vadd.f32 %v5893_v36, %v5728_v18  ;;  %v6014_v30 = vsel %vm226_vm1, %v10645_v27, -inf }
0x2200   :  { %5994 = vmax.xlane.f32.xlu1 %v5993_v41  ;;  %v8174_v45 = vpop.f32.mrf.mxu0 }
0x2201   :  { %v10663_v38 = vadd.f32 %v8174_v45, %v5731_v57  ;;  %v6008_v60 = vsel %vm226_vm1, %v10653_v51, -inf  ;;  %v1763_v45 = vadd.f32 %v11097_v7, %v1709_v40  ;;  %v5737_v57 = vld [vmem:[%s10579_s22 + $0xa8] sm:$0xff] }
0x2202   :  { %v5896_v59 = vpop.f32.mrf.mxu0  ;;  %v5745_v40 = vld [vmem:[%s10579_s22 + $0xe8] sm:$0xff] }
0x2203   :  { %v10673_v29 = vadd.f32 %v5896_v59, %v5729_v3  ;;  %v6017_v32 = vsel %vm226_vm1, %v10663_v38, -inf  ;;  %v5746_v59 = vld [vmem:[%s10579_s22 + $0xf0] sm:$0xff]  ;;  %v1772_v18 = vrot.slane %v1763_v45, %v11096_v58 }
0x2204   :  { %5988 = vmax.xlane.f32.xlu1 %v5987_v10  ;;  %v8177_v50 = vpop.f32.mrf.mxu0  ;;  %v5744_v10 = vld [vmem:[%s10579_s22 + $0xe0] sm:$0xff] }
0x2205   :  { %v10686_v61 = vadd.f32 %v8177_v50, %v5734_v2  ;;  %v6011_v53 = vsel %vm226_vm1, %v10673_v29, -inf }
0x2206   :  { %v5909_v26 = vpop.f32.mrf.mxu0 }
0x2207   :  { %v10696_v16 = vadd.f32 %v5909_v26, %v5732_v43 }
0x2208   :  { %6003 = vmax.xlane.f32.xlu1 %v6002_v8  ;;  %v10640_v35 = vpop.f32.mrf.mxu0 }
0x2209   :  { %v10709_v26 = vadd.f32 %v10640_v35, %v5735_v17 }
0x220a   :  { %v10642_v24 = vpop.f32.mrf.mxu0 }
0x220b   :  { %v6029_v35 = vsel %vm226_vm1, %v10709_v26, -inf }
0x220c   :  { %5997 = vmax.xlane.f32.xlu1 %v5996_v42  ;;  %v8181_v46 = vpop.f32.mrf.mxu0  ;;  %v6026_v42 = vsel %vm226_vm1, %v10686_v61, -inf }
0x220d   :  { %v10651_v20 = vadd.f32 %v8181_v46, %v5738_v48  ;;  %v1768_v46 = vld [vmem:[%s6807_s25] sm:$0xff] }
0x220e   :  { %v5925_v11 = vpop.f32.mrf.mxu0 }
0x220f   :  { %v10655_v55 = vadd.f32 %v5925_v11, %v5736_v23  ;;  %v6038_v5 = vsel %vm226_vm1, %v10651_v20, -inf  ;;  %v6020_v23 = vsel %vm226_vm1, %v10696_v16, -inf  ;;  %v5733_v11 = vld [vmem:[%s10579_s22 + $0x88] sm:$0xff] }
0x2210   :  { %6000 = vmax.xlane.f32.xlu1 %v5999_v9  ;;  %6039 = vmax.xlane.f32.xlu0 %v6038_v5  ;;  %v8182_v62 = vpop.f32.mrf.mxu0  ;;  %v10719_v58 = vadd.f32 %v10642_v24, %v5733_v11 }
0x2211   :  { %v10665_v15 = vadd.f32 %v8182_v62, %v5739_v34  ;;  %v6032_v44 = vsel %vm226_vm1, %v10655_v55, -inf }
0x2212   :  { %v5928_v14 = vpop.f32.mrf.mxu0 }
0x2213   :  { %v6041_v0 = vsel %vm226_vm1, %v10665_v15, -inf  ;;  %v10726_v62 = vadd.f32 %v5928_v14, %v5737_v57 }
0x2214   :  { %6015 = vmax.xlane.f32.xlu1 %v6014_v30  ;;  %v8185_v25 = vpop.f32.mrf.mxu0  ;;  %6033 = vmax.xlane.f32.xlu0 %v6032_v44  ;;  %v10716_v30 = vadd.f32 %v1772_v18, %v1768_v46  ;;  %v6023_v44 = vsel %vm226_vm1, %v10719_v58, -inf }
0x2215   :  { %v6035_v3 = vsel %vm226_vm1, %v10726_v62, -inf }
0x2216   :  { %v5941_v63 = vpop.f32.mrf.mxu0  ;;  %v1774_v34 = vsel %vm226_vm1, %v10716_v30, -inf }
0x2217   :  { %v10675_v12 = vadd.f32 %v5941_v63, %v5740_v28  ;;  %v5743_v28 = vld [vmem:[%s10579_s22 + $0xd8] sm:$0xff]  ;;  %v5741_v63 = vld [vmem:[%s10579_s22 + $0xc8] sm:$0xff] }
0x2218   :  { %6009 = vmax.xlane.f32.xlu1 %v6008_v60  ;;  %v8186_v56 = vpop.f32.mrf.mxu0  ;;  %6042 = vmax.xlane.f32.xlu0 %v6041_v0  ;;  %v5742_v60 = vld [vmem:[%s10579_s22 + $0xd0] sm:$0xff] }
0x2219   :  { %v6044_v41 = vsel %vm226_vm1, %v10675_v12, -inf  ;;  %v10731_v24 = vadd.f32 %v8185_v25, %v5742_v60  ;;  %v10736_v39 = vadd.f32 %v8186_v56, %v5743_v28 }
0x221a   :  { %v5944_v22 = vpop.f32.mrf.mxu0 }
0x221b   :  { %v6050_v14 = vsel %vm226_vm1, %v10731_v24, -inf  ;;  %v6053_v25 = vsel %vm226_vm1, %v10736_v39, -inf }
0x221c   :  { %6018 = vmax.xlane.f32.xlu1 %v6017_v32  ;;  %v8189_v36 = vpop.f32.mrf.mxu0  ;;  %6045 = vmax.xlane.f32.xlu0 %v6044_v41  ;;  %v10741_v32 = vadd.f32 %v5944_v22, %v5741_v63 }
0x221d   :  { %v10703_v48 = vadd.f32 %v8189_v36, %v5746_v59 }
0x221e   :  { %v5957_v8 = vpop.f32.mrf.mxu0  ;;  %v6047_v56 = vsel %vm226_vm1, %v10741_v32, -inf }
0x221f   :  { %v10698_v50 = vadd.f32 %v5957_v8, %v5744_v10  ;;  %v6062_v5 = vsel %vm226_vm1, %v10703_v48, -inf }
0x2220   :  { %6012 = vmax.xlane.f32.xlu1 %v6011_v53  ;;  %v8190_v0 = vpop.f32.mrf.mxu0  ;;  %v5747_v53 = vld [vmem:[%s10579_s22 + $0xf8] sm:$0xff] }
0x2221   :  { %v6056_v9 = vsel %vm226_vm1, %v10698_v50, -inf  ;;  %v10751_v43 = vadd.f32 %v8190_v0, %v5747_v53 }
0x2222   :  { %6057 = vmax.xlane.f32.xlu0 %v6056_v9  ;;  %v5960_v2 = vpop.f32.mrf.mxu0 }
0x2223   :  { %v10746_v41 = vadd.f32 %v5960_v2, %v5745_v40  ;;  %v6065_v22 = vsel %vm226_vm1, %v10751_v43, -inf }
0x2224   :  { %6027 = vmax.xlane.f32.xlu1 %v6026_v42 }
0x2225   :  { %v6059_v36 = vsel %vm226_vm1, %v10746_v41, -inf }
0x2226   :  { %6063 = vmax.xlane.f32.xlu0 %v6062_v5 }
0x2228   :  { %6021 = vmax.xlane.f32.xlu1 %v6020_v23 }
0x222a   :  { %1775 = vmax.xlane.f32.xlu0 %v1774_v34 }
0x222c   :  { %6030 = vmax.xlane.f32.xlu1 %v6029_v35 }
0x2230   :  { %6024 = vmax.xlane.f32.xlu1 %v6023_v44 }
0x2234   :  { %6036 = vmax.xlane.f32.xlu1 %v6035_v3 }
0x2238   :  { %6051 = vmax.xlane.f32.xlu1 %v6050_v14 }
0x223c   :  { %6054 = vmax.xlane.f32.xlu1 %v6053_v25 }
0x2240   :  { %6048 = vmax.xlane.f32.xlu1 %v6047_v56 }
0x2244   :  { %6060 = vmax.xlane.f32.xlu1 %v6059_v36 }
0x2248   :  { %6066 = vmax.xlane.f32.xlu1 %v6065_v22 }
0x2271   :  { %v5980_v10 = vpop.xlane.xlu1 %5979 }
0x2272   :  { %v6070_v7 = vsub.f32 %v10583_v54, %v5980_v10 }
0x2274   :  { %v6104_v45 = vmul.f32 1.442695, %v6070_v7 }
0x2275   :  { %v5974_v59 = vpop.xlane.xlu1 %5973 }
0x2276   :  { %8615 = vpow2.f32 %v6104_v45  ;;  %v6068_v8 = vsub.f32 %v10585_v13, %v5974_v59 }
0x2278   :  { %v6100_v42 = vmul.f32 1.442695, %v6068_v8 }
0x2279   :  { %v5983_v17 = vpop.xlane.xlu1 %5982 }
0x227a   :  { %8617 = vpow2.f32 %v6100_v42  ;;  %v6071_v9 = vsub.f32 %v10590_v31, %v5983_v17 }
0x227c   :  { %v6106_v18 = vmul.f32 1.442695, %v6071_v9 }
0x227d   :  { %v5977_v46 = vpop.xlane.xlu1 %5976 }
0x227e   :  { %8619 = vpow2.f32 %v6106_v18  ;;  %v6069_v23 = vsub.f32 %v10595_v49, %v5977_v46 }
0x2280   :  { %v6102_v11 = vmul.f32 1.442695, %v6069_v23 }
0x2281   :  { %v5992_v5 = vpop.xlane.xlu1 %5991 }
0x2282   :  { %8621 = vpow2.f32 %v6102_v11  ;;  %v6074_v54 = vsub.f32 %v10600_v52, %v5992_v5 }
0x2283   :  { %v10762_v35 = vpop.eup %8615 }
0x2284   :  { %v6112_v57 = vmul.f32 1.442695, %v6074_v54  ;;  %v6170_v13 = vsel %vm226_vm1, %v10762_v35, 0.0 }
0x2285   :  { %6171 = vadd.xlane.f32.xlu1 %v6170_v13  ;;  %v5986_v34 = vpop.xlane.xlu1 %5985  ;;  %v6007_v0 = vpop.xlane.xlu0 %6006 }
0x2286   :  { %8623 = vpow2.f32 %v6112_v57  ;;  %v6072_v31 = vsub.f32 %v10605_v6, %v5986_v34  ;;  %v6079_v40 = vsub.f32 %v10616_v1, %v6007_v0 }
0x2287   :  { %v10767_v44 = vpop.eup %8617 }
0x2288   :  { %v6108_v60 = vmul.f32 1.442695, %v6072_v31  ;;  %v6164_v49 = vsel %vm226_vm1, %v10767_v44, 0.0  ;;  %v6122_v10 = vmul.f32 1.442695, %v6079_v40 }
0x2289   :  { %6165 = vadd.xlane.f32.xlu1 %v6164_v49  ;;  %v5995_v3 = vpop.xlane.xlu1 %5994 }
0x228a   :  { %8625 = vpow2.f32 %v6108_v60  ;;  %v6075_v52 = vsub.f32 %v10611_v4, %v5995_v3 }
0x228b   :  { %v10772_v28 = vpop.eup %8619 }
0x228c   :  { %v6114_v14 = vmul.f32 1.442695, %v6075_v52  ;;  %v6173_v63 = vsel %vm226_vm1, %v10772_v28, 0.0 }
0x228d   :  { %v5989_v25 = vpop.xlane.xlu1 %5988  ;;  %6174 = vadd.xlane.f32.xlu0 %v6173_v63 }
0x228e   :  { %v6073_v6 = vsub.f32 %v10618_v47, %v5989_v25  ;;  %8627 = vpow2.f32 %v6114_v14 }
0x228f   :  { %v10777_v2 = vpop.eup %8621 }
0x2290   :  { %v6110_v56 = vmul.f32 1.442695, %v6073_v6  ;;  %v6167_v4 = vsel %vm226_vm1, %v10777_v2, 0.0 }
0x2291   :  { %v6004_v53 = vpop.xlane.xlu1 %6003  ;;  %6168 = vadd.xlane.f32.xlu0 %v6167_v4 }
0x2292   :  { %8629 = vpow2.f32 %v6110_v56  ;;  %v6078_v36 = vsub.f32 %v10625_v21, %v6004_v53 }
0x2293   :  { %v10783_v22 = vpop.eup %8623 }
0x2294   :  { %v6120_v7 = vmul.f32 1.442695, %v6078_v36  ;;  %v6182_v47 = vsel %vm226_vm1, %v10783_v22, 0.0 }
0x2295   :  { %6183 = vadd.xlane.f32.xlu1 %v6182_v47  ;;  %v5998_v45 = vpop.xlane.xlu1 %5997 }
0x2296   :  { %8631 = vpow2.f32 %v6120_v7  ;;  %v6076_v1 = vsub.f32 %v10630_v19, %v5998_v45 }
0x2297   :  { %v10788_v59 = vpop.eup %8625  ;;  %8633 = vpow2.f32 %v6122_v10 }
0x2298   :  { %v6116_v8 = vmul.f32 1.442695, %v6076_v1  ;;  %v6176_v42 = vsel %vm226_vm1, %v10788_v59, 0.0 }
0x2299   :  { %6177 = vadd.xlane.f32.xlu1 %v6176_v42  ;;  %v6001_v21 = vpop.xlane.xlu1 %6000  ;;  %v6040_v34 = vpop.xlane.xlu0 %6039 }
0x229a   :  { %8635 = vpow2.f32 %v6116_v8  ;;  %v6077_v17 = vsub.f32 %v10635_v33, %v6001_v21  ;;  %v6090_v36 = vsub.f32 %v10651_v20, %v6040_v34 }
0x229b   :  { %v10793_v9 = vpop.eup %8627 }
0x229c   :  { %v6118_v18 = vmul.f32 1.442695, %v6077_v17  ;;  %v6185_v46 = vsel %vm226_vm1, %v10793_v9, 0.0  ;;  %v6144_v8 = vmul.f32 1.442695, %v6090_v36 }
0x229d   :  { %v6016_v23 = vpop.xlane.xlu1 %6015  ;;  %6186 = vadd.xlane.f32.xlu1 %v6185_v46  ;;  %v6034_v0 = vpop.xlane.xlu0 %6033 }
0x229e   :  { %8637 = vpow2.f32 %v6118_v18  ;;  %v6082_v19 = vsub.f32 %v10645_v27, %v6016_v23  ;;  %v6088_v42 = vsub.f32 %v10655_v55, %v6034_v0 }
0x229f   :  { %v10798_v11 = vpop.eup %8629 }
0x22a0   :  { %v6128_v5 = vmul.f32 1.442695, %v6082_v19  ;;  %v6179_v54 = vsel %vm226_vm1, %v10798_v11, 0.0  ;;  %v6140_v23 = vmul.f32 1.442695, %v6088_v42 }
0x22a1   :  { %v6010_v57 = vpop.xlane.xlu1 %6009  ;;  %6180 = vadd.xlane.f32.xlu0 %v6179_v54  ;;  %v6043_v10 = vpop.xlane.xlu0 %6042 }
0x22a2   :  { %v6080_v33 = vsub.f32 %v10653_v51, %v6010_v57  ;;  %8639 = vpow2.f32 %v6128_v5 }
0x22a3   :  { %v10803_v13 = vpop.eup %8631 }
0x22a4   :  { %v6124_v31 = vmul.f32 1.442695, %v6080_v33  ;;  %v6194_v60 = vsel %vm226_vm1, %v10803_v13, 0.0  ;;  %v10807_v49 = vpop.eup %8633 }
0x22a5   :  { %v6019_v27 = vpop.xlane.xlu1 %6018  ;;  %6195 = vadd.xlane.f32.xlu0 %v6194_v60  ;;  %v6197_v63 = vsel %vm226_vm1, %v10807_v49, 0.0  ;;  %v6046_v20 = vpop.xlane.xlu0 %6045 }
0x22a6   :  { %v6083_v3 = vsub.f32 %v10663_v38, %v6019_v27  ;;  %8641 = vpow2.f32 %v6124_v31  ;;  %v6092_v31 = vsub.f32 %v10675_v12, %v6046_v20 }
0x22a7   :  { %v10810_v52 = vpop.eup %8635 }
0x22a8   :  { %v6130_v14 = vmul.f32 1.442695, %v6083_v3  ;;  %v6188_v51 = vsel %vm226_vm1, %v10810_v52, 0.0 }
0x22a9   :  { %6189 = vadd.xlane.f32.xlu1 %v6188_v51  ;;  %v6013_v25 = vpop.xlane.xlu1 %6012  ;;  %6198 = vadd.xlane.f32.xlu0 %v6197_v63  ;;  %v6148_v63 = vmul.f32 1.442695, %v6092_v31 }
0x22aa   :  { %v6081_v6 = vsub.f32 %v10673_v29, %v6013_v25  ;;  %8643 = vpow2.f32 %v6130_v14 }
0x22ab   :  { %v10817_v40 = vpop.eup %8637  ;;  %v6058_v55 = vpop.xlane.xlu0 %6057 }
0x22ac   :  { %v6126_v38 = vmul.f32 1.442695, %v6081_v6  ;;  %v6191_v56 = vsel %vm226_vm1, %v10817_v40, 0.0  ;;  %v6096_v51 = vsub.f32 %v10698_v50, %v6058_v55 }
0x22ad   :  { %v6028_v4 = vpop.xlane.xlu1 %6027  ;;  %6192 = vadd.xlane.f32.xlu0 %v6191_v56 }
0x22ae   :  { %v6086_v53 = vsub.f32 %v10686_v61, %v6028_v4  ;;  %8645 = vpow2.f32 %v6126_v38 }
0x22af   :  { %v10823_v7 = vpop.eup %8639 }
0x22b0   :  { %v6136_v47 = vmul.f32 1.442695, %v6086_v53  ;;  %v6206_v29 = vsel %vm226_vm1, %v10823_v7, 0.0 }
0x22b1   :  { %v6022_v45 = vpop.xlane.xlu1 %6021  ;;  %6207 = vadd.xlane.f32.xlu1 %v6206_v29 }
0x22b2   :  { %8647 = vpow2.f32 %v6136_v47  ;;  %v6084_v1 = vsub.f32 %v10696_v16, %v6022_v45  ;;  %v6091_v16 = vsub.f32 %v10665_v15, %v6043_v10 }
0x22b3   :  { %v10829_v21 = vpop.eup %8641 }
0x22b4   :  { %v6132_v61 = vmul.f32 1.442695, %v6084_v1  ;;  %v6200_v17 = vsel %vm226_vm1, %v10829_v21, 0.0 }
0x22b5   :  { %v6031_v18 = vpop.xlane.xlu1 %6030  ;;  %6201 = vadd.xlane.f32.xlu1 %v6200_v17 }
0x22b6   :  { %8649 = vpow2.f32 %v6132_v61  ;;  %v6087_v46 = vsub.f32 %v10709_v26, %v6031_v18  ;;  %v6146_v26 = vmul.f32 1.442695, %v6091_v16 }
0x22b7   :  { %8651 = vpow2.f32 %v6144_v8  ;;  %v10834_v19 = vpop.eup %8643 }
0x22b8   :  { %v6138_v5 = vmul.f32 1.442695, %v6087_v46  ;;  %v6209_v54 = vsel %vm226_vm1, %v10834_v19, 0.0 }
0x22b9   :  { %v6025_v57 = vpop.xlane.xlu1 %6024  ;;  %6210 = vadd.xlane.f32.xlu1 %v6209_v54 }
0x22ba   :  { %8653 = vpow2.f32 %v6138_v5  ;;  %v6085_v33 = vsub.f32 %v10719_v58, %v6025_v57  ;;  %v6064_v58 = vpop.xlane.xlu0 %6063 }
0x22bb   :  { %8655 = vpow2.f32 %v6140_v23  ;;  %v10840_v34 = vpop.eup %8645  ;;  %v6098_v50 = vsub.f32 %v10703_v48, %v6064_v58 }
0x22bc   :  { %v6134_v60 = vmul.f32 1.442695, %v6085_v33  ;;  %v6203_v15 = vsel %vm226_vm1, %v10840_v34, 0.0 }
0x22bd   :  { %v6037_v27 = vpop.xlane.xlu1 %6036  ;;  %6204 = vadd.xlane.f32.xlu0 %v6203_v15  ;;  %v6160_v1 = vmul.f32 1.442695, %v6098_v50 }
0x22be   :  { %8657 = vpow2.f32 %v6134_v60  ;;  %v6089_v3 = vsub.f32 %v10726_v62, %v6037_v27  ;;  %v6156_v62 = vmul.f32 1.442695, %v6096_v51  ;;  %v1776_v36 = vpop.xlane.xlu0 %1775 }
0x22bf   :  { %v10846_v14 = vpop.eup %8647  ;;  %8659 = vpow2.f32 %v6146_v26  ;;  %v1777_v48 = vsub.f32 %v10716_v30, %v1776_v36 }
0x22c0   :  { %v6142_v0 = vmul.f32 1.442695, %v6089_v3  ;;  %v6218_v12 = vsel %vm226_vm1, %v10846_v14, 0.0 }
0x22c1   :  { %v6052_v25 = vpop.xlane.xlu1 %6051  ;;  %6219 = vadd.xlane.f32.xlu0 %v6218_v12  ;;  %v1778_v18 = vmul.f32 1.442695, %v1777_v48 }
0x22c2   :  { %8661 = vpow2.f32 %v6142_v0  ;;  %v6094_v6 = vsub.f32 %v10731_v24, %v6052_v25 }
0x22c3   :  { %v10852_v38 = vpop.eup %8649  ;;  %8663 = vpow2.f32 %v6148_v63 }
0x22c4   :  { %v10854_v56 = vpop.eup %8651  ;;  %v6152_v4 = vmul.f32 1.442695, %v6094_v6  ;;  %v6212_v53 = vsel %vm226_vm1, %v10852_v38, 0.0 }
0x22c5   :  { %6213 = vadd.xlane.f32.xlu1 %v6212_v53  ;;  %v6055_v10 = vpop.xlane.xlu1 %6054  ;;  %v6230_v29 = vsel %vm226_vm1, %v10854_v56, 0.0 }
0x22c6   :  { %8665 = vpow2.f32 %v6152_v4  ;;  %v6095_v47 = vsub.f32 %v10736_v39, %v6055_v10 }
0x22c7   :  { %v10860_v24 = vpop.eup %8653  ;;  %8667 = vpow2.f32 %v6156_v62 }
0x22c8   :  { %v10864_v45 = vpop.eup %8655  ;;  %v6154_v8 = vmul.f32 1.442695, %v6095_v47  ;;  %v6221_v42 = vsel %vm226_vm1, %v10860_v24, 0.0 }
0x22c9   :  { %v6049_v61 = vpop.xlane.xlu1 %6048  ;;  %6222 = vadd.xlane.f32.xlu0 %v6221_v42  ;;  %6231 = vadd.xlane.f32.xlu1 %v6230_v29  ;;  %v6224_v17 = vsel %vm226_vm1, %v10864_v45, 0.0 }
0x22ca   :  { %8669 = vpow2.f32 %v6154_v8  ;;  %v6093_v39 = vsub.f32 %v10741_v32, %v6049_v61 }
0x22cb   :  { %v10870_v20 = vpop.eup %8657  ;;  %8671 = vpow2.f32 %v6160_v1 }
0x22cc   :  { %v6150_v46 = vmul.f32 1.442695, %v6093_v39  ;;  %v6215_v30 = vsel %vm226_vm1, %v10870_v20, 0.0  ;;  %v10876_v23 = vpop.eup %8659 }
0x22cd   :  { %v6061_v16 = vpop.xlane.xlu1 %6060  ;;  %6216 = vadd.xlane.f32.xlu0 %v6215_v30  ;;  %6225 = vadd.xlane.f32.xlu1 %v6224_v17  ;;  %v6233_v57 = vsel %vm226_vm1, %v10876_v23, 0.0 }
0x22ce   :  { %8673 = vpow2.f32 %v6150_v46  ;;  %v6097_v5 = vsub.f32 %v10746_v41, %v6061_v16 }
0x22cf   :  { %v10879_v32 = vpop.eup %8661  ;;  %8675 = vpow2.f32 %v1778_v18 }
0x22d0   :  { %v6158_v55 = vmul.f32 1.442695, %v6097_v5  ;;  %v6227_v54 = vsel %vm226_vm1, %v10879_v32, 0.0  ;;  %v10885_v33 = vpop.eup %8663 }
0x22d1   :  { %v6067_v26 = vpop.xlane.xlu1 %6066  ;;  %6228 = vadd.xlane.f32.xlu0 %v6227_v54  ;;  %6234 = vadd.xlane.f32.xlu1 %v6233_v57  ;;  %v6236_v3 = vsel %vm226_vm1, %v10885_v33, 0.0 }
0x22d2   :  { %8677 = vpow2.f32 %v6158_v55  ;;  %v6099_v31 = vsub.f32 %v10751_v43, %v6067_v26 }
0x22d3   :  { %v10888_v60 = vpop.eup %8665 }
0x22d4   :  { %v10890_v41 = vpop.eup %8667  ;;  %v6162_v27 = vmul.f32 1.442695, %v6099_v31  ;;  %v6242_v15 = vsel %vm226_vm1, %v10888_v60, 0.0 }
0x22d5   :  { %6243 = vadd.xlane.f32.xlu0 %v6242_v15  ;;  %6237 = vadd.xlane.f32.xlu1 %v6236_v3  ;;  %v6248_v43 = vsel %vm226_vm1, %v10890_v41, 0.0 }
0x22d6   :  { %8679 = vpow2.f32 %v6162_v27 }
0x22d7   :  { %v10896_v51 = vpop.eup %8669 }
0x22d8   :  { %v6245_v58 = vsel %vm226_vm1, %v10896_v51, 0.0  ;;  %v10902_v63 = vpop.eup %8671 }
0x22d9   :  { %6246 = vadd.xlane.f32.xlu0 %v6245_v58  ;;  %6249 = vadd.xlane.f32.xlu1 %v6248_v43  ;;  %v6254_v25 = vsel %vm226_vm1, %v10902_v63, 0.0 }
0x22db   :  { %v10904_v0 = vpop.eup %8673 }
0x22dc   :  { %v6239_v12 = vsel %vm226_vm1, %v10904_v0, 0.0  ;;  %v10910_v6 = vpop.eup %8675 }
0x22dd   :  { %6240 = vadd.xlane.f32.xlu0 %v6239_v12  ;;  %6255 = vadd.xlane.f32.xlu1 %v6254_v25  ;;  %v1780_v4 = vsel %vm226_vm1, %v10910_v6, 0.0 }
0x22df   :  { %v10912_v62 = vpop.eup %8677 }
0x22e0   :  { %v6251_v50 = vsel %vm226_vm1, %v10912_v62, 0.0 }
0x22e1   :  { %6252 = vadd.xlane.f32.xlu0 %v6251_v50  ;;  %1781 = vadd.xlane.f32.xlu1 %v1780_v4 }
0x22e3   :  { %v10918_v53 = vpop.eup %8679 }
0x22e4   :  { %v6257_v36 = vsel %vm226_vm1, %v10918_v53, 0.0 }
0x22e5   :  { %6258 = vadd.xlane.f32.xlu0 %v6257_v36 }
0x230e   :  { %v6172_v10 = vpop.xlane.xlu1 %6171 }
0x2312   :  { %v6166_v47 = vpop.xlane.xlu1 %6165 }
0x2313   :  { %8681 = vrcp.f32 %v6166_v47 }
0x2314   :  { %8683 = vrcp.f32 %v6172_v10 }
0x2316   :  { %v6175_v29 = vpop.xlane.xlu0 %6174 }
0x2317   :  { %8685 = vrcp.f32 %v6175_v29 }
0x231a   :  { %v6169_v1 = vpop.xlane.xlu0 %6168 }
0x231b   :  { %8687 = vrcp.f32 %v6169_v1 }
0x231e   :  { %v6184_v48 = vpop.xlane.xlu1 %6183 }
0x231f   :  { %8689 = vrcp.f32 %v6184_v48 }
0x2320   :  { %v8682_v8 = vpop.eup %8681 }
0x2321   :  { %v8684_v42 = vpop.eup %8683  ;;  %v6292_v61 = vmul.f32 %v8682_v8, %v10767_v44 }
0x2322   :  { %v6178_v39 = vpop.xlane.xlu1 %6177  ;;  %v6294_v18 = vmul.f32 %v8684_v42, %v10762_v35 }
0x2323   :  { %8691 = vrcp.f32 %v6178_v39  ;;  %v6324_v46 = vsel %vm226_vm1, %v6292_v61, 0.0 }
0x2324   :  { %v8686_v17 = vpop.eup %8685  ;;  %v6338_v55 = vsel %vm226_vm1, %v6294_v18, 0.0  ;;  %v6325_v54 = vrot.slane %v6324_v46, 4 }
0x2325   :  { %v6295_v30 = vmul.f32 %v8686_v17, %v10772_v28  ;;  %v6339_v35 = vrot.slane %v6338_v55, 4 }
0x2326   :  { %v6187_v16 = vpop.xlane.xlu1 %6186  ;;  %v6326_v3 = vadd.f32 %v6325_v54, %v6324_v46 }
0x2327   :  { %8693 = vrcp.f32 %v6187_v16  ;;  %v6345_v26 = vsel %vm226_vm1, %v6295_v30, 0.0  ;;  %v6340_v50 = vadd.f32 %v6339_v35, %v6338_v55 }
0x2328   :  { %v8688_v5 = vpop.eup %8687  ;;  %v6346_v58 = vrot.slane %v6345_v26, 4  ;;  %v6327_v36 = vrot.slane %v6326_v3, 2 }
0x2329   :  { %v6293_v57 = vmul.f32 %v8688_v5, %v10777_v2 }
0x232a   :  { %v6181_v44 = vpop.xlane.xlu0 %6180  ;;  %v6347_v10 = vadd.f32 %v6346_v58, %v6345_v26  ;;  %v6328_v17 = vadd.f32 %v6327_v36, %v6326_v3 }
0x232b   :  { %v6331_v31 = vsel %vm226_vm1, %v6293_v57, 0.0  ;;  %8695 = vrcp.f32 %v6181_v44 }
0x232c   :  { %v8690_v27 = vpop.eup %8689  ;;  %v6332_v15 = vrot.slane %v6331_v31, 4  ;;  %v6348_v18 = vrot.slane %v6347_v10, 2  ;;  %v6329_v44 = vrot.slane %v6328_v17, 1 }
0x232d   :  { %v6298_v28 = vmul.f32 %v8690_v27, %v10783_v22  ;;  %v6341_v22 = vrot.slane %v6340_v50, 2 }
0x232e   :  { %v6333_v43 = vadd.f32 %v6332_v15, %v6331_v31  ;;  %v6196_v12 = vpop.xlane.xlu0 %6195  ;;  %v6349_v31 = vadd.f32 %v6348_v18, %v6347_v10 }
0x232f   :  { %8697 = vrcp.f32 %v6196_v12  ;;  %v6366_v2 = vsel %vm226_vm1, %v6298_v28, 0.0  ;;  %v6342_v54 = vadd.f32 %v6341_v22, %v6340_v50  ;;  %v6330_v50 = vadd.f32 %v6329_v44, %v6328_v17 }
0x2330   :  { %v8692_v25 = vpop.eup %8691  ;;  %v6334_v4 = vrot.slane %v6333_v43, 2  ;;  %v6367_v8 = vrot.slane %v6366_v2, 4 }
0x2331   :  { %v6296_v47 = vmul.f32 %v8692_v25, %v10788_v59  ;;  %v6343_v25 = vrot.slane %v6342_v54, 1  ;;  %v6548_v18 = vmul.f32 0.125, %v6330_v50 }
0x2332   :  { %v6190_v29 = vpop.xlane.xlu1 %6189  ;;  %v6199_v1 = vpop.xlane.xlu0 %6198  ;;  %v6335_v48 = vadd.f32 %v6334_v4, %v6333_v43  ;;  %v6368_v59 = vadd.f32 %v6367_v8, %v6366_v2  ;;  %v6350_v2 = vrot.slane %v6349_v31, 1 }
0x2333   :  { %v6352_v42 = vsel %vm226_vm1, %v6296_v47, 0.0  ;;  %8699 = vrcp.f32 %v6190_v29  ;;  %v6344_v22 = vadd.f32 %v6343_v25, %v6342_v54 }
0x2334   :  { %v6353_v61 = vrot.slane %v6352_v42, 4  ;;  %8701 = vrcp.f32 %v6199_v1  ;;  %v8694_v39 = vpop.eup %8693  ;;  %v6336_v5 = vrot.slane %v6335_v48, 1 }
0x2335   :  { %v6299_v30 = vmul.f32 %v8694_v39, %v10793_v9  ;;  %v6369_v9 = vrot.slane %v6368_v59, 2 }
0x2336   :  { %v6354_v46 = vadd.f32 %v6353_v61, %v6352_v42  ;;  %v6193_v16 = vpop.xlane.xlu0 %6192  ;;  %v6337_v3 = vadd.f32 %v6336_v5, %v6335_v48 }
0x2337   :  { %8703 = vrcp.f32 %v6193_v16  ;;  %v6373_v26 = vsel %vm226_vm1, %v6299_v30, 0.0  ;;  %v6370_v8 = vadd.f32 %v6369_v9, %v6368_v59 }
0x2338   :  { %v8696_v55 = vpop.eup %8695  ;;  %v6355_v57 = vrot.slane %v6354_v46, 2  ;;  %v6374_v35 = vrot.slane %v6373_v26, 4 }
0x2339   :  { %v6297_v27 = vmul.f32 %v8696_v55, %v10798_v11  ;;  %v6549_v11 = vmul.f32 0.125, %v6337_v3 }
0x233a   :  { %v6356_v15 = vadd.f32 %v6355_v57, %v6354_v46  ;;  %v6208_v28 = vpop.xlane.xlu1 %6207  ;;  %v6375_v43 = vadd.f32 %v6374_v35, %v6373_v26  ;;  %v6351_v46 = vadd.f32 %v6350_v2, %v6349_v31  ;;  %v6371_v57 = vrot.slane %v6370_v8, 1 }
0x233b   :  { %v6359_v58 = vsel %vm226_vm1, %v6297_v27, 0.0  ;;  %8705 = vrcp.f32 %v6208_v28  ;;  %v6613_v26 = vsel %vm6612_vm0, %v6549_v11, %v6548_v18  ;;  %v6550_v35 = vmul.f32 0.125, %v6344_v22 }
0x233c   :  { %v8698_v12 = vpop.eup %8697  ;;  %v6360_v4 = vrot.slane %v6359_v58, 4  ;;  %v6376_v36 = vrot.slane %v6375_v43, 2  ;;  %v6357_v29 = vrot.slane %v6356_v15, 1 }
0x233d   :  { %v6302_v10 = vmul.f32 %v8698_v12, %v10803_v13  ;;  %v6615_v9 = vsel %vm6614_vm2, %v6550_v35, %v6613_v26 }
0x233e   :  { %v6361_v47 = vadd.f32 %v6360_v4, %v6359_v58  ;;  %v6202_v1 = vpop.xlane.xlu1 %6201  ;;  %v6377_v48 = vadd.f32 %v6376_v36, %v6375_v43  ;;  %v6358_v16 = vadd.f32 %v6357_v29, %v6356_v15  ;;  %v6551_v58 = vmul.f32 0.125, %v6351_v46 }
0x233f   :  { %8707 = vrcp.f32 %v6202_v1  ;;  %v6394_v30 = vsel %vm226_vm1, %v6302_v10, 0.0  ;;  %v6372_v4 = vadd.f32 %v6371_v57, %v6370_v8 }
0x2340   :  { %v8700_v42 = vpop.eup %8699  ;;  %v6362_v61 = vrot.slane %v6361_v47, 2  ;;  %v6378_v54 = vrot.slane %v6377_v48, 1  ;;  %v6552_v28 = vmul.f32 0.125, %v6358_v16 }
0x2341   :  { %v8702_v39 = vpop.eup %8701  ;;  %v6300_v17 = vmul.f32 %v8700_v42, %v10810_v52  ;;  %v6395_v52 = vrot.slane %v6394_v30, 4 }
0x2342   :  { %v6303_v13 = vmul.f32 %v8702_v39, %v10807_v49  ;;  %v6363_v5 = vadd.f32 %v6362_v61, %v6361_v47  ;;  %v6211_v55 = vpop.xlane.xlu1 %6210  ;;  %v6379_v50 = vadd.f32 %v6378_v54, %v6377_v48  ;;  %v6554_v39 = vmul.f32 0.125, %v6372_v4 }
0x2343   :  { %v6380_v59 = vsel %vm226_vm1, %v6300_v17, 0.0  ;;  %8709 = vrcp.f32 %v6211_v55  ;;  %v6396_v10 = vadd.f32 %v6395_v52, %v6394_v30 }
0x2344   :  { %v8704_v44 = vpop.eup %8703  ;;  %v6381_v27 = vrot.slane %v6380_v59, 4  ;;  %v6401_v31 = vsel %vm226_vm1, %v6303_v13, 0.0  ;;  %v6364_v49 = vrot.slane %v6363_v5, 1  ;;  %v6555_v8 = vmul.f32 0.125, %v6379_v50 }
0x2345   :  { %v6301_v3 = vmul.f32 %v8704_v44, %v10817_v40  ;;  %v6402_v2 = vrot.slane %v6401_v31, 4  ;;  %v6617_v40 = vsel %vm6616_vm6, %v6551_v58, %v6615_v9  ;;  %v6397_v13 = vrot.slane %v6396_v10, 2 }
0x2346   :  { %v6382_v15 = vadd.f32 %v6381_v27, %v6380_v59  ;;  %v6205_v12 = vpop.xlane.xlu0 %6204  ;;  %v6365_v25 = vadd.f32 %v6364_v49, %v6363_v5  ;;  %v6619_v22 = vsel %vm6618_vm7, %v6552_v28, %v6617_v40 }
0x2347   :  { %v6387_v43 = vsel %vm226_vm1, %v6301_v3, 0.0  ;;  %8711 = vrcp.f32 %v6205_v12  ;;  %v6403_v18 = vadd.f32 %v6402_v2, %v6401_v31  ;;  %v6398_v49 = vadd.f32 %v6397_v13, %v6396_v10 }
0x2348   :  { %v6388_v36 = vrot.slane %v6387_v43, 4  ;;  %v8706_v47 = vpop.eup %8705  ;;  %v6553_v29 = vmul.f32 0.125, %v6365_v25  ;;  %v6383_v11 = vrot.slane %v6382_v15, 2 }
0x2349   :  { %v6306_v42 = vmul.f32 %v8706_v47, %v10823_v7  ;;  %v6404_v44 = vrot.slane %v6403_v18, 2  ;;  %v6399_v47 = vrot.slane %v6398_v49, 1 }
0x234a   :  { %v6389_v1 = vadd.f32 %v6388_v36, %v6387_v43  ;;  %v6220_v61 = vpop.xlane.xlu0 %6219  ;;  %v6621_v48 = vsel %vm6620_vm8, %v6553_v29, %v6619_v22  ;;  %v6384_v59 = vadd.f32 %v6383_v11, %v6382_v15 }
0x234b   :  { %v6422_v46 = vsel %vm226_vm1, %v6306_v42, 0.0  ;;  %8713 = vrcp.f32 %v6220_v61  ;;  %v6623_v5 = vsel %vm6622_vm9, %v6554_v39, %v6621_v48  ;;  %v6405_v43 = vadd.f32 %v6404_v44, %v6403_v18 }
0x234c   :  { %v6390_v17 = vrot.slane %v6389_v1, 2  ;;  %v8708_v30 = vpop.eup %8707  ;;  %v6423_v16 = vrot.slane %v6422_v46, 4  ;;  %v6625_v57 = vsel %vm6624_vm10, %v6555_v8, %v6623_v5  ;;  %v6385_v15 = vrot.slane %v6384_v59, 1 }
0x234d   :  { %v6304_v55 = vmul.f32 %v8708_v30, %v10829_v21  ;;  %8222 = vmatmul.mubr.msk.f32.gmra.mxu1 %vm226_vm1, %v6625_v57  ;;  %v6406_v42 = vrot.slane %v6405_v43, 1 }
0x234e   :  { %v6391_v7 = vadd.f32 %v6390_v17, %v6389_v1  ;;  %v6214_v54 = vpop.xlane.xlu1 %6213  ;;  %v6424_v26 = vadd.f32 %v6423_v16, %v6422_v46  ;;  %8224 = vmatprep.mubr.msk.f32.mxu1 %vm8784_vm3, %v11087_v37  ;;  %v6386_v29 = vadd.f32 %v6385_v15, %v6384_v59  ;;  %v6400_v17 = vadd.f32 %v6399_v47, %v6398_v49 }
0x234f   :  { %8715 = vrcp.f32 %v6214_v54  ;;  %v6408_v35 = vsel %vm226_vm1, %v6304_v55, 0.0  ;;  %v6407_v57 = vadd.f32 %v6406_v42, %v6405_v43 }
0x2350   :  { %v6392_v27 = vrot.slane %v6391_v7, 1  ;;  %v8710_v52 = vpop.eup %8709  ;;  %v6409_v31 = vrot.slane %v6408_v35, 4  ;;  %v6425_v3 = vrot.slane %v6424_v26, 2  ;;  %v6556_v46 = vmul.f32 0.125, %v6386_v29 }
0x2351   :  { %v6307_v21 = vmul.f32 %v8710_v52, %v10834_v19  ;;  %v6558_v49 = vmul.f32 0.125, %v6400_v17  ;;  %v6559_v43 = vmul.f32 0.125, %v6407_v57 }
0x2352   :  { %v6232_v58 = vpop.xlane.xlu1 %6231  ;;  %v6223_v28 = vpop.xlane.xlu0 %6222  ;;  %v6410_v9 = vadd.f32 %v6409_v31, %v6408_v35  ;;  %v6393_v12 = vadd.f32 %v6392_v27, %v6391_v7  ;;  %v6426_v2 = vadd.f32 %v6425_v3, %v6424_v26 }
0x2353   :  { %8717 = vrcp.f32 %v6232_v58  ;;  %v6429_v25 = vsel %vm226_vm1, %v6307_v21, 0.0 }
0x2354   :  { %8719 = vrcp.f32 %v6223_v28  ;;  %v8712_v4 = vpop.eup %8711  ;;  %v6411_v50 = vrot.slane %v6410_v9, 2  ;;  %v6430_v36 = vrot.slane %v6429_v25, 4  ;;  %v6557_v22 = vmul.f32 0.125, %v6393_v12 }
0x2355   :  { %v6305_v10 = vmul.f32 %v8712_v4, %v10840_v34  ;;  %v6427_v48 = vrot.slane %v6426_v2, 1 }
0x2356   :  { %v6226_v40 = vpop.xlane.xlu1 %6225  ;;  %v6217_v11 = vpop.xlane.xlu0 %6216  ;;  %v6412_v19 = vadd.f32 %v6411_v50, %v6410_v9  ;;  %v6431_v1 = vadd.f32 %v6430_v36, %v6429_v25  ;;  %v6626_v54 = vsel %vm6612_vm0, %v6557_v22, %v6556_v46 }
0x2357   :  { %8721 = vrcp.f32 %v6226_v40  ;;  %v6415_v61 = vsel %vm226_vm1, %v6305_v10, 0.0  ;;  %v6428_v35 = vadd.f32 %v6427_v48, %v6426_v2  ;;  %v6627_v12 = vsel %vm6614_vm2, %v6558_v49, %v6626_v54 }
0x2358   :  { %8723 = vrcp.f32 %v6217_v11  ;;  %v8714_v39 = vpop.eup %8713  ;;  %v6416_v8 = vrot.slane %v6415_v61, 4  ;;  %v6432_v18 = vrot.slane %v6431_v1, 2  ;;  %v6413_v16 = vrot.slane %v6412_v19, 1 }
0x2359   :  { %v6310_v30 = vmul.f32 %v8714_v39, %v10846_v14  ;;  %v6562_v2 = vmul.f32 0.125, %v6428_v35 }
0x235a   :  { %v6235_v13 = vpop.xlane.xlu1 %6234  ;;  %v6229_v34 = vpop.xlane.xlu0 %6228  ;;  %v6417_v5 = vadd.f32 %v6416_v8, %v6415_v61  ;;  %v6433_v59 = vadd.f32 %v6432_v18, %v6431_v1  ;;  %v6414_v31 = vadd.f32 %v6413_v16, %v6412_v19 }
0x235b   :  { %8725 = vrcp.f32 %v6235_v13  ;;  %v6450_v55 = vsel %vm226_vm1, %v6310_v30, 0.0 }
0x235c   :  { %v8716_v7 = vpop.eup %8715  ;;  %8727 = vrcp.f32 %v6229_v34  ;;  %v6451_v26 = vrot.slane %v6450_v55, 4  ;;  %v6418_v27 = vrot.slane %v6417_v5, 2  ;;  %v6434_v3 = vrot.slane %v6433_v59, 1 }
0x235d   :  { %v6308_v44 = vmul.f32 %v8716_v7, %v10852_v38  ;;  %v6560_v11 = vmul.f32 0.125, %v6414_v31 }
0x235e   :  { %v6238_v52 = vpop.xlane.xlu1 %6237  ;;  %v6244_v14 = vpop.xlane.xlu0 %6243  ;;  %v6452_v15 = vadd.f32 %v6451_v26, %v6450_v55  ;;  %v6419_v58 = vadd.f32 %v6418_v27, %v6417_v5  ;;  %v6435_v40 = vadd.f32 %v6434_v3, %v6433_v59 }
0x235f   :  { %v6436_v21 = vsel %vm226_vm1, %v6308_v44, 0.0  ;;  %8729 = vrcp.f32 %v6238_v52 }
0x2360   :  { %v8718_v28 = vpop.eup %8717  ;;  %v6437_v9 = vrot.slane %v6436_v21, 4  ;;  %8731 = vrcp.f32 %v6244_v14  ;;  %v6453_v38 = vrot.slane %v6452_v15, 2  ;;  %v6420_v50 = vrot.slane %v6419_v58, 1 }
0x2361   :  { %v8720_v25 = vpop.eup %8719  ;;  %v6314_v4 = vmul.f32 %v8718_v28, %v10854_v56  ;;  %v6628_v56 = vsel %vm6616_vm6, %v6559_v43, %v6627_v12  ;;  %v6563_v16 = vmul.f32 0.125, %v6435_v40 }
0x2362   :  { %v6438_v36 = vadd.f32 %v6437_v9, %v6436_v21  ;;  %v6311_v47 = vmul.f32 %v8720_v25, %v10860_v24  ;;  %v6250_v29 = vpop.xlane.xlu1 %6249  ;;  %v6247_v10 = vpop.xlane.xlu0 %6246  ;;  %v6454_v19 = vadd.f32 %v6453_v38, %v6452_v15  ;;  %v6421_v42 = vadd.f32 %v6420_v50, %v6419_v58 }
0x2363   :  { %v6478_v1 = vsel %vm226_vm1, %v6314_v4, 0.0  ;;  %8733 = vrcp.f32 %v6250_v29  ;;  %v6629_v5 = vsel %vm6618_vm7, %v6560_v11, %v6628_v56 }
0x2364   :  { %v8722_v22 = vpop.eup %8721  ;;  %v6439_v61 = vrot.slane %v6438_v36, 2  ;;  %v6457_v39 = vsel %vm226_vm1, %v6311_v47, 0.0  ;;  %8735 = vrcp.f32 %v6247_v10  ;;  %v6479_v48 = vrot.slane %v6478_v1, 4 }
0x2365   :  { %v8724_v8 = vpop.eup %8723  ;;  %v6458_v18 = vrot.slane %v6457_v39, 4  ;;  %v6312_v24 = vmul.f32 %v8722_v22, %v10864_v45  ;;  %v6561_v17 = vmul.f32 0.125, %v6421_v42  ;;  %v6455_v59 = vrot.slane %v6454_v19, 1 }
0x2366   :  { %v6440_v46 = vadd.f32 %v6439_v61, %v6438_v36  ;;  %v6309_v30 = vmul.f32 %v8724_v8, %v10870_v20  ;;  %v6256_v13 = vpop.xlane.xlu1 %6255  ;;  %v6241_v34 = vpop.xlane.xlu0 %6240  ;;  %v6480_v52 = vadd.f32 %v6479_v48, %v6478_v1 }
0x2367   :  { %v6459_v7 = vadd.f32 %v6458_v18, %v6457_v39  ;;  %v6464_v55 = vsel %vm226_vm1, %v6312_v24, 0.0  ;;  %8737 = vrcp.f32 %v6256_v13  ;;  %v6630_v20 = vsel %vm6620_vm8, %v6561_v17, %v6629_v5 }
0x2368   :  { %v8726_v57 = vpop.eup %8725  ;;  %v6441_v54 = vrot.slane %v6440_v46, 1  ;;  %v6465_v26 = vrot.slane %v6464_v55, 4  ;;  %v6443_v44 = vsel %vm226_vm1, %v6309_v30, 0.0  ;;  %8739 = vrcp.f32 %v6241_v34 }
0x2369   :  { %v8728_v45 = vpop.eup %8727  ;;  %v6460_v27 = vrot.slane %v6459_v7, 2  ;;  %v6444_v35 = vrot.slane %v6443_v44, 4  ;;  %v6631_v49 = vsel %vm6622_vm9, %v6562_v2, %v6630_v20  ;;  %v10983_v58 = vadd.f32 %v6455_v59, %v6454_v19 }
0x236a   :  { %v6442_v14 = vadd.f32 %v6441_v54, %v6440_v46  ;;  %v6466_v31 = vadd.f32 %v6465_v26, %v6464_v55  ;;  %v6313_v3 = vmul.f32 %v8728_v45, %v10879_v32  ;;  %v1782_v15 = vpop.xlane.xlu1 %1781  ;;  %v6253_v21 = vpop.xlane.xlu0 %6252  ;;  %v6315_v9 = vmul.f32 %v8726_v57, %v10876_v23 }
0x236b   :  { %v6445_v28 = vadd.f32 %v6444_v35, %v6443_v44  ;;  %v6632_v43 = vsel %vm6624_vm10, %v6563_v16, %v6631_v49  ;;  %v6461_v25 = vadd.f32 %v6460_v27, %v6459_v7  ;;  %8741 = vrcp.f32 %v6253_v21 }
0x236c   :  { %v8730_v12 = vpop.eup %8729  ;;  %v6467_v38 = vrot.slane %v6466_v31, 2  ;;  %v6471_v4 = vsel %vm226_vm1, %v6313_v3, 0.0  ;;  %8225 = vmatmul.mubr.msk.f32.gmra.mxu1 %vm226_vm1, %v6632_v43  ;;  %8743 = vrcp.f32 %v1782_v15  ;;  %v10992_v23 = vmul.f32 0.125, %v6442_v14 }
0x236d   :  { %v8732_v32 = vpop.eup %8731  ;;  %v6446_v50 = vrot.slane %v6445_v28, 2  ;;  %v6472_v2 = vrot.slane %v6471_v4, 4  ;;  %v6316_v36 = vmul.f32 %v8730_v12, %v10885_v33  ;;  %8227 = vmatprep.mubr.msk.f32.mxu1 %vm8784_vm3, %v11087_v37  ;;  %v6481_v40 = vrot.slane %v6480_v52, 2 }
0x236e   :  { %v6318_v47 = vmul.f32 %v8732_v32, %v10888_v60  ;;  %v6259_v29 = vpop.xlane.xlu0 %6258  ;;  %v6468_v10 = vadd.f32 %v6467_v38, %v6466_v31  ;;  %v6462_v22 = vrot.slane %v6461_v25, 1  ;;  %v6485_v39 = vsel %vm226_vm1, %v6315_v9, 0.0 }
0x236f   :  { %v6447_v11 = vadd.f32 %v6446_v50, %v6445_v28  ;;  %v6473_v19 = vadd.f32 %v6472_v2, %v6471_v4  ;;  %v6492_v1 = vsel %vm226_vm1, %v6316_v36, 0.0  ;;  %8745 = vrcp.f32 %v6259_v29 }
0x2370   :  { %v8734_v42 = vpop.eup %8733  ;;  %v6493_v61 = vrot.slane %v6492_v1, 4  ;;  %v6506_v33 = vsel %vm226_vm1, %v6318_v47, 0.0  ;;  %v6469_v46 = vrot.slane %v6468_v10, 1  ;;  %v6482_v30 = vadd.f32 %v6481_v40, %v6480_v52 }
0x2371   :  { %v8736_v56 = vpop.eup %8735  ;;  %v6448_v8 = vrot.slane %v6447_v11, 1  ;;  %v6507_v48 = vrot.slane %v6506_v33, 4  ;;  %v6320_v60 = vmul.f32 %v8734_v42, %v10890_v41  ;;  %v6474_v18 = vrot.slane %v6473_v19, 2 }
0x2372   :  { %v6494_v24 = vadd.f32 %v6493_v61, %v6492_v1  ;;  %v6319_v17 = vmul.f32 %v8736_v56, %v10896_v51  ;;  %v6483_v54 = vrot.slane %v6482_v30, 1  ;;  %v6463_v27 = vadd.f32 %v6462_v22, %v6461_v25 }
0x2373   :  { %v6449_v13 = vadd.f32 %v6448_v8, %v6447_v11  ;;  %v6508_v34 = vadd.f32 %v6507_v48, %v6506_v33  ;;  %v6520_v16 = vsel %vm226_vm1, %v6320_v60, 0.0  ;;  %v6475_v5 = vadd.f32 %v6474_v18, %v6473_v19 }
0x2374   :  { %v8738_v59 = vpop.eup %8737  ;;  %v6495_v7 = vrot.slane %v6494_v24, 2  ;;  %v6521_v55 = vrot.slane %v6520_v16, 4  ;;  %v6513_v57 = vsel %vm226_vm1, %v6319_v17, 0.0  ;;  %v6470_v49 = vadd.f32 %v6469_v46, %v6468_v10 }
0x2375   :  { %v8740_v26 = vpop.eup %8739  ;;  %v6509_v44 = vrot.slane %v6508_v34, 2  ;;  %v6514_v41 = vrot.slane %v6513_v57, 4  ;;  %v6322_v45 = vmul.f32 %v8738_v59, %v10902_v63  ;;  %v6476_v52 = vrot.slane %v6475_v5, 1 }
0x2376   :  { %v6496_v51 = vadd.f32 %v6495_v7, %v6494_v24  ;;  %v6522_v35 = vadd.f32 %v6521_v55, %v6520_v16  ;;  %v6317_v20 = vmul.f32 %v8740_v26, %v10904_v0  ;;  %v6565_v15 = vmul.f32 0.125, %v6449_v13 }
0x2377   :  { %v6510_v14 = vadd.f32 %v6509_v44, %v6508_v34  ;;  %v6515_v31 = vadd.f32 %v6514_v41, %v6513_v57  ;;  %v6534_v3 = vsel %vm226_vm1, %v6322_v45, 0.0  ;;  %v6484_v9 = vadd.f32 %v6483_v54, %v6482_v30 }
0x2378   :  { %v6497_v21 = vrot.slane %v6496_v51, 1  ;;  %v6499_v28 = vsel %vm226_vm1, %v6317_v20, 0.0  ;;  %v8742_v43 = vpop.eup %8741  ;;  %v6523_v38 = vrot.slane %v6522_v35, 2  ;;  %v6535_v32 = vrot.slane %v6534_v3, 4 }
0x2379   :  { %v6511_v12 = vrot.slane %v6510_v14, 1  ;;  %v6516_v63 = vrot.slane %v6515_v31, 2  ;;  %v6500_v25 = vrot.slane %v6499_v28, 4  ;;  %v11006_v4 = vpop.eup %8743  ;;  %v6321_v0 = vmul.f32 %v8742_v43, %v10912_v62 }
0x237a   :  { %v6477_v50 = vadd.f32 %v6476_v52, %v6475_v5  ;;  %v6486_v2 = vrot.slane %v6485_v39, 4  ;;  %v6498_v36 = vadd.f32 %v6497_v21, %v6496_v51  ;;  %v6566_v10 = vmul.f32 0.125, %v10983_v58 }
0x237b   :  { %v6517_v47 = vadd.f32 %v6516_v63, %v6515_v31  ;;  %v6501_v29 = vadd.f32 %v6500_v25, %v6499_v28  ;;  %v6512_v11 = vadd.f32 %v6511_v12, %v6510_v14  ;;  %v6527_v19 = vsel %vm226_vm1, %v6321_v0, 0.0 }
0x237c   :  { %v8746_v40 = vpop.eup %8745  ;;  %v6487_v1 = vadd.f32 %v6486_v2, %v6485_v39  ;;  %v6567_v42 = vmul.f32 0.125, %v6463_v27  ;;  %v6528_v61 = vrot.slane %v6527_v19, 4  ;;  %v6568_v56 = vmul.f32 0.125, %v6470_v49 }
0x237d   :  { %v6502_v22 = vrot.slane %v6501_v29, 2  ;;  %v6323_v33 = vmul.f32 %v8746_v40, %v10918_v53  ;;  %v6518_v8 = vrot.slane %v6517_v47, 1  ;;  %v6569_v48 = vmul.f32 0.125, %v6477_v50 }
0x237e   :  { %v6488_v62 = vrot.slane %v6487_v1, 2  ;;  %v6633_v60 = vsel %vm6612_vm0, %v6565_v15, %v10992_v23  ;;  %v6529_v24 = vadd.f32 %v6528_v61, %v6527_v19  ;;  %v6570_v58 = vmul.f32 0.125, %v6484_v9 }
0x237f   :  { %v6503_v18 = vadd.f32 %v6502_v22, %v6501_v29  ;;  %v6634_v17 = vsel %vm6614_vm2, %v6566_v10, %v6633_v60  ;;  %v6524_v30 = vadd.f32 %v6523_v38, %v6522_v35  ;;  %v6536_v13 = vadd.f32 %v6535_v32, %v6534_v3 }
0x2380   :  { %v6489_v46 = vadd.f32 %v6488_v62, %v6487_v1  ;;  %v6635_v39 = vsel %vm6616_vm6, %v6567_v42, %v6634_v17  ;;  %v6530_v16 = vrot.slane %v6529_v24, 2  ;;  %v6541_v5 = vsel %vm226_vm1, %v6323_v33, 0.0 }
0x2381   :  { %v6504_v34 = vrot.slane %v6503_v18, 1  ;;  %v6636_v53 = vsel %vm6618_vm7, %v6568_v56, %v6635_v39  ;;  %v6525_v23 = vrot.slane %v6524_v30, 1  ;;  %v6537_v55 = vrot.slane %v6536_v13, 2 }
0x2382   :  { %v6490_v59 = vrot.slane %v6489_v46, 1  ;;  %v6637_v7 = vsel %vm6620_vm8, %v6569_v48, %v6636_v53  ;;  %v6519_v54 = vadd.f32 %v6518_v8, %v6517_v47  ;;  %v6531_v26 = vadd.f32 %v6530_v16, %v6529_v24 }
0x2383   :  { %v6505_v57 = vadd.f32 %v6504_v34, %v6503_v18  ;;  %v6542_v44 = vrot.slane %v6541_v5, 4  ;;  %v6572_v41 = vmul.f32 0.125, %v6498_v36  ;;  %v6526_v27 = vadd.f32 %v6525_v23, %v6524_v30 }
0x2384   :  { %v6491_v45 = vadd.f32 %v6490_v59, %v6489_v46  ;;  %v6538_v51 = vadd.f32 %v6537_v55, %v6536_v13  ;;  %v6638_v20 = vsel %vm6622_vm9, %v6570_v58, %v6637_v7  ;;  %v6532_v52 = vrot.slane %v6531_v26, 1 }
0x2385   :  { %v6573_v35 = vmul.f32 0.125, %v6505_v57  ;;  %v6543_v14 = vadd.f32 %v6542_v44, %v6541_v5  ;;  %v6574_v49 = vmul.f32 0.125, %v6512_v11  ;;  %v6575_v28 = vmul.f32 0.125, %v6519_v54 }
0x2386   :  { %v6571_v31 = vmul.f32 0.125, %v6491_v45  ;;  %v6539_v3 = vrot.slane %v6538_v51, 1  ;;  %v6533_v15 = vadd.f32 %v6532_v52, %v6531_v26  ;;  %v6576_v38 = vmul.f32 0.125, %v6526_v27 }
0x2387   :  { %v6544_v21 = vrot.slane %v6543_v14, 2  ;;  %v6640_v9 = vsel %vm6612_vm0, %v6573_v35, %v6572_v41  ;;  %v1784_v19 = vmul.f32 %v11006_v4, %v10910_v6 }
0x2388   :  { %v6639_v43 = vsel %vm6624_vm10, %v6571_v31, %v6638_v20  ;;  %v6540_v12 = vadd.f32 %v6539_v3, %v6538_v51  ;;  %v6641_v63 = vsel %vm6614_vm2, %v6574_v49, %v6640_v9  ;;  %v6577_v32 = vmul.f32 0.125, %v6533_v15 }
0x2389   :  { %8228 = vmatmul.mubr.msk.f32.gmra.mxu1 %vm226_vm1, %v6639_v43  ;;  %v6545_v25 = vadd.f32 %v6544_v21, %v6543_v14  ;;  %v6642_v0 = vsel %vm6616_vm6, %v6575_v28, %v6641_v63 }
0x238a   :  { %8230 = vmatprep.mubr.msk.f32.mxu1 %vm8784_vm3, %v11087_v37  ;;  %v6578_v50 = vmul.f32 0.125, %v6540_v12  ;;  %v6643_v2 = vsel %vm6618_vm7, %v6576_v38, %v6642_v0 }
0x238b   :  { %v6546_v36 = vrot.slane %v6545_v25, 1  ;;  %v6644_v47 = vsel %vm6620_vm8, %v6577_v32, %v6643_v2 }
0x238c   :  { %v6645_v29 = vsel %vm6622_vm9, %v6578_v50, %v6644_v47 }
0x238d   :  { %v6547_v10 = vadd.f32 %v6546_v36, %v6545_v25 }
0x238f   :  { %v6579_v40 = vmul.f32 0.125, %v6547_v10 }
0x2391   :  { %v6646_v11 = vsel %vm6624_vm10, %v6579_v40, %v6645_v29 }
0x2392   :  { %8231 = vmatmul.mubr.msk.f32.gmra.mxu1 %vm226_vm1, %v6646_v11 }
0x2393   :  { %8233 = vmatprep.mubr.msk.f32.mxu1 %vm8784_vm3, %v11087_v37 }
0x2396   :  { %8234 = vmatmul.mubr.msk.f32.gmra.mxu1 %vm226_vm1, %v1784_v19 }
0x240d   :  { %v6765_v1 = vpop.f32.mrf.mxu1 }
0x240e   :  { %6793 = vst [vmem:[%s10435_s10 + $0x20] sm:$0xff] %v6765_v1 }
0x240f   :  { %v8223_v42 = vpop.f32.mrf.mxu1 }
0x242c   :  { %v6770_v22 = vpop.f32.mrf.mxu1 }
0x242d   :  { %6794 = vst [vmem:[%s10435_s10 + $0x28] sm:$0xff] %v6770_v22 }
0x242e   :  { %v8226_v61 = vpop.f32.mrf.mxu1 }
0x2449   :  { %v6775_v33 = vpop.f32.mrf.mxu1 }
0x244a   :  { %6795 = vst [vmem:[%s10435_s10 + $0x30] sm:$0xff] %v6775_v33 }
0x244b   :  { %v8229_v56 = vpop.f32.mrf.mxu1 }
0x2452   :  { %v6780_v8 = vpop.f32.mrf.mxu1 }
0x2453   :  { %6796 = vst [vmem:[%s10435_s10 + $0x38] sm:$0xff] %v6780_v8 }
0x2454   :  { %v8232_v62 = vpop.f32.mrf.mxu1 }
0x2456   :  { %v6785_v48 = vpop.f32.mrf.mxu1 }
0x2457   :  { %6797 = vst [vmem:[%s10435_s10 + $0x40] sm:$0xff] %v6785_v48 }
0x2458   :  { %v8235_v37 = vpop.f32.mrf.mxu1 }

</bundles_post_ra>
